<compile_context>
chip_gen: v6e
topology: v6e:2x2x1
jax: 0.10.0
libtpu: 0.0.40
codegen_flags: <defaults>
</compile_context>

<pallas_src>
import math

import jax
import jax.numpy as jnp
from jax.experimental import pallas as pl
from jax.experimental.pallas import tpu as pltpu

# ---------------- config (small shapes consistent with the module) ----------
WV_PLANES = 32        # d_model of the weight-generator transformer (orig: 128)
EMBED_DIM = 32        # conv output channels (orig: 1024)
KERNEL_SIZE = 3
NUM_HEADS = 4
FFN_DIM = 64          # transformer feed-forward width (orig default: 2048)
WT_NUM = 128          # number of learned weight tokens (same as module)
SCALER = 0.01
NUM_KERNEL = KERNEL_SIZE * KERNEL_SIZE * EMBED_DIM
LN_EPS = 1e-5


# ---------------- in-kernel helpers (pure jnp, lower to VPU/EUP/XLU) ---------
def _layer_norm(x, w, b, eps=LN_EPS):
    mu = jnp.mean(x, axis=-1, keepdims=True)
    xc = x - mu
    var = jnp.mean(xc * xc, axis=-1, keepdims=True)
    return xc * jax.lax.rsqrt(var + eps) * w + b


def _erf(x):
    # Abramowitz & Stegun 7.1.26 (max abs err 1.5e-7), exp/mul/add/where only.
    a1, a2, a3, a4, a5 = (0.254829592, -0.284496736, 1.421413741,
                          -1.453152027, 1.061405429)
    p = 0.3275911
    ax = jnp.abs(x)
    t = 1.0 / (1.0 + p * ax)
    poly = ((((a5 * t + a4) * t + a3) * t + a2) * t + a1) * t
    y = 1.0 - poly * jnp.exp(-ax * ax)
    return jnp.where(x >= 0, y, -y)


def _gelu_exact(x):
    # PyTorch nn.GELU default (erf formulation), kept in f32.
    return 0.5 * x * (1.0 + _erf(x * 0.7071067811865476))


# ---------------- kernel 1: fused weight generator ---------------------------
def _weightgen_kernel(
    xbase_ref, fcw1_ref, fcb1_ref, fcw2_ref, fcb2_ref,
    wqkv_ref, bqkv_ref, wo_ref, ob_ref,
    ln1w_ref, ln1b_ref, ffw1_ref, ffb1_ref, ffw2_ref, ffb2_ref,
    ln2w_ref, ln2b_ref, fcww_ref, fcwb_ref, fcbw_ref, fcbb_ref,
    waves_ref, weight_ref, bias_tail_ref,
):
    f32 = jnp.float32
    bf16 = jnp.bfloat16
    S_pad, d = xbase_ref.shape
    C = waves_ref.shape[0]
    Dh = d // NUM_HEADS
    S_real = WT_NUM + C + 1          # [weight tokens | C wave tokens | bias token]

    def mm(a, b):
        # bf16 operands feed the MXU at full rate on every generation; f32 acc.
        return jnp.dot(a.astype(bf16), b, preferred_element_type=f32)

    xbase = xbase_ref[...]                                        # (S_pad, d) f32

    # ---- FCResLayer (Basic1d: Linear+ReLU, twice) ----------------------------
    # Applied to every row (trivially cheap at d=32); the residual is only
    # merged onto the wave-token rows via a row mask -- no scratch, no scatter.
    y = jnp.maximum(mm(xbase, fcw1_ref[...]) + fcb1_ref[...], 0.0)
    y = jnp.maximum(mm(y, fcw2_ref[...]) + fcb2_ref[...], 0.0)
    row = jax.lax.broadcasted_iota(jnp.int32, (S_pad, d), 0)
    wave_rows = jnp.logical_and(row >= WT_NUM, row < WT_NUM + C)
    x = xbase + jnp.where(wave_rows, y, 0.0)                      # (S_pad, d) f32
    waves = x[WT_NUM:WT_NUM + C, :]                               # (C, d)
    waves_ref[...] = waves

    # ---- multi-head self-attention: single fused QKV + single out-proj -------
    # 1/sqrt(Dh) is pre-folded into the q columns of wqkv/bqkv by the wrapper.
    qkv = mm(x, wqkv_ref[...]) + bqkv_ref[...]                    # (S_pad, 3d) f32
    key_idx = jax.lax.broadcasted_iota(jnp.int32, (S_pad, S_pad), 1)
    att_mask = jnp.where(key_idx < S_real, 0.0, -1e30).astype(f32)

    heads = []
    for h in range(NUM_HEADS):       # only the tiny Dh=8 score/PV matmuls remain per-head
        qh = qkv[:, h * Dh:(h + 1) * Dh]
        kh = qkv[:, d + h * Dh:d + (h + 1) * Dh]
        vh = qkv[:, 2 * d + h * Dh:2 * d + (h + 1) * Dh]
        s = jax.lax.dot_general(qh.astype(bf16), kh.astype(bf16),
                                (((1,), (1,)), ((), ())),
                                preferred_element_type=f32)       # (S_pad, S_pad)
        s = s + att_mask
        s = s - jnp.max(s, axis=-1, keepdims=True)
        p = jnp.exp(s)
        p = p * pl.reciprocal(jnp.sum(p, axis=-1, keepdims=True), approx=True)
        heads.append(jnp.dot(p.astype(bf16), vh.astype(bf16),
                             preferred_element_type=f32))         # (S_pad, Dh)
    attn = jnp.concatenate(heads, axis=-1)                        # (S_pad, d)
    sa = mm(attn, wo_ref[...]) + ob_ref[...]

    # ---- post-norm transformer encoder layer (norm_first=False) --------------
    x1 = _layer_norm(x + sa, ln1w_ref[...], ln1b_ref[...])
    hdn = mm(x1, ffw1_ref[...]) + ffb1_ref[...]
    hdn = _gelu_exact(hdn)
    hdn = mm(hdn, ffw2_ref[...]) + ffb2_ref[...]
    x2 = _layer_norm(x1 + hdn, ln2w_ref[...], ln2b_ref[...])

    # ---- dynamic weight / bias heads (SCALER folded into fcw/fcb params) -----
    tail = x2[WT_NUM:, :]               # aligned 8-row slice: waves, bias tok, pad
    xw = tail[0:C, :] + waves
    weight_ref[...] = (mm(xw, fcww_ref[...]) + fcwb_ref[...]).astype(weight_ref.dtype)
    # bias head on the whole aligned tail; wrapper picks the bias-token row (idx C)
    bias_tail_ref[...] = (mm(tail, fcbw_ref[...]) + fcbb_ref[...]).astype(bias_tail_ref.dtype)


# ---------------- kernel 2: dynamic conv as im2col matmul --------------------
def _conv_matmul_kernel(x_ref, w_ref, b_ref, o_ref):
    # bf16 operands, f32 accumulate, bias add in f32, bf16 writeback
    # (output-writeback-bound at production scale).
    acc = jnp.dot(x_ref[...], w_ref[...], preferred_element_type=jnp.float32)
    o_ref[...] = (acc + b_ref[...]).astype(o_ref.dtype)


def pallas_dynamic_conv(patches, w_mat, bias_row, *, out_dtype=jnp.bfloat16,
                        tm_cap=1024):
    """patches: (M, K) bf16, w_mat: (K, N) bf16, bias_row: (1, N) f32 -> (M, N)."""
    M, K = patches.shape
    K2, N = w_mat.shape
    assert K == K2 and bias_row.shape == (1, N)

    # Robust M tiling: single full-dim block when small, otherwise cdiv/padded
    # 1024-row tiles (fits v7x 64 MiB VMEM, splits across TensorCores).
    if M <= tm_cap:
        tm, Mp = M, M                    # block == full dim: always layout-legal
    else:
        tm = tm_cap                      # multiple of 128 -> (8,128)-legal tiles
        Mp = pl.cdiv(M, tm) * tm
        if Mp != M:
            patches = jnp.pad(patches, ((0, Mp - M), (0, 0)))

    # TODO(synk): at production scale (EMBED_DIM=1024, NUM_KERNEL=9216, big
    # images) also tile N and K with an f32 VMEM accumulator.
    out = pl.pallas_call(
        _conv_matmul_kernel,
        out_shape=jax.ShapeDtypeStruct((Mp, N), out_dtype),
        grid=(Mp // tm,),
        in_specs=[
            pl.BlockSpec((tm, K), lambda i: (i, 0)),
            # constant-index blocks: no need for double buffers -> more VMEM for tm
            pl.BlockSpec((K, N), lambda i: (0, 0), pipeline_mode=pl.Buffered(1)),
            pl.BlockSpec((1, N), lambda i: (0, 0), pipeline_mode=pl.Buffered(1)),
        ],
        out_specs=pl.BlockSpec((tm, N), lambda i: (i, 0)),
        compiler_params=pltpu.CompilerParams(
            dimension_semantics=("parallel",),
            vmem_limit_bytes=64 * 1024 * 1024),
    )(patches, w_mat, bias_row)
    return out[:M] if Mp != M else out


# ---------------- plain-JAX glue ----------------------------------------------
def sincos_pos_embed(embed_dim, pos):
    """(M,) -> (M, embed_dim); matches get_1d_sincos_pos_embed_from_grid_torch."""
    assert embed_dim % 2 == 0
    omega = jnp.arange(embed_dim // 2, dtype=jnp.float32) / (embed_dim / 2.0)
    omega = 1.0 / (10000.0 ** omega)
    out = pos.reshape(-1)[:, None] * omega[None, :]
    return jnp.concatenate([jnp.sin(out), jnp.cos(out)], axis=1)


# ---------------- parameters (deterministic synthetic init) ------------------
def _xavier(key, shape):
    lim = math.sqrt(6.0 / (shape[0] + shape[1]))
    return jax.random.uniform(key, shape, jnp.float32, -lim, lim)


def init_params(key):
    d = WV_PLANES
    ks = jax.random.split(key, 12)
    p = {}
    # FCResLayer (Basic1d blocks)
    p["fc_w1"] = _xavier(ks[0], (d, d)); p["fc_b1"] = jnp.full((d,), 0.01, jnp.float32)
    p["fc_w2"] = _xavier(ks[1], (d, d)); p["fc_b2"] = jnp.full((d,), 0.01, jnp.float32)
    # TransformerWeightGenerator tokens
    p["weight_tokens"] = 0.02 * jax.random.normal(ks[2], (WT_NUM, d), jnp.float32)
    p["bias_token"] = 0.02 * jax.random.normal(ks[3], (1, d), jnp.float32)
    # self-attention (weights stored (in, out) so kernels need no transpose)
    p["in_proj_w"] = _xavier(ks[4], (d, 3 * d)); p["in_proj_b"] = jnp.zeros((3 * d,), jnp.float32)
    p["out_proj_w"] = _xavier(ks[5], (d, d)); p["out_proj_b"] = jnp.full((d,), 0.01, jnp.float32)
    p["ln1_w"] = jnp.ones((d,), jnp.float32); p["ln1_b"] = jnp.zeros((d,), jnp.float32)
    # feed-forward
    p["ffn_w1"] = _xavier(ks[6], (d, FFN_DIM)); p["ffn_b1"] = jnp.full((FFN_DIM,), 0.01, jnp.float32)
    p["ffn_w2"] = _xavier(ks[7], (FFN_DIM, d)); p["ffn_b2"] = jnp.full((d,), 0.01, jnp.float32)
    p["ln2_w"] = jnp.ones((d,), jnp.float32); p["ln2_b"] = jnp.zeros((d,), jnp.float32)
    # weight / bias heads
    p["fcw_w"] = _xavier(ks[8], (d, NUM_KERNEL)); p["fcw_b"] = jnp.full((NUM_KERNEL,), 0.01, jnp.float32)
    p["fcb_w"] = _xavier(ks[9], (d, EMBED_DIM)); p["fcb_b"] = jnp.full((EMBED_DIM,), 0.01, jnp.float32)
    return p


# ---------------- full forward pass -------------------------------------------
def dofa_forward(params, img_feat, wvs):
    d = WV_PLANES
    H = NUM_HEADS
    Dh = d // H
    C = wvs.shape[0]
    S_real = WT_NUM + C + 1
    S_pad = ((S_real + 7) // 8) * 8          # sublane-multiple sequence length
    tail_len = S_pad - WT_NUM
    bf = jnp.bfloat16

    # 1) sincos embedding of wavelengths (tiny trig glue, stays in JAX)
    waves0 = sincos_pos_embed(d, wvs * 1000.0)                               # (C, d)

    # padded token sequence: [weight tokens | waves0 | bias token | zeros]
    x_base = jnp.concatenate(
        [params["weight_tokens"], waves0, params["bias_token"],
         jnp.zeros((S_pad - S_real, d), jnp.float32)], axis=0)               # (S_pad, d)

    # parameter re-packing (tiny, once per call):
    #  * fused QKV: single (d, 3d) matrix, 1/sqrt(Dh) folded into q columns
    #  * matmul weights pre-cast to bf16 (MXU native operand type)
    #  * SCALER folded into the weight/bias head params
    scale = 1.0 / math.sqrt(Dh)
    col_scale = jnp.concatenate(
        [jnp.full((d,), scale, jnp.float32), jnp.ones((2 * d,), jnp.float32)])
    wqkv = (params["in_proj_w"] * col_scale[None, :]).astype(bf)             # (d, 3d)
    bqkv = (params["in_proj_b"] * col_scale).reshape(1, 3 * d)               # f32

    inputs = (
        x_base,
        params["fc_w1"].astype(bf), params["fc_b1"].reshape(1, d),
        params["fc_w2"].astype(bf), params["fc_b2"].reshape(1, d),
        wqkv, bqkv,
        params["out_proj_w"].astype(bf), params["out_proj_b"].reshape(1, d),
        params["ln1_w"].reshape(1, d), params["ln1_b"].reshape(1, d),
        params["ffn_w1"].astype(bf), params["ffn_b1"].reshape(1, FFN_DIM),
        params["ffn_w2"].astype(bf), params["ffn_b2"].reshape(1, d),
        params["ln2_w"].reshape(1, d), params["ln2_b"].reshape(1, d),
        (params["fcw_w"] * SCALER).astype(bf),
        (params["fcw_b"] * SCALER).reshape(1, NUM_KERNEL),
        (params["fcb_w"] * SCALER).astype(bf),
        (params["fcb_b"] * SCALER).reshape(1, EMBED_DIM),
    )

    def full_spec(shape):
        zeros = (0,) * len(shape)
        return pl.BlockSpec(shape, lambda i, z=zeros: z)

    out_shapes = (
        jax.ShapeDtypeStruct((C, d), jnp.float32),                 # waves
        jax.ShapeDtypeStruct((C, NUM_KERNEL), jnp.bfloat16),       # dyn conv weight rows
        jax.ShapeDtypeStruct((tail_len, EMBED_DIM), jnp.float32),  # bias head on tail rows
    )

    waves, weight, bias_tail = pl.pallas_call(
        _weightgen_kernel,
        out_shape=out_shapes,
        grid=(1,),
        in_specs=[full_spec(a.shape) for a in inputs],
        out_specs=[full_spec(s.shape) for s in out_shapes],
    )(*inputs)

    bias_row = bias_tail[C:C + 1, :]                               # bias-token row, (1, E)

    # 3) dynamic conv (stride == kernel_size, padding = 1) via im2col + Pallas matmul;
    #    im2col glue done directly in bf16 (halves the XLA-side patch traffic).
    B, Cin, H_img, W_img = img_feat.shape
    assert Cin == C
    K = KERNEL_SIZE
    xp = jnp.pad(img_feat.astype(bf), ((0, 0), (0, 0), (1, 1), (1, 1)))
    OH = (H_img + 2 - K) // K + 1
    OW = (W_img + 2 - K) // K + 1
    xp = xp[:, :, :OH * K, :OW * K]            # valid because stride == kernel_size
    patches = xp.reshape(B, Cin, OH, K, OW, K).transpose(0, 2, 4, 1, 3, 5)
    patches = patches.reshape(B * OH * OW, Cin * K * K)            # (B*OH*OW, C*K*K) bf16
    # Reference semantics: weight.view(C, K, K, E).permute(3, 0, 1, 2) is the conv
    # filter; with that column ordering the matmul operand (C*K*K, E) is a free
    # row-major reshape (no transpose copy of the dynamic weight).
    w_mat = weight.reshape(Cin * K * K, EMBED_DIM)                 # bf16, free reshape
    out = pallas_dynamic_conv(patches, w_mat, bias_row)
    x_out = out.reshape(B, OH * OW, EMBED_DIM)  # == conv.flatten(2).transpose(1, 2)
    return x_out, waves


# ---------------- run ----------------------------------------------------------
if __name__ == "__main__":
    key = jax.random.PRNGKey(0)
    k_param, k_img, k_wv = jax.random.split(key, 3)

    params = init_params(k_param)
    img_feat = jax.random.normal(k_img, (2, 4, 16, 16), jnp.float32)      # NCHW
    wvs = jax.random.uniform(k_wv, (4,), jnp.float32, 0.4, 2.5)           # wavelengths (um)

    fwd = jax.jit(dofa_forward)
    x_out, waves = fwd(params, img_feat, wvs)
    jax.block_until_ready((x_out, waves))

    B, OH, OW = 2, 6, 6   # (16 + 2*1 - 3)//3 + 1 = 6
    assert x_out.shape == (B, OH * OW, EMBED_DIM), x_out.shape
    assert waves.shape == (4, WV_PLANES), waves.shape
    assert jnp.all(jnp.isfinite(x_out.astype(jnp.float32)))
    assert jnp.all(jnp.isfinite(waves))
    print("KERNEL_OK")
</pallas_src>

<mosaic_0001>
module attributes {stable_mosaic.version = 11 : i64} {
  func.func @_conv_matmul_kernel(%arg0: i32, %arg1: memref<72x36xbf16, #tpu.memory_space<vmem>>, %arg2: memref<36x32xbf16, #tpu.memory_space<vmem>>, %arg3: memref<1x32xf32, #tpu.memory_space<vmem>>, %arg4: memref<72x32xbf16, #tpu.memory_space<vmem>>) attributes {dimension_semantics = [#tpu.dimension_semantics<parallel>], iteration_bounds = array<i64: 1>, scalar_prefetch = 0 : i64, scratch_operands = 0 : i64, tpu.core_type = #tpu.core_type<tc>, window_params = [{transform_indices = @transform_0, window_bounds = array<i64: 72, 36>}, {pipeline_mode = #tpu.pipeline_mode<synchronous>, transform_indices = @transform_1, window_bounds = array<i64: 36, 32>}, {pipeline_mode = #tpu.pipeline_mode<synchronous>, transform_indices = @transform_2, window_bounds = array<i64: 1, 32>}, {transform_indices = @transform_3, window_bounds = array<i64: 72, 32>}]} {
    %c0 = arith.constant 0 : index
    %c0_0 = arith.constant 0 : index
    %0 = vector.load %arg1[%c0, %c0_0] : memref<72x36xbf16, #tpu.memory_space<vmem>>, vector<72x36xbf16>
    %c0_1 = arith.constant 0 : index
    %c0_2 = arith.constant 0 : index
    %1 = vector.load %arg2[%c0_1, %c0_2] : memref<36x32xbf16, #tpu.memory_space<vmem>>, vector<36x32xbf16>
    %cst = arith.constant dense<0.000000e+00> : vector<72x32xf32>
    %2 = tpu.matmul %0, %1, %cst {dimension_numbers = #tpu.dot_dimension_numbers<[1], [0], [0], [1], [0, 0, 1, 1], [], []>} : vector<72x36xbf16>, vector<36x32xbf16>, vector<72x32xf32> -> vector<72x32xf32>
    %c0_3 = arith.constant 0 : index
    %c0_4 = arith.constant 0 : index
    %3 = vector.load %arg3[%c0_3, %c0_4] : memref<1x32xf32, #tpu.memory_space<vmem>>, vector<1x32xf32>
    %4 = vector.broadcast %3 : vector<1x32xf32> to vector<72x32xf32>
    %5 = arith.addf %2, %4 : vector<72x32xf32>
    %6 = arith.truncf %5 : vector<72x32xf32> to vector<72x32xbf16>
    %c0_5 = arith.constant 0 : index
    %c0_6 = arith.constant 0 : index
    %7 = vector.load %arg4[%c0_5, %c0_6] : memref<72x32xbf16, #tpu.memory_space<vmem>>, vector<72x32xbf16>
    tpu.vector_store %arg4[%c0_5, %c0_6], %6 {strides = array<i32>} : memref<72x32xbf16, #tpu.memory_space<vmem>>, vector<72x32xbf16>,
    return
  }
  func.func @transform_0(%arg0: i32) -> (i32, i32) {
    %c0_i32 = arith.constant 0 : i32
    %c0_i32_0 = arith.constant 0 : i32
    return %arg0, %c0_i32 : i32, i32
  }
  func.func @transform_1(%arg0: i32) -> (i32, i32) {
    %c0_i32 = arith.constant 0 : i32
    %c0_i32_0 = arith.constant 0 : i32
    %c0_i32_1 = arith.constant 0 : i32
    return %c0_i32, %c0_i32_0 : i32, i32
  }
  func.func @transform_2(%arg0: i32) -> (i32, i32) {
    %c0_i32 = arith.constant 0 : i32
    %c0_i32_0 = arith.constant 0 : i32
    %c0_i32_1 = arith.constant 0 : i32
    return %c0_i32, %c0_i32_0 : i32, i32
  }
  func.func @transform_3(%arg0: i32) -> (i32, i32) {
    %c0_i32 = arith.constant 0 : i32
    %c0_i32_0 = arith.constant 0 : i32
    return %arg0, %c0_i32 : i32, i32
  }
}

module attributes {stable_mosaic.version = 11 : i64} {
  func.func @_weightgen_kernel(%arg0: i32, %arg1: memref<136x32xf32, #tpu.memory_space<vmem>>, %arg2: memref<32x32xbf16, #tpu.memory_space<vmem>>, %arg3: memref<1x32xf32, #tpu.memory_space<vmem>>, %arg4: memref<32x32xbf16, #tpu.memory_space<vmem>>, %arg5: memref<1x32xf32, #tpu.memory_space<vmem>>, %arg6: memref<32x96xbf16, #tpu.memory_space<vmem>>, %arg7: memref<1x96xf32, #tpu.memory_space<vmem>>, %arg8: memref<32x32xbf16, #tpu.memory_space<vmem>>, %arg9: memref<1x32xf32, #tpu.memory_space<vmem>>, %arg10: memref<1x32xf32, #tpu.memory_space<vmem>>, %arg11: memref<1x32xf32, #tpu.memory_space<vmem>>, %arg12: memref<32x64xbf16, #tpu.memory_space<vmem>>, %arg13: memref<1x64xf32, #tpu.memory_space<vmem>>, %arg14: memref<64x32xbf16, #tpu.memory_space<vmem>>, %arg15: memref<1x32xf32, #tpu.memory_space<vmem>>, %arg16: memref<1x32xf32, #tpu.memory_space<vmem>>, %arg17: memref<1x32xf32, #tpu.memory_space<vmem>>, %arg18: memref<32x288xbf16, #tpu.memory_space<vmem>>, %arg19: memref<1x288xf32, #tpu.memory_space<vmem>>, %arg20: memref<32x32xbf16, #tpu.memory_space<vmem>>, %arg21: memref<1x32xf32, #tpu.memory_space<vmem>>, %arg22: memref<4x32xf32, #tpu.memory_space<vmem>>, %arg23: memref<4x288xbf16, #tpu.memory_space<vmem>>, %arg24: memref<8x32xf32, #tpu.memory_space<vmem>>) attributes {dimension_semantics = [#tpu.dimension_semantics<arbitrary>], iteration_bounds = array<i64: 1>, scalar_prefetch = 0 : i64, scratch_operands = 0 : i64, tpu.core_type = #tpu.core_type<tc>, window_params = [{pipeline_mode = #tpu.pipeline_mode<synchronous>, transform_indices = @transform_0, window_bounds = array<i64: 136, 32>}, {pipeline_mode = #tpu.pipeline_mode<synchronous>, transform_indices = @transform_1, window_bounds = array<i64: 32, 32>}, {pipeline_mode = #tpu.pipeline_mode<synchronous>, transform_indices = @transform_2, window_bounds = array<i64: 1, 32>}, {pipeline_mode = #tpu.pipeline_mode<synchronous>, transform_indices = @transform_3, window_bounds = array<i64: 32, 32>}, {pipeline_mode = #tpu.pipeline_mode<synchronous>, transform_indices = @transform_4, window_bounds = array<i64: 1, 32>}, {pipeline_mode = #tpu.pipeline_mode<synchronous>, transform_indices = @transform_5, window_bounds = array<i64: 32, 96>}, {pipeline_mode = #tpu.pipeline_mode<synchronous>, transform_indices = @transform_6, window_bounds = array<i64: 1, 96>}, {pipeline_mode = #tpu.pipeline_mode<synchronous>, transform_indices = @transform_7, window_bounds = array<i64: 32, 32>}, {pipeline_mode = #tpu.pipeline_mode<synchronous>, transform_indices = @transform_8, window_bounds = array<i64: 1, 32>}, {pipeline_mode = #tpu.pipeline_mode<synchronous>, transform_indices = @transform_9, window_bounds = array<i64: 1, 32>}, {pipeline_mode = #tpu.pipeline_mode<synchronous>, transform_indices = @transform_10, window_bounds = array<i64: 1, 32>}, {pipeline_mode = #tpu.pipeline_mode<synchronous>, transform_indices = @transform_11, window_bounds = array<i64: 32, 64>}, {pipeline_mode = #tpu.pipeline_mode<synchronous>, transform_indices = @transform_12, window_bounds = array<i64: 1, 64>}, {pipeline_mode = #tpu.pipeline_mode<synchronous>, transform_indices = @transform_13, window_bounds = array<i64: 64, 32>}, {pipeline_mode = #tpu.pipeline_mode<synchronous>, transform_indices = @transform_14, window_bounds = array<i64: 1, 32>}, {pipeline_mode = #tpu.pipeline_mode<synchronous>, transform_indices = @transform_15, window_bounds = array<i64: 1, 32>}, {pipeline_mode = #tpu.pipeline_mode<synchronous>, transform_indices = @transform_16, window_bounds = array<i64: 1, 32>}, {pipeline_mode = #tpu.pipeline_mode<synchronous>, transform_indices = @transform_17, window_bounds = array<i64: 32, 288>}, {pipeline_mode = #tpu.pipeline_mode<synchronous>, transform_indices = @transform_18, window_bounds = array<i64: 1, 288>}, {pipeline_mode = #tpu.pipeline_mode<synchronous>, transform_indices = @transform_19, window_bounds = array<i64: 32, 32>}, {pipeline_mode = #tpu.pipeline_mode<synchronous>, transform_indices = @transform_20, window_bounds = array<i64: 1, 32>}, {pipeline_mode = #tpu.pipeline_mode<synchronous>, transform_indices = @transform_21, window_bounds = array<i64: 4, 32>}, {pipeline_mode = #tpu.pipeline_mode<synchronous>, transform_indices = @transform_22, window_bounds = array<i64: 4, 288>}, {pipeline_mode = #tpu.pipeline_mode<synchronous>, transform_indices = @transform_23, window_bounds = array<i64: 8, 32>}]} {
    %c0 = arith.constant 0 : index
    %c0_0 = arith.constant 0 : index
    %0 = vector.load %arg1[%c0, %c0_0] : memref<136x32xf32, #tpu.memory_space<vmem>>, vector<136x32xf32>
    %c0_1 = arith.constant 0 : index
    %c0_2 = arith.constant 0 : index
    %1 = vector.load %arg2[%c0_1, %c0_2] : memref<32x32xbf16, #tpu.memory_space<vmem>>, vector<32x32xbf16>
    %2 = arith.truncf %0 : vector<136x32xf32> to vector<136x32xbf16>
    %cst = arith.constant dense<0.000000e+00> : vector<136x32xf32>
    %3 = tpu.matmul %2, %1, %cst {dimension_numbers = #tpu.dot_dimension_numbers<[1], [0], [0], [1], [0, 0, 1, 1], [], []>} : vector<136x32xbf16>, vector<32x32xbf16>, vector<136x32xf32> -> vector<136x32xf32>
    %c0_3 = arith.constant 0 : index
    %c0_4 = arith.constant 0 : index
    %4 = vector.load %arg3[%c0_3, %c0_4] : memref<1x32xf32, #tpu.memory_space<vmem>>, vector<1x32xf32>
    %5 = vector.broadcast %4 : vector<1x32xf32> to vector<136x32xf32>
    %6 = arith.addf %3, %5 : vector<136x32xf32>
    %cst_5 = arith.constant 0.000000e+00 : f32
    %7 = vector.broadcast %cst_5 : f32 to vector<136x32xf32>
    %8 = arith.maximumf %6, %7 : vector<136x32xf32>
    %c0_6 = arith.constant 0 : index
    %c0_7 = arith.constant 0 : index
    %9 = vector.load %arg4[%c0_6, %c0_7] : memref<32x32xbf16, #tpu.memory_space<vmem>>, vector<32x32xbf16>
    %10 = arith.truncf %8 : vector<136x32xf32> to vector<136x32xbf16>
    %cst_8 = arith.constant dense<0.000000e+00> : vector<136x32xf32>
    %11 = tpu.matmul %10, %9, %cst_8 {dimension_numbers = #tpu.dot_dimension_numbers<[1], [0], [0], [1], [0, 0, 1, 1], [], []>} : vector<136x32xbf16>, vector<32x32xbf16>, vector<136x32xf32> -> vector<136x32xf32>
    %c0_9 = arith.constant 0 : index
    %c0_10 = arith.constant 0 : index
    %12 = vector.load %arg5[%c0_9, %c0_10] : memref<1x32xf32, #tpu.memory_space<vmem>>, vector<1x32xf32>
    %13 = vector.broadcast %12 : vector<1x32xf32> to vector<136x32xf32>
    %14 = arith.addf %11, %13 : vector<136x32xf32>
    %cst_11 = arith.constant 0.000000e+00 : f32
    %15 = vector.broadcast %cst_11 : f32 to vector<136x32xf32>
    %16 = arith.maximumf %14, %15 : vector<136x32xf32>
    %17 = tpu.iota {dimensions = array<i32: 0>} : vector<136x32xi32>
    %c128_i32 = arith.constant 128 : i32
    %18 = vector.broadcast %c128_i32 : i32 to vector<136x32xi32>
    %19 = arith.cmpi sge, %17, %18 : vector<136x32xi32>
    %c132_i32 = arith.constant 132 : i32
    %20 = vector.broadcast %c132_i32 : i32 to vector<136x32xi32>
    %21 = arith.cmpi slt, %17, %20 : vector<136x32xi32>
    %22 = arith.andi %19, %21 : vector<136x32xi1>
    %cst_12 = arith.constant 0.000000e+00 : f32
    %23 = vector.broadcast %cst_12 : f32 to vector<136x32xf32>
    %24 = arith.select %22, %16, %23 : vector<136x32xi1>, vector<136x32xf32>
    %25 = arith.addf %0, %24 : vector<136x32xf32>
    %26 = vector.extract_strided_slice %25 {offsets = [128, 0], sizes = [4, 32], strides = [1, 1]} : vector<136x32xf32> to vector<4x32xf32>
    %c0_13 = arith.constant 0 : index
    %c0_14 = arith.constant 0 : index
    %27 = vector.load %arg22[%c0_13, %c0_14] : memref<4x32xf32, #tpu.memory_space<vmem>>, vector<4x32xf32>
    tpu.vector_store %arg22[%c0_13, %c0_14], %26 {strides = array<i32>} : memref<4x32xf32, #tpu.memory_space<vmem>>, vector<4x32xf32>,
    %c0_15 = arith.constant 0 : index
    %c0_16 = arith.constant 0 : index
    %28 = vector.load %arg6[%c0_15, %c0_16] : memref<32x96xbf16, #tpu.memory_space<vmem>>, vector<32x96xbf16>
    %29 = arith.truncf %25 : vector<136x32xf32> to vector<136x32xbf16>
    %cst_17 = arith.constant dense<0.000000e+00> : vector<136x96xf32>
    %30 = tpu.matmul %29, %28, %cst_17 {dimension_numbers = #tpu.dot_dimension_numbers<[1], [0], [0], [1], [0, 0, 1, 1], [], []>} : vector<136x32xbf16>, vector<32x96xbf16>, vector<136x96xf32> -> vector<136x96xf32>
    %c0_18 = arith.constant 0 : index
    %c0_19 = arith.constant 0 : index
    %31 = vector.load %arg7[%c0_18, %c0_19] : memref<1x96xf32, #tpu.memory_space<vmem>>, vector<1x96xf32>
    %32 = vector.broadcast %31 : vector<1x96xf32> to vector<136x96xf32>
    %33 = arith.addf %30, %32 : vector<136x96xf32>
    %34 = tpu.iota {dimensions = array<i32: 1>} : vector<136x136xi32>
    %c133_i32 = arith.constant 133 : i32
    %35 = vector.broadcast %c133_i32 : i32 to vector<136x136xi32>
    %36 = arith.cmpi slt, %34, %35 : vector<136x136xi32>
    %cst_20 = arith.constant 0.000000e+00 : f32
    %cst_21 = arith.constant -1.000000e+30 : f32
    %37 = vector.broadcast %cst_20 : f32 to vector<136x136xf32>
    %38 = vector.broadcast %cst_21 : f32 to vector<136x136xf32>
    %39 = arith.select %36, %37, %38 : vector<136x136xi1>, vector<136x136xf32>
    %40 = vector.extract_strided_slice %33 {offsets = [0, 0], sizes = [136, 8], strides = [1, 1]} : vector<136x96xf32> to vector<136x8xf32>
    %41 = vector.extract_strided_slice %33 {offsets = [0, 32], sizes = [136, 8], strides = [1, 1]} : vector<136x96xf32> to vector<136x8xf32>
    %42 = vector.extract_strided_slice %33 {offsets = [0, 64], sizes = [136, 8], strides = [1, 1]} : vector<136x96xf32> to vector<136x8xf32>
    %43 = arith.truncf %40 : vector<136x8xf32> to vector<136x8xbf16>
    %44 = arith.truncf %41 : vector<136x8xf32> to vector<136x8xbf16>
    %cst_22 = arith.constant dense<0.000000e+00> : vector<136x136xf32>
    %45 = tpu.matmul %43, %44, %cst_22 {dimension_numbers = #tpu.dot_dimension_numbers<[1], [1], [0], [0], [0, 0, 1, 0], [], []>} : vector<136x8xbf16>, vector<136x8xbf16>, vector<136x136xf32> -> vector<136x136xf32>
    %46 = arith.addf %45, %39 : vector<136x136xf32>
    %cst_23 = arith.constant dense<0xFF800000> : vector<136xf32>
    %47 = vector.multi_reduction <maximumf>, %46, %cst_23 [1] : vector<136x136xf32> to vector<136xf32>
    %48 = vector.shape_cast %47 : vector<136xf32> to vector<136x1xf32>
    %49 = vector.broadcast %48 : vector<136x1xf32> to vector<136x136xf32>
    %50 = arith.subf %46, %49 : vector<136x136xf32>
    %51 = math.exp %50 : vector<136x136xf32>
    %cst_24 = arith.constant dense<0.000000e+00> : vector<136xf32>
    %52 = vector.multi_reduction <add>, %51, %cst_24 [1] : vector<136x136xf32> to vector<136xf32>
    %53 = vector.shape_cast %52 : vector<136xf32> to vector<136x1xf32>
    %54 = tpu.reciprocal %53 {approx = true} : vector<136x1xf32> -> vector<136x1xf32>
    %55 = vector.broadcast %54 : vector<136x1xf32> to vector<136x136xf32>
    %56 = arith.mulf %51, %55 : vector<136x136xf32>
    %57 = arith.truncf %56 : vector<136x136xf32> to vector<136x136xbf16>
    %58 = arith.truncf %42 : vector<136x8xf32> to vector<136x8xbf16>
    %cst_25 = arith.constant dense<0.000000e+00> : vector<136x8xf32>
    %59 = tpu.matmul %57, %58, %cst_25 {dimension_numbers = #tpu.dot_dimension_numbers<[1], [0], [0], [1], [0, 0, 1, 1], [], []>} : vector<136x136xbf16>, vector<136x8xbf16>, vector<136x8xf32> -> vector<136x8xf32>
    %60 = vector.extract_strided_slice %33 {offsets = [0, 8], sizes = [136, 8], strides = [1, 1]} : vector<136x96xf32> to vector<136x8xf32>
    %61 = vector.extract_strided_slice %33 {offsets = [0, 40], sizes = [136, 8], strides = [1, 1]} : vector<136x96xf32> to vector<136x8xf32>
    %62 = vector.extract_strided_slice %33 {offsets = [0, 72], sizes = [136, 8], strides = [1, 1]} : vector<136x96xf32> to vector<136x8xf32>
    %63 = arith.truncf %60 : vector<136x8xf32> to vector<136x8xbf16>
    %64 = arith.truncf %61 : vector<136x8xf32> to vector<136x8xbf16>
    %cst_26 = arith.constant dense<0.000000e+00> : vector<136x136xf32>
    %65 = tpu.matmul %63, %64, %cst_26 {dimension_numbers = #tpu.dot_dimension_numbers<[1], [1], [0], [0], [0, 0, 1, 0], [], []>} : vector<136x8xbf16>, vector<136x8xbf16>, vector<136x136xf32> -> vector<136x136xf32>
    %66 = arith.addf %65, %39 : vector<136x136xf32>
    %cst_27 = arith.constant dense<0xFF800000> : vector<136xf32>
    %67 = vector.multi_reduction <maximumf>, %66, %cst_27 [1] : vector<136x136xf32> to vector<136xf32>
    %68 = vector.shape_cast %67 : vector<136xf32> to vector<136x1xf32>
    %69 = vector.broadcast %68 : vector<136x1xf32> to vector<136x136xf32>
    %70 = arith.subf %66, %69 : vector<136x136xf32>
    %71 = math.exp %70 : vector<136x136xf32>
    %cst_28 = arith.constant dense<0.000000e+00> : vector<136xf32>
    %72 = vector.multi_reduction <add>, %71, %cst_28 [1] : vector<136x136xf32> to vector<136xf32>
    %73 = vector.shape_cast %72 : vector<136xf32> to vector<136x1xf32>
    %74 = tpu.reciprocal %73 {approx = true} : vector<136x1xf32> -> vector<136x1xf32>
    %75 = vector.broadcast %74 : vector<136x1xf32> to vector<136x136xf32>
    %76 = arith.mulf %71, %75 : vector<136x136xf32>
    %77 = arith.truncf %76 : vector<136x136xf32> to vector<136x136xbf16>
    %78 = arith.truncf %62 : vector<136x8xf32> to vector<136x8xbf16>
    %cst_29 = arith.constant dense<0.000000e+00> : vector<136x8xf32>
    %79 = tpu.matmul %77, %78, %cst_29 {dimension_numbers = #tpu.dot_dimension_numbers<[1], [0], [0], [1], [0, 0, 1, 1], [], []>} : vector<136x136xbf16>, vector<136x8xbf16>, vector<136x8xf32> -> vector<136x8xf32>
    %80 = vector.extract_strided_slice %33 {offsets = [0, 16], sizes = [136, 8], strides = [1, 1]} : vector<136x96xf32> to vector<136x8xf32>
    %81 = vector.extract_strided_slice %33 {offsets = [0, 48], sizes = [136, 8], strides = [1, 1]} : vector<136x96xf32> to vector<136x8xf32>
    %82 = vector.extract_strided_slice %33 {offsets = [0, 80], sizes = [136, 8], strides = [1, 1]} : vector<136x96xf32> to vector<136x8xf32>
    %83 = arith.truncf %80 : vector<136x8xf32> to vector<136x8xbf16>
    %84 = arith.truncf %81 : vector<136x8xf32> to vector<136x8xbf16>
    %cst_30 = arith.constant dense<0.000000e+00> : vector<136x136xf32>
    %85 = tpu.matmul %83, %84, %cst_30 {dimension_numbers = #tpu.dot_dimension_numbers<[1], [1], [0], [0], [0, 0, 1, 0], [], []>} : vector<136x8xbf16>, vector<136x8xbf16>, vector<136x136xf32> -> vector<136x136xf32>
    %86 = arith.addf %85, %39 : vector<136x136xf32>
    %cst_31 = arith.constant dense<0xFF800000> : vector<136xf32>
    %87 = vector.multi_reduction <maximumf>, %86, %cst_31 [1] : vector<136x136xf32> to vector<136xf32>
    %88 = vector.shape_cast %87 : vector<136xf32> to vector<136x1xf32>
    %89 = vector.broadcast %88 : vector<136x1xf32> to vector<136x136xf32>
    %90 = arith.subf %86, %89 : vector<136x136xf32>
    %91 = math.exp %90 : vector<136x136xf32>
    %cst_32 = arith.constant dense<0.000000e+00> : vector<136xf32>
    %92 = vector.multi_reduction <add>, %91, %cst_32 [1] : vector<136x136xf32> to vector<136xf32>
    %93 = vector.shape_cast %92 : vector<136xf32> to vector<136x1xf32>
    %94 = tpu.reciprocal %93 {approx = true} : vector<136x1xf32> -> vector<136x1xf32>
    %95 = vector.broadcast %94 : vector<136x1xf32> to vector<136x136xf32>
    %96 = arith.mulf %91, %95 : vector<136x136xf32>
    %97 = arith.truncf %96 : vector<136x136xf32> to vector<136x136xbf16>
    %98 = arith.truncf %82 : vector<136x8xf32> to vector<136x8xbf16>
    %cst_33 = arith.constant dense<0.000000e+00> : vector<136x8xf32>
    %99 = tpu.matmul %97, %98, %cst_33 {dimension_numbers = #tpu.dot_dimension_numbers<[1], [0], [0], [1], [0, 0, 1, 1], [], []>} : vector<136x136xbf16>, vector<136x8xbf16>, vector<136x8xf32> -> vector<136x8xf32>
    %100 = vector.extract_strided_slice %33 {offsets = [0, 24], sizes = [136, 8], strides = [1, 1]} : vector<136x96xf32> to vector<136x8xf32>
    %101 = vector.extract_strided_slice %33 {offsets = [0, 56], sizes = [136, 8], strides = [1, 1]} : vector<136x96xf32> to vector<136x8xf32>
    %102 = vector.extract_strided_slice %33 {offsets = [0, 88], sizes = [136, 8], strides = [1, 1]} : vector<136x96xf32> to vector<136x8xf32>
    %103 = arith.truncf %100 : vector<136x8xf32> to vector<136x8xbf16>
    %104 = arith.truncf %101 : vector<136x8xf32> to vector<136x8xbf16>
    %cst_34 = arith.constant dense<0.000000e+00> : vector<136x136xf32>
    %105 = tpu.matmul %103, %104, %cst_34 {dimension_numbers = #tpu.dot_dimension_numbers<[1], [1], [0], [0], [0, 0, 1, 0], [], []>} : vector<136x8xbf16>, vector<136x8xbf16>, vector<136x136xf32> -> vector<136x136xf32>
    %106 = arith.addf %105, %39 : vector<136x136xf32>
    %cst_35 = arith.constant dense<0xFF800000> : vector<136xf32>
    %107 = vector.multi_reduction <maximumf>, %106, %cst_35 [1] : vector<136x136xf32> to vector<136xf32>
    %108 = vector.shape_cast %107 : vector<136xf32> to vector<136x1xf32>
    %109 = vector.broadcast %108 : vector<136x1xf32> to vector<136x136xf32>
    %110 = arith.subf %106, %109 : vector<136x136xf32>
    %111 = math.exp %110 : vector<136x136xf32>
    %cst_36 = arith.constant dense<0.000000e+00> : vector<136xf32>
    %112 = vector.multi_reduction <add>, %111, %cst_36 [1] : vector<136x136xf32> to vector<136xf32>
    %113 = vector.shape_cast %112 : vector<136xf32> to vector<136x1xf32>
    %114 = tpu.reciprocal %113 {approx = true} : vector<136x1xf32> -> vector<136x1xf32>
    %115 = vector.broadcast %114 : vector<136x1xf32> to vector<136x136xf32>
    %116 = arith.mulf %111, %115 : vector<136x136xf32>
    %117 = arith.truncf %116 : vector<136x136xf32> to vector<136x136xbf16>
    %118 = arith.truncf %102 : vector<136x8xf32> to vector<136x8xbf16>
    %cst_37 = arith.constant dense<0.000000e+00> : vector<136x8xf32>
    %119 = tpu.matmul %117, %118, %cst_37 {dimension_numbers = #tpu.dot_dimension_numbers<[1], [0], [0], [1], [0, 0, 1, 1], [], []>} : vector<136x136xbf16>, vector<136x8xbf16>, vector<136x8xf32> -> vector<136x8xf32>
    %120 = tpu.concatenate %59, %79, %99, %119 in 1 : vector<136x8xf32>, vector<136x8xf32>, vector<136x8xf32>, vector<136x8xf32> -> vector<136x32xf32>
    %c0_38 = arith.constant 0 : index
    %c0_39 = arith.constant 0 : index
    %121 = vector.load %arg8[%c0_38, %c0_39] : memref<32x32xbf16, #tpu.memory_space<vmem>>, vector<32x32xbf16>
    %122 = arith.truncf %120 : vector<136x32xf32> to vector<136x32xbf16>
    %cst_40 = arith.constant dense<0.000000e+00> : vector<136x32xf32>
    %123 = tpu.matmul %122, %121, %cst_40 {dimension_numbers = #tpu.dot_dimension_numbers<[1], [0], [0], [1], [0, 0, 1, 1], [], []>} : vector<136x32xbf16>, vector<32x32xbf16>, vector<136x32xf32> -> vector<136x32xf32>
    %c0_41 = arith.constant 0 : index
    %c0_42 = arith.constant 0 : index
    %124 = vector.load %arg9[%c0_41, %c0_42] : memref<1x32xf32, #tpu.memory_space<vmem>>, vector<1x32xf32>
    %125 = vector.broadcast %124 : vector<1x32xf32> to vector<136x32xf32>
    %126 = arith.addf %123, %125 : vector<136x32xf32>
    %127 = arith.addf %25, %126 : vector<136x32xf32>
    %c0_43 = arith.constant 0 : index
    %c0_44 = arith.constant 0 : index
    %128 = vector.load %arg10[%c0_43, %c0_44] : memref<1x32xf32, #tpu.memory_space<vmem>>, vector<1x32xf32>
    %c0_45 = arith.constant 0 : index
    %c0_46 = arith.constant 0 : index
    %129 = vector.load %arg11[%c0_45, %c0_46] : memref<1x32xf32, #tpu.memory_space<vmem>>, vector<1x32xf32>
    %cst_47 = arith.constant dense<0.000000e+00> : vector<136xf32>
    %130 = vector.multi_reduction <add>, %127, %cst_47 [1] : vector<136x32xf32> to vector<136xf32>
    %131 = vector.shape_cast %130 : vector<136xf32> to vector<136x1xf32>
    %cst_48 = arith.constant 3.200000e+01 : f32
    %132 = vector.broadcast %cst_48 : f32 to vector<136x1xf32>
    %133 = arith.divf %131, %132 : vector<136x1xf32>
    %134 = vector.broadcast %133 : vector<136x1xf32> to vector<136x32xf32>
    %135 = arith.subf %127, %134 : vector<136x32xf32>
    %136 = arith.mulf %135, %135 : vector<136x32xf32>
    %cst_49 = arith.constant dense<0.000000e+00> : vector<136xf32>
    %137 = vector.multi_reduction <add>, %136, %cst_49 [1] : vector<136x32xf32> to vector<136xf32>
    %138 = vector.shape_cast %137 : vector<136xf32> to vector<136x1xf32>
    %cst_50 = arith.constant 3.200000e+01 : f32
    %139 = vector.broadcast %cst_50 : f32 to vector<136x1xf32>
    %140 = arith.divf %138, %139 : vector<136x1xf32>
    %cst_51 = arith.constant 9.99999974E-6 : f32
    %141 = vector.broadcast %cst_51 : f32 to vector<136x1xf32>
    %142 = arith.addf %140, %141 : vector<136x1xf32>
    %143 = math.rsqrt %142 : vector<136x1xf32>
    %144 = vector.broadcast %143 : vector<136x1xf32> to vector<136x32xf32>
    %145 = arith.mulf %135, %144 : vector<136x32xf32>
    %146 = vector.broadcast %128 : vector<1x32xf32> to vector<136x32xf32>
    %147 = arith.mulf %145, %146 : vector<136x32xf32>
    %148 = vector.broadcast %129 : vector<1x32xf32> to vector<136x32xf32>
    %149 = arith.addf %147, %148 : vector<136x32xf32>
    %c0_52 = arith.constant 0 : index
    %c0_53 = arith.constant 0 : index
    %150 = vector.load %arg12[%c0_52, %c0_53] : memref<32x64xbf16, #tpu.memory_space<vmem>>, vector<32x64xbf16>
    %151 = arith.truncf %149 : vector<136x32xf32> to vector<136x32xbf16>
    %cst_54 = arith.constant dense<0.000000e+00> : vector<136x64xf32>
    %152 = tpu.matmul %151, %150, %cst_54 {dimension_numbers = #tpu.dot_dimension_numbers<[1], [0], [0], [1], [0, 0, 1, 1], [], []>} : vector<136x32xbf16>, vector<32x64xbf16>, vector<136x64xf32> -> vector<136x64xf32>
    %c0_55 = arith.constant 0 : index
    %c0_56 = arith.constant 0 : index
    %153 = vector.load %arg13[%c0_55, %c0_56] : memref<1x64xf32, #tpu.memory_space<vmem>>, vector<1x64xf32>
    %154 = vector.broadcast %153 : vector<1x64xf32> to vector<136x64xf32>
    %155 = arith.addf %152, %154 : vector<136x64xf32>
    %cst_57 = arith.constant 5.000000e-01 : f32
    %156 = vector.broadcast %cst_57 : f32 to vector<136x64xf32>
    %157 = arith.mulf %156, %155 : vector<136x64xf32>
    %cst_58 = arith.constant 0.707106769 : f32
    %158 = vector.broadcast %cst_58 : f32 to vector<136x64xf32>
    %159 = arith.mulf %155, %158 : vector<136x64xf32>
    %160 = math.absf %159 : vector<136x64xf32>
    %cst_59 = arith.constant 0.327591091 : f32
    %161 = vector.broadcast %cst_59 : f32 to vector<136x64xf32>
    %162 = arith.mulf %161, %160 : vector<136x64xf32>
    %cst_60 = arith.constant 1.000000e+00 : f32
    %163 = vector.broadcast %cst_60 : f32 to vector<136x64xf32>
    %164 = arith.addf %163, %162 : vector<136x64xf32>
    %cst_61 = arith.constant 1.000000e+00 : f32
    %165 = vector.broadcast %cst_61 : f32 to vector<136x64xf32>
    %166 = arith.divf %165, %164 : vector<136x64xf32>
    %cst_62 = arith.constant 1.06140542 : f32
    %167 = vector.broadcast %cst_62 : f32 to vector<136x64xf32>
    %168 = arith.mulf %167, %166 : vector<136x64xf32>
    %cst_63 = arith.constant -1.45315206 : f32
    %169 = vector.broadcast %cst_63 : f32 to vector<136x64xf32>
    %170 = arith.addf %168, %169 : vector<136x64xf32>
    %171 = arith.mulf %170, %166 : vector<136x64xf32>
    %cst_64 = arith.constant 1.42141378 : f32
    %172 = vector.broadcast %cst_64 : f32 to vector<136x64xf32>
    %173 = arith.addf %171, %172 : vector<136x64xf32>
    %174 = arith.mulf %173, %166 : vector<136x64xf32>
    %cst_65 = arith.constant -0.284496725 : f32
    %175 = vector.broadcast %cst_65 : f32 to vector<136x64xf32>
    %176 = arith.addf %174, %175 : vector<136x64xf32>
    %177 = arith.mulf %176, %166 : vector<136x64xf32>
    %cst_66 = arith.constant 0.254829586 : f32
    %178 = vector.broadcast %cst_66 : f32 to vector<136x64xf32>
    %179 = arith.addf %177, %178 : vector<136x64xf32>
    %180 = arith.mulf %179, %166 : vector<136x64xf32>
    %cst_67 = arith.constant 0.000000e+00 : f32
    %181 = vector.broadcast %cst_67 : f32 to vector<136x64xf32>
    %182 = arith.subf %181, %160 : vector<136x64xf32>
    %183 = arith.mulf %182, %160 : vector<136x64xf32>
    %184 = math.exp %183 : vector<136x64xf32>
    %185 = arith.mulf %180, %184 : vector<136x64xf32>
    %cst_68 = arith.constant 1.000000e+00 : f32
    %186 = vector.broadcast %cst_68 : f32 to vector<136x64xf32>
    %187 = arith.subf %186, %185 : vector<136x64xf32>
    %cst_69 = arith.constant 0.000000e+00 : f32
    %188 = vector.broadcast %cst_69 : f32 to vector<136x64xf32>
    %189 = arith.cmpf oge, %159, %188 : vector<136x64xf32>
    %cst_70 = arith.constant 0.000000e+00 : f32
    %190 = vector.broadcast %cst_70 : f32 to vector<136x64xf32>
    %191 = arith.subf %190, %187 : vector<136x64xf32>
    %192 = arith.select %189, %187, %191 : vector<136x64xi1>, vector<136x64xf32>
    %cst_71 = arith.constant 1.000000e+00 : f32
    %193 = vector.broadcast %cst_71 : f32 to vector<136x64xf32>
    %194 = arith.addf %193, %192 : vector<136x64xf32>
    %195 = arith.mulf %157, %194 : vector<136x64xf32>
    %c0_72 = arith.constant 0 : index
    %c0_73 = arith.constant 0 : index
    %196 = vector.load %arg14[%c0_72, %c0_73] : memref<64x32xbf16, #tpu.memory_space<vmem>>, vector<64x32xbf16>
    %197 = arith.truncf %195 : vector<136x64xf32> to vector<136x64xbf16>
    %cst_74 = arith.constant dense<0.000000e+00> : vector<136x32xf32>
    %198 = tpu.matmul %197, %196, %cst_74 {dimension_numbers = #tpu.dot_dimension_numbers<[1], [0], [0], [1], [0, 0, 1, 1], [], []>} : vector<136x64xbf16>, vector<64x32xbf16>, vector<136x32xf32> -> vector<136x32xf32>
    %c0_75 = arith.constant 0 : index
    %c0_76 = arith.constant 0 : index
    %199 = vector.load %arg15[%c0_75, %c0_76] : memref<1x32xf32, #tpu.memory_space<vmem>>, vector<1x32xf32>
    %200 = vector.broadcast %199 : vector<1x32xf32> to vector<136x32xf32>
    %201 = arith.addf %198, %200 : vector<136x32xf32>
    %202 = arith.addf %149, %201 : vector<136x32xf32>
    %c0_77 = arith.constant 0 : index
    %c0_78 = arith.constant 0 : index
    %203 = vector.load %arg16[%c0_77, %c0_78] : memref<1x32xf32, #tpu.memory_space<vmem>>, vector<1x32xf32>
    %c0_79 = arith.constant 0 : index
    %c0_80 = arith.constant 0 : index
    %204 = vector.load %arg17[%c0_79, %c0_80] : memref<1x32xf32, #tpu.memory_space<vmem>>, vector<1x32xf32>
    %cst_81 = arith.constant dense<0.000000e+00> : vector<136xf32>
    %205 = vector.multi_reduction <add>, %202, %cst_81 [1] : vector<136x32xf32> to vector<136xf32>
    %206 = vector.shape_cast %205 : vector<136xf32> to vector<136x1xf32>
    %cst_82 = arith.constant 3.200000e+01 : f32
    %207 = vector.broadcast %cst_82 : f32 to vector<136x1xf32>
    %208 = arith.divf %206, %207 : vector<136x1xf32>
    %209 = vector.broadcast %208 : vector<136x1xf32> to vector<136x32xf32>
    %210 = arith.subf %202, %209 : vector<136x32xf32>
    %211 = arith.mulf %210, %210 : vector<136x32xf32>
    %cst_83 = arith.constant dense<0.000000e+00> : vector<136xf32>
    %212 = vector.multi_reduction <add>, %211, %cst_83 [1] : vector<136x32xf32> to vector<136xf32>
    %213 = vector.shape_cast %212 : vector<136xf32> to vector<136x1xf32>
    %cst_84 = arith.constant 3.200000e+01 : f32
    %214 = vector.broadcast %cst_84 : f32 to vector<136x1xf32>
    %215 = arith.divf %213, %214 : vector<136x1xf32>
    %cst_85 = arith.constant 9.99999974E-6 : f32
    %216 = vector.broadcast %cst_85 : f32 to vector<136x1xf32>
    %217 = arith.addf %215, %216 : vector<136x1xf32>
    %218 = math.rsqrt %217 : vector<136x1xf32>
    %219 = vector.broadcast %218 : vector<136x1xf32> to vector<136x32xf32>
    %220 = arith.mulf %210, %219 : vector<136x32xf32>
    %221 = vector.broadcast %203 : vector<1x32xf32> to vector<136x32xf32>
    %222 = arith.mulf %220, %221 : vector<136x32xf32>
    %223 = vector.broadcast %204 : vector<1x32xf32> to vector<136x32xf32>
    %224 = arith.addf %222, %223 : vector<136x32xf32>
    %225 = vector.extract_strided_slice %224 {offsets = [128, 0], sizes = [8, 32], strides = [1, 1]} : vector<136x32xf32> to vector<8x32xf32>
    %226 = vector.extract_strided_slice %225 {offsets = [0, 0], sizes = [4, 32], strides = [1, 1]} : vector<8x32xf32> to vector<4x32xf32>
    %227 = arith.addf %226, %26 : vector<4x32xf32>
    %c0_86 = arith.constant 0 : index
    %c0_87 = arith.constant 0 : index
    %228 = vector.load %arg18[%c0_86, %c0_87] : memref<32x288xbf16, #tpu.memory_space<vmem>>, vector<32x288xbf16>
    %229 = arith.truncf %227 : vector<4x32xf32> to vector<4x32xbf16>
    %cst_88 = arith.constant dense<0.000000e+00> : vector<4x288xf32>
    %230 = tpu.matmul %229, %228, %cst_88 {dimension_numbers = #tpu.dot_dimension_numbers<[1], [0], [0], [1], [0, 0, 1, 1], [], []>} : vector<4x32xbf16>, vector<32x288xbf16>, vector<4x288xf32> -> vector<4x288xf32>
    %c0_89 = arith.constant 0 : index
    %c0_90 = arith.constant 0 : index
    %231 = vector.load %arg19[%c0_89, %c0_90] : memref<1x288xf32, #tpu.memory_space<vmem>>, vector<1x288xf32>
    %232 = vector.broadcast %231 : vector<1x288xf32> to vector<4x288xf32>
    %233 = arith.addf %230, %232 : vector<4x288xf32>
    %234 = arith.truncf %233 : vector<4x288xf32> to vector<4x288xbf16>
    %c0_91 = arith.constant 0 : index
    %c0_92 = arith.constant 0 : index
    %235 = vector.load %arg23[%c0_91, %c0_92] : memref<4x288xbf16, #tpu.memory_space<vmem>>, vector<4x288xbf16>
    tpu.vector_store %arg23[%c0_91, %c0_92], %234 {strides = array<i32>} : memref<4x288xbf16, #tpu.memory_space<vmem>>, vector<4x288xbf16>,
    %c0_93 = arith.constant 0 : index
    %c0_94 = arith.constant 0 : index
    %236 = vector.load %arg20[%c0_93, %c0_94] : memref<32x32xbf16, #tpu.memory_space<vmem>>, vector<32x32xbf16>
    %237 = arith.truncf %225 : vector<8x32xf32> to vector<8x32xbf16>
    %cst_95 = arith.constant dense<0.000000e+00> : vector<8x32xf32>
    %238 = tpu.matmul %237, %236, %cst_95 {dimension_numbers = #tpu.dot_dimension_numbers<[1], [0], [0], [1], [0, 0, 1, 1], [], []>} : vector<8x32xbf16>, vector<32x32xbf16>, vector<8x32xf32> -> vector<8x32xf32>
    %c0_96 = arith.constant 0 : index
    %c0_97 = arith.constant 0 : index
    %239 = vector.load %arg21[%c0_96, %c0_97] : memref<1x32xf32, #tpu.memory_space<vmem>>, vector<1x32xf32>
    %240 = vector.broadcast %239 : vector<1x32xf32> to vector<8x32xf32>
    %241 = arith.addf %238, %240 : vector<8x32xf32>
    %c0_98 = arith.constant 0 : index
    %c0_99 = arith.constant 0 : index
    %242 = vector.load %arg24[%c0_98, %c0_99] : memref<8x32xf32, #tpu.memory_space<vmem>>, vector<8x32xf32>
    tpu.vector_store %arg24[%c0_98, %c0_99], %241 {strides = array<i32>} : memref<8x32xf32, #tpu.memory_space<vmem>>, vector<8x32xf32>,
    return
  }
  func.func @transform_0(%arg0: i32) -> (i32, i32) {
    %c0_i32 = arith.constant 0 : i32
    %c0_i32_0 = arith.constant 0 : i32
    %c0_i32_1 = arith.constant 0 : i32
    return %c0_i32, %c0_i32_0 : i32, i32
  }
  func.func @transform_1(%arg0: i32) -> (i32, i32) {
    %c0_i32 = arith.constant 0 : i32
    %c0_i32_0 = arith.constant 0 : i32
    %c0_i32_1 = arith.constant 0 : i32
    return %c0_i32, %c0_i32_0 : i32, i32
  }
  func.func @transform_2(%arg0: i32) -> (i32, i32) {
    %c0_i32 = arith.constant 0 : i32
    %c0_i32_0 = arith.constant 0 : i32
    %c0_i32_1 = arith.constant 0 : i32
    return %c0_i32, %c0_i32_0 : i32, i32
  }
  func.func @transform_3(%arg0: i32) -> (i32, i32) {
    %c0_i32 = arith.constant 0 : i32
    %c0_i32_0 = arith.constant 0 : i32
    %c0_i32_1 = arith.constant 0 : i32
    return %c0_i32, %c0_i32_0 : i32, i32
  }
  func.func @transform_4(%arg0: i32) -> (i32, i32) {
    %c0_i32 = arith.constant 0 : i32
    %c0_i32_0 = arith.constant 0 : i32
    %c0_i32_1 = arith.constant 0 : i32
    return %c0_i32, %c0_i32_0 : i32, i32
  }
  func.func @transform_5(%arg0: i32) -> (i32, i32) {
    %c0_i32 = arith.constant 0 : i32
    %c0_i32_0 = arith.constant 0 : i32
    %c0_i32_1 = arith.constant 0 : i32
    return %c0_i32, %c0_i32_0 : i32, i32
  }
  func.func @transform_6(%arg0: i32) -> (i32, i32) {
    %c0_i32 = arith.constant 0 : i32
    %c0_i32_0 = arith.constant 0 : i32
    %c0_i32_1 = arith.constant 0 : i32
    return %c0_i32, %c0_i32_0 : i32, i32
  }
  func.func @transform_7(%arg0: i32) -> (i32, i32) {
    %c0_i32 = arith.constant 0 : i32
    %c0_i32_0 = arith.constant 0 : i32
    %c0_i32_1 = arith.constant 0 : i32
    return %c0_i32, %c0_i32_0 : i32, i32
  }
  func.func @transform_8(%arg0: i32) -> (i32, i32) {
    %c0_i32 = arith.constant 0 : i32
    %c0_i32_0 = arith.constant 0 : i32
    %c0_i32_1 = arith.constant 0 : i32
    return %c0_i32, %c0_i32_0 : i32, i32
  }
  func.func @transform_9(%arg0: i32) -> (i32, i32) {
    %c0_i32 = arith.constant 0 : i32
    %c0_i32_0 = arith.constant 0 : i32
    %c0_i32_1 = arith.constant 0 : i32
    return %c0_i32, %c0_i32_0 : i32, i32
  }
  func.func @transform_10(%arg0: i32) -> (i32, i32) {
    %c0_i32 = arith.constant 0 : i32
    %c0_i32_0 = arith.constant 0 : i32
    %c0_i32_1 = arith.constant 0 : i32
    return %c0_i32, %c0_i32_0 : i32, i32
  }
  func.func @transform_11(%arg0: i32) -> (i32, i32) {
    %c0_i32 = arith.constant 0 : i32
    %c0_i32_0 = arith.constant 0 : i32
    %c0_i32_1 = arith.constant 0 : i32
    return %c0_i32, %c0_i32_0 : i32, i32
  }
  func.func @transform_12(%arg0: i32) -> (i32, i32) {
    %c0_i32 = arith.constant 0 : i32
    %c0_i32_0 = arith.constant 0 : i32
    %c0_i32_1 = arith.constant 0 : i32
    return %c0_i32, %c0_i32_0 : i32, i32
  }
  func.func @transform_13(%arg0: i32) -> (i32, i32) {
    %c0_i32 = arith.constant 0 : i32
    %c0_i32_0 = arith.constant 0 : i32
    %c0_i32_1 = arith.constant 0 : i32
    return %c0_i32, %c0_i32_0 : i32, i32
  }
  func.func @transform_14(%arg0: i32) -> (i32, i32) {
    %c0_i32 = arith.constant 0 : i32
    %c0_i32_0 = arith.constant 0 : i32
    %c0_i32_1 = arith.constant 0 : i32
    return %c0_i32, %c0_i32_0 : i32, i32
  }
  func.func @transform_15(%arg0: i32) -> (i32, i32) {
    %c0_i32 = arith.constant 0 : i32
    %c0_i32_0 = arith.constant 0 : i32
    %c0_i32_1 = arith.constant 0 : i32
    return %c0_i32, %c0_i32_0 : i32, i32
  }
  func.func @transform_16(%arg0: i32) -> (i32, i32) {
    %c0_i32 = arith.constant 0 : i32
    %c0_i32_0 = arith.constant 0 : i32
    %c0_i32_1 = arith.constant 0 : i32
    return %c0_i32, %c0_i32_0 : i32, i32
  }
  func.func @transform_17(%arg0: i32) -> (i32, i32) {
    %c0_i32 = arith.constant 0 : i32
    %c0_i32_0 = arith.constant 0 : i32
    %c0_i32_1 = arith.constant 0 : i32
    return %c0_i32, %c0_i32_0 : i32, i32
  }
  func.func @transform_18(%arg0: i32) -> (i32, i32) {
    %c0_i32 = arith.constant 0 : i32
    %c0_i32_0 = arith.constant 0 : i32
    %c0_i32_1 = arith.constant 0 : i32
    return %c0_i32, %c0_i32_0 : i32, i32
  }
  func.func @transform_19(%arg0: i32) -> (i32, i32) {
    %c0_i32 = arith.constant 0 : i32
    %c0_i32_0 = arith.constant 0 : i32
    %c0_i32_1 = arith.constant 0 : i32
    return %c0_i32, %c0_i32_0 : i32, i32
  }
  func.func @transform_20(%arg0: i32) -> (i32, i32) {
    %c0_i32 = arith.constant 0 : i32
    %c0_i32_0 = arith.constant 0 : i32
    %c0_i32_1 = arith.constant 0 : i32
    return %c0_i32, %c0_i32_0 : i32, i32
  }
  func.func @transform_21(%arg0: i32) -> (i32, i32) {
    %c0_i32 = arith.constant 0 : i32
    %c0_i32_0 = arith.constant 0 : i32
    %c0_i32_1 = arith.constant 0 : i32
    return %c0_i32, %c0_i32_0 : i32, i32
  }
  func.func @transform_22(%arg0: i32) -> (i32, i32) {
    %c0_i32 = arith.constant 0 : i32
    %c0_i32_0 = arith.constant 0 : i32
    %c0_i32_1 = arith.constant 0 : i32
    return %c0_i32, %c0_i32_0 : i32, i32
  }
  func.func @transform_23(%arg0: i32) -> (i32, i32) {
    %c0_i32 = arith.constant 0 : i32
    %c0_i32_0 = arith.constant 0 : i32
    %c0_i32_1 = arith.constant 0 : i32
    return %c0_i32, %c0_i32_0 : i32, i32
  }
}

</mosaic_0001>

<bundles_post_ra>
// kernel: dofa_forward.3
= control target key start
LH: loop header
LB: loop body
LE: loop exit
PB: predicated region body
PF: predicated region fallthrough
CT: control target
= control target key end

     0   :  { %vm90_vm0 = vcmask 1041408   ;;  %v299_v0 = vmov 0.0   ;;  %vm300_vm1 = vmmov 0   ;;  %vm74_vm2 = vcmask 293888   ;;  %s389_s1 = inlined_call_operand.vmem [shape: bf16[36,32], index: 1, kind: input, shape index: {}]   ;;  %s390_s0 = inlined_call_operand.vmem [shape: bf16[72,36], index: 0, kind: input, shape index: {}]   ;;  %s391_s2 = inlined_call_operand.vmem [shape: f32[1,32], index: 2, kind: input, shape index: {}]   ;;  %s392_s3 = inlined_call_operand.vmem [shape: bf16[72,32], index: 3, kind: output, shape index: {}]  }
   0x1   :  { %257 = vmatprep.subr.bf16.mxu0 %v299_v0  ;;  %v291_v1 = vld [vmem:[%s389_s1 + $0x10] ss:$0 sps:$4 sm:$0x33]   ;;  %283 = vmatprep.subr.bf16.mxu1 %v299_v0  ;;  %v292_v3 = vld [vmem:[%s389_s1 + $0x8] sm:$0xff]   ;;  %v293_v4 = vld [vmem:[%s389_s1] sm:$0xff]   ;;  %vm203_vm3 = vcmask 257024  }
   0x2   :  { %263 = vmatprep.mubr.msk.bf16.mxu0 %vm300_vm1, %v299_v0  ;;  %275 = vmatprep.mubr.msk.bf16.mxu1 %vm300_vm1, %v299_v0  ;;  %v92_v2 = vsel %vm90_vm0, %v291_v1, 0  ;;  %v294_v5 = vld [vmem:[%s390_s0] sm:$0xff]   ;;  %v295_v6 = vld [vmem:[%s390_s0 + $0x18] sm:$0xff]   ;;  %v296_v7 = vld [vmem:[%s390_s0 + $0x8] sm:$0xff]  }
   0x3   :  { %258 = vmatpush3.bf16.msra.mxu0 %v92_v2  ;;  %286 = vmatpush3.bf16.msra.mxu1 %v92_v2  ;;  %v297_v8 = vld [vmem:[%s390_s0 + $0x20] ss:$0 sps:$4 sm:$0xff]   ;;  %v298_v9 = vld [vmem:[%s390_s0 + $0x10] sm:$0xff]  }
   0x4   :  { %259 = vmatprep.subr.bf16.mxu0 %v299_v0  ;;  %284 = vmatprep.subr.bf16.mxu1 %v299_v0  ;;  %v217_v10 = vld [vmem:[%s391_s2] ss:$0 sm:$0xff] }
   0x7   :  { %260 = vmatpush3.bf16.msra.mxu0 %v292_v3  ;;  %287 = vmatpush3.bf16.msra.mxu1 %v292_v3 }
   0x8   :  { %261 = vmatprep.subr.bf16.mxu0 %v299_v0  ;;  %285 = vmatprep.subr.bf16.mxu1 %v299_v0 }
   0xb   :  { %262 = vmatpush3.bf16.msra.mxu0 %v293_v4  ;;  %288 = vmatpush3.bf16.msra.mxu1 %v293_v4 }
   0xe   :  { %264 = vmatmul.mubr.msk.bf16.vlgmr.msra.gmra.mxu0 %vm74_vm2, %v294_v5  ;;  %276 = vmatmul.mubr.msk.bf16.vlgmr.msra.gmra.mxu1 %vm74_vm2, %v295_v6 }
   0xf   :  { %267 = vmatprep.mubr.msk.bf16.mxu0 %vm300_vm1, %v299_v0  ;;  %279 = vmatprep.mubr.msk.bf16.mxu1 %vm300_vm1, %v299_v0 }
  0x16   :  { %268 = vmatmul.mubr.msk.bf16.gmra.mxu0 %vm74_vm2, %v296_v7  ;;  %280 = vmatmul.mubr.msk.bf16.gmra.mxu1 %vm74_vm2, %v297_v8 }
  0x17   :  { %271 = vmatprep.mubr.msk.bf16.mxu0 %vm300_vm1, %v299_v0 }
  0x1e   :  { %272 = vmatmul.mubr.msk.bf16.gmra.mxu0 %vm74_vm2, %v298_v9 }
  0xce   :  { %v128_v11 = vpop.f32.mrf.mxu0  ;;  %v152_v12 = vpop.f32.mrf.mxu1 }
  0xcf   :  { %v129_v13 = vadd.f32 %v217_v10, %v128_v11  ;;  %v153_v14 = vadd.f32 %v217_v10, %v152_v12 }
  0xd0   :  { %v265_v15 = vpop.f32.mrf.mxu0  ;;  %v277_v16 = vpop.f32.mrf.mxu1 }
  0xd1   :  { %v240_v17 = vpack.c.bf16 %v129_v13, %v129_v13  ;;  %v246_v18 = vpack.c.bf16 %v153_v14, %v153_v14 }
  0xd2   :  { %v131_v19 = vpop.f32.mrf.mxu0  ;;  %v155_v20 = vpop.f32.mrf.mxu1 }
  0xd3   :  { %204 = vst.msk [vmem:[%s392_s3] sm:$0xf] %vm203_vm3, %v240_v17  ;;  %v132_v21 = vadd.f32 %v217_v10, %v131_v19  ;;  %210 = vst.msk [vmem:[%s392_s3 + $0x18] sm:$0xf] %vm203_vm3, %v246_v18  ;;  %v156_v22 = vadd.f32 %v217_v10, %v155_v20 }
  0xd4   :  { %v266_v23 = vpop.f32.mrf.mxu0  ;;  %v278_v24 = vpop.f32.mrf.mxu1 }
  0xd5   :  { %v241_v25 = vpack.c.bf16 %v132_v21, %v132_v21  ;;  %v247_v26 = vpack.c.bf16 %v156_v22, %v156_v22 }
  0xd6   :  { %v136_v27 = vpop.f32.mrf.mxu0  ;;  %v160_v28 = vpop.f32.mrf.mxu1 }
  0xd7   :  { %205 = vst.msk [vmem:[%s392_s3 + $0x4] sm:$0xf] %vm203_vm3, %v241_v25  ;;  %v137_v29 = vadd.f32 %v217_v10, %v136_v27  ;;  %211 = vst.msk [vmem:[%s392_s3 + $0x1c] sm:$0xf] %vm203_vm3, %v247_v26  ;;  %v161_v30 = vadd.f32 %v217_v10, %v160_v28 }
  0xd8   :  { %v269_v31 = vpop.f32.mrf.mxu0  ;;  %v281_v32 = vpop.f32.mrf.mxu1 }
  0xd9   :  { %v242_v33 = vpack.c.bf16 %v137_v29, %v137_v29  ;;  %v248_v34 = vpack.c.bf16 %v161_v30, %v161_v30 }
  0xda   :  { %v139_v35 = vpop.f32.mrf.mxu0  ;;  %v163_v36 = vpop.f32.mrf.mxu1 }
  0xdb   :  { %206 = vst.msk [vmem:[%s392_s3 + $0x8] sm:$0xf] %vm203_vm3, %v242_v33  ;;  %v140_v37 = vadd.f32 %v217_v10, %v139_v35  ;;  %212 = vst.msk [vmem:[%s392_s3 + $0x20] sm:$0xf] %vm203_vm3, %v248_v34 }
  0xdc   :  { %v270_v38 = vpop.f32.mrf.mxu0  ;;  %v282_v39 = vpop.f32.mrf.mxu1 }
  0xdd   :  { %v243_v40 = vpack.c.bf16 %v140_v37, %v140_v37 }
  0xde   :  { %v144_v41 = vpop.f32.mrf.mxu0 }
  0xdf   :  { %207 = vst.msk [vmem:[%s392_s3 + $0xc] sm:$0xf] %vm203_vm3, %v243_v40  ;;  %v145_v42 = vadd.f32 %v217_v10, %v144_v41 }
  0xe0   :  { %v273_v43 = vpop.f32.mrf.mxu0 }
  0xe1   :  { %v244_v44 = vpack.c.bf16 %v145_v42, %v145_v42 }
  0xe2   :  { %v147_v45 = vpop.f32.mrf.mxu0 }
  0xe3   :  { %208 = vst.msk [vmem:[%s392_s3 + $0x10] sm:$0xf] %vm203_vm3, %v244_v44  ;;  %v148_v46 = vadd.f32 %v217_v10, %v147_v45 }
  0xe4   :  { %v274_v47 = vpop.f32.mrf.mxu0 }
  0xe5   :  { %v245_v48 = vpack.c.bf16 %v148_v46, %v148_v46 }
  0xe7   :  { %209 = vst.msk [vmem:[%s392_s3 + $0x14] sm:$0xf] %vm203_vm3, %v245_v48 }

// kernel: dofa_forward.2
= control target key start
LH: loop header
LB: loop body
LE: loop exit
PB: predicated region body
PF: predicated region fallthrough
CT: control target
= control target key end

     0   :  { %s9985_s0 = inlined_call_operand.vmem [shape: f32[136,32], index: 0, kind: input, shape index: {}]   ;;  %s9986_s1 = inlined_call_operand.vmem [shape: bf16[32,32], index: 1, kind: input, shape index: {}]   ;;  %s9987_s2 = inlined_call_operand.vmem [shape: f32[1,32], index: 2, kind: input, shape index: {}]   ;;  %s9988_s3 = inlined_call_operand.vmem [shape: bf16[32,32], index: 3, kind: input, shape index: {}]   ;;  %s9989_s4 = inlined_call_operand.vmem [shape: f32[1,32], index: 4, kind: input, shape index: {}]   ;;  %s9990_s5 = inlined_call_operand.vmem [shape: bf16[32,96], index: 5, kind: input, shape index: {}]   ;;  %s9991_s6 = inlined_call_operand.vmem [shape: f32[1,96], index: 6, kind: input, shape index: {}]   ;;  %s9992_s7 = inlined_call_operand.vmem [shape: bf16[32,32], index: 7, kind: input, shape index: {}]   ;;  %s9993_s8 = inlined_call_operand.vmem [shape: f32[1,32], index: 8, kind: input, shape index: {}]   ;;  %s9994_s9 = inlined_call_operand.vmem [shape: f32[1,32], index: 9, kind: input, shape index: {}]   ;;  %s9995_s10 = inlined_call_operand.vmem [shape: f32[1,32], index: 10, kind: input, shape index: {}]   ;;  %s9996_s11 = inlined_call_operand.vmem [shape: bf16[32,64], index: 11, kind: input, shape index: {}]   ;;  %s9997_s12 = inlined_call_operand.vmem [shape: f32[1,64], index: 12, kind: input, shape index: {}]   ;;  %s9998_s13 = inlined_call_operand.vmem [shape: bf16[64,32], index: 13, kind: input, shape index: {}]   ;;  %s9999_s14 = inlined_call_operand.vmem [shape: f32[1,32], index: 14, kind: input, shape index: {}]   ;;  %s10000_s15 = inlined_call_operand.vmem [shape: f32[1,32], index: 15, kind: input, shape index: {}]   ;;  %s10001_s16 = inlined_call_operand.vmem [shape: f32[1,32], index: 16, kind: input, shape index: {}]   ;;  %s10002_s17 = inlined_call_operand.vmem [shape: bf16[32,288], index: 17, kind: input, shape index: {}]   ;;  %s10003_s18 = inlined_call_operand.vmem [shape: f32[1,288], index: 18, kind: input, shape index: {}]   ;;  %s10004_s19 = inlined_call_operand.vmem [shape: bf16[32,32], index: 19, kind: input, shape index: {}]   ;;  %s10005_s20 = inlined_call_operand.vmem [shape: f32[1,32], index: 20, kind: input, shape index: {}]   ;;  %s10006_s21 = inlined_call_operand.hbm [shape: f32[4,32], index: 21, kind: output, shape index: {0}]   ;;  %s10007_s22 = inlined_call_operand.vmem [shape: bf16[4,288], index: 22, kind: output, shape index: {1}]   ;;  %s10008_s23 = inlined_call_operand.vmem [shape: f32[8,32], index: 23, kind: output, shape index: {2}]  }
   0x1   :  { %10179 = sst [smem:[#allocation134_spill]] %s9985_s0 }
   0x2   :  { %10180 = sst [smem:[#allocation135_spill]] %s9986_s1 }
   0x3   :  { %10181 = sst [smem:[#allocation136_spill]] %s9987_s2 }
   0x4   :  { %10182 = sst [smem:[#allocation137_spill]] %s9988_s3 }
   0x5   :  { %10183 = sst [smem:[#allocation138_spill]] %s9989_s4 }
   0x6   :  { %10184 = sst [smem:[#allocation139_spill]] %s9990_s5 }
   0x7   :  { %10185 = sst [smem:[#allocation140_spill]] %s9991_s6 }
   0x8   :  { %10186 = sst [smem:[#allocation141_spill]] %s9992_s7 }
   0x9   :  { %s10187_s24 = sld [smem:[#allocation135_spill]]  ;;  %v10014_v1 = vmov 0.0   ;;  %vm6437_vm0 = vmmov 0   ;;  %vm122_vm1 = vcmask 261120  }
   0xa   :  { %5462 = vmatprep.subr.bf16.mxu0 %v10014_v1  ;;  %5502 = vmatprep.subr.bf16.mxu1 %v10014_v1  ;;  %s10188_s2 = sld [smem:[#allocation134_spill]] }
   0xb   :  { %5466 = vmatprep.mubr.msk.bf16.mxu0 %vm6437_vm0, %v10014_v1  ;;  %5506 = vmatprep.mubr.msk.bf16.mxu1 %vm6437_vm0, %v10014_v1 }
   0xf   :  { %v5862_v0 = vld [vmem:[%s10187_s24 + $0x8] sm:$0xff]   ;;  %v5863_v2 = vld [vmem:[%s10187_s24] sm:$0xff]  }
  0x10   :  { %5463 = vmatpush3.bf16.msra.mxu0 %v5862_v0  ;;  %v73_v3 = vld [vmem:[%s10188_s2] sm:$0xff]  ;;  %v74_v4 = vld [vmem:[%s10188_s2 + $0x8] sm:$0xff]  ;;  %v75_v6 = vld [vmem:[%s10188_s2 + $0x10] sm:$0xff] }
  0x11   :  { %5464 = vmatprep.subr.bf16.mxu0 %v10014_v1  ;;  %v94_v5 = vpack.c.bf16 %v74_v4, %v73_v3  ;;  %v76_v7 = vld [vmem:[%s10188_s2 + $0x18] sm:$0xff]  ;;  %v77_v9 = vld [vmem:[%s10188_s2 + $0x20] sm:$0xff]  ;;  %v78_v10 = vld [vmem:[%s10188_s2 + $0x28] sm:$0xff] }
  0x12   :  { %v95_v8 = vpack.c.bf16 %v76_v7, %v75_v6 }
  0x14   :  { %5465 = vmatpush3.bf16.msra.mxu0 %v5863_v2 }
  0x15   :  { %5542 = vmatprep.subr.bf16.mxu0 %v10014_v1 }
  0x17   :  { %5467 = vmatmul.mubr.msk.bf16.vlgmr.msra.gmra.mxu0 %vm122_vm1, %v94_v5 }
  0x18   :  { %5470 = vmatprep.mubr.msk.bf16.mxu0 %vm6437_vm0, %v10014_v1 }
  0x1f   :  { %5471 = vmatmul.mubr.msk.bf16.gmra.mxu0 %vm122_vm1, %v95_v8 }
  0x20   :  { %5474 = vmatprep.mubr.msk.bf16.mxu0 %vm6437_vm0, %v10014_v1 }
  0x21   :  { %29 = vsyncpa [#allocation3], 0  ;;  %v96_v11 = vpack.c.bf16 %v78_v10, %v77_v9  ;;  %v79_v12 = vld [vmem:[%s10188_s2 + $0x30] sm:$0xff]  ;;  %v80_v13 = vld [vmem:[%s10188_s2 + $0x38] sm:$0xff]  ;;  %s10189_s0 = sld [smem:[#allocation137_spill]]  ;;  %s6440_s4 = smov 88  }
  0x22   :  { %v97_v14 = vpack.c.bf16 %v80_v13, %v79_v12  ;;  %v81_v15 = vld [vmem:[%s10188_s2 + $0x40] sm:$0xff]  ;;  %v82_v16 = vld [vmem:[%s10188_s2 + $0x48] sm:$0xff]  ;;  %v83_v18 = vld [vmem:[%s10188_s2 + $0x50] sm:$0xff]  ;;  %s10190_s5 = sld [smem:[#allocation139_spill]]  ;;  %vm554_vm3 = vcmask 257024   ;;  %vm762_vm4 = vcmask 64512  }
  0x23   :  { %v98_v17 = vpack.c.bf16 %v82_v16, %v81_v15  ;;  %v84_v19 = vld [vmem:[%s10188_s2 + $0x58] sm:$0xff]  ;;  %v85_v21 = vld [vmem:[%s10188_s2 + $0x60] sm:$0xff]  ;;  %v86_v22 = vld [vmem:[%s10188_s2 + $0x68] sm:$0xff]  ;;  %s10191_s7 = sld [smem:[#allocation136_spill]]  ;;  %s6442_s1 = smov 120   ;;  %vm1298_vm5 = vcmask 1043456  }
  0x24   :  { %v99_v20 = vpack.c.bf16 %v84_v19, %v83_v18  ;;  %v100_v23 = vpack.c.bf16 %v86_v22, %v85_v21  ;;  %v87_v24 = vld [vmem:[%s10188_s2 + $0x70] sm:$0xff]  ;;  %v88_v25 = vld [vmem:[%s10188_s2 + $0x78] sm:$0xff]  ;;  %v6665_v27 = vld [vmem:[%s10188_s2 + $0x80] sm:$0xff]  ;;  %s10192_s3 = sld [smem:[#allocation140_spill]]  ;;  %s6443_s26 = smov 72   ;;  %vm3661_vm7 = vcmask 130048  }
  0x25   :  { %v101_v26 = vpack.c.bf16 %v88_v25, %v87_v24  ;;  %v102_v28 = vpack.c.bf16 %v6665_v27, %v6665_v27  ;;  %s10197_s25 = sld [smem:[#allocation138_spill]]  ;;  %s6444_s6 = smov 112   ;;  %vm3679_vm8 = vcmask 195584   ;;  %vm4817_vm12 = vcmask 523264  }
  0x26   :  { %s6445_s27 = smov 104   ;;  %s6447_s28 = smov 56  }
  0x27   :  { %5475 = vmatmul.mubr.msk.bf16.gmra.mxu0 %vm122_vm1, %v96_v11  ;;  %v5864_v29 = vld [vmem:[%s10189_s0 + $0x8] sm:$0xff]   ;;  %v5865_v30 = vld [vmem:[%s10189_s0] sm:$0xff]   ;;  %s6438_s0 = smov 96   ;;  %s6448_s29 = smov 48  }
  0x28   :  { %5478 = vmatprep.mubr.msk.bf16.mxu0 %vm6437_vm0, %v10014_v1  ;;  %5503 = vmatpush3.bf16.msra.mxu1 %v5864_v29  ;;  %v5866_v31 = vld [vmem:[%s10190_s5 + $0x8] sm:$0xff]   ;;  %v5867_v32 = vld [vmem:[%s10190_s5] sm:$0xff]   ;;  %s6441_s5 = smov 80  }
  0x29   :  { %5504 = vmatprep.subr.bf16.mxu1 %v10014_v1  ;;  %5543 = vmatpush3.bf16.msra.mxu0 %v5866_v31  ;;  %v6713_v33 = vld [vmem:[%s10191_s7] ss:$0 sm:$0xff]  ;;  %s6446_s7 = smov 64  }
  0x2a   :  { %5544 = vmatprep.subr.bf16.mxu0 %v10014_v1 }
  0x2c   :  { %5505 = vmatpush3.bf16.msra.mxu1 %v5865_v30 }
  0x2d   :  { %5545 = vmatpush3.bf16.msra.mxu0 %v5867_v32 }
  0x2f   :  { %5479 = vmatmul.mubr.msk.bf16.gmra.mxu0 %vm122_vm1, %v97_v14 }
  0x30   :  { %5482 = vmatprep.mubr.msk.bf16.mxu0 %vm6437_vm0, %v10014_v1 }
  0x37   :  { %5483 = vmatmul.mubr.msk.bf16.gmra.mxu0 %vm122_vm1, %v98_v17 }
  0x38   :  { %5486 = vmatprep.mubr.msk.bf16.mxu0 %vm6437_vm0, %v10014_v1 }
  0x3f   :  { %5487 = vmatmul.mubr.msk.bf16.gmra.mxu0 %vm122_vm1, %v99_v20 }
  0x40   :  { %5490 = vmatprep.mubr.msk.bf16.mxu0 %vm6437_vm0, %v10014_v1 }
  0x47   :  { %5491 = vmatmul.mubr.msk.bf16.gmra.mxu0 %vm122_vm1, %v100_v23 }
  0x48   :  { %5494 = vmatprep.mubr.msk.bf16.mxu0 %vm6437_vm0, %v10014_v1 }
  0x4f   :  { %5495 = vmatmul.mubr.msk.bf16.gmra.mxu0 %vm122_vm1, %v101_v26 }
  0x50   :  { %5498 = vmatprep.mubr.msk.bf16.mxu0 %vm6437_vm0, %v10014_v1 }
  0x57   :  { %5499 = vmatmul.mubr.msk.bf16.gmra.mxu0 %vm122_vm1, %v102_v28 }
  0x58   :  { %5546 = vmatprep.mubr.msk.bf16.mxu0 %vm6437_vm0, %v10014_v1 }
  0x5f   :  { %5547 = vmatmul.mubr.msk.bf16.vlgmr.msra.gmra.mxu0 %vm122_vm1, %v94_v5 }
  0x60   :  { %5550 = vmatprep.mubr.msk.bf16.mxu0 %vm6437_vm0, %v10014_v1 }
  0x67   :  { %5551 = vmatmul.mubr.msk.bf16.gmra.mxu0 %vm122_vm1, %v95_v8 }
  0x68   :  { %5554 = vmatprep.mubr.msk.bf16.mxu0 %vm6437_vm0, %v10014_v1 }
  0x6f   :  { %5555 = vmatmul.mubr.msk.bf16.gmra.mxu0 %vm122_vm1, %v96_v11 }
  0x70   :  { %5558 = vmatprep.mubr.msk.bf16.mxu0 %vm6437_vm0, %v10014_v1 }
  0x77   :  { %5559 = vmatmul.mubr.msk.bf16.gmra.mxu0 %vm122_vm1, %v97_v14 }
  0x78   :  { %5562 = vmatprep.mubr.msk.bf16.mxu0 %vm6437_vm0, %v10014_v1 }
  0x7f   :  { %5563 = vmatmul.mubr.msk.bf16.gmra.mxu0 %vm122_vm1, %v98_v17 }
  0x80   :  { %5566 = vmatprep.mubr.msk.bf16.mxu0 %vm6437_vm0, %v10014_v1 }
  0x87   :  { %5567 = vmatmul.mubr.msk.bf16.gmra.mxu0 %vm122_vm1, %v99_v20 }
  0x88   :  { %5570 = vmatprep.mubr.msk.bf16.mxu0 %vm6437_vm0, %v10014_v1 }
  0x8f   :  { %5571 = vmatmul.mubr.msk.bf16.gmra.mxu0 %vm122_vm1, %v100_v23 }
  0x90   :  { %5574 = vmatprep.mubr.msk.bf16.mxu0 %vm6437_vm0, %v10014_v1 }
  0x97   :  { %5575 = vmatmul.mubr.msk.bf16.gmra.mxu0 %vm122_vm1, %v101_v26 }
  0x98   :  { %5578 = vmatprep.mubr.msk.bf16.mxu0 %vm6437_vm0, %v10014_v1 }
  0xd7   :  { %v184_v34 = vpop.f32.mrf.mxu0 }
  0xd8   :  { %v185_v36 = vadd.f32 %v6713_v33, %v184_v34 }
  0xd9   :  { %v5468_v35 = vpop.f32.mrf.mxu0 }
  0xda   :  { %v254_v40 = vmax.f32 %v185_v36, 0.0 }
  0xdb   :  { %v187_v37 = vpop.f32.mrf.mxu0 }
  0xdc   :  { %v188_v38 = vadd.f32 %v6713_v33, %v187_v37 }
  0xdd   :  { %v5469_v39 = vpop.f32.mrf.mxu0 }
  0xde   :  { %v255_v41 = vmax.f32 %v188_v38, 0.0 }
  0xdf   :  { %v192_v42 = vpop.f32.mrf.mxu0 }
  0xe0   :  { %v275_v43 = vpack.c.bf16 %v255_v41, %v254_v40  ;;  %v193_v45 = vadd.f32 %v6713_v33, %v192_v42 }
  0xe1   :  { %v5472_v44 = vpop.f32.mrf.mxu0 }
  0xe2   :  { %5507 = vmatmul.mubr.msk.bf16.vlgmr.msra.gmra.mxu1 %vm122_vm1, %v275_v43  ;;  %v256_v49 = vmax.f32 %v193_v45, 0.0 }
  0xe3   :  { %v195_v46 = vpop.f32.mrf.mxu0  ;;  %5510 = vmatprep.mubr.msk.bf16.mxu1 %vm6437_vm0, %v10014_v1 }
  0xe4   :  { %v196_v47 = vadd.f32 %v6713_v33, %v195_v46 }
  0xe5   :  { %v5473_v48 = vpop.f32.mrf.mxu0 }
  0xe6   :  { %v257_v50 = vmax.f32 %v196_v47, 0.0 }
  0xe7   :  { %v200_v51 = vpop.f32.mrf.mxu0 }
  0xe8   :  { %v276_v52 = vpack.c.bf16 %v257_v50, %v256_v49  ;;  %v201_v54 = vadd.f32 %v6713_v33, %v200_v51 }
  0xe9   :  { %v5476_v53 = vpop.f32.mrf.mxu0 }
  0xea   :  { %5511 = vmatmul.mubr.msk.bf16.gmra.mxu1 %vm122_vm1, %v276_v52  ;;  %v258_v58 = vmax.f32 %v201_v54, 0.0 }
  0xeb   :  { %v203_v55 = vpop.f32.mrf.mxu0  ;;  %5514 = vmatprep.mubr.msk.bf16.mxu1 %vm6437_vm0, %v10014_v1 }
  0xec   :  { %v204_v56 = vadd.f32 %v6713_v33, %v203_v55 }
  0xed   :  { %v5477_v57 = vpop.f32.mrf.mxu0 }
  0xee   :  { %v259_v59 = vmax.f32 %v204_v56, 0.0 }
  0xef   :  { %v208_v60 = vpop.f32.mrf.mxu0 }
  0xf0   :  { %v277_v61 = vpack.c.bf16 %v259_v59, %v258_v58  ;;  %v209_v63 = vadd.f32 %v6713_v33, %v208_v60 }
  0xf1   :  { %v5480_v62 = vpop.f32.mrf.mxu0 }
  0xf2   :  { %5515 = vmatmul.mubr.msk.bf16.gmra.mxu1 %vm122_vm1, %v277_v61  ;;  %v260_v4 = vmax.f32 %v209_v63, 0.0 }
  0xf3   :  { %v211_v0 = vpop.f32.mrf.mxu0  ;;  %5518 = vmatprep.mubr.msk.bf16.mxu1 %vm6437_vm0, %v10014_v1 }
  0xf4   :  { %v212_v2 = vadd.f32 %v6713_v33, %v211_v0 }
  0xf5   :  { %v5481_v3 = vpop.f32.mrf.mxu0 }
  0xf6   :  { %v261_v5 = vmax.f32 %v212_v2, 0.0 }
  0xf7   :  { %v216_v6 = vpop.f32.mrf.mxu0 }
  0xf8   :  { %v278_v7 = vpack.c.bf16 %v261_v5, %v260_v4  ;;  %v217_v9 = vadd.f32 %v6713_v33, %v216_v6 }
  0xf9   :  { %v5484_v8 = vpop.f32.mrf.mxu0 }
  0xfa   :  { %5519 = vmatmul.mubr.msk.bf16.gmra.mxu1 %vm122_vm1, %v278_v7  ;;  %v262_v13 = vmax.f32 %v217_v9, 0.0 }
  0xfb   :  { %v219_v10 = vpop.f32.mrf.mxu0  ;;  %5522 = vmatprep.mubr.msk.bf16.mxu1 %vm6437_vm0, %v10014_v1 }
  0xfc   :  { %v220_v11 = vadd.f32 %v6713_v33, %v219_v10  ;;  %v6760_v10 = vld [vmem:[%s10192_s3] ss:$0 sm:$0xff]  ;;  %s6449_s3 = smov 40  }
  0xfd   :  { %v5485_v12 = vpop.f32.mrf.mxu0 }
  0xfe   :  { %v263_v14 = vmax.f32 %v220_v11, 0.0 }
  0xff   :  { %v224_v15 = vpop.f32.mrf.mxu0 }
 0x100   :  { %v279_v16 = vpack.c.bf16 %v263_v14, %v262_v13  ;;  %v225_v18 = vadd.f32 %v6713_v33, %v224_v15 }
 0x101   :  { %v5488_v17 = vpop.f32.mrf.mxu0 }
 0x102   :  { %5523 = vmatmul.mubr.msk.bf16.gmra.mxu1 %vm122_vm1, %v279_v16  ;;  %v264_v22 = vmax.f32 %v225_v18, 0.0 }
 0x103   :  { %v227_v19 = vpop.f32.mrf.mxu0  ;;  %5526 = vmatprep.mubr.msk.bf16.mxu1 %vm6437_vm0, %v10014_v1 }
 0x104   :  { %v228_v20 = vadd.f32 %v6713_v33, %v227_v19 }
 0x105   :  { %v5489_v21 = vpop.f32.mrf.mxu0 }
 0x106   :  { %v265_v23 = vmax.f32 %v228_v20, 0.0 }
 0x107   :  { %v232_v24 = vpop.f32.mrf.mxu0 }
 0x108   :  { %v280_v25 = vpack.c.bf16 %v265_v23, %v264_v22  ;;  %v233_v28 = vadd.f32 %v6713_v33, %v232_v24 }
 0x109   :  { %v5492_v26 = vpop.f32.mrf.mxu0 }
 0x10a   :  { %5527 = vmatmul.mubr.msk.bf16.gmra.mxu1 %vm122_vm1, %v280_v25  ;;  %v266_v32 = vmax.f32 %v233_v28, 0.0  ;;  %v10021_v28 = vmov 0  }
 0x10b   :  { %v235_v29 = vpop.f32.mrf.mxu0  ;;  %5530 = vmatprep.mubr.msk.bf16.mxu1 %vm6437_vm0, %v10014_v1  ;;  %817 = vmatprep.subr.bf16.mxu1 %v10021_v28 }
 0x10c   :  { %v236_v30 = vadd.f32 %v6713_v33, %v235_v29  ;;  %1302 = vmatprep.subr.bf16.mxu0 %v10021_v28 }
 0x10d   :  { %v5493_v31 = vpop.f32.mrf.mxu0 }
 0x10e   :  { %v267_v34 = vmax.f32 %v236_v30, 0.0 }
 0x10f   :  { %v240_v35 = vpop.f32.mrf.mxu0 }
 0x110   :  { %v281_v36 = vpack.c.bf16 %v267_v34, %v266_v32  ;;  %v241_v38 = vadd.f32 %v6713_v33, %v240_v35 }
 0x111   :  { %v5496_v37 = vpop.f32.mrf.mxu0 }
 0x112   :  { %5531 = vmatmul.mubr.msk.bf16.gmra.mxu1 %vm122_vm1, %v281_v36  ;;  %v268_v42 = vmax.f32 %v241_v38, 0.0 }
 0x113   :  { %v243_v39 = vpop.f32.mrf.mxu0  ;;  %5534 = vmatprep.mubr.msk.bf16.mxu1 %vm6437_vm0, %v10014_v1 }
 0x114   :  { %v244_v40 = vadd.f32 %v6713_v33, %v243_v39 }
 0x115   :  { %v5497_v41 = vpop.f32.mrf.mxu0 }
 0x116   :  { %v269_v43 = vmax.f32 %v244_v40, 0.0 }
 0x117   :  { %v248_v44 = vpop.f32.mrf.mxu0 }
 0x118   :  { %v282_v45 = vpack.c.bf16 %v269_v43, %v268_v42  ;;  %v249_v46 = vadd.f32 %v6713_v33, %v248_v44 }
 0x119   :  { %v5500_v47 = vpop.f32.mrf.mxu0 }
 0x11a   :  { %v270_v48 = vmax.f32 %v249_v46, 0.0  ;;  %5535 = vmatmul.mubr.msk.bf16.gmra.mxu1 %vm122_vm1, %v282_v45 }
 0x11b   :  { %v251_v49 = vpop.f32.mrf.mxu0  ;;  %5538 = vmatprep.mubr.msk.bf16.mxu1 %vm6437_vm0, %v10014_v1 }
 0x11c   :  { %v283_v51 = vpack.c.bf16 %v270_v48, %v270_v48 }
 0x11d   :  { %v5501_v50 = vpop.f32.mrf.mxu0 }
 0x11f   :  { %v649_v52 = vpop.f32.mrf.mxu0 }
 0x120   :  { %v650_v24 = vadd.f32 %v6760_v10, %v649_v52 }
 0x121   :  { %v5548_v53 = vpop.f32.mrf.mxu0 }
 0x122   :  { %5539 = vmatmul.mubr.msk.bf16.gmra.mxu1 %vm122_vm1, %v283_v51 }
 0x123   :  { %v652_v54 = vpop.f32.mrf.mxu0  ;;  %849 = vmatprep.mubr.bf16.mxu1 %v10021_v28 }
 0x124   :  { %v653_v25 = vadd.f32 %v6760_v10, %v652_v54 }
 0x125   :  { %v5549_v55 = vpop.f32.mrf.mxu0 }
 0x126   :  { %v6783_v31 = vpack.c.bf16 %v653_v25, %v650_v24 }
 0x127   :  { %v657_v56 = vpop.f32.mrf.mxu0 }
 0x128   :  { %10194 = vst [vmem:[#allocation6_spill] sm:$0xff] %v6783_v31  ;;  %v658_v44 = vadd.f32 %v6760_v10, %v657_v56 }
 0x129   :  { %v5552_v57 = vpop.f32.mrf.mxu0 }
 0x12b   :  { %v660_v58 = vpop.f32.mrf.mxu0 }
 0x12c   :  { %v661_v45 = vadd.f32 %v6760_v10, %v660_v58 }
 0x12d   :  { %v5553_v33 = vpop.f32.mrf.mxu0 }
 0x12e   :  { %v6811_v47 = vpack.c.bf16 %v661_v45, %v658_v44 }
 0x12f   :  { %v665_v59 = vpop.f32.mrf.mxu0 }
 0x130   :  { %v666_v19 = vadd.f32 %v6760_v10, %v665_v59  ;;  %10195 = vst [vmem:[#allocation7_spill] sm:$0xff] %v6811_v47 }
 0x131   :  { %v5556_v60 = vpop.f32.mrf.mxu0 }
 0x133   :  { %v668_v61 = vpop.f32.mrf.mxu0 }
 0x134   :  { %v669_v20 = vadd.f32 %v6760_v10, %v668_v61 }
 0x135   :  { %v5557_v62 = vpop.f32.mrf.mxu0 }
 0x136   :  { %v6776_v26 = vpack.c.bf16 %v669_v20, %v666_v19  ;;  %v5237_v20 = vld [vmem:[%s10197_s25] ss:$0 sm:$0xff]  ;;  %s10560_s25 = sld [smem:[#allocation141_spill]] }
 0x137   :  { %v673_v63 = vpop.f32.mrf.mxu0 }
 0x138   :  { %10193 = vst [vmem:[#allocation5_spill] sm:$0xff] %v6776_v26  ;;  %v674_v41 = vadd.f32 %v6760_v10, %v673_v63 }
 0x139   :  { %v5560_v0 = vpop.f32.mrf.mxu0 }
 0x13b   :  { %v676_v2 = vpop.f32.mrf.mxu0 }
 0x13c   :  { %v677_v42 = vadd.f32 %v6760_v10, %v676_v2 }
 0x13d   :  { %v5561_v3 = vpop.f32.mrf.mxu0 }
 0x13e   :  { %v6805_v46 = vpack.c.bf16 %v677_v42, %v674_v41 }
 0x13f   :  { %v681_v4 = vpop.f32.mrf.mxu0 }
 0x140   :  { %v682_v13 = vadd.f32 %v6760_v10, %v681_v4 }
 0x141   :  { %v5564_v5 = vpop.f32.mrf.mxu0 }
 0x143   :  { %v684_v6 = vpop.f32.mrf.mxu0 }
 0x144   :  { %v685_v14 = vadd.f32 %v6760_v10, %v684_v6 }
 0x145   :  { %v5565_v7 = vpop.f32.mrf.mxu0 }
 0x146   :  { %v6770_v21 = vpack.c.bf16 %v685_v14, %v682_v13  ;;  %v451_v13 = vlaneseq }
 0x147   :  { %v689_v8 = vpop.f32.mrf.mxu0 }
 0x148   :  { %v690_v11 = vadd.f32 %v6760_v10, %v689_v8 }
 0x149   :  { %v5568_v9 = vpop.f32.mrf.mxu0 }
 0x14b   :  { %v692_v12 = vpop.f32.mrf.mxu0 }
 0x14c   :  { %v693_v15 = vadd.f32 %v6760_v10, %v692_v12 }
 0x14d   :  { %v5569_v16 = vpop.f32.mrf.mxu0 }
 0x14e   :  { %v6766_v17 = vpack.c.bf16 %v693_v15, %v690_v11  ;;  %v6826_v16 = vshrl.u32 %v451_v13, 7 }
 0x14f   :  { %v697_v18 = vpop.f32.mrf.mxu0 }
 0x150   :  { %754 = vrot.lane.b32.xlu1 %v6766_v17, %s6438_s0  ;;  %v698_v36 = vadd.f32 %v6760_v10, %v697_v18  ;;  %10196 = vst [vmem:[#allocation8_spill] sm:$0xff] %v6826_v16 }
 0x151   :  { %v5572_v22 = vpop.f32.mrf.mxu0 }
 0x152   :  { %v468_v22 = vadd.s32 128, %v6826_v16 }
 0x153   :  { %v700_v23 = vpop.f32.mrf.mxu0 }
 0x154   :  { %752 = vrot.lane.b32.xlu1 %v6770_v21, %s6438_s0  ;;  %v701_v37 = vadd.f32 %v6760_v10, %v700_v23  ;;  %vm502_vm2 = vcmp.lt.s32.totalorder %v468_v22, 132 }
 0x155   :  { %v5573_v29 = vpop.f32.mrf.mxu0 }
 0x156   :  { %v6797_v43 = vpack.c.bf16 %v701_v37, %v698_v36 }
 0x157   :  { %v705_v30 = vpop.f32.mrf.mxu0 }
 0x158   :  { %748 = vrot.lane.b32.xlu1 %v6776_v26, %s6438_s0  ;;  %v706_v34 = vadd.f32 %v6760_v10, %v705_v30 }
 0x159   :  { %v5576_v32 = vpop.f32.mrf.mxu0 }
 0x15b   :  { %v708_v35 = vpop.f32.mrf.mxu0 }
 0x15c   :  { %v709_v38 = vadd.f32 %v6760_v10, %v708_v35  ;;  %744 = vrot.lane.b32.xlu1 %v6783_v31, %s6438_s0 }
 0x15d   :  { %v5577_v39 = vpop.f32.mrf.mxu0 }
 0x15e   :  { %v6793_v40 = vpack.c.bf16 %v709_v38, %v706_v34 }
 0x160   :  { %758 = vrot.lane.b32.xlu0 %v6793_v40, %s6438_s0  ;;  %1438 = vrot.lane.b32.xlu1 %v6793_v40, %s6440_s4 }
 0x164   :  { %756 = vrot.lane.b32.xlu0 %v6797_v43, %s6438_s0  ;;  %1434 = vrot.lane.b32.xlu1 %v6766_v17, %s6440_s4 }
 0x168   :  { %750 = vrot.lane.b32.xlu0 %v6805_v46, %s6438_s0  ;;  %1430 = vrot.lane.b32.xlu1 %v6805_v46, %s6440_s4 }
 0x16c   :  { %746 = vrot.lane.b32.xlu0 %v6811_v47, %s6438_s0  ;;  %1426 = vrot.lane.b32.xlu1 %v6811_v47, %s6440_s4 }
 0x170   :  { %1436 = vrot.lane.b32.xlu0 %v6797_v43, %s6440_s4 }
 0x174   :  { %1432 = vrot.lane.b32.xlu0 %v6770_v21, %s6440_s4 }
 0x1a2   :  { %v364_v48 = vpop.f32.mrf.mxu1 }
 0x1a4   :  { %v5508_v49 = vpop.f32.mrf.mxu1 }
 0x1a6   :  { %v367_v50 = vpop.f32.mrf.mxu1 }
 0x1a8   :  { %v5509_v51 = vpop.f32.mrf.mxu1 }
 0x1aa   :  { %v372_v52 = vpop.f32.mrf.mxu1 }
 0x1ac   :  { %v5512_v53 = vpop.f32.mrf.mxu1 }
 0x1ae   :  { %v375_v54 = vpop.f32.mrf.mxu1 }
 0x1b0   :  { %v5513_v55 = vpop.f32.mrf.mxu1 }
 0x1b2   :  { %v380_v56 = vpop.f32.mrf.mxu1 }
 0x1b4   :  { %v5516_v57 = vpop.f32.mrf.mxu1 }
 0x1b6   :  { %v383_v58 = vpop.f32.mrf.mxu1 }
 0x1b8   :  { %v5517_v33 = vpop.f32.mrf.mxu1 }
 0x1ba   :  { %v388_v59 = vpop.f32.mrf.mxu1 }
 0x1bc   :  { %v5520_v60 = vpop.f32.mrf.mxu1 }
 0x1be   :  { %v391_v61 = vpop.f32.mrf.mxu1 }
 0x1c0   :  { %v5521_v62 = vpop.f32.mrf.mxu1 }
 0x1c2   :  { %v396_v63 = vpop.f32.mrf.mxu1 }
 0x1c4   :  { %v5524_v0 = vpop.f32.mrf.mxu1 }
 0x1c6   :  { %v399_v2 = vpop.f32.mrf.mxu1 }
 0x1c8   :  { %v5525_v3 = vpop.f32.mrf.mxu1 }
 0x1ca   :  { %v404_v4 = vpop.f32.mrf.mxu1 }
 0x1cc   :  { %v5528_v5 = vpop.f32.mrf.mxu1 }
 0x1ce   :  { %v407_v6 = vpop.f32.mrf.mxu1 }
 0x1d0   :  { %v5529_v7 = vpop.f32.mrf.mxu1 }
 0x1d2   :  { %v412_v8 = vpop.f32.mrf.mxu1  ;;  %v759_v37 = vpop.permute.xlu0 %758 }
 0x1d3   :  { %v812_v38 = vsel %vm762_vm4, %v759_v37, 0 }
 0x1d4   :  { %v5532_v9 = vpop.f32.mrf.mxu1  ;;  %818 = vmatpush1.bf16.xpose.msra.mxu1 %v812_v38 }
 0x1d5   :  { %819 = vmatprep.subr.bf16.mxu1 %v10021_v28 }
 0x1d6   :  { %v415_v11 = vpop.f32.mrf.mxu1  ;;  %v757_v39 = vpop.permute.xlu0 %756 }
 0x1d7   :  { %v809_v41 = vsel %vm762_vm4, %v757_v39, 0 }
 0x1d8   :  { %v5533_v12 = vpop.f32.mrf.mxu1 }
 0x1da   :  { %v420_v14 = vpop.f32.mrf.mxu1  ;;  %v751_v48 = vpop.permute.xlu0 %750 }
 0x1db   :  { %v800_v49 = vsel %vm762_vm4, %v751_v48, 0 }
 0x1dc   :  { %v5536_v15 = vpop.f32.mrf.mxu1  ;;  %820 = vmatpush1.bf16.xpose.msra.mxu1 %v809_v41 }
 0x1dd   :  { %821 = vmatprep.subr.bf16.mxu1 %v10021_v28 }
 0x1de   :  { %v423_v18 = vpop.f32.mrf.mxu1  ;;  %v747_v52 = vpop.permute.xlu0 %746 }
 0x1df   :  { %v794_v53 = vsel %vm762_vm4, %v747_v52, 0 }
 0x1e0   :  { %v5537_v19 = vpop.f32.mrf.mxu1 }
 0x1e2   :  { %v428_v23 = vpop.f32.mrf.mxu1  ;;  %v1437_v63 = vpop.permute.xlu0 %1436 }
 0x1e3   :  { %v429_v24 = vadd.f32 %v5237_v20, %v428_v23  ;;  %v1488_v19 = vsel %vm762_vm4, %v1437_v63, 0 }
 0x1e4   :  { %v5540_v25 = vpop.f32.mrf.mxu1 }
 0x1e5   :  { %v450_v29 = vmax.f32 %v429_v24, 0.0 }
 0x1e6   :  { %v431_v30 = vpop.f32.mrf.mxu1  ;;  %v1433_v2 = vpop.permute.xlu0 %1432 }
 0x1e7   :  { %v536_v32 = vsel %vm502_vm2, %v450_v29, 0.0 }
 0x1e8   :  { %v6833_v34 = vadd.f32 %v536_v32, %v6665_v27  ;;  %v5541_v35 = vpop.f32.mrf.mxu1  ;;  %v755_v27 = vpop.permute.xlu1 %754 }
 0x1e9   :  { %v806_v42 = vsel %vm762_vm4, %v755_v27, 0 }
 0x1ea   :  { %10198 = vst [vmem:[#allocation9_spill] sm:$0xff] %v6833_v34  ;;  %v568_v36 = vpack.c.bf16 %v6833_v34, %v6833_v34  ;;  %555 = vst.msk [vmem:[#allocation2] sm:$0xf] %vm554_vm3, %v6833_v34  ;;  %822 = vmatpush1.bf16.xpose.msra.mxu1 %v806_v42 }
 0x1eb   :  { %823 = vmatprep.subr.bf16.mxu1 %v10021_v28 }
 0x1ec   :  { %5579 = vmatmul.mubr.msk.bf16.gmra.mxu0 %vm122_vm1, %v568_v36  ;;  %v753_v44 = vpop.permute.xlu1 %752  ;;  %v1482_v36 = vsel %vm762_vm4, %v1433_v2, 0 }
 0x1ed   :  { %v803_v45 = vsel %vm762_vm4, %v753_v44, 0 }
 0x1f0   :  { %v749_v50 = vpop.permute.xlu1 %748 }
 0x1f1   :  { %v797_v51 = vsel %vm762_vm4, %v749_v50, 0 }
 0x1f2   :  { %824 = vmatpush1.bf16.xpose.msra.mxu1 %v803_v45 }
 0x1f3   :  { %825 = vmatprep.subr.bf16.mxu1 %v10021_v28 }
 0x1f4   :  { %v745_v54 = vpop.permute.xlu1 %744 }
 0x1f5   :  { %v791_v55 = vsel %vm762_vm4, %v745_v54, 0 }
 0x1fa   :  { %826 = vmatpush1.bf16.xpose.msra.mxu1 %v800_v49 }
 0x1fb   :  { %827 = vmatprep.subr.bf16.mxu1 %v10021_v28 }
 0x202   :  { %828 = vmatpush1.bf16.xpose.msra.mxu1 %v797_v51 }
 0x203   :  { %829 = vmatprep.subr.bf16.mxu1 %v10021_v28 }
 0x20a   :  { %830 = vmatpush1.bf16.xpose.msra.mxu1 %v794_v53 }
 0x20b   :  { %831 = vmatprep.subr.bf16.mxu1 %v10021_v28 }
 0x212   :  { %832 = vmatpush1.bf16.xpose.msra.mxu1 %v791_v55 }
 0x213   :  { %847 = vmatprep.subr.bf16.mxu1 %v10021_v28 }
 0x2ac   :  { %v713_v56 = vpop.f32.mrf.mxu0 }
 0x2ad   :  { %v714_v57 = vadd.f32 %v6760_v10, %v713_v56  ;;  %v1439_v10 = vpop.permute.xlu1 %1438 }
 0x2ae   :  { %v5580_v58 = vpop.f32.mrf.mxu0  ;;  %v1491_v11 = vsel %vm762_vm4, %v1439_v10, 0 }
 0x2af   :  { %v6856_v33 = vpack.c.bf16 %v714_v57, %v714_v57 }
 0x2b0   :  { %v716_v59 = vpop.f32.mrf.mxu0 }
 0x2b1   :  { %10199 = vst [vmem:[#allocation10_spill] sm:$0xff] %v6856_v33  ;;  %1440 = vrot.lane.b32.xlu1 %v6856_v33, %s6440_s4  ;;  %760 = vrot.lane.b32.xlu0 %v6856_v33, %s6438_s0  ;;  %v1435_v61 = vpop.permute.xlu1 %1434  ;;  %s6451_s0 = smov 8  }
 0x2b2   :  { %v5581_v60 = vpop.f32.mrf.mxu0  ;;  %v1485_v25 = vsel %vm762_vm4, %v1435_v61, 0 }
 0x2b5   :  { %2116 = vrot.lane.b32.xlu1 %v6793_v40, %s6441_s5  ;;  %1428 = vrot.lane.b32.xlu0 %v6776_v26, %s6440_s4  ;;  %v6962_v62 = vpop.permute.xlu1 %1430 }
 0x2b6   :  { %v1479_v27 = vsel %vm762_vm4, %v6962_v62, 0 }
 0x2b9   :  { %2114 = vrot.lane.b32.xlu1 %v6797_v43, %s6441_s5  ;;  %1424 = vrot.lane.b32.xlu0 %v6783_v31, %s6440_s4  ;;  %v6972_v0 = vpop.permute.xlu1 %1426  ;;  %s6452_s4 = smov 16  }
 0x2ba   :  { %v1473_v54 = vsel %vm762_vm4, %v6972_v0, 0 }
 0x2bd   :  { %2112 = vrot.lane.b32.xlu1 %v6766_v17, %s6441_s5  ;;  %1406 = vrot.lane.b32.xlu0 %v6783_v31, %s6442_s1 }
 0x2c1   :  { %2110 = vrot.lane.b32.xlu1 %v6770_v21, %s6441_s5  ;;  %1408 = vrot.lane.b32.xlu0 %v6811_v47, %s6442_s1 }
 0x2c5   :  { %2108 = vrot.lane.b32.xlu1 %v6805_v46, %s6441_s5  ;;  %1410 = vrot.lane.b32.xlu0 %v6776_v26, %s6442_s1 }
 0x2c9   :  { %2106 = vrot.lane.b32.xlu1 %v6776_v26, %s6441_s5  ;;  %1412 = vrot.lane.b32.xlu0 %v6805_v46, %s6442_s1 }
 0x2cd   :  { %2104 = vrot.lane.b32.xlu1 %v6811_v47, %s6441_s5  ;;  %1414 = vrot.lane.b32.xlu0 %v6770_v21, %s6442_s1 }
 0x2d1   :  { %2102 = vrot.lane.b32.xlu1 %v6783_v31, %s6441_s5  ;;  %1416 = vrot.lane.b32.xlu0 %v6766_v17, %s6442_s1 }
 0x2d5   :  { %2794 = vrot.lane.b32.xlu1 %v6793_v40, %s6443_s26  ;;  %1418 = vrot.lane.b32.xlu0 %v6797_v43, %s6442_s1 }
 0x2d9   :  { %2792 = vrot.lane.b32.xlu1 %v6797_v43, %s6443_s26  ;;  %1420 = vrot.lane.b32.xlu0 %v6793_v40, %s6442_s1 }
 0x2dd   :  { %2790 = vrot.lane.b32.xlu1 %v6766_v17, %s6443_s26  ;;  %2084 = vrot.lane.b32.xlu0 %v6783_v31, %s6444_s6 }
 0x2e1   :  { %2788 = vrot.lane.b32.xlu1 %v6770_v21, %s6443_s26  ;;  %2086 = vrot.lane.b32.xlu0 %v6811_v47, %s6444_s6 }
 0x2e5   :  { %2786 = vrot.lane.b32.xlu1 %v6805_v46, %s6443_s26  ;;  %2088 = vrot.lane.b32.xlu0 %v6776_v26, %s6444_s6 }
 0x2e9   :  { %2784 = vrot.lane.b32.xlu1 %v6776_v26, %s6443_s26  ;;  %2090 = vrot.lane.b32.xlu0 %v6805_v46, %s6444_s6 }
 0x2ed   :  { %2782 = vrot.lane.b32.xlu1 %v6811_v47, %s6443_s26  ;;  %2092 = vrot.lane.b32.xlu0 %v6770_v21, %s6444_s6 }
 0x2f1   :  { %2780 = vrot.lane.b32.xlu1 %v6783_v31, %s6443_s26  ;;  %2094 = vrot.lane.b32.xlu0 %v6766_v17, %s6444_s6 }
 0x2f5   :  { %2764 = vrot.lane.b32.xlu1 %v6811_v47, %s6445_s27  ;;  %2096 = vrot.lane.b32.xlu0 %v6797_v43, %s6444_s6 }
 0x2f9   :  { %2118 = vrot.lane.b32.xlu1 %v6856_v33, %s6441_s5  ;;  %2098 = vrot.lane.b32.xlu0 %v6793_v40, %s6444_s6 }
 0x2fd   :  { %2768 = vrot.lane.b32.xlu1 %v6805_v46, %s6445_s27  ;;  %2762 = vrot.lane.b32.xlu0 %v6783_v31, %s6445_s27 }
 0x301   :  { %2772 = vrot.lane.b32.xlu1 %v6766_v17, %s6445_s27  ;;  %2766 = vrot.lane.b32.xlu0 %v6776_v26, %s6445_s27 }
 0x305   :  { %2776 = vrot.lane.b32.xlu1 %v6793_v40, %s6445_s27  ;;  %1422 = vrot.lane.b32.xlu0 %v6856_v33, %s6442_s1 }
 0x309   :  { %1257 = vrot.lane.b32.xlu1 %v6797_v43, %s6446_s7  ;;  %2770 = vrot.lane.b32.xlu0 %v6770_v21, %s6445_s27 }
 0x30d   :  { %1255 = vrot.lane.b32.xlu1 %v6766_v17, %s6446_s7  ;;  %2774 = vrot.lane.b32.xlu0 %v6797_v43, %s6445_s27 }
 0x311   :  { %1251 = vrot.lane.b32.xlu1 %v6805_v46, %s6446_s7  ;;  %1259 = vrot.lane.b32.xlu0 %v6793_v40, %s6446_s7 }
 0x315   :  { %1247 = vrot.lane.b32.xlu1 %v6811_v47, %s6446_s7  ;;  %1253 = vrot.lane.b32.xlu0 %v6770_v21, %s6446_s7 }
 0x319   :  { %1245 = vrot.lane.b32.xlu1 %v6783_v31, %s6446_s7  ;;  %1249 = vrot.lane.b32.xlu0 %v6776_v26, %s6446_s7 }
 0x31d   :  { %1938 = vrot.lane.b32.xlu1 %v6793_v40, %s6447_s28  ;;  %1934 = vrot.lane.b32.xlu0 %v6766_v17, %s6447_s28 }
 0x321   :  { %1936 = vrot.lane.b32.xlu1 %v6797_v43, %s6447_s28  ;;  %1930 = vrot.lane.b32.xlu0 %v6805_v46, %s6447_s28 }
 0x323   :  { %v6978_v3 = vpop.permute.xlu1 %1440  ;;  %v761_v4 = vpop.permute.xlu0 %760 }
 0x324   :  { %v815_v5 = vsel %vm762_vm4, %v761_v4, 0  ;;  %v1494_v10 = vsel %vm762_vm4, %v6978_v3, 0 }
 0x325   :  { %1932 = vrot.lane.b32.xlu1 %v6770_v21, %s6447_s28  ;;  %1928 = vrot.lane.b32.xlu0 %v6776_v26, %s6447_s28 }
 0x326   :  { %848 = vmatpush2.bf16.xpose.msra.mxu1 %v815_v5 }
 0x327   :  { %v6985_v6 = vpop.permute.xlu1 %2116  ;;  %v6987_v7 = vpop.permute.xlu0 %1428  ;;  %1496 = vmatprep.subr.bf16.mxu1 %v10021_v28 }
 0x328   :  { %v1476_v49 = vsel %vm762_vm4, %v6987_v7, 0  ;;  %v2169_v0 = vsel %vm762_vm4, %v6985_v6, 0 }
 0x329   :  { %1926 = vrot.lane.b32.xlu1 %v6811_v47, %s6447_s28  ;;  %1924 = vrot.lane.b32.xlu0 %v6783_v31, %s6447_s28 }
 0x32b   :  { %v6994_v8 = vpop.permute.xlu1 %2114  ;;  %v6996_v9 = vpop.permute.xlu0 %1424 }
 0x32c   :  { %v1470_v58 = vsel %vm762_vm4, %v6996_v9, 0  ;;  %v2166_v5 = vsel %vm762_vm4, %v6994_v8, 0 }
 0x32d   :  { %5261 = vmatmul.mubr.msk.bf16.vlgmr.msra.gmra.mxu1 %vm762_vm4, %v6783_v31  ;;  %2614 = vrot.lane.b32.xlu1 %v6797_v43, %s6448_s29 }
 0x32e   :  { %2616 = vrot.lane.b32.xlu0 %v6793_v40, %s6448_s29  ;;  %1497 = vmatpush1.bf16.xpose.msra.mxu1 %v1491_v11 }
 0x32f   :  { %v7005_v12 = vpop.permute.xlu1 %2112  ;;  %v7007_v14 = vpop.permute.xlu0 %1406  ;;  %859 = vmatprep.mubr.bf16.mxu1 %v10021_v28  ;;  %1498 = vmatprep.subr.bf16.mxu1 %v10021_v28 }
 0x330   :  { %v2163_v11 = vsel %vm762_vm4, %v7005_v12, 0 }
 0x331   :  { %2608 = vrot.lane.b32.xlu1 %v6805_v46, %s6448_s29 }
 0x332   :  { %2612 = vrot.lane.b32.xlu0 %v6766_v17, %s6448_s29 }
 0x333   :  { %v7015_v15 = vpop.permute.xlu1 %2110  ;;  %v7017_v18 = vpop.permute.xlu0 %1408 }
 0x334   :  { %v2160_v12 = vsel %vm762_vm4, %v7015_v15, 0 }
 0x335   :  { %5262 = vmatmul.mubr.msk.bf16.gmra.mxu1 %vm762_vm4, %v6811_v47  ;;  %2606 = vrot.lane.b32.xlu1 %v6776_v26, %s6448_s29 }
 0x336   :  { %2610 = vrot.lane.b32.xlu0 %v6770_v21, %s6448_s29  ;;  %1499 = vmatpush1.bf16.xpose.msra.mxu1 %v1488_v19 }
 0x337   :  { %v7026_v20 = vpop.permute.xlu1 %2108  ;;  %v7028_v22 = vpop.permute.xlu0 %1410  ;;  %869 = vmatprep.mubr.bf16.mxu1 %v10021_v28  ;;  %1500 = vmatprep.subr.bf16.mxu1 %v10021_v28 }
 0x338   :  { %v2157_v15 = vsel %vm762_vm4, %v7026_v20, 0 }
 0x339   :  { %2602 = vrot.lane.b32.xlu1 %v6783_v31, %s6448_s29 }
 0x33a   :  { %2604 = vrot.lane.b32.xlu0 %v6811_v47, %s6448_s29 }
 0x33b   :  { %v7036_v23 = vpop.permute.xlu1 %2106  ;;  %v7038_v24 = vpop.permute.xlu0 %1412 }
 0x33c   :  { %v2154_v20 = vsel %vm762_vm4, %v7036_v23, 0 }
 0x33d   :  { %5263 = vmatmul.mubr.msk.bf16.gmra.mxu1 %vm762_vm4, %v6776_v26  ;;  %3294 = vrot.lane.b32.xlu1 %v6793_v40, %s6449_s3 }
 0x33e   :  { %3292 = vrot.lane.b32.xlu0 %v6797_v43, %s6449_s3  ;;  %1501 = vmatpush1.bf16.xpose.msra.mxu1 %v1485_v25 }
 0x33f   :  { %v7047_v29 = vpop.permute.xlu1 %2104  ;;  %v7049_v30 = vpop.permute.xlu0 %1414  ;;  %879 = vmatprep.mubr.bf16.mxu1 %v10021_v28  ;;  %1502 = vmatprep.subr.bf16.mxu1 %v10021_v28 }
 0x340   :  { %v2151_v23 = vsel %vm762_vm4, %v7047_v29, 0 }
 0x341   :  { %2796 = vrot.lane.b32.xlu1 %v6856_v33, %s6443_s26  ;;  %s6453_s26 = smov 24  }
 0x342   :  { %2100 = vrot.lane.b32.xlu0 %v6856_v33, %s6444_s6 }
 0x343   :  { %v7057_v32 = vpop.permute.xlu1 %2102  ;;  %v7059_v35 = vpop.permute.xlu0 %1416 }
 0x345   :  { %5264 = vmatmul.mubr.msk.bf16.gmra.mxu1 %vm762_vm4, %v6805_v46  ;;  %3290 = vrot.lane.b32.xlu1 %v6766_v17, %s6449_s3 }
 0x346   :  { %1261 = vrot.lane.b32.xlu0 %v6856_v33, %s6446_s7  ;;  %1503 = vmatpush1.bf16.xpose.msra.mxu1 %v1482_v36 }
 0x347   :  { %v7068_v37 = vpop.permute.xlu1 %2794  ;;  %v7070_v38 = vpop.permute.xlu0 %1418  ;;  %889 = vmatprep.mubr.bf16.mxu1 %v10021_v28  ;;  %1504 = vmatprep.subr.bf16.mxu1 %v10021_v28 }
 0x349   :  { %2778 = vrot.lane.b32.xlu1 %v6856_v33, %s6445_s27 }
 0x34a   :  { %2618 = vrot.lane.b32.xlu0 %v6856_v33, %s6448_s29 }
 0x34b   :  { %v7078_v39 = vpop.permute.xlu1 %2792  ;;  %v7080_v41 = vpop.permute.xlu0 %1420 }
 0x34d   :  { %5265 = vmatmul.mubr.msk.bf16.gmra.mxu1 %vm762_vm4, %v6770_v21  ;;  %1940 = vrot.lane.b32.xlu1 %v6856_v33, %s6447_s28 }
 0x34e   :  { %1505 = vmatpush1.bf16.xpose.msra.mxu1 %v1479_v27  ;;  %899 = vmatprep.mubr.bf16.mxu1 %v10021_v28 }
 0x34f   :  { %v7089_v42 = vpop.permute.xlu1 %2790  ;;  %v7091_v44 = vpop.permute.xlu0 %2084  ;;  %1506 = vmatprep.subr.bf16.mxu1 %v10021_v28 }
 0x353   :  { %v7094_v45 = vpop.permute.xlu1 %2788  ;;  %v7096_v48 = vpop.permute.xlu0 %2086 }
 0x355   :  { %5266 = vmatmul.mubr.msk.bf16.gmra.mxu1 %vm762_vm4, %v6766_v17 }
 0x356   :  { %1507 = vmatpush1.bf16.xpose.msra.mxu1 %v1476_v49  ;;  %909 = vmatprep.mubr.bf16.mxu1 %v10021_v28 }
 0x357   :  { %v7103_v50 = vpop.permute.xlu1 %2786  ;;  %v7105_v51 = vpop.permute.xlu0 %2088  ;;  %1508 = vmatprep.subr.bf16.mxu1 %v10021_v28 }
 0x35b   :  { %v7108_v52 = vpop.permute.xlu1 %2784  ;;  %v7110_v53 = vpop.permute.xlu0 %2090 }
 0x35d   :  { %5267 = vmatmul.mubr.msk.bf16.gmra.mxu1 %vm762_vm4, %v6797_v43 }
 0x35e   :  { %1509 = vmatpush1.bf16.xpose.msra.mxu1 %v1473_v54  ;;  %919 = vmatprep.mubr.bf16.mxu1 %v10021_v28 }
 0x35f   :  { %v7117_v17 = vpop.permute.xlu1 %2782  ;;  %v7119_v55 = vpop.permute.xlu0 %2092  ;;  %1510 = vmatprep.subr.bf16.mxu1 %v10021_v28 }
 0x363   :  { %v7122_v56 = vpop.permute.xlu1 %2780  ;;  %v7124_v57 = vpop.permute.xlu0 %2094 }
 0x365   :  { %5268 = vmatmul.mubr.msk.bf16.gmra.mxu1 %vm762_vm4, %v6793_v40 }
 0x366   :  { %1511 = vmatpush1.bf16.xpose.msra.mxu1 %v1470_v58  ;;  %929 = vmatprep.mubr.bf16.mxu1 %v10021_v28 }
 0x367   :  { %v7131_v43 = vpop.permute.xlu1 %2764  ;;  %v7133_v59 = vpop.permute.xlu0 %2096  ;;  %1526 = vmatprep.subr.bf16.mxu1 %v10021_v28 }
 0x36b   :  { %v7136_v60 = vpop.permute.xlu0 %2098  ;;  %v7140_v61 = vpop.permute.xlu1 %2118 }
 0x36d   :  { %5269 = vmatmul.mubr.msk.bf16.gmra.mxu1 %vm762_vm4, %v6856_v33 }
 0x36e   :  { %1527 = vmatpush2.bf16.xpose.msra.mxu1 %v1494_v10  ;;  %1528 = vmatprep.mubr.bf16.mxu1 %v10021_v28 }
 0x36f   :  { %v7145_v40 = vpop.permute.xlu0 %2762  ;;  %2174 = vmatprep.subr.bf16.mxu1 %v10021_v28  ;;  %v7148_v62 = vpop.permute.xlu1 %2768 }
 0x373   :  { %v7150_v63 = vpop.permute.xlu0 %2766  ;;  %v7160_v3 = vpop.permute.xlu1 %2772 }
 0x375   :  { %5279 = vmatmul.mubr.msk.bf16.vlgmr.msra.gmra.mxu1 %vm762_vm4, %v7007_v14 }
 0x376   :  { %2175 = vmatpush1.bf16.xpose.msra.mxu1 %v2169_v0  ;;  %1538 = vmatprep.mubr.bf16.mxu1 %v10021_v28  ;;  %v2148_v0 = vsel %vm762_vm4, %v7057_v32, 0 }
 0x377   :  { %v7157_v2 = vpop.permute.xlu0 %1422  ;;  %2176 = vmatprep.subr.bf16.mxu1 %v10021_v28  ;;  %v7169_v6 = vpop.permute.xlu1 %2776 }
 0x37b   :  { %v7162_v4 = vpop.permute.xlu0 %2770  ;;  %v1258_v14 = vpop.permute.xlu1 %1257 }
 0x37d   :  { %5280 = vmatmul.mubr.msk.bf16.gmra.mxu1 %vm762_vm4, %v7017_v18 }
 0x37e   :  { %2177 = vmatpush1.bf16.xpose.msra.mxu1 %v2166_v5  ;;  %1548 = vmatprep.mubr.bf16.mxu1 %v10021_v28  ;;  %v2172_v5 = vsel %vm762_vm4, %v7140_v61, 0 }
 0x37f   :  { %v7171_v7 = vpop.permute.xlu0 %2774  ;;  %2178 = vmatprep.subr.bf16.mxu1 %v10021_v28  ;;  %v1256_v18 = vpop.permute.xlu1 %1255 }
 0x383   :  { %v1260_v9 = vpop.permute.xlu0 %1259  ;;  %v1252_v25 = vpop.permute.xlu1 %1251 }
 0x384   :  { %1303 = vmatpush1.bf16.msra.mxu0 %v1260_v9  ;;  %v2847_v9 = vsel %vm762_vm4, %v7068_v37, 0 }
 0x385   :  { %5281 = vmatmul.mubr.msk.bf16.gmra.mxu1 %vm762_vm4, %v7028_v22  ;;  %1304 = vmatprep.subr.bf16.mxu0 %v10021_v28 }
 0x386   :  { %2179 = vmatpush1.bf16.xpose.msra.mxu1 %v2163_v11  ;;  %1558 = vmatprep.mubr.bf16.mxu1 %v10021_v28 }
 0x387   :  { %v1254_v8 = vpop.permute.xlu0 %1253  ;;  %2180 = vmatprep.subr.bf16.mxu1 %v10021_v28  ;;  %v1248_v27 = vpop.permute.xlu1 %1247 }
 0x388   :  { %1305 = vmatpush1.bf16.msra.mxu0 %v1258_v14  ;;  %v2832_v14 = vsel %vm762_vm4, %v7108_v52, 0 }
 0x389   :  { %1306 = vmatprep.subr.bf16.mxu0 %v10021_v28 }
 0x38b   :  { %v1250_v19 = vpop.permute.xlu0 %1249 }
 0x38c   :  { %1307 = vmatpush1.bf16.msra.mxu0 %v1256_v18 }
 0x38d   :  { %5282 = vmatmul.mubr.msk.bf16.gmra.mxu1 %vm762_vm4, %v7038_v24  ;;  %1308 = vmatprep.subr.bf16.mxu0 %v10021_v28 }
 0x38e   :  { %2181 = vmatpush1.bf16.xpose.msra.mxu1 %v2160_v12  ;;  %1568 = vmatprep.mubr.bf16.mxu1 %v10021_v28 }
 0x38f   :  { %v7188_v22 = vpop.permute.xlu0 %1934  ;;  %2182 = vmatprep.subr.bf16.mxu1 %v10021_v28 }
 0x390   :  { %10200 = vst [vmem:[#allocation11_spill] sm:$0xff] %v7188_v22  ;;  %1309 = vmatpush1.bf16.msra.mxu0 %v1254_v8 }
 0x391   :  { %1310 = vmatprep.subr.bf16.mxu0 %v10021_v28 }
 0x393   :  { %v7192_v36 = vpop.permute.xlu0 %1930 }
 0x394   :  { %10201 = vst [vmem:[#allocation12_spill] sm:$0xff] %v7192_v36  ;;  %1311 = vmatpush1.bf16.msra.mxu0 %v1252_v25 }
 0x395   :  { %5283 = vmatmul.mubr.msk.bf16.gmra.mxu1 %vm762_vm4, %v7049_v30  ;;  %1312 = vmatprep.subr.bf16.mxu0 %v10021_v28  ;;  %v1246_v30 = vpop.permute.xlu1 %1245 }
 0x396   :  { %2183 = vmatpush1.bf16.xpose.msra.mxu1 %v2157_v15  ;;  %1578 = vmatprep.mubr.bf16.mxu1 %v10021_v28 }
 0x397   :  { %v7200_v24 = vpop.permute.xlu0 %1928  ;;  %2184 = vmatprep.subr.bf16.mxu1 %v10021_v28 }
 0x398   :  { %10202 = vst [vmem:[#allocation13_spill] sm:$0xff] %v7200_v24  ;;  %1313 = vmatpush1.bf16.msra.mxu0 %v1250_v19 }
 0x399   :  { %1314 = vmatprep.subr.bf16.mxu0 %v10021_v28  ;;  %v7252_v61 = vpop.permute.xlu1 %1938 }
 0x39a   :  { %10209 = vst [vmem:[#allocation20_spill] sm:$0xff] %v7252_v61 }
 0x39b   :  { %v7204_v49 = vpop.permute.xlu0 %1924 }
 0x39c   :  { %10203 = vst [vmem:[#allocation14_spill] sm:$0xff] %v7204_v49  ;;  %1315 = vmatpush1.bf16.msra.mxu0 %v1248_v27 }
 0x39d   :  { %5284 = vmatmul.mubr.msk.bf16.gmra.mxu1 %vm762_vm4, %v7059_v35  ;;  %1316 = vmatprep.subr.bf16.mxu0 %v10021_v28  ;;  %v7260_v37 = vpop.permute.xlu1 %1936 }
 0x39e   :  { %2185 = vmatpush1.bf16.xpose.msra.mxu1 %v2154_v20  ;;  %1588 = vmatprep.mubr.bf16.mxu1 %v10021_v28  ;;  %10210 = vst [vmem:[#allocation21_spill] sm:$0xff] %v7260_v37 }
 0x39f   :  { %2186 = vmatprep.subr.bf16.mxu1 %v10021_v28 }
 0x3a0   :  { %v7213_v54 = vpop.permute.xlu0 %2616  ;;  %1317 = vmatpush1.bf16.msra.mxu0 %v1246_v30  ;;  %v2826_v30 = vsel %vm762_vm4, %v7122_v56, 0 }
 0x3a1   :  { %10204 = vst [vmem:[#allocation15_spill] sm:$0xff] %v7213_v54  ;;  %1332 = vmatprep.subr.bf16.mxu0 %v10021_v28 }
 0x3a4   :  { %v7216_v58 = vpop.permute.xlu0 %2612 }
 0x3a5   :  { %10205 = vst [vmem:[#allocation16_spill] sm:$0xff] %v7216_v58  ;;  %5285 = vmatmul.mubr.msk.bf16.gmra.mxu1 %vm762_vm4, %v7070_v38 }
 0x3a6   :  { %2187 = vmatpush1.bf16.xpose.msra.mxu1 %v2151_v23  ;;  %1598 = vmatprep.mubr.bf16.mxu1 %v10021_v28 }
 0x3a7   :  { %2188 = vmatprep.subr.bf16.mxu1 %v10021_v28 }
 0x3a8   :  { %v7224_v35 = vpop.permute.xlu0 %2610 }
 0x3a9   :  { %10206 = vst [vmem:[#allocation17_spill] sm:$0xff] %v7224_v35 }
 0x3ac   :  { %v7226_v10 = vpop.permute.xlu0 %2604 }
 0x3ad   :  { %10207 = vst [vmem:[#allocation18_spill] sm:$0xff] %v7226_v10  ;;  %5286 = vmatmul.mubr.msk.bf16.gmra.mxu1 %vm762_vm4, %v7080_v41 }
 0x3ae   :  { %2189 = vmatpush1.bf16.xpose.msra.mxu1 %v2148_v0  ;;  %1608 = vmatprep.mubr.bf16.mxu1 %v10021_v28 }
 0x3af   :  { %2204 = vmatprep.subr.bf16.mxu1 %v10021_v28 }
 0x3b0   :  { %v7234_v29 = vpop.permute.xlu0 %3292 }
 0x3b1   :  { %10208 = vst [vmem:[#allocation19_spill] sm:$0xff] %v7234_v29 }
 0x3b4   :  { %v7236_v38 = vpop.permute.xlu0 %2100 }
 0x3b5   :  { %5287 = vmatmul.mubr.msk.bf16.gmra.mxu1 %vm762_vm4, %v7157_v2  ;;  %v2844_v2 = vsel %vm762_vm4, %v7078_v39, 0  ;;  %v7268_v39 = vpop.permute.xlu1 %1932 }
 0x3b6   :  { %2205 = vmatpush2.bf16.xpose.msra.mxu1 %v2172_v5  ;;  %2206 = vmatprep.mubr.bf16.mxu1 %v10021_v28  ;;  %10211 = vst [vmem:[#allocation22_spill] sm:$0xff] %v7268_v39 }
 0x3b7   :  { %2852 = vmatprep.subr.bf16.mxu1 %v10021_v28 }
 0x3b8   :  { %v1262_v32 = vpop.permute.xlu0 %1261 }
 0x3b9   :  { %v1300_v41 = vsel %vm1298_vm5, %v1262_v32, 0  ;;  %v7274_v11 = vpop.permute.xlu1 %1926 }
 0x3ba   :  { %1333 = vmatpush2.bf16.msra.mxu0 %v1300_v41  ;;  %10212 = vst [vmem:[#allocation23_spill] sm:$0xff] %v7274_v11 }
 0x3bb   :  { %1980 = vmatprep.subr.bf16.mxu0 %v10021_v28 }
 0x3bd   :  { %5297 = vmatmul.mubr.msk.bf16.vlgmr.msra.gmra.mxu1 %vm762_vm4, %v7091_v44  ;;  %v2841_v44 = vsel %vm762_vm4, %v7089_v42, 0  ;;  %v7278_v42 = vpop.permute.xlu1 %2614 }
 0x3be   :  { %2853 = vmatpush1.bf16.xpose.msra.mxu1 %v2847_v9  ;;  %2216 = vmatprep.mubr.bf16.mxu1 %v10021_v28  ;;  %10213 = vst [vmem:[#allocation24_spill] sm:$0xff] %v7278_v42 }
 0x3bf   :  { %2854 = vmatprep.subr.bf16.mxu1 %v10021_v28 }
 0x3c5   :  { %5298 = vmatmul.mubr.msk.bf16.gmra.mxu1 %vm762_vm4, %v7096_v48  ;;  %v2838_v48 = vsel %vm762_vm4, %v7094_v45, 0  ;;  %v720_v45 = vand.u32 127, %v451_v13  ;;  %v2829_v13 = vsel %vm762_vm4, %v7117_v17, 0 }
 0x3c6   :  { %2855 = vmatpush1.bf16.xpose.msra.mxu1 %v2844_v2  ;;  %2226 = vmatprep.mubr.bf16.mxu1 %v10021_v28 }
 0x3c7   :  { %2856 = vmatprep.subr.bf16.mxu1 %v10021_v28  ;;  %v721_v8 = vadd.s32 128, %v720_v45 }
 0x3c9   :  { %vm723_vm6 = vcmp.lt.s32.totalorder %v721_v8, 133 }
 0x3cd   :  { %5299 = vmatmul.mubr.msk.bf16.gmra.mxu1 %vm762_vm4, %v7105_v51  ;;  %v2835_v51 = vsel %vm762_vm4, %v7103_v50, 0 }
 0x3ce   :  { %2857 = vmatpush1.bf16.xpose.msra.mxu1 %v2841_v44  ;;  %2236 = vmatprep.mubr.bf16.mxu1 %v10021_v28 }
 0x3cf   :  { %2858 = vmatprep.subr.bf16.mxu1 %v10021_v28 }
 0x3d5   :  { %5300 = vmatmul.mubr.msk.bf16.gmra.mxu1 %vm762_vm4, %v7110_v53  ;;  %v7287_v53 = vpop.permute.xlu1 %2608 }
 0x3d6   :  { %2859 = vmatpush1.bf16.xpose.msra.mxu1 %v2838_v48  ;;  %2246 = vmatprep.mubr.bf16.mxu1 %v10021_v28  ;;  %10214 = vst [vmem:[#allocation25_spill] sm:$0xff] %v7287_v53 }
 0x3d7   :  { %2860 = vmatprep.subr.bf16.mxu1 %v10021_v28 }
 0x3d9   :  { %v7295_v50 = vpop.permute.xlu1 %2606 }
 0x3da   :  { %10215 = vst [vmem:[#allocation26_spill] sm:$0xff] %v7295_v50 }
 0x3dd   :  { %5301 = vmatmul.mubr.msk.bf16.gmra.mxu1 %vm762_vm4, %v7119_v55  ;;  %v6450_v55 = vmov -1e+30   ;;  %v7305_v52 = vpop.permute.xlu1 %2602 }
 0x3de   :  { %2861 = vmatpush1.bf16.xpose.msra.mxu1 %v2835_v51  ;;  %2256 = vmatprep.mubr.bf16.mxu1 %v10021_v28  ;;  %v7297_v18 = vsel %vm723_vm6, 0.0, %v6450_v55  ;;  %10216 = vst [vmem:[#allocation27_spill] sm:$0xff] %v7305_v52 }
 0x3df   :  { %2862 = vmatprep.subr.bf16.mxu1 %v10021_v28 }
 0x3e5   :  { %5302 = vmatmul.mubr.msk.bf16.gmra.mxu1 %vm762_vm4, %v7124_v57 }
 0x3e6   :  { %2863 = vmatpush1.bf16.xpose.msra.mxu1 %v2832_v14  ;;  %2266 = vmatprep.mubr.bf16.mxu1 %v10021_v28 }
 0x3e7   :  { %2864 = vmatprep.subr.bf16.mxu1 %v10021_v28 }
 0x3ed   :  { %v7301_v19 = vpop.f32.mrf.mxu1  ;;  %5303 = vmatmul.mubr.msk.bf16.gmra.mxu1 %vm762_vm4, %v7133_v59  ;;  %v7317_v59 = vpop.permute.xlu1 %3294 }
 0x3ee   :  { %2865 = vmatpush1.bf16.xpose.msra.mxu1 %v2829_v13  ;;  %2276 = vmatprep.mubr.bf16.mxu1 %v10021_v28  ;;  %10217 = vst [vmem:[#allocation28_spill] sm:$0xff] %v7317_v59 }
 0x3ef   :  { %v853_v57 = vpop.f32.mrf.mxu1  ;;  %2866 = vmatprep.subr.bf16.mxu1 %v10021_v28 }
 0x3f0   :  { %v7310_v12 = vadd.f32 %v853_v57, %v7297_v18 }
 0x3f1   :  { %v7312_v25 = vpop.f32.mrf.mxu1  ;;  %v2797_v9 = vpop.permute.xlu1 %2796 }
 0x3f2   :  { %v938_v17 = vsel %vm762_vm4, %v7310_v12, -inf  ;;  %v2850_v51 = vsel %vm762_vm4, %v2797_v9, 0 }
 0x3f3   :  { %v857_v15 = vpop.f32.mrf.mxu1  ;;  %v939_v27 = vmax.f32 %v7301_v19, %v938_v17 }
 0x3f4   :  { %v7320_v20 = vadd.f32 %v857_v15, %v7297_v18 }
 0x3f5   :  { %v7324_v23 = vpop.f32.mrf.mxu1  ;;  %940 = vmax.xlane.f32.xlu0 %v939_v27  ;;  %5304 = vmatmul.mubr.msk.bf16.gmra.mxu1 %vm762_vm4, %v7136_v60  ;;  %v7459_v50 = vpop.permute.xlu1 %3290 }
 0x3f6   :  { %2867 = vmatpush1.bf16.xpose.msra.mxu1 %v2826_v30  ;;  %v942_v0 = vsel %vm762_vm4, %v7320_v20, -inf  ;;  %2286 = vmatprep.mubr.bf16.mxu1 %v10021_v28  ;;  %10218 = vst [vmem:[#allocation29_spill] sm:$0xff] %v7459_v50 }
 0x3f7   :  { %v863_v5 = vpop.f32.mrf.mxu1  ;;  %v943_v32 = vmax.f32 %v7312_v25, %v942_v0  ;;  %2882 = vmatprep.subr.bf16.mxu1 %v10021_v28 }
 0x3f8   :  { %v7334_v41 = vadd.f32 %v863_v5, %v7297_v18 }
 0x3f9   :  { %v7336_v56 = vpop.f32.mrf.mxu1  ;;  %944 = vmax.xlane.f32.xlu1 %v943_v32  ;;  %v2779_v50 = vpop.permute.xlu1 %2778 }
 0x3fa   :  { %v946_v60 = vsel %vm762_vm4, %v7334_v41, -inf }
 0x3fb   :  { %v947_v2 = vmax.f32 %v7324_v23, %v946_v60  ;;  %v867_v44 = vpop.f32.mrf.mxu1 }
 0x3fc   :  { %v7342_v48 = vadd.f32 %v867_v44, %v7297_v18 }
 0x3fd   :  { %v7345_v45 = vpop.f32.mrf.mxu1  ;;  %948 = vmax.xlane.f32.xlu1 %v947_v2  ;;  %5305 = vmatmul.mubr.msk.bf16.gmra.mxu1 %vm762_vm4, %v7236_v38 }
 0x3fe   :  { %v950_v14 = vsel %vm762_vm4, %v7342_v48, -inf  ;;  %2883 = vmatpush2.bf16.xpose.msra.mxu1 %v2850_v51  ;;  %2884 = vmatprep.mubr.bf16.mxu1 %v10021_v28 }
 0x3ff   :  { %v873_v8 = vpop.f32.mrf.mxu1  ;;  %v951_v55 = vmax.f32 %v7336_v56, %v950_v14  ;;  %5582 = vmatprep.subr.bf16.mxu1 %v10014_v1 }
 0x400   :  { %v7355_v13 = vadd.f32 %v873_v8, %v7297_v18 }
 0x401   :  { %v7357_v57 = vpop.f32.mrf.mxu1  ;;  %952 = vmax.xlane.f32.xlu1 %v951_v55 }
 0x402   :  { %v954_v38 = vsel %vm762_vm4, %v7355_v13, -inf }
 0x403   :  { %v877_v17 = vpop.f32.mrf.mxu1  ;;  %v955_v15 = vmax.f32 %v7345_v45, %v954_v38 }
 0x404   :  { %v7363_v27 = vadd.f32 %v877_v17, %v7297_v18 }
 0x405   :  { %v7365_v30 = vpop.f32.mrf.mxu1  ;;  %956 = vmax.xlane.f32.xlu0 %v955_v15  ;;  %5315 = vmatmul.mubr.msk.bf16.vlgmr.msra.gmra.mxu1 %vm762_vm4, %v7145_v40 }
 0x406   :  { %v958_v0 = vsel %vm762_vm4, %v7363_v27, -inf  ;;  %2894 = vmatprep.mubr.bf16.mxu1 %v10021_v28 }
 0x407   :  { %v883_v5 = vpop.f32.mrf.mxu1  ;;  %v959_v32 = vmax.f32 %v7357_v57, %v958_v0 }
 0x408   :  { %v7419_v16 = vadd.f32 %v883_v5, %v7297_v18 }
 0x409   :  { %v7373_v9 = vpop.f32.mrf.mxu1  ;;  %960 = vmax.xlane.f32.xlu1 %v959_v32 }
 0x40b   :  { %v887_v60 = vpop.f32.mrf.mxu1 }
 0x40c   :  { %v7422_v29 = vadd.f32 %v887_v60, %v7297_v18 }
 0x40d   :  { %v7375_v2 = vpop.f32.mrf.mxu1  ;;  %5316 = vmatmul.mubr.msk.bf16.gmra.mxu1 %vm762_vm4, %v7131_v43 }
 0x40e   :  { %2904 = vmatprep.mubr.bf16.mxu1 %v10021_v28  ;;  %v966_v60 = vsel %vm762_vm4, %v7422_v29, -inf }
 0x40f   :  { %v893_v40 = vpop.f32.mrf.mxu1  ;;  %v967_v10 = vmax.f32 %v7373_v9, %v966_v60 }
 0x411   :  { %v7380_v44 = vpop.f32.mrf.mxu1 }
 0x413   :  { %v897_v51 = vpop.f32.mrf.mxu1 }
 0x414   :  { %v7453_v31 = vadd.f32 %v897_v51, %v7297_v18 }
 0x415   :  { %v7382_v14 = vpop.f32.mrf.mxu1  ;;  %5317 = vmatmul.mubr.msk.bf16.gmra.mxu1 %vm762_vm4, %v7150_v63 }
 0x416   :  { %2914 = vmatprep.mubr.bf16.mxu1 %v10021_v28  ;;  %v974_v53 = vsel %vm762_vm4, %v7453_v31, -inf }
 0x417   :  { %v903_v8 = vpop.f32.mrf.mxu1 }
 0x418   :  { %v7468_v51 = vadd.f32 %v903_v8, %v7297_v18  ;;  %v10221_v8 = vmov 0.0  }
 0x419   :  { %v7387_v55 = vpop.f32.mrf.mxu1 }
 0x41a   :  { %3288 = vrot.lane.b32.xlu1 %v6770_v21, %s6449_s3 }
 0x41b   :  { %v907_v43 = vpop.f32.mrf.mxu1  ;;  %3286 = vrot.lane.b32.xlu0 %v6805_v46, %s6449_s3 }
 0x41c   :  { %v7478_v58 = vadd.f32 %v907_v43, %v7297_v18 }
 0x41d   :  { %v7393_v38 = vpop.f32.mrf.mxu1  ;;  %5318 = vmatmul.mubr.msk.bf16.gmra.mxu1 %vm762_vm4, %v7148_v62 }
 0x41e   :  { %2924 = vmatprep.mubr.bf16.mxu1 %v10021_v28 }
 0x41f   :  { %v913_v63 = vpop.f32.mrf.mxu1 }
 0x420   :  { %v7492_v43 = vadd.f32 %v913_v63, %v7297_v18 }
 0x421   :  { %v7398_v17 = vpop.f32.mrf.mxu1 }
 0x422   :  { %v986_v49 = vsel %vm762_vm4, %v7492_v43, -inf }
 0x423   :  { %v7400_v15 = vpop.f32.mrf.mxu1  ;;  %v987_v11 = vmax.f32 %v7393_v38, %v986_v49 }
 0x424   :  { %v7507_v63 = vadd.f32 %v7400_v15, %v7297_v18 }
 0x425   :  { %v7402_v0 = vpop.f32.mrf.mxu1  ;;  %5319 = vmatmul.mubr.msk.bf16.gmra.mxu1 %vm762_vm4, %v7162_v4 }
 0x426   :  { %2934 = vmatprep.mubr.bf16.mxu1 %v10021_v28  ;;  %v990_v24 = vsel %vm762_vm4, %v7507_v63, -inf }
 0x427   :  { %v923_v21 = vpop.f32.mrf.mxu1 }
 0x428   :  { %v7425_v59 = vadd.f32 %v923_v21, %v7297_v18  ;;  %v7440_v21 = vadd.f32 %v893_v40, %v7297_v18 }
 0x429   :  { %v7407_v46 = vpop.f32.mrf.mxu1 }
 0x42b   :  { %v7409_v32 = vpop.f32.mrf.mxu1 }
 0x42c   :  { %v7522_v15 = vadd.f32 %v7409_v32, %v7297_v18 }
 0x42d   :  { %v7411_v62 = vpop.f32.mrf.mxu1  ;;  %5320 = vmatmul.mubr.msk.bf16.gmra.mxu1 %vm762_vm4, %v7160_v3  ;;  %v962_v3 = vsel %vm762_vm4, %v7419_v16, -inf }
 0x42e   :  { %2944 = vmatprep.mubr.bf16.mxu1 %v10021_v28  ;;  %v998_v36 = vsel %vm762_vm4, %v7522_v15, -inf }
 0x42f   :  { %v7416_v1 = vpop.f32.mrf.mxu1  ;;  %v999_v22 = vmax.f32 %v7407_v46, %v998_v36 }
 0x430   :  { %v7534_v39 = vadd.f32 %v7416_v1, %v7297_v18 }
 0x431   :  { %v935_v4 = vpop.f32.mrf.mxu1 }
 0x432   :  { %v994_v4 = vsel %vm762_vm4, %v7425_v59, -inf }
 0x433   :  { %v936_v34 = vpop.f32.mrf.mxu1 }
 0x434   :  { %v963_v34 = vmax.f32 %v7365_v30, %v962_v3  ;;  %v970_v3 = vsel %vm762_vm4, %v7440_v21, -inf }
 0x435   :  { %v7427_v52 = vpop.f32.mrf.mxu1  ;;  %5321 = vmatmul.mubr.msk.bf16.gmra.mxu1 %vm762_vm4, %v7171_v7  ;;  %v971_v60 = vmax.f32 %v7375_v2, %v970_v3 }
 0x436   :  { %2954 = vmatprep.mubr.bf16.mxu1 %v10021_v28  ;;  %v995_v28 = vmax.f32 %v7402_v0, %v994_v4  ;;  %v10219_v4 = vmov 0  }
 0x437   :  { %v7434_v5 = vpop.f32.mrf.mxu1 }
 0x439   :  { %v7444_v33 = vpop.f32.mrf.mxu1 }
 0x43a   :  { %964 = vmax.xlane.f32.xlu0 %v963_v34 }
 0x43b   :  { %v7446_v7 = vpop.f32.mrf.mxu1 }
 0x43c   :  { %v7555_v36 = vadd.f32 %v7446_v7, %v7297_v18 }
 0x43d   :  { %v7455_v40 = vpop.f32.mrf.mxu1  ;;  %5322 = vmatmul.mubr.msk.bf16.gmra.mxu1 %vm762_vm4, %v7169_v6 }
 0x43e   :  { %996 = vmax.xlane.f32.xlu1 %v995_v28  ;;  %968 = vmax.xlane.f32.xlu0 %v967_v10  ;;  %v975_v28 = vmax.f32 %v7380_v44, %v974_v53  ;;  %v978_v10 = vsel %vm762_vm4, %v7468_v51, -inf  ;;  %v982_v53 = vsel %vm762_vm4, %v7478_v58, -inf }
 0x43f   :  { %v7461_v34 = vpop.f32.mrf.mxu1  ;;  %2964 = vmatprep.mubr.bf16.mxu1 %v10219_v4  ;;  %v979_v42 = vmax.f32 %v7382_v14, %v978_v10 }
 0x441   :  { %v7470_v35 = vpop.f32.mrf.mxu1 }
 0x442   :  { %972 = vmax.xlane.f32.xlu0 %v971_v60 }
 0x443   :  { %v7472_v6 = vpop.f32.mrf.mxu1 }
 0x445   :  { %v7480_v3 = vpop.f32.mrf.mxu1  ;;  %5323 = vmatmul.mubr.msk.bf16.gmra.mxu1 %vm762_vm4, %v2779_v50 }
 0x446   :  { %10220 = vst [vmem:[#allocation30_spill] sm:$0xff] %v7480_v3  ;;  %976 = vmax.xlane.f32.xlu0 %v975_v28  ;;  %5586 = vmatprep.mubr.msk.bf16.mxu1 %vm6437_vm0, %v10221_v8 }
 0x447   :  { %v1552_v60 = vpop.f32.mrf.mxu1 }
 0x448   :  { %v7487_v54 = vadd.f32 %v1552_v60, %v7297_v18  ;;  %v983_v60 = vmax.f32 %v7387_v55, %v982_v53 }
 0x449   :  { %v7494_v26 = vpop.f32.mrf.mxu1 }
 0x44a   :  { %10222 = vst [vmem:[#allocation31_spill] sm:$0xff] %v7494_v26  ;;  %v1633_v50 = vsel %vm762_vm4, %v7487_v54, -inf  ;;  %980 = vmax.xlane.f32.xlu0 %v979_v42 }
 0x44b   :  { %v1634_v28 = vmax.f32 %v7480_v3, %v1633_v50  ;;  %v1556_v8 = vpop.f32.mrf.mxu1 }
 0x44c   :  { %v7500_v10 = vadd.f32 %v1556_v8, %v7297_v18 }
 0x44d   :  { %1635 = vmax.xlane.f32.xlu1 %v1634_v28  ;;  %v7509_v47 = vpop.f32.mrf.mxu1 }
 0x44e   :  { %10223 = vst [vmem:[#allocation32_spill] sm:$0xff] %v7500_v10  ;;  %10224 = vst [vmem:[#allocation33_spill] sm:$0xff] %v7509_v47  ;;  %v1637_v42 = vsel %vm762_vm4, %v7500_v10, -inf  ;;  %984 = vmax.xlane.f32.xlu0 %v983_v60 }
 0x44f   :  { %v1562_v50 = vpop.f32.mrf.mxu1  ;;  %v1638_v8 = vmax.f32 %v7494_v26, %v1637_v42 }
 0x450   :  { %v7516_v53 = vadd.f32 %v1562_v50, %v7297_v18  ;;  %v991_v50 = vmax.f32 %v7398_v17, %v990_v24  ;;  %v7543_v24 = vadd.f32 %v7434_v5, %v7297_v18 }
 0x451   :  { %1639 = vmax.xlane.f32.xlu1 %v1638_v8  ;;  %v7524_v28 = vpop.f32.mrf.mxu1 }
 0x452   :  { %10225 = vst [vmem:[#allocation34_spill] sm:$0xff] %v7516_v53  ;;  %10226 = vst [vmem:[#allocation35_spill] sm:$0xff] %v7524_v28  ;;  %v1641_v60 = vsel %vm762_vm4, %v7516_v53, -inf  ;;  %988 = vmax.xlane.f32.xlu0 %v987_v11  ;;  %v1002_v11 = vsel %vm762_vm4, %v7534_v39, -inf }
 0x453   :  { %v1642_v42 = vmax.f32 %v7509_v47, %v1641_v60  ;;  %v1566_v49 = vpop.f32.mrf.mxu1  ;;  %v1003_v1 = vmax.f32 %v7411_v62, %v1002_v11  ;;  %v7567_v47 = vadd.f32 %v7461_v34, %v7297_v18 }
 0x455   :  { %1643 = vmax.xlane.f32.xlu1 %v1642_v42  ;;  %v7536_v32 = vpop.f32.mrf.mxu1 }
 0x456   :  { %992 = vmax.xlane.f32.xlu0 %v991_v50  ;;  %v1617_v50 = vsel %vm762_vm4, %v7543_v24, -inf }
 0x457   :  { %v1572_v8 = vpop.f32.mrf.mxu1  ;;  %v1618_v11 = vmax.f32 %v7427_v52, %v1617_v50  ;;  %v1625_v50 = vsel %vm762_vm4, %v7567_v47, -inf }
 0x459   :  { %v7545_v60 = vpop.f32.mrf.mxu1 }
 0x45a   :  { %10227 = vst [vmem:[#allocation36_spill] sm:$0xff] %v7545_v60  ;;  %1000 = vmax.xlane.f32.xlu0 %v999_v22 }
 0x45b   :  { %v1576_v37 = vpop.f32.mrf.mxu1 }
 0x45c   :  { %v7549_v42 = vadd.f32 %v1576_v37, %v7297_v18  ;;  %v1621_v37 = vsel %vm762_vm4, %v7555_v36, -inf }
 0x45d   :  { %v7557_v4 = vpop.f32.mrf.mxu1 }
 0x45e   :  { %10228 = vst [vmem:[#allocation37_spill] sm:$0xff] %v7549_v42  ;;  %10229 = vst [vmem:[#allocation38_spill] sm:$0xff] %v7557_v4  ;;  %v1653_v5 = vsel %vm762_vm4, %v7549_v42, -inf  ;;  %1004 = vmax.xlane.f32.xlu0 %v1003_v1  ;;  %v1622_v1 = vmax.f32 %v7444_v33, %v1621_v37 }
 0x45f   :  { %v1582_v22 = vpop.f32.mrf.mxu1  ;;  %v1654_v61 = vmax.f32 %v7545_v60, %v1653_v5  ;;  %v7579_v5 = vadd.f32 %v7472_v6, %v7297_v18  ;;  %v7593_v6 = vadd.f32 %v1566_v49, %v7297_v18 }
 0x461   :  { %1655 = vmax.xlane.f32.xlu1 %v1654_v61  ;;  %v7569_v7 = vpop.f32.mrf.mxu1  ;;  %v1629_v10 = vsel %vm762_vm4, %v7579_v5, -inf  ;;  %10234 = vst [vmem:[#allocation43_spill] sm:$0xff] %v7593_v6 }
 0x462   :  { %10230 = vst [vmem:[#allocation39_spill] sm:$0xff] %v7569_v7  ;;  %1619 = vmax.xlane.f32.xlu0 %v1618_v11 }
 0x463   :  { %v1586_v26 = vpop.f32.mrf.mxu1 }
 0x464   :  { %v7572_v42 = vadd.f32 %v1586_v26, %v7297_v18  ;;  %v1626_v26 = vmax.f32 %v7455_v40, %v1625_v50  ;;  %v1630_v50 = vmax.f32 %v7470_v35, %v1629_v10  ;;  %v7615_v10 = vadd.f32 %v1582_v22, %v7297_v18 }
 0x465   :  { %v7581_v60 = vpop.f32.mrf.mxu1 }
 0x466   :  { %10231 = vst [vmem:[#allocation40_spill] sm:$0xff] %v7572_v42  ;;  %10232 = vst [vmem:[#allocation41_spill] sm:$0xff] %v7581_v60  ;;  %v1661_v61 = vsel %vm762_vm4, %v7572_v42, -inf  ;;  %1623 = vmax.xlane.f32.xlu0 %v1622_v1  ;;  %v7604_v42 = vadd.f32 %v1572_v8, %v7297_v18 }
 0x467   :  { %v1592_v34 = vpop.f32.mrf.mxu1  ;;  %v1662_v11 = vmax.f32 %v7569_v7, %v1661_v61 }
 0x468   :  { %v7588_v37 = vadd.f32 %v1592_v34, %v7297_v18  ;;  %v1645_v34 = vsel %vm762_vm4, %v7593_v6, -inf }
 0x469   :  { %1663 = vmax.xlane.f32.xlu1 %v1662_v11  ;;  %v7595_v53 = vpop.f32.mrf.mxu1 }
 0x46a   :  { %10233 = vst [vmem:[#allocation42_spill] sm:$0xff] %v7588_v37  ;;  %10235 = vst [vmem:[#allocation44_spill] sm:$0xff] %v7595_v53  ;;  %v1665_v1 = vsel %vm762_vm4, %v7588_v37, -inf  ;;  %1627 = vmax.xlane.f32.xlu0 %v1626_v26  ;;  %v1646_v26 = vmax.f32 %v7524_v28, %v1645_v34  ;;  %v1657_v34 = vsel %vm762_vm4, %v7615_v10, -inf }
 0x46b   :  { %v1666_v61 = vmax.f32 %v7581_v60, %v1665_v1  ;;  %v1596_v7 = vpop.f32.mrf.mxu1  ;;  %v1649_v1 = vsel %vm762_vm4, %v7604_v42, -inf  ;;  %v1658_v6 = vmax.f32 %v7557_v4, %v1657_v34 }
 0x46c   :  { %v7626_v37 = vadd.f32 %v1596_v7, %v7297_v18 }
 0x46d   :  { %1667 = vmax.xlane.f32.xlu1 %v1666_v61  ;;  %v7606_v49 = vpop.f32.mrf.mxu1 }
 0x46e   :  { %10236 = vst [vmem:[#allocation45_spill] sm:$0xff] %v7606_v49  ;;  %1631 = vmax.xlane.f32.xlu0 %v1630_v50  ;;  %10239 = vst [vmem:[#allocation48_spill] sm:$0xff] %v7626_v37 }
 0x46f   :  { %v1602_v11 = vpop.f32.mrf.mxu1 }
 0x470   :  { %v7609_v3 = vadd.f32 %v1602_v11, %v7297_v18  ;;  %v1650_v11 = vmax.f32 %v7536_v32, %v1649_v1 }
 0x471   :  { %v7617_v60 = vpop.f32.mrf.mxu1 }
 0x472   :  { %10237 = vst [vmem:[#allocation46_spill] sm:$0xff] %v7609_v3  ;;  %10238 = vst [vmem:[#allocation47_spill] sm:$0xff] %v7617_v60  ;;  %v1673_v8 = vsel %vm762_vm4, %v7609_v3, -inf  ;;  %1647 = vmax.xlane.f32.xlu0 %v1646_v26  ;;  %v7639_v3 = vpop.permute.xlu0 %2618 }
 0x473   :  { %v1674_v61 = vmax.f32 %v7606_v49, %v1673_v8  ;;  %v1606_v50 = vpop.f32.mrf.mxu1  ;;  %v1669_v8 = vsel %vm762_vm4, %v7626_v37, -inf  ;;  %10243 = vst [vmem:[#allocation52_spill] sm:$0xff] %v7639_v3 }
 0x474   :  { %v7637_v1 = vadd.f32 %v1606_v50, %v7297_v18  ;;  %v1670_v34 = vmax.f32 %v7595_v53, %v1669_v8  ;;  %v7649_v50 = vpop.permute.xlu1 %1940 }
 0x475   :  { %1675 = vmax.xlane.f32.xlu1 %v1674_v61  ;;  %v7628_v22 = vpop.f32.mrf.mxu1  ;;  %10245 = vst [vmem:[#allocation54_spill] sm:$0xff] %v7649_v50 }
 0x476   :  { %10240 = vst [vmem:[#allocation49_spill] sm:$0xff] %v7628_v22  ;;  %1651 = vmax.xlane.f32.xlu0 %v1650_v11  ;;  %10242 = vst [vmem:[#allocation51_spill] sm:$0xff] %v7637_v1 }
 0x477   :  { %v1612_v28 = vpop.f32.mrf.mxu1 }
 0x478   :  { %v7632_v26 = vadd.f32 %v1612_v28, %v7297_v18  ;;  %v1677_v28 = vsel %vm762_vm4, %v7637_v1, -inf }
 0x479   :  { %v1614_v49 = vpop.f32.mrf.mxu1  ;;  %v1678_v8 = vmax.f32 %v7617_v60, %v1677_v28 }
 0x47a   :  { %10241 = vst [vmem:[#allocation50_spill] sm:$0xff] %v7632_v26  ;;  %v1681_v7 = vsel %vm762_vm4, %v7632_v26, -inf  ;;  %1659 = vmax.xlane.f32.xlu0 %v1658_v6 }
 0x47b   :  { %v1682_v61 = vmax.f32 %v7628_v22, %v1681_v7  ;;  %v1615_v11 = vpop.f32.mrf.mxu1 }
 0x47d   :  { %v7647_v4 = vpop.f32.mrf.mxu1  ;;  %1683 = vmax.xlane.f32.xlu1 %v1682_v61 }
 0x47e   :  { %10244 = vst [vmem:[#allocation53_spill] sm:$0xff] %v7647_v4  ;;  %1671 = vmax.xlane.f32.xlu0 %v1670_v34  ;;  %v941_v49 = vpop.xlane.xlu0 %940 }
 0x47f   :  { %v1006_v3 = vsub.f32 %v7301_v19, %v941_v49  ;;  %v1007_v26 = vsub.f32 %v7310_v12, %v941_v49  ;;  %v2210_v6 = vpop.f32.mrf.mxu1 }
 0x480   :  { %v7654_v7 = vadd.f32 %v2210_v6, %v7297_v18 }
 0x481   :  { %v1040_v11 = vmul.f32 1.442695, %v1006_v3  ;;  %v1042_v22 = vmul.f32 1.442695, %v1007_v26  ;;  %v7657_v1 = vpop.f32.mrf.mxu1 }
 0x482   :  { %10246 = vst [vmem:[#allocation55_spill] sm:$0xff] %v7654_v7  ;;  %10247 = vst [vmem:[#allocation56_spill] sm:$0xff] %v7657_v1  ;;  %v2295_v61 = vsel %vm762_vm4, %v7654_v7, -inf  ;;  %v945_v50 = vpop.xlane.xlu1 %944  ;;  %1679 = vmax.xlane.f32.xlu0 %v1678_v8 }
 0x483   :  { %5886 = vpow2.f32 %v1040_v11  ;;  %v2296_v19 = vmax.f32 %v7647_v4, %v2295_v61  ;;  %v1008_v12 = vsub.f32 %v7312_v25, %v945_v50  ;;  %v1009_v34 = vsub.f32 %v7320_v20, %v945_v50  ;;  %v2214_v49 = vpop.f32.mrf.mxu1 }
 0x484   :  { %5888 = vpow2.f32 %v1042_v22  ;;  %v7665_v28 = vadd.f32 %v2214_v49, %v7297_v18 }
 0x485   :  { %v1044_v3 = vmul.f32 1.442695, %v1008_v12  ;;  %v1046_v26 = vmul.f32 1.442695, %v1009_v34  ;;  %v7667_v6 = vpop.f32.mrf.mxu1 }
 0x486   :  { %10248 = vst [vmem:[#allocation57_spill] sm:$0xff] %v7665_v28  ;;  %10249 = vst [vmem:[#allocation58_spill] sm:$0xff] %v7667_v6  ;;  %v2299_v7 = vsel %vm762_vm4, %v7665_v28, -inf  ;;  %v949_v8 = vpop.xlane.xlu1 %948  ;;  %2297 = vmax.xlane.f32.xlu0 %v2296_v19 }
 0x487   :  { %5890 = vpow2.f32 %v1044_v3  ;;  %v1010_v11 = vsub.f32 %v7324_v23, %v949_v8  ;;  %v1011_v25 = vsub.f32 %v7334_v41, %v949_v8  ;;  %v2220_v20 = vpop.f32.mrf.mxu1  ;;  %v2300_v22 = vmax.f32 %v7657_v1, %v2299_v7 }
 0x488   :  { %5892 = vpow2.f32 %v1046_v26  ;;  %v7675_v50 = vadd.f32 %v2220_v20, %v7297_v18 }
 0x489   :  { %v1050_v61 = vmul.f32 1.442695, %v1011_v25  ;;  %v7677_v12 = vpop.f32.mrf.mxu1  ;;  %2301 = vmax.xlane.f32.xlu1 %v2300_v22  ;;  %v1048_v49 = vmul.f32 1.442695, %v1010_v11 }
 0x48a   :  { %10250 = vst [vmem:[#allocation59_spill] sm:$0xff] %v7675_v50  ;;  %10251 = vst [vmem:[#allocation60_spill] sm:$0xff] %v7677_v12  ;;  %v2303_v34 = vsel %vm762_vm4, %v7675_v50, -inf  ;;  %v953_v19 = vpop.xlane.xlu1 %952 }
 0x48b   :  { %v2304_v23 = vmax.f32 %v7667_v6, %v2303_v34  ;;  %v1012_v41 = vsub.f32 %v7336_v56, %v953_v19  ;;  %v1013_v3 = vsub.f32 %v7342_v48, %v953_v19  ;;  %v2224_v7 = vpop.f32.mrf.mxu1  ;;  %5894 = vpow2.f32 %v1050_v61 }
 0x48c   :  { %v7685_v26 = vadd.f32 %v2224_v7, %v7297_v18  ;;  %5896 = vpow2.f32 %v1048_v49 }
 0x48d   :  { %v1054_v8 = vmul.f32 1.442695, %v1013_v3  ;;  %v7687_v25 = vpop.f32.mrf.mxu1  ;;  %2305 = vmax.xlane.f32.xlu0 %v2304_v23  ;;  %v1052_v11 = vmul.f32 1.442695, %v1012_v41 }
 0x48e   :  { %10252 = vst [vmem:[#allocation61_spill] sm:$0xff] %v7685_v26  ;;  %10253 = vst [vmem:[#allocation62_spill] sm:$0xff] %v7687_v25  ;;  %v2307_v20 = vsel %vm762_vm4, %v7685_v26, -inf  ;;  %v957_v22 = vpop.xlane.xlu0 %956 }
 0x48f   :  { %v2230_v34 = vpop.f32.mrf.mxu1  ;;  %v2308_v56 = vmax.f32 %v7677_v12, %v2307_v20  ;;  %5898 = vpow2.f32 %v1054_v8  ;;  %v1015_v48 = vsub.f32 %v7355_v13, %v957_v22  ;;  %v1014_v7 = vsub.f32 %v7345_v45, %v957_v22 }
 0x490   :  { %v7692_v6 = vpop.eup %5886  ;;  %v7696_v61 = vadd.f32 %v2230_v34, %v7297_v18  ;;  %5900 = vpow2.f32 %v1052_v11 }
 0x491   :  { %10254 = vst [vmem:[#allocation63_spill] sm:$0xff] %v7692_v6  ;;  %v7698_v19 = vpop.eup %5888  ;;  %v7700_v23 = vpop.f32.mrf.mxu1  ;;  %2309 = vmax.xlane.f32.xlu1 %v2308_v56  ;;  %v1058_v34 = vmul.f32 1.442695, %v1015_v48  ;;  %v1056_v22 = vmul.f32 1.442695, %v1014_v7 }
 0x492   :  { %10255 = vst [vmem:[#allocation64_spill] sm:$0xff] %v7696_v61  ;;  %10256 = vst [vmem:[#allocation65_spill] sm:$0xff] %v7698_v19  ;;  %v2311_v49 = vsel %vm762_vm4, %v7696_v61, -inf  ;;  %v961_v41 = vpop.xlane.xlu1 %960  ;;  %v1108_v3 = vsel %vm762_vm4, %v7698_v19, 0.0 }
 0x493   :  { %10257 = vst [vmem:[#allocation66_spill] sm:$0xff] %v7700_v23  ;;  %v2312_v13 = vmax.f32 %v7687_v25, %v2311_v49  ;;  %v2234_v8 = vpop.f32.mrf.mxu1  ;;  %v1017_v12 = vsub.f32 %v7363_v27, %v961_v41  ;;  %v1109_v61 = vadd.f32 %v7692_v6, %v1108_v3  ;;  %v1016_v11 = vsub.f32 %v7357_v57, %v961_v41 }
 0x494   :  { %v7708_v20 = vpop.eup %5890  ;;  %v7712_v56 = vadd.f32 %v2234_v8, %v7297_v18  ;;  %5902 = vpow2.f32 %v1058_v34 }
 0x495   :  { %10258 = vst [vmem:[#allocation67_spill] sm:$0xff] %v7708_v20  ;;  %v7715_v26 = vpop.eup %5892  ;;  %v7717_v50 = vpop.f32.mrf.mxu1  ;;  %2313 = vmax.xlane.f32.xlu0 %v2312_v13  ;;  %1110 = vadd.xlane.f32.xlu1 %v1109_v61  ;;  %v1062_v49 = vmul.f32 1.442695, %v1017_v12  ;;  %5904 = vpow2.f32 %v1056_v22  ;;  %v1060_v57 = vmul.f32 1.442695, %v1016_v11 }
 0x496   :  { %10259 = vst [vmem:[#allocation68_spill] sm:$0xff] %v7712_v56  ;;  %10260 = vst [vmem:[#allocation69_spill] sm:$0xff] %v7715_v26  ;;  %v1112_v45 = vsel %vm762_vm4, %v7715_v26, 0.0  ;;  %v2315_v3 = vsel %vm762_vm4, %v7712_v56, -inf }
 0x497   :  { %10261 = vst [vmem:[#allocation70_spill] sm:$0xff] %v7717_v50  ;;  %v2240_v48 = vpop.f32.mrf.mxu1  ;;  %v1113_v27 = vadd.f32 %v7708_v20, %v1112_v45  ;;  %v2316_v12 = vmax.f32 %v7700_v23, %v2315_v3  ;;  %5906 = vpow2.f32 %v1062_v49 }
 0x498   :  { %v7726_v8 = vadd.f32 %v2240_v48, %v7297_v18  ;;  %v7728_v25 = vpop.eup %5894  ;;  %5908 = vpow2.f32 %v1060_v57 }
 0x499   :  { %10263 = vst [vmem:[#allocation72_spill] sm:$0xff] %v7728_v25  ;;  %v7730_v61 = vpop.f32.mrf.mxu1  ;;  %1114 = vadd.xlane.f32.xlu0 %v1113_v27  ;;  %v7736_v34 = vpop.eup %5896  ;;  %v1116_v45 = vsel %vm762_vm4, %v7728_v25, 0.0 }
 0x49a   :  { %10262 = vst [vmem:[#allocation71_spill] sm:$0xff] %v7726_v8  ;;  %10264 = vst [vmem:[#allocation73_spill] sm:$0xff] %v7730_v61  ;;  %v2319_v7 = vsel %vm762_vm4, %v7726_v8, -inf  ;;  %v1117_v11 = vadd.f32 %v7736_v34, %v1116_v45 }
 0x49b   :  { %v2320_v41 = vmax.f32 %v7717_v50, %v2319_v7  ;;  %v2244_v13 = vpop.f32.mrf.mxu1  ;;  %10265 = vst [vmem:[#allocation74_spill] sm:$0xff] %v7736_v34 }
 0x49c   :  { %v7740_v48 = vpop.eup %5898  ;;  %v7748_v3 = vadd.f32 %v2244_v13, %v7297_v18 }
 0x49d   :  { %10266 = vst [vmem:[#allocation75_spill] sm:$0xff] %v7740_v48  ;;  %v7742_v56 = vpop.f32.mrf.mxu1  ;;  %2317 = vmax.xlane.f32.xlu0 %v2316_v12  ;;  %2321 = vmax.xlane.f32.xlu1 %v2320_v41  ;;  %v7745_v27 = vpop.eup %5900  ;;  %v1120_v7 = vsel %vm762_vm4, %v7740_v48, 0.0 }
 0x49e   :  { %10267 = vst [vmem:[#allocation76_spill] sm:$0xff] %v7742_v56  ;;  %10268 = vst [vmem:[#allocation77_spill] sm:$0xff] %v7745_v27  ;;  %v1121_v45 = vadd.f32 %v7745_v27, %v1120_v7  ;;  %v2323_v13 = vsel %vm762_vm4, %v7748_v3, -inf }
 0x49f   :  { %v2250_v22 = vpop.f32.mrf.mxu1  ;;  %10269 = vst [vmem:[#allocation78_spill] sm:$0xff] %v7748_v3 }
 0x4a0   :  { %v7751_v49 = vadd.f32 %v2250_v22, %v7297_v18 }
 0x4a1   :  { %v7755_v8 = vpop.f32.mrf.mxu1  ;;  %1118 = vadd.xlane.f32.xlu0 %v1117_v11  ;;  %v7763_v50 = vpop.eup %5902  ;;  %v2324_v11 = vmax.f32 %v7730_v61, %v2323_v13 }
 0x4a2   :  { %10270 = vst [vmem:[#allocation79_spill] sm:$0xff] %v7751_v49  ;;  %10271 = vst [vmem:[#allocation80_spill] sm:$0xff] %v7755_v8  ;;  %v2327_v57 = vsel %vm762_vm4, %v7751_v49, -inf  ;;  %v7768_v34 = vpop.eup %5904  ;;  %v1124_v7 = vsel %vm762_vm4, %v7763_v50, 0.0 }
 0x4a3   :  { %v2328_v41 = vmax.f32 %v7742_v56, %v2327_v57  ;;  %v2254_v12 = vpop.f32.mrf.mxu1  ;;  %10272 = vst [vmem:[#allocation81_spill] sm:$0xff] %v7763_v50  ;;  %10274 = vst [vmem:[#allocation83_spill] sm:$0xff] %v7768_v34  ;;  %v1125_v13 = vadd.f32 %v7768_v34, %v1124_v7 }
 0x4a4   :  { %v7775_v57 = vpop.eup %5906 }
 0x4a5   :  { %v7765_v22 = vpop.f32.mrf.mxu1  ;;  %1122 = vadd.xlane.f32.xlu0 %v1121_v45  ;;  %2329 = vmax.xlane.f32.xlu1 %v2328_v41  ;;  %10276 = vst [vmem:[#allocation85_spill] sm:$0xff] %v7775_v57  ;;  %v7785_v61 = vpop.eup %5908  ;;  %v1128_v50 = vsel %vm762_vm4, %v7775_v57, 0.0 }
 0x4a6   :  { %10273 = vst [vmem:[#allocation82_spill] sm:$0xff] %v7765_v22  ;;  %10278 = vst [vmem:[#allocation87_spill] sm:$0xff] %v7785_v61 }
 0x4a7   :  { %v2260_v23 = vpop.f32.mrf.mxu1 }
 0x4a8   :  { %v7771_v49 = vadd.f32 %v2260_v23, %v7297_v18  ;;  %v7788_v23 = vadd.f32 %v2254_v12, %v7297_v18 }
 0x4a9   :  { %v7777_v56 = vpop.f32.mrf.mxu1  ;;  %2325 = vmax.xlane.f32.xlu0 %v2324_v11 }
 0x4aa   :  { %10275 = vst [vmem:[#allocation84_spill] sm:$0xff] %v7771_v49  ;;  %10277 = vst [vmem:[#allocation86_spill] sm:$0xff] %v7777_v56  ;;  %v2335_v45 = vsel %vm762_vm4, %v7771_v49, -inf  ;;  %v2331_v49 = vsel %vm762_vm4, %v7788_v23, -inf }
 0x4ab   :  { %v2336_v41 = vmax.f32 %v7765_v22, %v2335_v45  ;;  %v7782_v3 = vpop.f32.mrf.mxu1  ;;  %10279 = vst [vmem:[#allocation88_spill] sm:$0xff] %v7788_v23  ;;  %v1129_v45 = vadd.f32 %v7785_v61, %v1128_v50  ;;  %v2332_v12 = vmax.f32 %v7755_v8, %v2331_v49  ;;  %v7814_v61 = vpop.permute.xlu0 %3286 }
 0x4ac   :  { %10281 = vst [vmem:[#allocation90_spill] sm:$0xff] %v7814_v61 }
 0x4ad   :  { %v7792_v27 = vpop.f32.mrf.mxu1  ;;  %2337 = vmax.xlane.f32.xlu1 %v2336_v41  ;;  %1126 = vadd.xlane.f32.xlu0 %v1125_v13 }
 0x4af   :  { %v7794_v11 = vpop.f32.mrf.mxu1 }
 0x4b1   :  { %v7799_v7 = vpop.f32.mrf.mxu1  ;;  %1130 = vadd.xlane.f32.xlu0 %v1129_v45 }
 0x4b3   :  { %v7801_v22 = vpop.f32.mrf.mxu1 }
 0x4b5   :  { %v7804_v34 = vpop.f32.mrf.mxu1  ;;  %2333 = vmax.xlane.f32.xlu0 %v2332_v12 }
 0x4b6   :  { %10280 = vst [vmem:[#allocation89_spill] sm:$0xff] %v7804_v34 }
 0x4b7   :  { %v7806_v57 = vpop.f32.mrf.mxu1 }
 0x4b9   :  { %v7808_v41 = vpop.f32.mrf.mxu1 }
 0x4bb   :  { %v7810_v13 = vpop.f32.mrf.mxu1 }
 0x4bd   :  { %v7812_v50 = vpop.f32.mrf.mxu1 }
 0x4bf   :  { %v7816_v23 = vpop.f32.mrf.mxu1 }
 0x4c1   :  { %v2292_v45 = vpop.f32.mrf.mxu1 }
 0x4c3   :  { %v2293_v48 = vpop.f32.mrf.mxu1  ;;  %v965_v25 = vpop.xlane.xlu0 %964 }
 0x4c4   :  { %v1018_v49 = vsub.f32 %v7365_v30, %v965_v25  ;;  %v1019_v8 = vsub.f32 %v7419_v16, %v965_v25 }
 0x4c5   :  { %v7820_v12 = vpop.f32.mrf.mxu1 }
 0x4c6   :  { %v1064_v1 = vmul.f32 1.442695, %v1018_v49  ;;  %v1066_v28 = vmul.f32 1.442695, %v1019_v8 }
 0x4c7   :  { %v7822_v4 = vpop.f32.mrf.mxu1  ;;  %v969_v20 = vpop.xlane.xlu0 %968 }
 0x4c8   :  { %5910 = vpow2.f32 %v1066_v28  ;;  %v1020_v6 = vsub.f32 %v7373_v9, %v969_v20  ;;  %v1021_v61 = vsub.f32 %v7422_v29, %v969_v20 }
 0x4c9   :  { %v7826_v26 = vpop.f32.mrf.mxu1  ;;  %5912 = vpow2.f32 %v1064_v1 }
 0x4ca   :  { %10282 = vst [vmem:[#allocation91_spill] sm:$0xff] %v7826_v26  ;;  %v1068_v48 = vmul.f32 1.442695, %v1020_v6  ;;  %v1070_v45 = vmul.f32 1.442695, %v1021_v61 }
 0x4cb   :  { %v7828_v30 = vpop.f32.mrf.mxu1  ;;  %v973_v16 = vpop.xlane.xlu0 %972 }
 0x4cc   :  { %v1022_v25 = vsub.f32 %v7375_v2, %v973_v16  ;;  %v1023_v8 = vsub.f32 %v7440_v21, %v973_v16  ;;  %5914 = vpow2.f32 %v1068_v48 }
 0x4cd   :  { %v7832_v49 = vpop.f32.mrf.mxu1  ;;  %5916 = vpow2.f32 %v1070_v45 }
 0x4ce   :  { %10283 = vst [vmem:[#allocation92_spill] sm:$0xff] %v7832_v49  ;;  %v1074_v28 = vmul.f32 1.442695, %v1023_v8  ;;  %v1072_v29 = vmul.f32 1.442695, %v1022_v25 }
 0x4cf   :  { %v7834_v9 = vpop.f32.mrf.mxu1  ;;  %v977_v20 = vpop.xlane.xlu0 %976 }
 0x4d0   :  { %v1024_v1 = vsub.f32 %v7380_v44, %v977_v20  ;;  %v1025_v6 = vsub.f32 %v7453_v31, %v977_v20  ;;  %5918 = vpow2.f32 %v1074_v28 }
 0x4d1   :  { %v7838_v61 = vpop.f32.mrf.mxu1  ;;  %5920 = vpow2.f32 %v1072_v29 }
 0x4d2   :  { %v1076_v19 = vmul.f32 1.442695, %v1024_v1  ;;  %v1078_v2 = vmul.f32 1.442695, %v1025_v6  ;;  %v7862_v6 = vadd.f32 %v7782_v3, %v7297_v18  ;;  %v7878_v3 = vadd.f32 %v7794_v11, %v7297_v18 }
 0x4d3   :  { %v7840_v60 = vpop.f32.mrf.mxu1  ;;  %v981_v21 = vpop.xlane.xlu0 %980 }
 0x4d4   :  { %5922 = vpow2.f32 %v1076_v19  ;;  %v1026_v48 = vsub.f32 %v7382_v14, %v981_v21  ;;  %v1027_v45 = vsub.f32 %v7468_v51, %v981_v21  ;;  %10287 = vst [vmem:[#allocation96_spill] sm:$0xff] %v7862_v6  ;;  %10290 = vst [vmem:[#allocation99_spill] sm:$0xff] %v7878_v3 }
 0x4d5   :  { %v7844_v16 = vpop.f32.mrf.mxu1  ;;  %v7846_v25 = vpop.eup %5910  ;;  %5924 = vpow2.f32 %v1078_v2 }
 0x4d6   :  { %10284 = vst [vmem:[#allocation93_spill] sm:$0xff] %v7846_v25  ;;  %v7848_v31 = vpop.eup %5912  ;;  %v1080_v44 = vmul.f32 1.442695, %v1026_v48  ;;  %v1082_v8 = vmul.f32 1.442695, %v1027_v45  ;;  %v1132_v29 = vsel %vm762_vm4, %v7846_v25, 0.0  ;;  %v7869_v45 = vpop.permute.xlu1 %3288 }
 0x4d7   :  { %10285 = vst [vmem:[#allocation94_spill] sm:$0xff] %v7848_v31  ;;  %v7850_v28 = vpop.f32.mrf.mxu1  ;;  %v985_v20 = vpop.xlane.xlu0 %984  ;;  %v1133_v51 = vadd.f32 %v7848_v31, %v1132_v29  ;;  %10289 = vst [vmem:[#allocation98_spill] sm:$0xff] %v7869_v45 }
 0x4d8   :  { %5926 = vpow2.f32 %v1080_v44  ;;  %v1029_v14 = vsub.f32 %v7478_v58, %v985_v20  ;;  %v1028_v2 = vsub.f32 %v7387_v55, %v985_v20 }
 0x4d9   :  { %v7855_v19 = vpop.f32.mrf.mxu1  ;;  %5928 = vpow2.f32 %v1082_v8  ;;  %v7858_v1 = vpop.eup %5914  ;;  %1134 = vadd.xlane.f32.xlu0 %v1133_v51 }
 0x4da   :  { %10286 = vst [vmem:[#allocation95_spill] sm:$0xff] %v7858_v1  ;;  %v7867_v48 = vpop.eup %5916  ;;  %v1086_v58 = vmul.f32 1.442695, %v1029_v14  ;;  %v2339_v14 = vsel %vm762_vm4, %v7862_v6, -inf  ;;  %v1084_v51 = vmul.f32 1.442695, %v1028_v2  ;;  %v997_v25 = vpop.xlane.xlu1 %996 }
 0x4db   :  { %v7865_v21 = vpop.f32.mrf.mxu1  ;;  %10288 = vst [vmem:[#allocation97_spill] sm:$0xff] %v7867_v48  ;;  %v989_v44 = vpop.xlane.xlu0 %988  ;;  %v1136_v31 = vsel %vm762_vm4, %v7867_v48, 0.0 }
 0x4dc   :  { %v1031_v8 = vsub.f32 %v7492_v43, %v989_v44  ;;  %v1030_v55 = vsub.f32 %v7393_v38, %v989_v44  ;;  %v1137_v45 = vadd.f32 %v7858_v1, %v1136_v31  ;;  %5930 = vpow2.f32 %v1086_v58 }
 0x4dd   :  { %v7872_v29 = vpop.f32.mrf.mxu1  ;;  %v7881_v20 = vpop.eup %5918  ;;  %v2343_v31 = vsel %vm762_vm4, %v7878_v3, -inf  ;;  %5932 = vpow2.f32 %v1084_v51 }
 0x4de   :  { %10291 = vst [vmem:[#allocation100_spill] sm:$0xff] %v7881_v20  ;;  %v1090_v53 = vmul.f32 1.442695, %v1031_v8  ;;  %v7888_v37 = vpop.eup %5920  ;;  %1138 = vadd.xlane.f32.xlu0 %v1137_v45  ;;  %v1140_v2 = vsel %vm762_vm4, %v7881_v20, 0.0  ;;  %v1088_v58 = vmul.f32 1.442695, %v1030_v55  ;;  %v2340_v8 = vmax.f32 %v7777_v56, %v2339_v14 }
 0x4df   :  { %v7886_v43 = vpop.f32.mrf.mxu1  ;;  %v993_v48 = vpop.xlane.xlu0 %992  ;;  %10292 = vst [vmem:[#allocation101_spill] sm:$0xff] %v7888_v37  ;;  %v2344_v51 = vmax.f32 %v7792_v27, %v2343_v31 }
 0x4e0   :  { %v1032_v11 = vsub.f32 %v7398_v17, %v993_v48  ;;  %v1033_v38 = vsub.f32 %v7507_v63, %v993_v48  ;;  %v7905_v17 = vadd.f32 %v7801_v22, %v7297_v18  ;;  %v1035_v63 = vsub.f32 %v7425_v59, %v997_v25 }
 0x4e1   :  { %v7892_v44 = vpop.f32.mrf.mxu1  ;;  %v7896_v6 = vpop.eup %5922  ;;  %5934 = vpow2.f32 %v1090_v53 }
 0x4e2   :  { %10293 = vst [vmem:[#allocation102_spill] sm:$0xff] %v7892_v44  ;;  %10294 = vst [vmem:[#allocation103_spill] sm:$0xff] %v7896_v6  ;;  %v7901_v1 = vpop.eup %5924  ;;  %v1094_v48 = vmul.f32 1.442695, %v1033_v38  ;;  %v1092_v20 = vmul.f32 1.442695, %v1032_v11  ;;  %v1141_v44 = vadd.f32 %v7888_v37, %v1140_v2  ;;  %2341 = vmax.xlane.f32.xlu0 %v2340_v8  ;;  %5936 = vpow2.f32 %v1088_v58 }
 0x4e3   :  { %10295 = vst [vmem:[#allocation104_spill] sm:$0xff] %v7901_v1  ;;  %v7908_v45 = vpop.f32.mrf.mxu1  ;;  %v1001_v3 = vpop.xlane.xlu0 %1000  ;;  %v1144_v55 = vsel %vm762_vm4, %v7901_v1, 0.0  ;;  %v2347_v11 = vsel %vm762_vm4, %v7905_v17, -inf  ;;  %v7926_v38 = vadd.f32 %v7806_v57, %v7297_v18  ;;  %v1098_v8 = vmul.f32 1.442695, %v1035_v63 }
 0x4e4   :  { %v1037_v14 = vsub.f32 %v7522_v15, %v1001_v3  ;;  %v1145_v22 = vadd.f32 %v7896_v6, %v1144_v55  ;;  %1142 = vadd.xlane.f32.xlu1 %v1141_v44  ;;  %v1034_v15 = vsub.f32 %v7402_v0, %v997_v25  ;;  %5938 = vpow2.f32 %v1094_v48 }
 0x4e5   :  { %v7914_v56 = vpop.f32.mrf.mxu1  ;;  %v7917_v59 = vpop.eup %5926  ;;  %5940 = vpow2.f32 %v1092_v20  ;;  %v1036_v31 = vsub.f32 %v7407_v46, %v1001_v3  ;;  %v7936_v55 = vadd.f32 %v7810_v13, %v7297_v18  ;;  %v2348_v20 = vmax.f32 %v7799_v7, %v2347_v11 }
 0x4e6   :  { %10296 = vst [vmem:[#allocation105_spill] sm:$0xff] %v7914_v56  ;;  %10297 = vst [vmem:[#allocation106_spill] sm:$0xff] %v7917_v59  ;;  %v7920_v53 = vpop.eup %5928  ;;  %v1102_v6 = vmul.f32 1.442695, %v1037_v14  ;;  %1146 = vadd.xlane.f32.xlu0 %v1145_v22  ;;  %v1096_v25 = vmul.f32 1.442695, %v1034_v15  ;;  %5942 = vpow2.f32 %v1098_v8 }
 0x4e7   :  { %10298 = vst [vmem:[#allocation107_spill] sm:$0xff] %v7920_v53  ;;  %v7929_v2 = vpop.f32.mrf.mxu1  ;;  %v1005_v58 = vpop.xlane.xlu0 %1004  ;;  %v1148_v44 = vsel %vm762_vm4, %v7920_v53, 0.0  ;;  %v2351_v46 = vsel %vm762_vm4, %v7926_v38, -inf  ;;  %v1100_v3 = vmul.f32 1.442695, %v1036_v31  ;;  %v2355_v22 = vsel %vm762_vm4, %v7936_v55, -inf }
 0x4e8   :  { %2345 = vmax.xlane.f32.xlu1 %v2344_v51  ;;  %v1149_v0 = vadd.f32 %v7917_v59, %v1148_v44  ;;  %v1039_v13 = vsub.f32 %v7534_v39, %v1005_v58  ;;  %5944 = vpow2.f32 %v1102_v6  ;;  %v2352_v11 = vmax.f32 %v7804_v34, %v2351_v46  ;;  %v7959_v39 = vpop.xlane.xlu1 %1635 }
 0x4e9   :  { %v7938_v57 = vpop.f32.mrf.mxu1  ;;  %v7947_v14 = vpop.eup %5930  ;;  %5946 = vpow2.f32 %v1096_v25  ;;  %v1038_v15 = vsub.f32 %v7411_v62, %v1005_v58  ;;  %v2356_v59 = vmax.f32 %v7808_v41, %v2355_v22  ;;  %v7974_v58 = vadd.f32 %v7816_v23, %v7297_v18 }
 0x4ea   :  { %10299 = vst [vmem:[#allocation108_spill] sm:$0xff] %v7947_v14  ;;  %2349 = vmax.xlane.f32.xlu0 %v2348_v20  ;;  %v7957_v31 = vpop.eup %5932  ;;  %5948 = vpow2.f32 %v1100_v3  ;;  %v1106_v44 = vmul.f32 1.442695, %v1039_v13 }
 0x4eb   :  { %v7942_v63 = vpop.f32.mrf.mxu1  ;;  %v1620_v48 = vpop.xlane.xlu0 %1619  ;;  %10300 = vst [vmem:[#allocation109_spill] sm:$0xff] %v7957_v31  ;;  %10304 = vst [vmem:[#allocation113_spill] sm:$0xff] %v7974_v58  ;;  %v1104_v46 = vmul.f32 1.442695, %v1038_v15 }
 0x4ec   :  { %1150 = vadd.xlane.f32.xlu1 %v1149_v0  ;;  %v1152_v0 = vsel %vm762_vm4, %v7947_v14, 0.0  ;;  %v7983_v14 = vadd.f32 %v7822_v4, %v7297_v18  ;;  %5950 = vpow2.f32 %v1106_v44  ;;  %v1685_v37 = vsub.f32 %v7427_v52, %v1620_v48 }
 0x4ed   :  { %v7951_v51 = vpop.f32.mrf.mxu1  ;;  %v1153_v3 = vadd.f32 %v7957_v31, %v1152_v0  ;;  %v7993_v31 = vpop.xlane.xlu1 %1639  ;;  %5952 = vpow2.f32 %v1104_v46 }
 0x4ee   :  { %v7966_v20 = vpop.eup %5934  ;;  %2353 = vmax.xlane.f32.xlu0 %v2352_v11 }
 0x4ef   :  { %v7955_v8 = vpop.f32.mrf.mxu1  ;;  %v7962_v6 = vpop.xlane.xlu0 %1623  ;;  %10301 = vst [vmem:[#allocation110_spill] sm:$0xff] %v7966_v20  ;;  %v1156_v53 = vsel %vm762_vm4, %v7966_v20, 0.0 }
 0x4f0   :  { %2357 = vmax.xlane.f32.xlu1 %v2356_v59  ;;  %v7970_v62 = vpop.eup %5936  ;;  %v1686_v59 = vsub.f32 %v7543_v24, %v1620_v48  ;;  %v2359_v24 = vsel %vm762_vm4, %v7974_v58, -inf  ;;  %v1688_v44 = vsub.f32 %v7555_v36, %v7962_v6 }
 0x4f1   :  { %v7968_v25 = vpop.f32.mrf.mxu1  ;;  %10303 = vst [vmem:[#allocation112_spill] sm:$0xff] %v7970_v62  ;;  %v7979_v22 = vpop.eup %5938 }
 0x4f2   :  { %10302 = vst [vmem:[#allocation111_spill] sm:$0xff] %v7968_v25  ;;  %10305 = vst [vmem:[#allocation114_spill] sm:$0xff] %v7979_v22  ;;  %v7988_v23 = vpop.eup %5940  ;;  %1154 = vadd.xlane.f32.xlu0 %v1153_v3  ;;  %v1160_v4 = vsel %vm762_vm4, %v7979_v22, 0.0  ;;  %v1157_v3 = vadd.f32 %v7970_v62, %v1156_v53  ;;  %v1721_v1 = vmul.f32 1.442695, %v1686_v59  ;;  %v2360_v62 = vmax.f32 %v7812_v50, %v2359_v24  ;;  %v8032_v24 = vpop.xlane.xlu1 %1643 }
 0x4f3   :  { %v7977_v13 = vpop.f32.mrf.mxu1  ;;  %v1628_v11 = vpop.xlane.xlu0 %1627  ;;  %10306 = vst [vmem:[#allocation115_spill] sm:$0xff] %v7988_v23  ;;  %v1161_v48 = vadd.f32 %v7988_v23, %v1160_v4  ;;  %v8019_v59 = vadd.f32 %v7828_v30, %v7297_v18  ;;  %v1725_v4 = vmul.f32 1.442695, %v1688_v44 }
 0x4f4   :  { %v1690_v15 = vsub.f32 %v7567_v47, %v1628_v11  ;;  %v2973_v47 = vsel %vm762_vm4, %v7983_v14, -inf  ;;  %v1689_v52 = vsub.f32 %v7455_v40, %v1628_v11  ;;  %v8009_v34 = vpop.eup %5942  ;;  %v1719_v40 = vmul.f32 1.442695, %v1685_v37 }
 0x4f5   :  { %v7991_v0 = vpop.f32.mrf.mxu1  ;;  %10308 = vst [vmem:[#allocation117_spill] sm:$0xff] %v8009_v34  ;;  %v8014_v53 = vpop.eup %5944  ;;  %10311 = vst [vmem:[#allocation120_spill] sm:$0xff] %v8019_v59  ;;  %1162 = vadd.xlane.f32.xlu1 %v1161_v48  ;;  %v2974_v11 = vmax.f32 %v7820_v12, %v2973_v47  ;;  %5954 = vpow2.f32 %v1721_v1  ;;  %v2977_v1 = vsel %vm762_vm4, %v8019_v59, -inf }
 0x4f6   :  { %10307 = vst [vmem:[#allocation116_spill] sm:$0xff] %v7991_v0  ;;  %v1729_v58 = vmul.f32 1.442695, %v1690_v15  ;;  %1158 = vadd.xlane.f32.xlu0 %v1157_v3  ;;  %10310 = vst [vmem:[#allocation119_spill] sm:$0xff] %v8014_v53  ;;  %v8024_v15 = vadd.f32 %v7834_v9, %v7297_v18  ;;  %v8030_v23 = vpop.eup %5946  ;;  %v1727_v30 = vmul.f32 1.442695, %v1689_v52 }
 0x4f7   :  { %v8003_v20 = vpop.f32.mrf.mxu1  ;;  %v1632_v22 = vpop.xlane.xlu0 %1631  ;;  %10313 = vst [vmem:[#allocation122_spill] sm:$0xff] %v8030_v23  ;;  %v1164_v9 = vsel %vm762_vm4, %v8009_v34, 0.0  ;;  %v1168_v44 = vsel %vm762_vm4, %v8014_v53, 0.0 }
 0x4f8   :  { %v1692_v46 = vsub.f32 %v7579_v5, %v1632_v22  ;;  %10312 = vst [vmem:[#allocation121_spill] sm:$0xff] %v8024_v15  ;;  %v1687_v5 = vsub.f32 %v7444_v33, %v7962_v6  ;;  %v1691_v37 = vsub.f32 %v7470_v35, %v1632_v22  ;;  %v8039_v47 = vpop.eup %5948  ;;  %5956 = vpow2.f32 %v1729_v58 }
 0x4f9   :  { %v8012_v36 = vpop.f32.mrf.mxu1  ;;  %10314 = vst [vmem:[#allocation123_spill] sm:$0xff] %v8039_v47  ;;  %5958 = vpow2.f32 %v1719_v40  ;;  %2975 = vmax.xlane.f32.xlu1 %v2974_v11  ;;  %v2981_v35 = vsel %vm762_vm4, %v8024_v15, -inf  ;;  %v1165_v52 = vadd.f32 %v8030_v23, %v1164_v9  ;;  %v1169_v53 = vadd.f32 %v8039_v47, %v1168_v44  ;;  %v8059_v11 = vpop.eup %5950  ;;  %v10318_v9 = vld [vmem:[#allocation30_spill] sm:$0xff] }
 0x4fa   :  { %10309 = vst [vmem:[#allocation118_spill] sm:$0xff] %v8012_v36  ;;  %v1733_v33 = vmul.f32 1.442695, %v1692_v46  ;;  %2361 = vmax.xlane.f32.xlu0 %v2360_v62  ;;  %v1723_v22 = vmul.f32 1.442695, %v1687_v5  ;;  %5960 = vpow2.f32 %v1725_v4  ;;  %v1694_v62 = vsub.f32 %v7487_v54, %v7959_v39  ;;  %v8054_v46 = vpop.xlane.xlu1 %1655  ;;  %10315 = vst [vmem:[#allocation124_spill] sm:$0xff] %v8059_v11 }
 0x4fb   :  { %v8028_v3 = vpop.f32.mrf.mxu1  ;;  %v8035_v48 = vpop.xlane.xlu0 %1647  ;;  %5962 = vpow2.f32 %v1727_v30  ;;  %v1731_v34 = vmul.f32 1.442695, %v1691_v37  ;;  %v8063_v5 = vadd.f32 %v7850_v28, %v7297_v18  ;;  %v2978_v54 = vmax.f32 %v7826_v26, %v2977_v1 }
 0x4fc   :  { %5964 = vpow2.f32 %v1733_v33  ;;  %v2982_v30 = vmax.f32 %v7832_v49, %v2981_v35  ;;  %v8071_v37 = vadd.f32 %v7840_v60, %v7297_v18  ;;  %v1693_v44 = vsub.f32 %v10318_v9, %v7959_v39  ;;  %v8077_v28 = vpop.eup %5952  ;;  %v10321_v35 = vld [vmem:[#allocation32_spill] sm:$0xff] }
 0x4fd   :  { %v8041_v6 = vpop.f32.mrf.mxu1  ;;  %10316 = vst [vmem:[#allocation125_spill] sm:$0xff] %v8063_v5  ;;  %1170 = vadd.xlane.f32.xlu1 %v1169_v53  ;;  %5966 = vpow2.f32 %v1723_v22  ;;  %10319 = vst [vmem:[#allocation30_spill] sm:$0xff] %v8077_v28  ;;  %v1737_v33 = vmul.f32 1.442695, %v1694_v62  ;;  %v1172_v60 = vsel %vm762_vm4, %v8059_v11, 0.0  ;;  %v2989_v39 = vsel %vm762_vm4, %v8063_v5, -inf }
 0x4fe   :  { %1166 = vadd.xlane.f32.xlu0 %v1165_v52  ;;  %v10320_v52 = vld [vmem:[#allocation34_spill] sm:$0xff]  ;;  %v8081_v1 = vpop.xlane.xlu1 %1663  ;;  %5968 = vpow2.f32 %v1731_v34  ;;  %v1696_v22 = vsub.f32 %v10321_v35, %v7993_v31  ;;  %v8093_v62 = vadd.f32 %v7865_v21, %v7297_v18  ;;  %v1735_v34 = vmul.f32 1.442695, %v1693_v44  ;;  %v10324_v11 = vld [vmem:[#allocation33_spill] sm:$0xff] }
 0x4ff   :  { %v8050_v58 = vpop.f32.mrf.mxu1  ;;  %v8057_v40 = vpop.xlane.xlu0 %1651  ;;  %v1698_v23 = vsub.f32 %v10320_v52, %v8032_v24  ;;  %v10323_v52 = vld [vmem:[#allocation31_spill] sm:$0xff]  ;;  %v1697_v49 = vsub.f32 %v10324_v11, %v8032_v24  ;;  %v1173_v5 = vadd.f32 %v8077_v28, %v1172_v60  ;;  %v2985_v35 = vsel %vm762_vm4, %v8071_v37, -inf }
 0x500   :  { %10322 = vst [vmem:[#allocation34_spill] sm:$0xff] %v8093_v62  ;;  %v1695_v15 = vsub.f32 %v10323_v52, %v7993_v31  ;;  %5970 = vpow2.f32 %v1737_v33  ;;  %v2990_v21 = vmax.f32 %v7844_v16, %v2989_v39  ;;  %v2993_v31 = vsel %vm762_vm4, %v8093_v62, -inf }
 0x501   :  { %v8065_v4 = vpop.f32.mrf.mxu1  ;;  %2983 = vmax.xlane.f32.xlu1 %v2982_v30  ;;  %v1741_v30 = vmul.f32 1.442695, %v1696_v22  ;;  %v2986_v33 = vmax.f32 %v7838_v61, %v2985_v35  ;;  %5972 = vpow2.f32 %v1735_v34  ;;  %v1743_v39 = vmul.f32 1.442695, %v1697_v49 }
 0x502   :  { %10317 = vst [vmem:[#allocation126_spill] sm:$0xff] %v8065_v4  ;;  %2979 = vmax.xlane.f32.xlu0 %v2978_v54  ;;  %v1745_v54 = vmul.f32 1.442695, %v1698_v23  ;;  %v8107_v26 = vpop.eup %5954  ;;  %v8113_v11 = vpop.xlane.xlu1 %1667  ;;  %v1739_v23 = vmul.f32 1.442695, %v1695_v15  ;;  %v8135_v34 = vadd.f32 %v7886_v43, %v7297_v18 }
 0x503   :  { %v8075_v47 = vpop.f32.mrf.mxu1  ;;  %v8083_v53 = vpop.xlane.xlu0 %1659  ;;  %10325 = vst [vmem:[#allocation32_spill] sm:$0xff] %v8107_v26 }
 0x504   :  { %5974 = vpow2.f32 %v1745_v54 }
 0x505   :  { %v8095_v9 = vpop.f32.mrf.mxu1  ;;  %v8111_v24 = vpop.eup %5956  ;;  %2991 = vmax.xlane.f32.xlu1 %v2990_v21  ;;  %v1787_v21 = vsel %vm762_vm4, %v8107_v26, 0.0  ;;  %5976 = vpow2.f32 %v1741_v30 }
 0x506   :  { %1174 = vadd.xlane.f32.xlu0 %v1173_v5  ;;  %10326 = vst [vmem:[#allocation31_spill] sm:$0xff] %v8111_v24  ;;  %v8117_v52 = vpop.eup %5958  ;;  %v2994_v5 = vmax.f32 %v7855_v19, %v2993_v31  ;;  %v1795_v15 = vsel %vm762_vm4, %v8111_v24, 0.0  ;;  %v8137_v35 = vpop.xlane.xlu1 %1675  ;;  %5978 = vpow2.f32 %v1743_v39  ;;  %v8153_v39 = vadd.f32 %v7908_v45, %v7297_v18  ;;  %v10335_v45 = vld [vmem:[#allocation35_spill] sm:$0xff] }
 0x507   :  { %v8102_v59 = vpop.f32.mrf.mxu1  ;;  %v8115_v60 = vpop.xlane.xlu0 %1671  ;;  %10327 = vst [vmem:[#allocation33_spill] sm:$0xff] %v8117_v52  ;;  %v1788_v54 = vadd.f32 %v8117_v52, %v1787_v21  ;;  %5980 = vpow2.f32 %v1739_v23  ;;  %v8165_v21 = vadd.f32 %v7929_v2, %v7297_v18 }
 0x508   :  { %v8120_v28 = vpop.eup %5960 }
 0x509   :  { %v2970_v44 = vpop.f32.mrf.mxu1  ;;  %10328 = vst [vmem:[#allocation127_spill] sm:$0xff] %v8120_v28  ;;  %v8127_v62 = vpop.eup %5962  ;;  %2995 = vmax.xlane.f32.xlu1 %v2994_v5  ;;  %v1791_v43 = vsel %vm762_vm4, %v8120_v28, 0.0  ;;  %v2997_v5 = vsel %vm762_vm4, %v8135_v34, -inf }
 0x50a   :  { %v1702_v44 = vsub.f32 %v7604_v42, %v8057_v40  ;;  %10329 = vst [vmem:[#allocation128_spill] sm:$0xff] %v8127_v62  ;;  %2987 = vmax.xlane.f32.xlu0 %v2986_v33  ;;  %v8131_v49 = vpop.eup %5964  ;;  %v1701_v42 = vsub.f32 %v7536_v32, %v8057_v40  ;;  %v10333_v32 = vld [vmem:[#allocation43_spill] sm:$0xff]  ;;  %v2998_v2 = vmax.f32 %v7872_v29, %v2997_v5 }
 0x50b   :  { %v2971_v22 = vpop.f32.mrf.mxu1  ;;  %10330 = vst [vmem:[#allocation129_spill] sm:$0xff] %v8131_v49  ;;  %v8142_v30 = vpop.eup %5966  ;;  %v1700_v40 = vsub.f32 %v10333_v32, %v8035_v48  ;;  %v1799_v23 = vsel %vm762_vm4, %v8131_v49, 0.0  ;;  %10334 = vst [vmem:[#allocation43_spill] sm:$0xff] %v8165_v21 }
 0x50c   :  { %10331 = vst [vmem:[#allocation130_spill] sm:$0xff] %v8142_v30  ;;  %v1753_v31 = vmul.f32 1.442695, %v1702_v44  ;;  %v8144_v33 = vpop.xlane.xlu0 %1679  ;;  %v1796_v22 = vadd.f32 %v8127_v62, %v1795_v15  ;;  %v8149_v24 = vpop.eup %5968  ;;  %v1699_v15 = vsub.f32 %v10335_v45, %v8035_v48  ;;  %v1751_v62 = vmul.f32 1.442695, %v1701_v42  ;;  %v10339_v45 = vld [vmem:[#allocation102_spill] sm:$0xff] }
 0x50d   :  { %10332 = vst [vmem:[#allocation131_spill] sm:$0xff] %v8149_v24  ;;  %v8161_v44 = vpop.xlane.xlu1 %1683  ;;  %v1792_v32 = vadd.f32 %v8142_v30, %v1791_v43  ;;  %v1800_v49 = vadd.f32 %v8149_v24, %v1799_v23  ;;  %v8173_v52 = vpop.eup %5970  ;;  %v1749_v28 = vmul.f32 1.442695, %v1700_v40  ;;  %v3005_v42 = vsel %vm762_vm4, %v8165_v21, -inf  ;;  %v10342_v21 = vld [vmem:[#allocation36_spill] sm:$0xff] }
 0x50e   :  { %1789 = vadd.xlane.f32.xlu0 %v1788_v54  ;;  %1797 = vadd.xlane.f32.xlu1 %v1796_v22  ;;  %5982 = vpow2.f32 %v1753_v31  ;;  %v1706_v54 = vsub.f32 %v7615_v10, %v8083_v53  ;;  %10336 = vst [vmem:[#allocation35_spill] sm:$0xff] %v8173_v52  ;;  %v3001_v22 = vsel %vm762_vm4, %v8153_v39, -inf  ;;  %v1747_v10 = vmul.f32 1.442695, %v1699_v15  ;;  %v10337_v31 = vld [vmem:[#allocation38_spill] sm:$0xff]  ;;  %v8186_v23 = vpop.eup %5972 }
 0x50f   :  { %5984 = vpow2.f32 %v1751_v62  ;;  %v1705_v43 = vsub.f32 %v10337_v31, %v8083_v53  ;;  %10338 = vst [vmem:[#allocation38_spill] sm:$0xff] %v8186_v23  ;;  %v3002_v40 = vmax.f32 %v10339_v45, %v3001_v22  ;;  %v1703_v15 = vsub.f32 %v10342_v21, %v8054_v46 }
 0x510   :  { %v8178_v26 = vpop.xlane.xlu0 %2297  ;;  %v1761_v24 = vmul.f32 1.442695, %v1706_v54  ;;  %5986 = vpow2.f32 %v1749_v28  ;;  %v3006_v53 = vmax.f32 %v7914_v56, %v3005_v42  ;;  %v8202_v22 = vadd.f32 %v7942_v63, %v7297_v18  ;;  %v10347_v63 = vld [vmem:[#allocation48_spill] sm:$0xff] }
 0x511   :  { %v8193_v30 = vpop.eup %5974  ;;  %5988 = vpow2.f32 %v1747_v10  ;;  %v1712_v42 = vsub.f32 %v10347_v63, %v8115_v60  ;;  %v10350_v63 = vld [vmem:[#allocation44_spill] sm:$0xff] }
 0x512   :  { %1793 = vadd.xlane.f32.xlu0 %v1792_v32  ;;  %1801 = vadd.xlane.f32.xlu1 %v1800_v49  ;;  %v8180_v48 = vpop.xlane.xlu1 %2301  ;;  %v10340_v32 = vld [vmem:[#allocation37_spill] sm:$0xff]  ;;  %v1803_v49 = vsel %vm762_vm4, %v8173_v52, 0.0  ;;  %10341 = vst [vmem:[#allocation102_spill] sm:$0xff] %v8193_v30  ;;  %v8197_v62 = vpop.eup %5976  ;;  %10344 = vst [vmem:[#allocation36_spill] sm:$0xff] %v8202_v22  ;;  %5990 = vpow2.f32 %v1761_v24  ;;  %v1755_v52 = vmul.f32 1.442695, %v1703_v15  ;;  %v1711_v15 = vsub.f32 %v10350_v63, %v8115_v60 }
 0x513   :  { %v1704_v5 = vsub.f32 %v10340_v32, %v8054_v46  ;;  %10343 = vst [vmem:[#allocation37_spill] sm:$0xff] %v8197_v62  ;;  %v8210_v32 = vadd.f32 %v7977_v13, %v7297_v18  ;;  %v1759_v46 = vmul.f32 1.442695, %v1705_v43  ;;  %v1804_v28 = vadd.f32 %v8186_v23, %v1803_v49  ;;  %v8213_v21 = vpop.eup %5978  ;;  %v10349_v43 = vld [vmem:[#allocation40_spill] sm:$0xff]  ;;  %v10351_v23 = vld [vmem:[#allocation51_spill] sm:$0xff] }
 0x514   :  { %10346 = vst [vmem:[#allocation133_spill] sm:$0xff] %v8213_v21  ;;  %v8219_v56 = vpop.eup %5980  ;;  %v1807_v13 = vsel %vm762_vm4, %v8197_v62, 0.0  ;;  %v3009_v10 = vsel %vm762_vm4, %v8202_v22, -inf  ;;  %v1716_v22 = vsub.f32 %v10351_v23, %v8144_v33 }
 0x515   :  { %10345 = vst [vmem:[#allocation132_spill] sm:$0xff] %v8210_v32  ;;  %10348 = vst [vmem:[#allocation48_spill] sm:$0xff] %v8219_v56  ;;  %v3017_v49 = vsel %vm762_vm4, %v8210_v32, -inf  ;;  %5992 = vpow2.f32 %v1759_v46  ;;  %v1808_v62 = vadd.f32 %v8219_v56, %v1807_v13  ;;  %v8241_v32 = vadd.f32 %v7955_v8, %v7297_v18  ;;  %v10353_v46 = vld [vmem:[#allocation39_spill] sm:$0xff]  ;;  %v10354_v13 = vld [vmem:[#allocation42_spill] sm:$0xff] }
 0x516   :  { %2999 = vmax.xlane.f32.xlu0 %v2998_v2  ;;  %3003 = vmax.xlane.f32.xlu1 %v3002_v40  ;;  %v8204_v54 = vpop.xlane.xlu0 %2305  ;;  %v1757_v2 = vmul.f32 1.442695, %v1704_v5  ;;  %v1811_v40 = vsel %vm762_vm4, %v8193_v30, 0.0  ;;  %v1708_v5 = vsub.f32 %v10349_v43, %v8081_v1  ;;  %v1773_v30 = vmul.f32 1.442695, %v1712_v42 }
 0x517   :  { %10352 = vst [vmem:[#allocation40_spill] sm:$0xff] %v8241_v32  ;;  %v3010_v60 = vmax.f32 %v7938_v57, %v3009_v10  ;;  %v1710_v63 = vsub.f32 %v10354_v13, %v8113_v11  ;;  %v8255_v10 = vadd.f32 %v8028_v3, %v7297_v18 }
 0x518   :  { %5994 = vpow2.f32 %v1757_v2  ;;  %v1707_v2 = vsub.f32 %v10353_v46, %v8081_v1  ;;  %v1765_v42 = vmul.f32 1.442695, %v1708_v5  ;;  %v1781_v1 = vmul.f32 1.442695, %v1716_v22 }
 0x519   :  { %5996 = vpow2.f32 %v1755_v52  ;;  %v10355_v52 = vld [vmem:[#allocation47_spill] sm:$0xff]  ;;  %10356 = vst [vmem:[#allocation44_spill] sm:$0xff] %v8255_v10  ;;  %v3013_v5 = vsel %vm762_vm4, %v8241_v32, -inf }
 0x51a   :  { %v8206_v31 = vpop.xlane.xlu1 %2309  ;;  %3007 = vmax.xlane.f32.xlu0 %v3006_v53  ;;  %1805 = vadd.xlane.f32.xlu1 %v1804_v28  ;;  %v1812_v53 = vadd.f32 %v8213_v21, %v1811_v40  ;;  %v3018_v40 = vmax.f32 %v7968_v25, %v3017_v49  ;;  %v1771_v21 = vmul.f32 1.442695, %v1711_v15  ;;  %v1715_v56 = vsub.f32 %v10355_v52, %v8144_v33  ;;  %v10357_v15 = vld [vmem:[#allocation41_spill] sm:$0xff] }
 0x51b   :  { %v8237_v28 = vpop.eup %5982  ;;  %v1763_v33 = vmul.f32 1.442695, %v1707_v2  ;;  %v3014_v46 = vmax.f32 %v7951_v51, %v3013_v5  ;;  %v10362_v5 = vld [vmem:[#allocation46_spill] sm:$0xff] }
 0x51c   :  { %v8251_v8 = vpop.eup %5984 }
 0x51d   :  { %v8261_v49 = vpop.eup %5986 }
 0x51e   :  { %v8227_v24 = vpop.xlane.xlu0 %2313  ;;  %v1111_v43 = vpop.xlane.xlu1 %1110  ;;  %1813 = vadd.xlane.f32.xlu0 %v1812_v53  ;;  %1809 = vadd.xlane.f32.xlu1 %v1808_v62  ;;  %v1819_v62 = vsel %vm762_vm4, %v8237_v28, 0.0  ;;  %v1709_v53 = vsub.f32 %v10357_v15, %v8113_v11  ;;  %v8277_v11 = vadd.f32 %v8003_v20, %v7297_v18 }
 0x51f   :  { %5998 = vrcp.f32 %v1111_v43  ;;  %v1820_v22 = vadd.f32 %v8251_v8, %v1819_v62  ;;  %v8268_v43 = vpop.eup %5988 }
 0x520   :  { %6000 = vpow2.f32 %v1773_v30  ;;  %v1779_v30 = vmul.f32 1.442695, %v1715_v56  ;;  %v8273_v2 = vpop.eup %5990  ;;  %10359 = vst [vmem:[#allocation39_spill] sm:$0xff] %v8277_v11  ;;  %v1815_v56 = vsel %vm762_vm4, %v8261_v49, 0.0  ;;  %v3021_v62 = vsel %vm762_vm4, %v8277_v11, -inf }
 0x521   :  { %10358 = vst [vmem:[#allocation51_spill] sm:$0xff] %v8273_v2  ;;  %v1816_v20 = vadd.f32 %v8268_v43, %v1815_v56  ;;  %v1827_v52 = vsel %vm762_vm4, %v8273_v2, 0.0  ;;  %v10372_v2 = vld [vmem:[#allocation67_spill] sm:$0xff] }
 0x522   :  { %v1115_v23 = vpop.xlane.xlu0 %1114  ;;  %3019 = vmax.xlane.f32.xlu0 %v3018_v40  ;;  %3011 = vmax.xlane.f32.xlu1 %v3010_v60  ;;  %v1769_v40 = vmul.f32 1.442695, %v1710_v63  ;;  %v8282_v13 = vpop.eup %5992  ;;  %v8286_v63 = vadd.f32 %v8075_v47, %v7297_v18  ;;  %v10363_v47 = vld [vmem:[#allocation45_spill] sm:$0xff] }
 0x523   :  { %6002 = vrcp.f32 %v1115_v23  ;;  %v3025_v23 = vsel %vm762_vm4, %v8255_v10, -inf  ;;  %10360 = vst [vmem:[#allocation42_spill] sm:$0xff] %v8282_v13  ;;  %v10368_v10 = vld [vmem:[#allocation65_spill] sm:$0xff] }
 0x524   :  { %6004 = vpow2.f32 %v1765_v42  ;;  %v3026_v42 = vmax.f32 %v8012_v36, %v3025_v23  ;;  %10361 = vst [vmem:[#allocation47_spill] sm:$0xff] %v8286_v63  ;;  %v3022_v23 = vmax.f32 %v7991_v0, %v3021_v62  ;;  %v3033_v56 = vsel %vm762_vm4, %v8286_v63, -inf  ;;  %v10367_v62 = vld [vmem:[#allocation49_spill] sm:$0xff] }
 0x525   :  { %6006 = vpow2.f32 %v1771_v21  ;;  %v1767_v21 = vmul.f32 1.442695, %v1709_v53  ;;  %v1713_v53 = vsub.f32 %v10363_v47, %v8137_v35  ;;  %v1717_v47 = vsub.f32 %v10367_v62, %v8161_v44 }
 0x526   :  { %v8265_v3 = vpop.xlane.xlu0 %2317  ;;  %6008 = vpow2.f32 %v1781_v1  ;;  %1821 = vadd.xlane.f32.xlu0 %v1820_v22  ;;  %3015 = vmax.xlane.f32.xlu1 %v3014_v46  ;;  %v8291_v1 = vpop.eup %5994  ;;  %v1828_v46 = vadd.f32 %v8282_v13, %v1827_v52  ;;  %v3034_v36 = vmax.f32 %v8065_v4, %v3033_v56 }
 0x527   :  { %6010 = vpow2.f32 %v1763_v33  ;;  %v1714_v33 = vsub.f32 %v10362_v5, %v8137_v35  ;;  %v8297_v15 = vpop.eup %5996  ;;  %v1775_v5 = vmul.f32 1.442695, %v1713_v53 }
 0x528   :  { %6012 = vpow2.f32 %v1779_v30  ;;  %v8303_v30 = vadd.f32 %v8050_v58, %v7297_v18  ;;  %v10366_v58 = vld [vmem:[#allocation50_spill] sm:$0xff] }
 0x529   :  { %6014 = vpow2.f32 %v1769_v40 }
 0x52a   :  { %v1119_v60 = vpop.xlane.xlu0 %1118  ;;  %3027 = vmax.xlane.f32.xlu0 %v3026_v42  ;;  %6016 = vpow2.f32 %v1767_v21  ;;  %10364 = vst [vmem:[#allocation41_spill] sm:$0xff] %v8303_v30  ;;  %1817 = vadd.xlane.f32.xlu1 %v1816_v20  ;;  %v1823_v21 = vsel %vm762_vm4, %v8291_v1, 0.0  ;;  %v1777_v42 = vmul.f32 1.442695, %v1714_v33  ;;  %v1718_v20 = vsub.f32 %v10366_v58, %v8161_v44 }
 0x52b   :  { %6018 = vrcp.f32 %v1119_v60  ;;  %v3029_v52 = vsel %vm762_vm4, %v8303_v30, -inf  ;;  %v1824_v33 = vadd.f32 %v8297_v15, %v1823_v21  ;;  %v10370_v30 = vld [vmem:[#allocation55_spill] sm:$0xff]  ;;  %v1783_v21 = vmul.f32 1.442695, %v1717_v47 }
 0x52c   :  { %v5999_v40 = vpop.eup %5998  ;;  %v2364_v13 = vsub.f32 %v10370_v30, %v8178_v26  ;;  %v1785_v56 = vmul.f32 1.442695, %v1718_v20  ;;  %v3030_v30 = vmax.f32 %v8041_v6, %v3029_v52  ;;  %v10375_v52 = vld [vmem:[#allocation20_spill] sm:$0xff] }
 0x52d   :  { %v8311_v35 = vpop.eup %6000  ;;  %v1194_v58 = vmul.f32 %v5999_v40, %v10368_v10 }
 0x52e   :  { %v1123_v22 = vpop.xlane.xlu0 %1122  ;;  %10365 = vst [vmem:[#allocation46_spill] sm:$0xff] %v8311_v35  ;;  %1829 = vadd.xlane.f32.xlu0 %v1828_v46  ;;  %3023 = vmax.xlane.f32.xlu1 %v3022_v23  ;;  %v10369_v46 = vld [vmem:[#allocation69_spill] sm:$0xff]  ;;  %v1839_v44 = vsel %vm762_vm4, %v8311_v35, 0.0  ;;  %v10371_v23 = vld [vmem:[#allocation63_spill] sm:$0xff] }
 0x52f   :  { %6020 = vrcp.f32 %v1123_v22  ;;  %v1193_v62 = vmul.f32 %v5999_v40, %v10371_v23  ;;  %v10373_v40 = vld [vmem:[#allocation53_spill] sm:$0xff] }
 0x530   :  { %v6003_v60 = vpop.eup %6002  ;;  %6022 = vpow2.f32 %v1777_v42  ;;  %v2363_v42 = vsub.f32 %v10373_v40, %v8178_v26  ;;  %v10376_v26 = vmov 0  }
 0x531   :  { %v8321_v63 = vpop.eup %6004  ;;  %v1196_v25 = vmul.f32 %v6003_v60, %v10369_v46  ;;  %v1195_v0 = vmul.f32 %v6003_v60, %v10372_v2  ;;  %6024 = vpow2.f32 %v1775_v5  ;;  %v10374_v60 = vld [vmem:[#allocation57_spill] sm:$0xff] }
 0x532   :  { %v8319_v22 = vpop.xlane.xlu0 %2325  ;;  %v8327_v53 = vpop.eup %6006  ;;  %3035 = vmax.xlane.f32.xlu0 %v3034_v36  ;;  %1825 = vadd.xlane.f32.xlu1 %v1824_v33  ;;  %v2399_v36 = vmul.f32 1.442695, %v2364_v13  ;;  %6026 = vpow2.f32 %v1785_v56  ;;  %v2366_v5 = vsub.f32 %v10374_v60, %v8180_v48  ;;  %v2397_v23 = vmul.f32 1.442695, %v2363_v42  ;;  %v10380_v42 = vld [vmem:[#allocation75_spill] sm:$0xff] }
 0x533   :  { %v8335_v32 = vpop.eup %6008  ;;  %v1228_v10 = vpack.c.bf16 %v1196_v25, %v1194_v58  ;;  %v1227_v46 = vpack.c.bf16 %v1195_v0, %v1193_v62  ;;  %v1840_v35 = vadd.f32 %v8327_v53, %v1839_v44  ;;  %v1831_v25 = vsel %vm762_vm4, %v8321_v63, 0.0  ;;  %v10377_v62 = vld [vmem:[#allocation56_spill] sm:$0xff] }
 0x534   :  { %v8337_v11 = vpop.eup %6010  ;;  %v1847_v0 = vsel %vm762_vm4, %v8335_v32, 0.0  ;;  %6028 = vpow2.f32 %v1783_v21  ;;  %v8366_v21 = vadd.f32 %v8102_v59, %v7297_v18 }
 0x535   :  { %5270 = vmatprep.mubr.msk.bf16.mxu0 %vm762_vm4, %v1228_v10  ;;  %v8342_v2 = vpop.eup %6012  ;;  %v1832_v33 = vadd.f32 %v8337_v11, %v1831_v25 }
 0x536   :  { %v1127_v4 = vpop.xlane.xlu0 %1126  ;;  %1335 = vmatmul.mubr.bf16.vlgmr.msra.gmra.mxu0 %v1227_v46  ;;  %v8350_v20 = vpop.eup %6014  ;;  %1841 = vadd.xlane.f32.xlu0 %v1840_v35  ;;  %v1848_v58 = vadd.f32 %v8342_v2, %v1847_v0  ;;  %v2365_v35 = vsub.f32 %v10377_v62, %v8180_v48  ;;  %v2403_v46 = vmul.f32 1.442695, %v2366_v5  ;;  %v10382_v0 = vld [vmem:[#allocation77_spill] sm:$0xff]  ;;  %v10384_v62 = vld [vmem:[#allocation22_spill] sm:$0xff] }
 0x537   :  { %1981 = vmatpush1.bf16.msra.mxu0 %v10375_v52  ;;  %3031 = vmax.xlane.f32.xlu1 %v3030_v30  ;;  %v8356_v47 = vpop.eup %6016  ;;  %6030 = vrcp.f32 %v1127_v4  ;;  %v1835_v56 = vsel %vm762_vm4, %v8350_v20, 0.0  ;;  %v10378_v4 = vld [vmem:[#allocation21_spill] sm:$0xff]  ;;  %v10379_v30 = vld [vmem:[#allocation72_spill] sm:$0xff] }
 0x538   :  { %1982 = vmatprep.subr.bf16.mxu0 %v10376_v26  ;;  %v6019_v44 = vpop.eup %6018  ;;  %6032 = vpow2.f32 %v2399_v36  ;;  %v10381_v36 = vld [vmem:[#allocation74_spill] sm:$0xff]  ;;  %v1836_v52 = vadd.f32 %v8356_v47, %v1835_v56  ;;  %v2401_v18 = vmul.f32 1.442695, %v2365_v35 }
 0x539   :  { %v1198_v40 = vmul.f32 %v6019_v44, %v10379_v30  ;;  %v1197_v25 = vmul.f32 %v6019_v44, %v10381_v36  ;;  %v10388_v36 = vld [vmem:[#allocation81_spill] sm:$0xff] }
 0x53a   :  { %v1131_v13 = vpop.xlane.xlu0 %1130  ;;  %1849 = vadd.xlane.f32.xlu0 %v1848_v58  ;;  %v10383_v58 = vld [vmem:[#allocation11_spill] sm:$0xff] }
 0x53b   :  { %1983 = vmatpush1.bf16.msra.mxu0 %v10378_v4  ;;  %6034 = vrcp.f32 %v1131_v13  ;;  %1833 = vadd.xlane.f32.xlu1 %v1832_v33  ;;  %v3037_v13 = vsel %vm762_vm4, %v8366_v21, -inf }
 0x53c   :  { %v6021_v10 = vpop.eup %6020  ;;  %1984 = vmatprep.subr.bf16.mxu0 %v10376_v26  ;;  %6036 = vpow2.f32 %v2397_v23  ;;  %v3038_v23 = vmax.f32 %v8095_v9, %v3037_v13 }
 0x53d   :  { %v1200_v48 = vmul.f32 %v6021_v10, %v10380_v42  ;;  %v1199_v60 = vmul.f32 %v6021_v10, %v10382_v0  ;;  %6038 = vpow2.f32 %v2403_v46  ;;  %v8378_v33 = vpop.eup %6022  ;;  %v10389_v0 = vld [vmem:[#allocation85_spill] sm:$0xff] }
 0x53e   :  { %v8382_v44 = vpop.eup %6024  ;;  %6040 = vpow2.f32 %v2401_v18  ;;  %v1843_v35 = vsel %vm762_vm4, %v8378_v33, 0.0 }
 0x53f   :  { %v1230_v59 = vpack.c.bf16 %v1200_v48, %v1198_v40  ;;  %v1229_v5 = vpack.c.bf16 %v1199_v60, %v1197_v25  ;;  %1985 = vmatpush1.bf16.msra.mxu0 %v10383_v58  ;;  %1837 = vadd.xlane.f32.xlu1 %v1836_v52  ;;  %v8388_v56 = vpop.eup %6026  ;;  %v1844_v4 = vadd.f32 %v8382_v44, %v1843_v35  ;;  %v10387_v40 = vld [vmem:[#allocation12_spill] sm:$0xff]  ;;  %v10390_v52 = vld [vmem:[#allocation83_spill] sm:$0xff] }
 0x540   :  { %1986 = vmatprep.subr.bf16.mxu0 %v10376_v26  ;;  %v1851_v42 = vsel %vm762_vm4, %v8388_v56, 0.0 }
 0x541   :  { %5271 = vmatprep.mubr.msk.bf16.mxu0 %vm762_vm4, %v1230_v59  ;;  %v8391_v10 = vpop.eup %6028  ;;  %v10391_v59 = vld [vmem:[#allocation87_spill] sm:$0xff] }
 0x542   :  { %1343 = vmatmul.mubr.bf16.gmra.mxu0 %v1229_v5  ;;  %10385 = vst [vmem:[#allocation45_spill] sm:$0xff] %v8391_v10  ;;  %v1852_v13 = vadd.f32 %v8391_v10, %v1851_v42 }
 0x543   :  { %1987 = vmatpush1.bf16.msra.mxu0 %v10384_v62  ;;  %3039 = vmax.xlane.f32.xlu1 %v3038_v23  ;;  %v10393_v23 = vld [vmem:[#allocation13_spill] sm:$0xff] }
 0x544   :  { %1988 = vmatprep.subr.bf16.mxu0 %v10376_v26  ;;  %v6031_v46 = vpop.eup %6030 }
 0x545   :  { %v8394_v30 = vpop.eup %6032  ;;  %v1202_v25 = vmul.f32 %v6031_v46, %v10388_v36  ;;  %v1201_v18 = vmul.f32 %v6031_v46, %v10390_v52 }
 0x546   :  { %10386 = vst [vmem:[#allocation50_spill] sm:$0xff] %v8394_v30  ;;  %v2465_v62 = vsel %vm762_vm4, %v8394_v30, 0.0  ;;  %v10412_v30 = vld [vmem:[#allocation5_spill] sm:$0xff] }
 0x547   :  { %1989 = vmatpush1.bf16.msra.mxu0 %v10387_v40  ;;  %1845 = vadd.xlane.f32.xlu1 %v1844_v4 }
 0x548   :  { %v6035_v48 = vpop.eup %6034  ;;  %1990 = vmatprep.subr.bf16.mxu0 %v10376_v26 }
 0x549   :  { %v1204_v60 = vmul.f32 %v6035_v48, %v10389_v0  ;;  %v1203_v5 = vmul.f32 %v6035_v48, %v10391_v59  ;;  %v8405_v58 = vpop.eup %6036  ;;  %v10396_v48 = vld [vmem:[#allocation23_spill] sm:$0xff]  ;;  %v10400_v59 = vld [vmem:[#allocation54_spill] sm:$0xff] }
 0x54a   :  { %10392 = vst [vmem:[#allocation49_spill] sm:$0xff] %v8405_v58  ;;  %v8410_v40 = vpop.eup %6038  ;;  %v2466_v46 = vadd.f32 %v8405_v58, %v2465_v62  ;;  %v2334_v58 = vpop.xlane.xlu0 %2333 }
 0x54b   :  { %1991 = vmatpush1.bf16.msra.mxu0 %v10393_v23  ;;  %v1232_v35 = vpack.c.bf16 %v1204_v60, %v1202_v25  ;;  %v1231_v4 = vpack.c.bf16 %v1203_v5, %v1201_v18  ;;  %10394 = vst [vmem:[#allocation65_spill] sm:$0xff] %v8410_v40  ;;  %1853 = vadd.xlane.f32.xlu1 %v1852_v13  ;;  %v8415_v42 = vpop.eup %6040  ;;  %v2469_v36 = vsel %vm762_vm4, %v8410_v40, 0.0  ;;  %v10397_v25 = vld [vmem:[#allocation7_spill] sm:$0xff]  ;;  %v10399_v18 = vld [vmem:[#allocation14_spill] sm:$0xff]  ;;  %v1978_v5 = vsel %vm1298_vm5, %v10400_v59, 0 }
 0x54c   :  { %1992 = vmatprep.subr.bf16.mxu0 %v10376_v26  ;;  %10395 = vst [vmem:[#allocation69_spill] sm:$0xff] %v8415_v42  ;;  %v2470_v0 = vadd.f32 %v8415_v42, %v2469_v36  ;;  %v10398_v60 = vld [vmem:[#allocation59_spill] sm:$0xff]  ;;  %v10401_v13 = vld [vmem:[#allocation58_spill] sm:$0xff] }
 0x54d   :  { %5272 = vmatprep.mubr.msk.bf16.mxu0 %vm762_vm4, %v1232_v35  ;;  %v2368_v52 = vsub.f32 %v10398_v60, %v8204_v54  ;;  %v2367_v23 = vsub.f32 %v10401_v13, %v8204_v54  ;;  %v10402_v35 = vld [vmem:[#allocation61_spill] sm:$0xff] }
 0x54e   :  { %1351 = vmatmul.mubr.bf16.gmra.mxu0 %v1231_v4  ;;  %v2370_v4 = vsub.f32 %v10402_v35, %v8206_v31  ;;  %v2322_v35 = vpop.xlane.xlu1 %2321 }
 0x54f   :  { %1993 = vmatpush1.bf16.msra.mxu0 %v10396_v48  ;;  %2467 = vadd.xlane.f32.xlu1 %v2466_v46  ;;  %v2407_v62 = vmul.f32 1.442695, %v2368_v52  ;;  %v10403_v46 = vld [vmem:[#allocation60_spill] sm:$0xff]  ;;  %v2405_v36 = vmul.f32 1.442695, %v2367_v23 }
 0x550   :  { %1994 = vmatprep.subr.bf16.mxu0 %v10376_v26  ;;  %3282 = vrot.lane.b32.xlu0 %v10397_v25, %s6449_s3  ;;  %v2369_v48 = vsub.f32 %v10403_v46, %v8206_v31  ;;  %v10404_v25 = vld [vmem:[#allocation64_spill] sm:$0xff]  ;;  %v2411_v60 = vmul.f32 1.442695, %v2370_v4  ;;  %v10407_v31 = vld [vmem:[#allocation66_spill] sm:$0xff] }
 0x551   :  { %6042 = vpow2.f32 %v2407_v62  ;;  %v10406_v52 = vld [vmem:[#allocation68_spill] sm:$0xff]  ;;  %v2373_v23 = vsub.f32 %v10407_v31, %v8265_v3  ;;  %v10408_v62 = vld [vmem:[#allocation70_spill] sm:$0xff] }
 0x552   :  { %v2409_v54 = vmul.f32 1.442695, %v2369_v48  ;;  %v2374_v13 = vsub.f32 %v10406_v52, %v8265_v3  ;;  %6044 = vpow2.f32 %v2405_v36  ;;  %v2375_v4 = vsub.f32 %v10408_v62, %v2322_v35  ;;  %v10410_v36 = vld [vmem:[#allocation71_spill] sm:$0xff]  ;;  %v10414_v31 = vld [vmem:[#allocation88_spill] sm:$0xff] }
 0x553   :  { %1995 = vmatpush1.bf16.msra.mxu0 %v10399_v18  ;;  %2471 = vadd.xlane.f32.xlu1 %v2470_v0  ;;  %v2372_v0 = vsub.f32 %v10404_v25, %v8227_v24  ;;  %v10405_v18 = vld [vmem:[#allocation62_spill] sm:$0xff]  ;;  %6046 = vpow2.f32 %v2411_v60  ;;  %v2330_v25 = vpop.xlane.xlu1 %2329  ;;  %v2417_v52 = vmul.f32 1.442695, %v2373_v23  ;;  %v10411_v60 = vld [vmem:[#allocation76_spill] sm:$0xff]  ;;  %v2382_v62 = vsub.f32 %v10414_v31, %v2334_v58 }
 0x554   :  { %2010 = vmatprep.subr.bf16.mxu0 %v10376_v26  ;;  %v2371_v59 = vsub.f32 %v10405_v18, %v8227_v24  ;;  %6048 = vpow2.f32 %v2409_v54  ;;  %v2419_v46 = vmul.f32 1.442695, %v2374_v13  ;;  %v10409_v24 = vld [vmem:[#allocation78_spill] sm:$0xff]  ;;  %v2421_v3 = vmul.f32 1.442695, %v2375_v4  ;;  %v10413_v54 = vld [vmem:[#allocation73_spill] sm:$0xff] }
 0x555   :  { %v2378_v48 = vsub.f32 %v10409_v24, %v8319_v22  ;;  %v2377_v13 = vsub.f32 %v10413_v54, %v8319_v22  ;;  %v2435_v22 = vmul.f32 1.442695, %v2382_v62 }
 0x556   :  { %v2413_v42 = vmul.f32 1.442695, %v2371_v59  ;;  %v2379_v59 = vsub.f32 %v10411_v60, %v2330_v25 }
 0x557   :  { %2011 = vmatpush2.bf16.msra.mxu0 %v1978_v5  ;;  %v2415_v5 = vmul.f32 1.442695, %v2372_v0  ;;  %v2376_v0 = vsub.f32 %v10410_v36, %v2322_v35  ;;  %v10416_v36 = vld [vmem:[#allocation80_spill] sm:$0xff] }
 0x558   :  { %2658 = vmatprep.subr.bf16.mxu0 %v10376_v26  ;;  %v2429_v23 = vmul.f32 1.442695, %v2379_v59  ;;  %v2381_v60 = vsub.f32 %v10416_v36, %v2334_v58  ;;  %v10420_v59 = vld [vmem:[#allocation82_spill] sm:$0xff] }
 0x559   :  { %6050 = vpow2.f32 %v2415_v5  ;;  %v2427_v5 = vmul.f32 1.442695, %v2378_v48 }
 0x55a   :  { %6052 = vpow2.f32 %v2413_v42  ;;  %v2423_v42 = vmul.f32 1.442695, %v2376_v0  ;;  %v10419_v0 = vld [vmem:[#allocation79_spill] sm:$0xff]  ;;  %v2433_v58 = vmul.f32 1.442695, %v2381_v60 }
 0x55b   :  { %6054 = vpow2.f32 %v2419_v46  ;;  %v2338_v46 = vpop.xlane.xlu1 %2337 }
 0x55c   :  { %v2383_v31 = vsub.f32 %v10420_v59, %v2338_v46 }
 0x55e   :  { %v8455_v24 = vpop.eup %6042 }
 0x55f   :  { %10415 = vst [vmem:[#allocation55_spill] sm:$0xff] %v8455_v24  ;;  %v8458_v4 = vpop.eup %6044  ;;  %v2473_v48 = vsel %vm762_vm4, %v8455_v24, 0.0 }
 0x560   :  { %10417 = vst [vmem:[#allocation63_spill] sm:$0xff] %v8458_v4  ;;  %v2474_v24 = vadd.f32 %v8458_v4, %v2473_v48  ;;  %v10427_v4 = vld [vmem:[#allocation99_spill] sm:$0xff] }
 0x562   :  { %v1135_v18 = vpop.xlane.xlu0 %1134 }
 0x563   :  { %6056 = vrcp.f32 %v1135_v18  ;;  %v8462_v18 = vpop.eup %6046 }
 0x564   :  { %3284 = vrot.lane.b32.xlu1 %v10412_v30, %s6449_s3  ;;  %6058 = vpow2.f32 %v2417_v52  ;;  %v2425_v30 = vmul.f32 1.442695, %v2377_v13  ;;  %10418 = vst [vmem:[#allocation67_spill] sm:$0xff] %v8462_v18  ;;  %v2380_v52 = vsub.f32 %v10419_v0, %v2330_v25  ;;  %v8467_v36 = vpop.eup %6048  ;;  %v2477_v25 = vsel %vm762_vm4, %v8462_v18, 0.0  ;;  %v10425_v0 = vld [vmem:[#allocation84_spill] sm:$0xff]  ;;  %v10430_v18 = vld [vmem:[#allocation97_spill] sm:$0xff] }
 0x565   :  { %10422 = vst [vmem:[#allocation53_spill] sm:$0xff] %v8467_v36  ;;  %v2384_v60 = vsub.f32 %v10425_v0, %v2338_v46 }
 0x566   :  { %v8471_v40 = vpop.eup %6050 }
 0x567   :  { %v1139_v35 = vpop.xlane.xlu0 %1138  ;;  %10424 = vst [vmem:[#allocation57_spill] sm:$0xff] %v8471_v40 }
 0x568   :  { %6060 = vrcp.f32 %v1139_v35 }
 0x569   :  { %6062 = vpow2.f32 %v2421_v3  ;;  %v10421_v3 = vld [vmem:[#allocation96_spill] sm:$0xff] }
 0x56a   :  { %6064 = vpow2.f32 %v2427_v5  ;;  %v10423_v5 = vld [vmem:[#allocation86_spill] sm:$0xff] }
 0x56b   :  { %6066 = vpow2.f32 %v2423_v42  ;;  %v2342_v54 = vpop.xlane.xlu0 %2341 }
 0x56c   :  { %6068 = vpow2.f32 %v2429_v23  ;;  %v2386_v13 = vsub.f32 %v10421_v3, %v2342_v54  ;;  %v2385_v62 = vsub.f32 %v10423_v5, %v2342_v54  ;;  %v2431_v23 = vmul.f32 1.442695, %v2380_v52  ;;  %v8476_v3 = vpop.eup %6052 }
 0x56d   :  { %v1143_v35 = vpop.xlane.xlu1 %1142  ;;  %6070 = vpow2.f32 %v2425_v30  ;;  %10426 = vst [vmem:[#allocation20_spill] sm:$0xff] %v8476_v3  ;;  %v2437_v30 = vmul.f32 1.442695, %v2383_v31  ;;  %v8478_v5 = vpop.eup %6054 }
 0x56e   :  { %6072 = vpow2.f32 %v2435_v22  ;;  %v2443_v42 = vmul.f32 1.442695, %v2386_v13  ;;  %v2441_v48 = vmul.f32 1.442695, %v2385_v62  ;;  %v2478_v22 = vadd.f32 %v8467_v36, %v2477_v25 }
 0x56f   :  { %6074 = vrcp.f32 %v1143_v35  ;;  %2475 = vadd.xlane.f32.xlu0 %v2474_v24  ;;  %v1147_v59 = vpop.xlane.xlu0 %1146  ;;  %v2481_v13 = vsel %vm762_vm4, %v8471_v40, 0.0  ;;  %v2439_v24 = vmul.f32 1.442695, %v2384_v60 }
 0x570   :  { %6076 = vpow2.f32 %v2433_v58  ;;  %v6057_v52 = vpop.eup %6056  ;;  %v2482_v25 = vadd.f32 %v8476_v3, %v2481_v13 }
 0x571   :  { %v2346_v54 = vpop.xlane.xlu1 %2345  ;;  %6078 = vpow2.f32 %v2443_v42  ;;  %v8484_v31 = vpop.eup %6058 }
 0x572   :  { %v2388_v46 = vsub.f32 %v10427_v4, %v2346_v54  ;;  %6080 = vrcp.f32 %v1147_v59  ;;  %v2387_v40 = vsub.f32 %v7792_v27, %v2346_v54  ;;  %v10428_v4 = vld [vmem:[#allocation93_spill] sm:$0xff]  ;;  %v10432_v27 = vld [vmem:[#allocation95_spill] sm:$0xff] }
 0x573   :  { %6082 = vpow2.f32 %v2431_v23  ;;  %2479 = vadd.xlane.f32.xlu0 %v2478_v22  ;;  %v2350_v35 = vpop.xlane.xlu0 %2349  ;;  %v1206_v59 = vmul.f32 %v6057_v52, %v10428_v4  ;;  %v2485_v23 = vsel %vm762_vm4, %v8478_v5, 0.0 }
 0x574   :  { %6084 = vpow2.f32 %v2437_v30  ;;  %v2389_v62 = vsub.f32 %v7799_v7, %v2350_v35  ;;  %v2390_v42 = vsub.f32 %v7905_v17, %v2350_v35  ;;  %v2447_v22 = vmul.f32 1.442695, %v2388_v46 }
 0x575   :  { %v1151_v58 = vpop.xlane.xlu1 %1150  ;;  %v6061_v0 = vpop.eup %6060  ;;  %6086 = vpow2.f32 %v2441_v48  ;;  %v10431_v48 = vld [vmem:[#allocation94_spill] sm:$0xff]  ;;  %v2486_v46 = vadd.f32 %v8484_v31, %v2485_v23 }
 0x576   :  { %v8493_v60 = vpop.eup %6062  ;;  %v2449_v30 = vmul.f32 1.442695, %v2389_v62  ;;  %v2451_v36 = vmul.f32 1.442695, %v2390_v42  ;;  %v1208_v7 = vmul.f32 %v6061_v0, %v10430_v18  ;;  %6088 = vpow2.f32 %v2439_v24 }
 0x577   :  { %10429 = vst [vmem:[#allocation56_spill] sm:$0xff] %v8493_v60  ;;  %v8496_v10 = vpop.eup %6064  ;;  %2483 = vadd.xlane.f32.xlu0 %v2482_v25  ;;  %v2354_v17 = vpop.xlane.xlu0 %2353  ;;  %v1205_v13 = vmul.f32 %v6057_v52, %v10431_v48  ;;  %v1207_v54 = vmul.f32 %v6061_v0, %v10432_v27  ;;  %v2445_v52 = vmul.f32 1.442695, %v2387_v40  ;;  %v10437_v40 = vld [vmem:[#allocation89_spill] sm:$0xff] }
 0x578   :  { %v8500_v35 = vpop.eup %6066  ;;  %6090 = vpow2.f32 %v2449_v30  ;;  %v1234_v3 = vpack.c.bf16 %v1208_v7, %v1206_v59  ;;  %v2493_v0 = vsel %vm762_vm4, %v8496_v10, 0.0 }
 0x579   :  { %v2358_v4 = vpop.xlane.xlu1 %2357  ;;  %v8503_v62 = vpop.eup %6068  ;;  %6092 = vpow2.f32 %v2451_v36  ;;  %v1233_v42 = vpack.c.bf16 %v1207_v54, %v1205_v13  ;;  %v2392_v36 = vsub.f32 %v7926_v38, %v2354_v17  ;;  %v10439_v54 = vld [vmem:[#allocation100_spill] sm:$0xff] }
 0x57a   :  { %10433 = vst [vmem:[#allocation21_spill] sm:$0xff] %v8503_v62  ;;  %v2393_v18 = vsub.f32 %v7808_v41, %v2358_v4  ;;  %v2394_v24 = vsub.f32 %v7936_v55, %v2358_v4  ;;  %v8507_v25 = vpop.eup %6070  ;;  %6094 = vpow2.f32 %v2447_v22  ;;  %5273 = vmatprep.mubr.msk.bf16.mxu0 %vm762_vm4, %v1234_v3  ;;  %v2391_v22 = vsub.f32 %v10437_v40, %v2354_v17  ;;  %v10441_v17 = vld [vmem:[#allocation104_spill] sm:$0xff] }
 0x57b   :  { %10434 = vst [vmem:[#allocation72_spill] sm:$0xff] %v8507_v25  ;;  %v8512_v59 = vpop.eup %6072  ;;  %6096 = vrcp.f32 %v1151_v58  ;;  %2487 = vadd.xlane.f32.xlu0 %v2486_v46  ;;  %1359 = vmatmul.mubr.bf16.gmra.mxu0 %v1233_v42  ;;  %v1155_v41 = vpop.xlane.xlu0 %1154  ;;  %v2494_v3 = vadd.f32 %v8507_v25, %v2493_v0  ;;  %v2455_v38 = vmul.f32 1.442695, %v2392_v36  ;;  %v10442_v42 = vld [vmem:[#allocation101_spill] sm:$0xff]  ;;  %v2489_v36 = vsel %vm762_vm4, %v8500_v35, 0.0 }
 0x57c   :  { %10435 = vst [vmem:[#allocation75_spill] sm:$0xff] %v8512_v59  ;;  %v2457_v23 = vmul.f32 1.442695, %v2393_v18  ;;  %v2459_v30 = vmul.f32 1.442695, %v2394_v24  ;;  %v6075_v55 = vpop.eup %6074  ;;  %v2501_v58 = vsel %vm762_vm4, %v8512_v59, 0.0 }
 0x57d   :  { %v8515_v7 = vpop.eup %6076  ;;  %v1210_v4 = vmul.f32 %v6075_v55, %v10439_v54  ;;  %v1209_v0 = vmul.f32 %v6075_v55, %v10442_v42  ;;  %v2453_v59 = vmul.f32 1.442695, %v2391_v22 }
 0x57e   :  { %10436 = vst [vmem:[#allocation74_spill] sm:$0xff] %v8515_v7  ;;  %6098 = vpow2.f32 %v2457_v23  ;;  %v8519_v48 = vpop.eup %6078  ;;  %v1163_v18 = vpop.xlane.xlu1 %1162  ;;  %v10443_v23 = vld [vmem:[#allocation103_spill] sm:$0xff] }
 0x57f   :  { %10438 = vst [vmem:[#allocation77_spill] sm:$0xff] %v8519_v48  ;;  %6100 = vpow2.f32 %v2459_v30  ;;  %v6081_v13 = vpop.eup %6080  ;;  %2495 = vadd.xlane.f32.xlu0 %v2494_v3  ;;  %v1159_v27 = vpop.xlane.xlu0 %1158 }
 0x580   :  { %6102 = vpow2.f32 %v2445_v52  ;;  %v8524_v46 = vpop.eup %6082  ;;  %v1212_v24 = vmul.f32 %v6081_v13, %v10441_v17  ;;  %v1211_v30 = vmul.f32 %v6081_v13, %v10443_v23  ;;  %v2502_v52 = vadd.f32 %v8515_v7, %v2501_v58 }
 0x581   :  { %10440 = vst [vmem:[#allocation11_spill] sm:$0xff] %v8524_v46  ;;  %6104 = vrcp.f32 %v1155_v41  ;;  %v8529_v40 = vpop.eup %6084  ;;  %v2509_v17 = vsel %vm762_vm4, %v8519_v48, 0.0  ;;  %v10453_v48 = vld [vmem:[#allocation106_spill] sm:$0xff] }
 0x582   :  { %10444 = vst [vmem:[#allocation22_spill] sm:$0xff] %v8529_v40  ;;  %6106 = vrcp.f32 %v1163_v18  ;;  %v8534_v3 = vpop.eup %6086  ;;  %v1236_v41 = vpack.c.bf16 %v1212_v24, %v1210_v4  ;;  %v1235_v54 = vpack.c.bf16 %v1211_v30, %v1209_v0  ;;  %v2976_v22 = vpop.xlane.xlu1 %2975  ;;  %v10447_v18 = vld [vmem:[#allocation113_spill] sm:$0xff]  ;;  %v2490_v4 = vadd.f32 %v8493_v60, %v2489_v36 }
 0x583   :  { %10445 = vst [vmem:[#allocation12_spill] sm:$0xff] %v8534_v3  ;;  %6108 = vrcp.f32 %v1159_v27  ;;  %2503 = vadd.xlane.f32.xlu0 %v2502_v52  ;;  %v2362_v55 = vpop.xlane.xlu0 %2361  ;;  %v8538_v13 = vpop.eup %6088  ;;  %v3042_v27 = vsub.f32 %v7983_v14, %v2976_v22  ;;  %v3041_v0 = vsub.f32 %v7820_v12, %v2976_v22 }
 0x584   :  { %6110 = vpow2.f32 %v2455_v38  ;;  %10446 = vst [vmem:[#allocation81_spill] sm:$0xff] %v8538_v13  ;;  %5274 = vmatprep.mubr.msk.bf16.mxu0 %vm762_vm4, %v1236_v41  ;;  %v2395_v58 = vsub.f32 %v7812_v50, %v2362_v55  ;;  %v2396_v42 = vsub.f32 %v10447_v18, %v2362_v55  ;;  %v2510_v38 = vadd.f32 %v8534_v3, %v2509_v17 }
 0x585   :  { %v8543_v23 = vpop.eup %6090  ;;  %1367 = vmatmul.mubr.bf16.gmra.mxu0 %v1235_v54  ;;  %6112 = vpow2.f32 %v2453_v59  ;;  %v2497_v50 = vsel %vm762_vm4, %v8524_v46, 0.0  ;;  %v3077_v41 = vmul.f32 1.442695, %v3042_v27  ;;  %v2505_v54 = vsel %vm762_vm4, %v8538_v13, 0.0  ;;  %v10458_v13 = vld [vmem:[#allocation108_spill] sm:$0xff] }
 0x586   :  { %10448 = vst [vmem:[#allocation85_spill] sm:$0xff] %v8543_v23  ;;  %v8548_v24 = vpop.eup %6092  ;;  %v2461_v30 = vmul.f32 1.442695, %v2395_v58  ;;  %v2463_v55 = vmul.f32 1.442695, %v2396_v42  ;;  %v1171_v59 = vpop.xlane.xlu1 %1170  ;;  %v2498_v18 = vadd.f32 %v8503_v62, %v2497_v50  ;;  %v2506_v42 = vadd.f32 %v8529_v40, %v2505_v54  ;;  %v10454_v50 = vld [vmem:[#allocation91_spill] sm:$0xff] }
 0x587   :  { %10449 = vst [vmem:[#allocation83_spill] sm:$0xff] %v8548_v24  ;;  %v8553_v52 = vpop.eup %6094  ;;  %2511 = vadd.xlane.f32.xlu0 %v2510_v38  ;;  %v1167_v14 = vpop.xlane.xlu0 %1166  ;;  %v2517_v36 = vsel %vm762_vm4, %v8548_v24, 0.0  ;;  %v3075_v58 = vmul.f32 1.442695, %v3041_v0  ;;  %v10452_v24 = vld [vmem:[#allocation107_spill] sm:$0xff]  ;;  %v10455_v54 = vld [vmem:[#allocation120_spill] sm:$0xff] }
 0x588   :  { %10450 = vst [vmem:[#allocation87_spill] sm:$0xff] %v8553_v52  ;;  %v6097_v17 = vpop.eup %6096  ;;  %2491 = vadd.xlane.f32.xlu1 %v2490_v4  ;;  %6114 = vpow2.f32 %v2461_v30  ;;  %v2518_v12 = vadd.f32 %v8543_v23, %v2517_v36  ;;  %v2513_v30 = vsel %vm762_vm4, %v8553_v52, 0.0  ;;  %v10459_v62 = vld [vmem:[#allocation109_spill] sm:$0xff] }
 0x589   :  { %6116 = vpow2.f32 %v3077_v41  ;;  %v1214_v3 = vmul.f32 %v6097_v17, %v10452_v24  ;;  %v1213_v4 = vmul.f32 %v6097_v17, %v10453_v48  ;;  %v10456_v24 = vld [vmem:[#allocation92_spill] sm:$0xff]  ;;  %v10457_v48 = vld [vmem:[#allocation121_spill] sm:$0xff] }
 0x58a   :  { %6118 = vpow2.f32 %v2463_v55  ;;  %v2984_v0 = vpop.xlane.xlu1 %2983 }
 0x58b   :  { %v8560_v22 = vpop.eup %6098  ;;  %2519 = vadd.xlane.f32.xlu0 %v2518_v12  ;;  %v2980_v38 = vpop.xlane.xlu0 %2979  ;;  %6120 = vrcp.f32 %v1171_v59  ;;  %v3045_v40 = vsub.f32 %v10456_v24, %v2984_v0  ;;  %v3046_v17 = vsub.f32 %v10457_v48, %v2984_v0 }
 0x58c   :  { %v8564_v27 = vpop.eup %6100  ;;  %2499 = vadd.xlane.f32.xlu1 %v2498_v18  ;;  %v3043_v41 = vsub.f32 %v10454_v50, %v2980_v38  ;;  %v3044_v23 = vsub.f32 %v10455_v54, %v2980_v38  ;;  %6122 = vrcp.f32 %v1167_v14  ;;  %v10460_v14 = vld [vmem:[#allocation114_spill] sm:$0xff] }
 0x58d   :  { %10451 = vst [vmem:[#allocation13_spill] sm:$0xff] %v8564_v27  ;;  %v8570_v36 = vpop.eup %6102  ;;  %v2525_v55 = vsel %vm762_vm4, %v8564_v27, 0.0  ;;  %6124 = vpow2.f32 %v3075_v58  ;;  %v3083_v38 = vmul.f32 1.442695, %v3045_v40  ;;  %v3085_v54 = vmul.f32 1.442695, %v3046_v17 }
 0x58e   :  { %v6105_v12 = vpop.eup %6104  ;;  %v2526_v52 = vadd.f32 %v8560_v22, %v2525_v55  ;;  %v3079_v59 = vmul.f32 1.442695, %v3043_v41  ;;  %v3081_v25 = vmul.f32 1.442695, %v3044_v23  ;;  %v2992_v55 = vpop.xlane.xlu1 %2991  ;;  %v10461_v41 = vld [vmem:[#allocation110_spill] sm:$0xff] }
 0x58f   :  { %v6107_v7 = vpop.eup %6106  ;;  %v1216_v18 = vmul.f32 %v6105_v12, %v10458_v13  ;;  %v1215_v50 = vmul.f32 %v6105_v12, %v10459_v62  ;;  %v1175_v27 = vpop.xlane.xlu0 %1174  ;;  %v3049_v62 = vsub.f32 %v7844_v16, %v2992_v55  ;;  %v10462_v13 = vld [vmem:[#allocation125_spill] sm:$0xff] }
 0x590   :  { %v6109_v46 = vpop.eup %6108  ;;  %2527 = vadd.xlane.f32.xlu0 %v2526_v52  ;;  %v1220_v60 = vmul.f32 %v6107_v7, %v10460_v14  ;;  %6126 = vpow2.f32 %v3079_v59  ;;  %2507 = vadd.xlane.f32.xlu1 %v2506_v42  ;;  %v3050_v40 = vsub.f32 %v10462_v13, %v2992_v55  ;;  %v2514_v52 = vadd.f32 %v8570_v36, %v2513_v30  ;;  %v10463_v30 = vld [vmem:[#allocation112_spill] sm:$0xff] }
 0x591   :  { %v8582_v24 = vpop.eup %6110  ;;  %v1238_v0 = vpack.c.bf16 %v1216_v18, %v1214_v3  ;;  %v1237_v58 = vpack.c.bf16 %v1215_v50, %v1213_v4  ;;  %v1218_v48 = vmul.f32 %v6109_v46, %v10461_v41  ;;  %6128 = vpow2.f32 %v3083_v38  ;;  %v10464_v50 = vld [vmem:[#allocation34_spill] sm:$0xff] }
 0x592   :  { %6130 = vpow2.f32 %v3085_v54  ;;  %v8589_v12 = vpop.eup %6112  ;;  %v3091_v3 = vmul.f32 1.442695, %v3049_v62  ;;  %v3093_v17 = vmul.f32 1.442695, %v3050_v40  ;;  %v2521_v4 = vsel %vm762_vm4, %v8582_v24, 0.0  ;;  %v2996_v16 = vpop.xlane.xlu1 %2995  ;;  %v10465_v54 = vld [vmem:[#allocation115_spill] sm:$0xff] }
 0x593   :  { %5275 = vmatprep.mubr.msk.bf16.mxu0 %vm762_vm4, %v1238_v0  ;;  %v1240_v23 = vpack.c.bf16 %v1220_v60, %v1218_v48  ;;  %6132 = vpow2.f32 %v3081_v25  ;;  %v2988_v42 = vpop.xlane.xlu0 %2987  ;;  %v1217_v18 = vmul.f32 %v6109_v46, %v10463_v30  ;;  %v3051_v25 = vsub.f32 %v7855_v19, %v2996_v16  ;;  %v10469_v30 = vld [vmem:[#allocation122_spill] sm:$0xff] }
 0x594   :  { %1375 = vmatmul.mubr.bf16.gmra.mxu0 %v1237_v58  ;;  %6134 = vrcp.f32 %v1175_v27  ;;  %2515 = vadd.xlane.f32.xlu1 %v2514_v52  ;;  %v3047_v59 = vsub.f32 %v7838_v61, %v2988_v42  ;;  %v3048_v60 = vsub.f32 %v8071_v37, %v2988_v42  ;;  %v3052_v38 = vsub.f32 %v10464_v50, %v2996_v16  ;;  %v10466_v52 = vld [vmem:[#allocation119_spill] sm:$0xff]  ;;  %v10468_v42 = vld [vmem:[#allocation117_spill] sm:$0xff] }
 0x595   :  { %5276 = vmatprep.mubr.msk.bf16.mxu0 %vm762_vm4, %v1240_v23  ;;  %6136 = vpow2.f32 %v3091_v3  ;;  %v1219_v14 = vmul.f32 %v6107_v7, %v10465_v54  ;;  %v8600_v0 = vpop.eup %6114  ;;  %v2522_v55 = vadd.f32 %v8589_v12, %v2521_v4  ;;  %v3095_v61 = vmul.f32 1.442695, %v3051_v25  ;;  %v10470_v25 = vld [vmem:[#allocation123_spill] sm:$0xff] }
 0x596   :  { %6138 = vpow2.f32 %v3093_v17  ;;  %v3087_v27 = vmul.f32 1.442695, %v3047_v59  ;;  %v8603_v58 = vpop.eup %6116  ;;  %v3097_v41 = vmul.f32 1.442695, %v3052_v38  ;;  %v3089_v37 = vmul.f32 1.442695, %v3048_v60 }
 0x597   :  { %v1790_v48 = vpop.xlane.xlu0 %1789  ;;  %v8605_v46 = vpop.eup %6118  ;;  %v1239_v7 = vpack.c.bf16 %v1219_v14, %v1217_v18  ;;  %v3143_v59 = vsel %vm762_vm4, %v8603_v58, 0.0 }
 0x598   :  { %6140 = vpow2.f32 %v3087_v27  ;;  %v1798_v19 = vpop.xlane.xlu1 %1797  ;;  %2523 = vadd.xlane.f32.xlu1 %v2522_v55  ;;  %v6121_v62 = vpop.eup %6120  ;;  %v2529_v13 = vsel %vm762_vm4, %v8605_v46, 0.0 }
 0x599   :  { %6142 = vpow2.f32 %v3095_v61  ;;  %v6123_v40 = vpop.eup %6122  ;;  %v2530_v23 = vadd.f32 %v8600_v0, %v2529_v13  ;;  %v1224_v3 = vmul.f32 %v6121_v62, %v10466_v52  ;;  %v1223_v50 = vmul.f32 %v6121_v62, %v10470_v25 }
 0x59a   :  { %6144 = vpow2.f32 %v3097_v41  ;;  %v8611_v17 = vpop.eup %6124  ;;  %v1222_v4 = vmul.f32 %v6123_v40, %v10468_v42  ;;  %v1221_v18 = vmul.f32 %v6123_v40, %v10469_v30 }
 0x59b   :  { %10467 = vst [vmem:[#allocation23_spill] sm:$0xff] %v8611_v17  ;;  %6146 = vpow2.f32 %v3089_v37  ;;  %v1794_v16 = vpop.xlane.xlu0 %1793  ;;  %2531 = vadd.xlane.f32.xlu0 %v2530_v23  ;;  %v3144_v27 = vadd.f32 %v8611_v17, %v3143_v59 }
 0x59c   :  { %1383 = vmatmul.mubr.bf16.gmra.mxu0 %v1239_v7  ;;  %6148 = vrcp.f32 %v1798_v19  ;;  %v1802_v60 = vpop.xlane.xlu1 %1801  ;;  %v1242_v54 = vpack.c.bf16 %v1224_v3, %v1222_v4  ;;  %v1241_v19 = vpack.c.bf16 %v1223_v50, %v1221_v18 }
 0x59d   :  { %v8618_v38 = vpop.eup %6126  ;;  %6150 = vrcp.f32 %v1790_v48 }
 0x59e   :  { %v8620_v14 = vpop.eup %6128  ;;  %6152 = vrcp.f32 %v1802_v60  ;;  %5277 = vmatprep.mubr.msk.bf16.mxu0 %vm762_vm4, %v1242_v54 }
 0x59f   :  { %10471 = vst [vmem:[#allocation7_spill] sm:$0xff] %v8620_v14  ;;  %v8623_v55 = vpop.eup %6130  ;;  %6154 = vrcp.f32 %v1794_v16  ;;  %v3000_v61 = vpop.xlane.xlu0 %2999  ;;  %3145 = vadd.xlane.f32.xlu0 %v3144_v27  ;;  %v10474_v16 = vld [vmem:[#allocation124_spill] sm:$0xff]  ;;  %v10477_v27 = vld [vmem:[#allocation30_spill] sm:$0xff] }
 0x5a0   :  { %10472 = vst [vmem:[#allocation59_spill] sm:$0xff] %v8623_v55  ;;  %v8626_v41 = vpop.eup %6132  ;;  %v3004_v37 = vpop.xlane.xlu1 %3003  ;;  %v3053_v62 = vsub.f32 %v7872_v29, %v3000_v61  ;;  %v3054_v48 = vsub.f32 %v8135_v34, %v3000_v61  ;;  %v3151_v7 = vsel %vm762_vm4, %v8623_v55, 0.0 }
 0x5a1   :  { %v6135_v13 = vpop.eup %6134  ;;  %v3055_v40 = vsub.f32 %v10339_v45, %v3004_v37  ;;  %v3056_v23 = vsub.f32 %v8153_v39, %v3004_v37  ;;  %v3152_v52 = vadd.f32 %v8620_v14, %v3151_v7  ;;  %v3147_v3 = vsel %vm762_vm4, %v8626_v41, 0.0 }
 0x5a2   :  { %v8637_v42 = vpop.eup %6136  ;;  %v3099_v4 = vmul.f32 1.442695, %v3053_v62  ;;  %v3148_v29 = vadd.f32 %v8618_v38, %v3147_v3  ;;  %v1226_v34 = vmul.f32 %v6135_v13, %v10474_v16  ;;  %v3101_v45 = vmul.f32 1.442695, %v3054_v48 }
 0x5a3   :  { %10473 = vst [vmem:[#allocation14_spill] sm:$0xff] %v8637_v42  ;;  %v8641_v59 = vpop.eup %6138  ;;  %v3103_v60 = vmul.f32 1.442695, %v3055_v40  ;;  %v3105_v30 = vmul.f32 1.442695, %v3056_v23  ;;  %3153 = vadd.xlane.f32.xlu1 %v3152_v52  ;;  %v8643_v39 = vpop.xlane.xlu0 %3007  ;;  %v1225_v61 = vmul.f32 %v6135_v13, %v10477_v27  ;;  %v10481_v27 = vld [vmem:[#allocation33_spill] sm:$0xff] }
 0x5a4   :  { %10475 = vst [vmem:[#allocation54_spill] sm:$0xff] %v8641_v59  ;;  %1391 = vmatmul.mubr.bf16.gmra.mxu0 %v1241_v19  ;;  %6156 = vpow2.f32 %v3099_v4  ;;  %3149 = vadd.xlane.f32.xlu0 %v3148_v29  ;;  %v1244_v18 = vpack.c.bf16 %v1226_v34, %v1226_v34  ;;  %v1806_v25 = vpop.xlane.xlu1 %1805  ;;  %v3159_v54 = vsel %vm762_vm4, %v8641_v59, 0.0 }
 0x5a5   :  { %v8645_v50 = vpop.eup %6140  ;;  %6158 = vpow2.f32 %v3103_v60  ;;  %v3160_v19 = vadd.f32 %v8637_v42, %v3159_v54  ;;  %v1243_v52 = vpack.c.bf16 %v1225_v61, %v1225_v61 }
 0x5a6   :  { %10476 = vst [vmem:[#allocation58_spill] sm:$0xff] %v8645_v50  ;;  %v8650_v37 = vpop.eup %6142  ;;  %6160 = vpow2.f32 %v3105_v30  ;;  %5278 = vmatprep.mubr.msk.bf16.mxu0 %vm762_vm4, %v1244_v18 }
 0x5a7   :  { %v8654_v62 = vpop.eup %6144  ;;  %6162 = vpow2.f32 %v3101_v45  ;;  %v1814_v48 = vpop.xlane.xlu0 %1813  ;;  %3161 = vadd.xlane.f32.xlu1 %v3160_v19  ;;  %v10479_v45 = vld [vmem:[#allocation32_spill] sm:$0xff]  ;;  %v10482_v19 = vld [vmem:[#allocation130_spill] sm:$0xff] }
 0x5a8   :  { %10478 = vst [vmem:[#allocation61_spill] sm:$0xff] %v8654_v62  ;;  %v8656_v7 = vpop.eup %6146  ;;  %v1810_v40 = vpop.xlane.xlu1 %1809  ;;  %6164 = vrcp.f32 %v1806_v25  ;;  %v3163_v34 = vsel %vm762_vm4, %v8654_v62, 0.0  ;;  %v10480_v25 = vld [vmem:[#allocation127_spill] sm:$0xff] }
 0x5a9   :  { %v6149_v23 = vpop.eup %6148  ;;  %v3155_v13 = vsel %vm762_vm4, %v8656_v7, 0.0  ;;  %6166 = vrcp.f32 %v1810_v40  ;;  %v3164_v40 = vadd.f32 %v8650_v37, %v3163_v34 }
 0x5aa   :  { %v6151_v3 = vpop.eup %6150  ;;  %v3156_v4 = vadd.f32 %v8645_v50, %v3155_v13  ;;  %6168 = vrcp.f32 %v1814_v48 }
 0x5ab   :  { %v6153_v29 = vpop.eup %6152  ;;  %v8661_v16 = vpop.xlane.xlu0 %3019  ;;  %v1873_v18 = vmul.f32 %v6151_v3, %v10479_v45  ;;  %v1872_v61 = vmul.f32 %v6151_v3, %v10481_v27 }
 0x5ac   :  { %1399 = vmatmul.mubr.bf16.gmra.mxu0 %v1243_v52  ;;  %v6155_v60 = vpop.eup %6154  ;;  %3157 = vadd.xlane.f32.xlu0 %v3156_v4  ;;  %v8665_v30 = vpop.xlane.xlu1 %3011  ;;  %v10483_v52 = vld [vmem:[#allocation129_spill] sm:$0xff]  ;;  %v10484_v4 = vld [vmem:[#allocation31_spill] sm:$0xff] }
 0x5ad   :  { %v1875_v54 = vmul.f32 %v6155_v60, %v10480_v25  ;;  %v1874_v13 = vmul.f32 %v6155_v60, %v10482_v19  ;;  %v1879_v42 = vmul.f32 %v6153_v29, %v10483_v52  ;;  %v1877_v55 = vmul.f32 %v6149_v23, %v10484_v4  ;;  %v10486_v25 = vld [vmem:[#allocation15_spill] sm:$0xff] }
 0x5af   :  { %v1907_v59 = vpack.c.bf16 %v1875_v54, %v1873_v18  ;;  %v1906_v14 = vpack.c.bf16 %v1874_v13, %v1872_v61  ;;  %v1822_v50 = vpop.xlane.xlu0 %1821  ;;  %v1909_v3 = vpack.c.bf16 %v1879_v42, %v1877_v55  ;;  %v10487_v42 = vld [vmem:[#allocation131_spill] sm:$0xff]  ;;  %v10488_v13 = vld [vmem:[#allocation128_spill] sm:$0xff] }
 0x5b0   :  { %3165 = vadd.xlane.f32.xlu0 %v3164_v40  ;;  %v8673_v62 = vpop.xlane.xlu1 %3015  ;;  %v1876_v40 = vmul.f32 %v6149_v23, %v10488_v13 }
 0x5b1   :  { %v8676_v17 = vpop.eup %6156  ;;  %5288 = vmatprep.mubr.msk.bf16.mxu0 %vm762_vm4, %v1907_v59  ;;  %v1878_v59 = vmul.f32 %v6153_v29, %v10487_v42  ;;  %v10491_v29 = vld [vmem:[#allocation37_spill] sm:$0xff] }
 0x5b2   :  { %v8679_v45 = vpop.eup %6158 }
 0x5b3   :  { %10485 = vst [vmem:[#allocation60_spill] sm:$0xff] %v8679_v45  ;;  %v8681_v60 = vpop.eup %6160  ;;  %v8683_v34 = vpop.xlane.xlu0 %3027 }
 0x5b4   :  { %2013 = vmatmul.mubr.bf16.vlgmr.msra.gmra.mxu0 %v1906_v14  ;;  %v8685_v18 = vpop.eup %6162  ;;  %v1818_v54 = vpop.xlane.xlu1 %1817  ;;  %v3171_v27 = vsel %vm762_vm4, %v8681_v60, 0.0 }
 0x5b5   :  { %2659 = vmatpush1.bf16.msra.mxu0 %v10486_v25  ;;  %5289 = vmatprep.mubr.msk.bf16.mxu0 %vm762_vm4, %v1909_v3  ;;  %v3172_v55 = vadd.f32 %v8679_v45, %v3171_v27  ;;  %v3167_v14 = vsel %vm762_vm4, %v8685_v18, 0.0  ;;  %v6165_v61 = vpop.eup %6164  ;;  %6170 = vrcp.f32 %v1818_v54  ;;  %v10489_v3 = vld [vmem:[#allocation24_spill] sm:$0xff]  ;;  %v1908_v25 = vpack.c.bf16 %v1878_v59, %v1876_v40  ;;  %v10490_v27 = vld [vmem:[#allocation35_spill] sm:$0xff]  ;;  %v10494_v59 = vld [vmem:[#allocation38_spill] sm:$0xff] }
 0x5b6   :  { %2660 = vmatprep.subr.bf16.mxu0 %v10376_v26  ;;  %v3168_v19 = vadd.f32 %v8676_v17, %v3167_v14  ;;  %v6167_v4 = vpop.eup %6166  ;;  %v1881_v45 = vmul.f32 %v6165_v61, %v10490_v27  ;;  %v10492_v54 = vld [vmem:[#allocation16_spill] sm:$0xff]  ;;  %6172 = vrcp.f32 %v1822_v50  ;;  %v1880_v40 = vmul.f32 %v6165_v61, %v10494_v59 }
 0x5b7   :  { %3173 = vadd.xlane.f32.xlu0 %v3172_v55  ;;  %v1830_v52 = vpop.xlane.xlu0 %1829  ;;  %v1883_v42 = vmul.f32 %v6167_v4, %v10491_v29 }
 0x5b8   :  { %3169 = vadd.xlane.f32.xlu1 %v3168_v19  ;;  %v8699_v48 = vpop.xlane.xlu1 %3023  ;;  %v10493_v19 = vld [vmem:[#allocation48_spill] sm:$0xff] }
 0x5b9   :  { %2661 = vmatpush1.bf16.msra.mxu0 %v10489_v3  ;;  %v1911_v14 = vpack.c.bf16 %v1883_v42, %v1881_v45  ;;  %v1882_v13 = vmul.f32 %v6167_v4, %v10493_v19  ;;  %v10495_v3 = vld [vmem:[#allocation17_spill] sm:$0xff]  ;;  %v10497_v4 = vld [vmem:[#allocation102_spill] sm:$0xff] }
 0x5ba   :  { %2662 = vmatprep.subr.bf16.mxu0 %v10376_v26  ;;  %v10496_v42 = vld [vmem:[#allocation25_spill] sm:$0xff] }
 0x5bb   :  { %v8707_v23 = vpop.xlane.xlu0 %3035  ;;  %v1910_v45 = vpack.c.bf16 %v1882_v13, %v1880_v40 }
 0x5bc   :  { %2021 = vmatmul.mubr.bf16.gmra.mxu0 %v1908_v25  ;;  %v1826_v55 = vpop.xlane.xlu1 %1825  ;;  %v6169_v25 = vpop.eup %6168 }
 0x5bd   :  { %2663 = vmatpush1.bf16.msra.mxu0 %v10492_v54  ;;  %5290 = vmatprep.mubr.msk.bf16.mxu0 %vm762_vm4, %v1911_v14  ;;  %6174 = vrcp.f32 %v1826_v55  ;;  %v1885_v54 = vmul.f32 %v6169_v25, %v10497_v4  ;;  %v10498_v55 = vld [vmem:[#allocation133_spill] sm:$0xff]  ;;  %v10501_v4 = vld [vmem:[#allocation6_spill] sm:$0xff] }
 0x5be   :  { %2664 = vmatprep.subr.bf16.mxu0 %v10376_v26  ;;  %6176 = vrcp.f32 %v1830_v52  ;;  %v1884_v19 = vmul.f32 %v6169_v25, %v10498_v55  ;;  %v10502_v25 = vld [vmem:[#allocation43_spill] sm:$0xff] }
 0x5bf   :  { %v1842_v50 = vpop.xlane.xlu0 %1841 }
 0x5c0   :  { %v8712_v27 = vpop.xlane.xlu1 %3031  ;;  %6178 = vrcp.f32 %v1842_v50 }
 0x5c1   :  { %2665 = vmatpush1.bf16.msra.mxu0 %v10495_v3  ;;  %v10499_v3 = vld [vmem:[#allocation105_spill] sm:$0xff] }
 0x5c2   :  { %2666 = vmatprep.subr.bf16.mxu0 %v10376_v26  ;;  %v6171_v29 = vpop.eup %6170  ;;  %v3057_v52 = vsub.f32 %v10499_v3, %v8643_v39 }
 0x5c3   :  { %v1887_v61 = vmul.f32 %v6171_v29, %v8261_v49  ;;  %v1886_v59 = vmul.f32 %v6171_v29, %v8268_v43  ;;  %v6173_v49 = vpop.eup %6172  ;;  %v3058_v43 = vsub.f32 %v10502_v25, %v8643_v39  ;;  %v3059_v25 = vsub.f32 %v7938_v57, %v8665_v30  ;;  %v10509_v57 = vld [vmem:[#allocation52_spill] sm:$0xff] }
 0x5c4   :  { %2029 = vmatmul.mubr.bf16.gmra.mxu0 %v1910_v45  ;;  %v1834_v14 = vpop.xlane.xlu1 %1833  ;;  %v10500_v45 = vld [vmem:[#allocation26_spill] sm:$0xff]  ;;  %v3107_v29 = vmul.f32 1.442695, %v3057_v52  ;;  %v1888_v3 = vmul.f32 %v6173_v49, %v8251_v8  ;;  %v3061_v8 = vsub.f32 %v7951_v51, %v8673_v62 }
 0x5c5   :  { %2667 = vmatpush1.bf16.msra.mxu0 %v10496_v42  ;;  %6180 = vrcp.f32 %v1834_v14  ;;  %v1913_v13 = vpack.c.bf16 %v1887_v61, %v1885_v54  ;;  %v1912_v40 = vpack.c.bf16 %v1886_v59, %v1884_v19  ;;  %v10503_v14 = vld [vmem:[#allocation36_spill] sm:$0xff]  ;;  %v10504_v61 = vld [vmem:[#allocation18_spill] sm:$0xff]  ;;  %v1889_v59 = vmul.f32 %v6173_v49, %v8237_v28 }
 0x5c6   :  { %2668 = vmatprep.subr.bf16.mxu0 %v10376_v26  ;;  %v3060_v54 = vsub.f32 %v10503_v14, %v8665_v30  ;;  %v10505_v19 = vld [vmem:[#allocation10_spill] sm:$0xff]  ;;  %v2656_v30 = vsel %vm1298_vm5, %v10509_v57, 0 }
 0x5c7   :  { %5291 = vmatprep.mubr.msk.bf16.mxu0 %vm762_vm4, %v1913_v13  ;;  %v3109_v13 = vmul.f32 1.442695, %v3058_v43 }
 0x5c8   :  { %v1838_v42 = vpop.xlane.xlu1 %1837  ;;  %v3113_v14 = vmul.f32 1.442695, %v3060_v54  ;;  %v3111_v54 = vmul.f32 1.442695, %v3059_v25 }
 0x5c9   :  { %2669 = vmatpush1.bf16.msra.mxu0 %v10500_v45  ;;  %3280 = vrot.lane.b32.xlu1 %v10501_v4, %s6449_s3  ;;  %6182 = vrcp.f32 %v1838_v42  ;;  %v10506_v45 = vld [vmem:[#allocation132_spill] sm:$0xff] }
 0x5ca   :  { %2670 = vmatprep.subr.bf16.mxu0 %v10376_v26  ;;  %v6175_v50 = vpop.eup %6174  ;;  %v3064_v42 = vsub.f32 %v10506_v45, %v8661_v16  ;;  %6184 = vpow2.f32 %v3107_v29 }
 0x5cb   :  { %v1891_v39 = vmul.f32 %v6175_v50, %v8291_v1  ;;  %v1890_v52 = vmul.f32 %v6175_v50, %v8297_v15  ;;  %v6177_v1 = vpop.eup %6176  ;;  %v10508_v15 = vld [vmem:[#allocation39_spill] sm:$0xff] }
 0x5cc   :  { %2037 = vmatmul.mubr.bf16.gmra.mxu0 %v1912_v40  ;;  %v8733_v55 = vpop.xlane.xlu1 %3039  ;;  %v1850_v40 = vpop.xlane.xlu0 %1849  ;;  %v3066_v49 = vsub.f32 %v10508_v15, %v8699_v48  ;;  %v3121_v50 = vmul.f32 1.442695, %v3064_v42 }
 0x5cd   :  { %2671 = vmatpush1.bf16.msra.mxu0 %v10504_v61  ;;  %3296 = vrot.lane.b32.xlu0 %v10505_v19, %s6449_s3  ;;  %v1915_v4 = vpack.c.bf16 %v1891_v39, %v1889_v59  ;;  %v10507_v61 = vld [vmem:[#allocation27_spill] sm:$0xff]  ;;  %v1914_v19 = vpack.c.bf16 %v1890_v52, %v1888_v3  ;;  %6186 = vrcp.f32 %v1850_v40  ;;  %v6179_v43 = vpop.eup %6178  ;;  %v10510_v59 = vld [vmem:[#allocation40_spill] sm:$0xff] }
 0x5ce   :  { %2672 = vmatprep.subr.bf16.mxu0 %v10376_v26  ;;  %6188 = vpow2.f32 %v3109_v13  ;;  %v3062_v39 = vsub.f32 %v10510_v59, %v8673_v62  ;;  %v10511_v13 = vld [vmem:[#allocation116_spill] sm:$0xff]  ;;  %v10512_v3 = vld [vmem:[#allocation51_spill] sm:$0xff]  ;;  %v10514_v62 = vld [vmem:[#allocation41_spill] sm:$0xff] }
 0x5cf   :  { %5292 = vmatprep.mubr.msk.bf16.mxu0 %vm762_vm4, %v1915_v4  ;;  %v3065_v40 = vsub.f32 %v10511_v13, %v8699_v48  ;;  %v1893_v52 = vmul.f32 %v6177_v1, %v10512_v3  ;;  %v10513_v4 = vld [vmem:[#allocation42_spill] sm:$0xff] }
 0x5d0   :  { %v1846_v28 = vpop.xlane.xlu1 %1845 }
 0x5d1   :  { %2673 = vmatpush1.bf16.msra.mxu0 %v10507_v61  ;;  %6190 = vrcp.f32 %v1846_v28  ;;  %v1892_v61 = vmul.f32 %v6177_v1, %v10513_v4  ;;  %v3125_v28 = vmul.f32 1.442695, %v3066_v49  ;;  %v3123_v13 = vmul.f32 1.442695, %v3065_v40 }
 0x5d2   :  { %2688 = vmatprep.subr.bf16.mxu0 %v10376_v26  ;;  %v6181_v29 = vpop.eup %6180  ;;  %6192 = vpow2.f32 %v3113_v14  ;;  %v3115_v14 = vmul.f32 1.442695, %v3061_v8  ;;  %v3069_v49 = vsub.f32 %v8041_v6, %v8712_v27 }
 0x5d3   :  { %v1895_v45 = vmul.f32 %v6181_v29, %v8321_v63  ;;  %v1894_v42 = vmul.f32 %v6181_v29, %v8337_v11  ;;  %v3117_v63 = vmul.f32 1.442695, %v3062_v39  ;;  %v10516_v11 = vld [vmem:[#allocation111_spill] sm:$0xff] }
 0x5d4   :  { %2045 = vmatmul.mubr.bf16.gmra.mxu0 %v1914_v19  ;;  %v1854_v51 = vpop.xlane.xlu1 %1853  ;;  %v3070_v19 = vsub.f32 %v10514_v62, %v8712_v27  ;;  %v3063_v29 = vsub.f32 %v10516_v11, %v8661_v16  ;;  %v3131_v27 = vmul.f32 1.442695, %v3069_v49  ;;  %v10519_v62 = vld [vmem:[#allocation47_spill] sm:$0xff] }
 0x5d5   :  { %2689 = vmatpush2.bf16.msra.mxu0 %v2656_v30  ;;  %6194 = vrcp.f32 %v1854_v51  ;;  %v1917_v48 = vpack.c.bf16 %v1895_v45, %v1893_v52  ;;  %v1916_v15 = vpack.c.bf16 %v1894_v42, %v1892_v61  ;;  %v10515_v30 = vld [vmem:[#allocation46_spill] sm:$0xff]  ;;  %v3073_v52 = vsub.f32 %v8095_v9, %v8733_v55 }
 0x5d6   :  { %3336 = vmatprep.subr.bf16.mxu0 %v10376_v26  ;;  %v6183_v25 = vpop.eup %6182  ;;  %v1899_v59 = vmul.f32 %v6179_v43, %v10515_v30  ;;  %6196 = vpow2.f32 %v3111_v54  ;;  %v3133_v51 = vmul.f32 1.442695, %v3070_v19  ;;  %v10517_v54 = vld [vmem:[#allocation44_spill] sm:$0xff]  ;;  %v3119_v40 = vmul.f32 1.442695, %v3063_v29  ;;  %v10518_v45 = vld [vmem:[#allocation118_spill] sm:$0xff] }
 0x5d7   :  { %v1897_v57 = vmul.f32 %v6183_v25, %v8350_v20  ;;  %6198 = vpow2.f32 %v3121_v50  ;;  %5293 = vmatprep.mubr.msk.bf16.mxu0 %vm762_vm4, %v1917_v48  ;;  %v3074_v20 = vsub.f32 %v8366_v21, %v8733_v55  ;;  %v3068_v39 = vsub.f32 %v10517_v54, %v8683_v34  ;;  %v8778_v50 = vpop.eup %6184 }
 0x5d8   :  { %v2468_v1 = vpop.xlane.xlu1 %2467  ;;  %6200 = vpow2.f32 %v3115_v14  ;;  %v1896_v3 = vmul.f32 %v6183_v25, %v8356_v47  ;;  %v3067_v4 = vsub.f32 %v10518_v45, %v8683_v34  ;;  %v1898_v42 = vmul.f32 %v6179_v43, %v8327_v53  ;;  %v10520_v53 = vld [vmem:[#allocation126_spill] sm:$0xff] }
 0x5d9   :  { %v1919_v8 = vpack.c.bf16 %v1899_v59, %v1897_v57  ;;  %6202 = vpow2.f32 %v3125_v28  ;;  %v3141_v61 = vmul.f32 1.442695, %v3074_v20  ;;  %v3129_v28 = vmul.f32 1.442695, %v3068_v39 }
 0x5da   :  { %6204 = vpow2.f32 %v3117_v63  ;;  %v6187_v6 = vpop.eup %6186  ;;  %v3072_v47 = vsub.f32 %v10519_v62, %v8707_v23  ;;  %v1918_v9 = vpack.c.bf16 %v1898_v42, %v1896_v3  ;;  %v3139_v34 = vmul.f32 1.442695, %v3073_v52 }
 0x5db   :  { %6206 = vpow2.f32 %v3123_v13  ;;  %v8783_v21 = vpop.eup %6188  ;;  %v1903_v19 = vmul.f32 %v6187_v6, %v8335_v32  ;;  %v3071_v43 = vsub.f32 %v10520_v53, %v8707_v23  ;;  %v1902_v11 = vmul.f32 %v6187_v6, %v8342_v2  ;;  %v10521_v6 = vld [vmem:[#allocation45_spill] sm:$0xff] }
 0x5dc   :  { %2053 = vmatmul.mubr.bf16.gmra.mxu0 %v1916_v15  ;;  %v2472_v16 = vpop.xlane.xlu1 %2471  ;;  %v3127_v15 = vmul.f32 1.442695, %v3067_v4  ;;  %v3137_v30 = vmul.f32 1.442695, %v3072_v47  ;;  %v10522_v4 = vld [vmem:[#allocation65_spill] sm:$0xff]  ;;  %v10523_v47 = vld [vmem:[#allocation50_spill] sm:$0xff] }
 0x5dd   :  { %5294 = vmatprep.mubr.msk.bf16.mxu0 %vm762_vm4, %v1919_v8  ;;  %6208 = vrcp.f32 %v2472_v16  ;;  %v3135_v23 = vmul.f32 1.442695, %v3071_v43 }
 0x5de   :  { %6210 = vpow2.f32 %v3133_v51  ;;  %v6191_v14 = vpop.eup %6190 }
 0x5df   :  { %6212 = vrcp.f32 %v2468_v1  ;;  %v8790_v25 = vpop.eup %6192  ;;  %v1901_v55 = vmul.f32 %v6191_v14, %v8378_v33  ;;  %v1900_v33 = vmul.f32 %v6191_v14, %v8382_v44  ;;  %v3175_v44 = vsel %vm762_vm4, %v8783_v21, 0.0 }
 0x5e0   :  { %6214 = vpow2.f32 %v3119_v40  ;;  %v3179_v29 = vsel %vm762_vm4, %v8790_v25, 0.0  ;;  %v3176_v2 = vadd.f32 %v8778_v50, %v3175_v44 }
 0x5e1   :  { %6216 = vpow2.f32 %v3131_v27  ;;  %v1921_v57 = vpack.c.bf16 %v1903_v19, %v1901_v55  ;;  %v1920_v49 = vpack.c.bf16 %v1902_v11, %v1900_v33  ;;  %v8850_v33 = vpop.permute.xlu0 %3282  ;;  %v10524_v11 = vld [vmem:[#allocation69_spill] sm:$0xff] }
 0x5e2   :  { %v6195_v48 = vpop.eup %6194  ;;  %6218 = vpow2.f32 %v3141_v61 }
 0x5e3   :  { %6220 = vpow2.f32 %v3129_v28  ;;  %v8796_v59 = vpop.eup %6196  ;;  %v1905_v32 = vmul.f32 %v6195_v48, %v8388_v56  ;;  %v1904_v27 = vmul.f32 %v6195_v48, %v10521_v6 }
 0x5e4   :  { %2061 = vmatmul.mubr.bf16.gmra.mxu0 %v1918_v9  ;;  %v8800_v63 = vpop.eup %6198  ;;  %6222 = vpow2.f32 %v3139_v34  ;;  %v3180_v20 = vadd.f32 %v8796_v59, %v3179_v29 }
 0x5e5   :  { %5295 = vmatprep.mubr.msk.bf16.mxu0 %vm762_vm4, %v1921_v57  ;;  %v8803_v1 = vpop.eup %6200  ;;  %6224 = vpow2.f32 %v3127_v15  ;;  %v1923_v56 = vpack.c.bf16 %v1905_v32, %v1905_v32  ;;  %v3187_v55 = vsel %vm762_vm4, %v8800_v63, 0.0  ;;  %v1922_v34 = vpack.c.bf16 %v1904_v27, %v1904_v27 }
 0x5e6   :  { %v8808_v13 = vpop.eup %6202  ;;  %6226 = vpow2.f32 %v3137_v30 }
 0x5e7   :  { %v8812_v8 = vpop.eup %6204  ;;  %6228 = vpow2.f32 %v3135_v23  ;;  %v3191_v39 = vsel %vm762_vm4, %v8808_v13, 0.0 }
 0x5e8   :  { %v8814_v51 = vpop.eup %6206  ;;  %v3183_v40 = vsel %vm762_vm4, %v8812_v8, 0.0 }
 0x5e9   :  { %v3192_v45 = vadd.f32 %v8814_v51, %v3191_v39  ;;  %v3184_v14 = vadd.f32 %v8803_v1, %v3183_v40 }
 0x5ea   :  { %v6209_v54 = vpop.eup %6208 }
 0x5eb   :  { %v8820_v16 = vpop.eup %6210  ;;  %v2553_v61 = vmul.f32 %v6209_v54, %v10522_v4  ;;  %v2552_v29 = vmul.f32 %v6209_v54, %v10524_v11 }
 0x5ec   :  { %2069 = vmatmul.mubr.bf16.gmra.mxu0 %v1920_v49  ;;  %3181 = vadd.xlane.f32.xlu0 %v3180_v20  ;;  %v6213_v3 = vpop.eup %6212  ;;  %v3199_v28 = vsel %vm762_vm4, %v8820_v16, 0.0 }
 0x5ed   :  { %5296 = vmatprep.mubr.msk.bf16.mxu0 %vm762_vm4, %v1923_v56  ;;  %3177 = vadd.xlane.f32.xlu1 %v3176_v2  ;;  %v8826_v52 = vpop.eup %6214  ;;  %v2551_v9 = vmul.f32 %v6213_v3, %v10523_v47  ;;  %v10525_v56 = vld [vmem:[#allocation49_spill] sm:$0xff] }
 0x5ee   :  { %v8830_v42 = vpop.eup %6216  ;;  %v3188_v43 = vadd.f32 %v8826_v52, %v3187_v55  ;;  %v2550_v20 = vmul.f32 %v6213_v3, %v10525_v56  ;;  %v10526_v3 = vld [vmem:[#allocation28_spill] sm:$0xff] }
 0x5ef   :  { %v8835_v62 = vpop.eup %6218  ;;  %v2585_v48 = vpack.c.bf16 %v2553_v61, %v2551_v9  ;;  %v3200_v15 = vadd.f32 %v8830_v42, %v3199_v28  ;;  %v10527_v28 = vld [vmem:[#allocation19_spill] sm:$0xff] }
 0x5f0   :  { %3193 = vadd.xlane.f32.xlu0 %v3192_v45  ;;  %v8840_v19 = vpop.eup %6220  ;;  %v3207_v57 = vsel %vm762_vm4, %v8835_v62, 0.0  ;;  %v2584_v45 = vpack.c.bf16 %v2552_v29, %v2550_v20  ;;  %v10531_v20 = vld [vmem:[#allocation67_spill] sm:$0xff] }
 0x5f1   :  { %3185 = vadd.xlane.f32.xlu1 %v3184_v14  ;;  %v8843_v53 = vpop.eup %6222  ;;  %v3195_v32 = vsel %vm762_vm4, %v8840_v19, 0.0 }
 0x5f2   :  { %v8848_v30 = vpop.eup %6224  ;;  %v3208_v49 = vadd.f32 %v8843_v53, %v3207_v57 }
 0x5f3   :  { %v8855_v23 = vpop.eup %6226  ;;  %v3196_v2 = vadd.f32 %v8848_v30, %v3195_v32  ;;  %v10529_v32 = vld [vmem:[#allocation98_spill] sm:$0xff] }
 0x5f4   :  { %2077 = vmatmul.mubr.bf16.gmra.mxu0 %v1922_v34  ;;  %3201 = vadd.xlane.f32.xlu0 %v3200_v15  ;;  %v8863_v40 = vpop.eup %6228  ;;  %v3203_v27 = vsel %vm762_vm4, %v8855_v23, 0.0  ;;  %v10528_v34 = vld [vmem:[#allocation29_spill] sm:$0xff] }
 0x5f5   :  { %5306 = vmatprep.mubr.msk.bf16.mxu0 %vm762_vm4, %v2585_v48  ;;  %3189 = vadd.xlane.f32.xlu1 %v3188_v43  ;;  %v3204_v4 = vadd.f32 %v8863_v40, %v3203_v27  ;;  %v10533_v27 = vld [vmem:[#allocation53_spill] sm:$0xff] }
 0x5f6   :  { %v8858_v44 = vpop.f32.mrf.mxu0 }
 0x5f8   :  { %v1338_v39 = vpop.f32.mrf.mxu0  ;;  %3209 = vadd.xlane.f32.xlu0 %v3208_v49  ;;  %v2476_v6 = vpop.xlane.xlu0 %2475  ;;  %v10530_v49 = vld [vmem:[#allocation55_spill] sm:$0xff] }
 0x5f9   :  { %3197 = vadd.xlane.f32.xlu1 %v3196_v2  ;;  %6230 = vrcp.f32 %v2476_v6  ;;  %v10532_v39 = vld [vmem:[#allocation63_spill] sm:$0xff] }
 0x5fa   :  { %v8867_v54 = vpop.f32.mrf.mxu0 }
 0x5fc   :  { %2691 = vmatmul.mubr.bf16.vlgmr.msra.gmra.mxu0 %v2584_v45  ;;  %v1341_v61 = vpop.f32.mrf.mxu0  ;;  %v2480_v14 = vpop.xlane.xlu0 %2479 }
 0x5fd   :  { %3337 = vmatpush1.bf16.msra.mxu0 %v10526_v3  ;;  %3205 = vadd.xlane.f32.xlu1 %v3204_v4  ;;  %6232 = vrcp.f32 %v2480_v14  ;;  %v10534_v4 = vld [vmem:[#allocation90_spill] sm:$0xff]  ;;  %v3285_v61 = vpop.permute.xlu1 %3284 }
 0x5fe   :  { %3338 = vmatprep.subr.bf16.mxu0 %v10376_v26 }
 0x600   :  { %v2484_v47 = vpop.xlane.xlu0 %2483 }
 0x601   :  { %3339 = vmatpush1.bf16.msra.mxu0 %v10527_v28  ;;  %6234 = vrcp.f32 %v2484_v47 }
 0x602   :  { %v8873_v9 = vpop.f32.mrf.mxu0  ;;  %3340 = vmatprep.subr.bf16.mxu0 %v10376_v26 }
 0x604   :  { %v1346_v55 = vpop.f32.mrf.mxu0  ;;  %v2488_v48 = vpop.xlane.xlu0 %2487 }
 0x605   :  { %3341 = vmatpush1.bf16.msra.mxu0 %v10528_v34  ;;  %6236 = vrcp.f32 %v2488_v48 }
 0x606   :  { %v8877_v15 = vpop.f32.mrf.mxu0  ;;  %3342 = vmatprep.subr.bf16.mxu0 %v10376_v26  ;;  %v6231_v57 = vpop.eup %6230 }
 0x607   :  { %v2555_v56 = vmul.f32 %v6231_v57, %v10530_v49  ;;  %v2554_v6 = vmul.f32 %v6231_v57, %v10532_v39 }
 0x608   :  { %v1349_v43 = vpop.f32.mrf.mxu0  ;;  %v2496_v29 = vpop.xlane.xlu0 %2495 }
 0x609   :  { %3343 = vmatpush1.bf16.msra.mxu0 %v10529_v32  ;;  %6238 = vrcp.f32 %v2496_v29  ;;  %v10536_v29 = vld [vmem:[#allocation20_spill] sm:$0xff] }
 0x60a   :  { %3344 = vmatprep.subr.bf16.mxu0 %v10376_v26  ;;  %v6233_v11 = vpop.eup %6232 }
 0x60b   :  { %v2557_v2 = vmul.f32 %v6233_v11, %v10531_v20  ;;  %v2556_v45 = vmul.f32 %v6233_v11, %v10533_v27  ;;  %v10535_v11 = vld [vmem:[#allocation57_spill] sm:$0xff] }
 0x60c   :  { %v2504_v34 = vpop.xlane.xlu0 %2503 }
 0x60d   :  { %3345 = vmatpush1.bf16.msra.mxu0 %v10534_v4  ;;  %v2587_v14 = vpack.c.bf16 %v2557_v2, %v2555_v56  ;;  %v2586_v28 = vpack.c.bf16 %v2556_v45, %v2554_v6 }
 0x60e   :  { %3346 = vmatprep.subr.bf16.mxu0 %v10376_v26  ;;  %v8888_v3 = vpop.f32.mrf.mxu0  ;;  %v6235_v55 = vpop.eup %6234 }
 0x60f   :  { %5307 = vmatprep.mubr.msk.bf16.mxu0 %vm762_vm4, %v2587_v14  ;;  %v2559_v49 = vmul.f32 %v6235_v55, %v10535_v11  ;;  %v2558_v20 = vmul.f32 %v6235_v55, %v10536_v29  ;;  %v10539_v29 = vld [vmem:[#allocation11_spill] sm:$0xff] }
 0x610   :  { %v1354_v47 = vpop.f32.mrf.mxu0  ;;  %2699 = vmatmul.mubr.bf16.gmra.mxu0 %v2586_v28  ;;  %v2512_v45 = vpop.xlane.xlu0 %2511 }
 0x611   :  { %3347 = vmatpush1.bf16.msra.mxu0 %v3285_v61  ;;  %v2492_v48 = vpop.xlane.xlu1 %2491  ;;  %v10537_v47 = vld [vmem:[#allocation56_spill] sm:$0xff] }
 0x612   :  { %3348 = vmatprep.subr.bf16.mxu0 %v10376_v26  ;;  %v8892_v43 = vpop.f32.mrf.mxu0  ;;  %v6237_v57 = vpop.eup %6236  ;;  %6240 = vrcp.f32 %v2492_v48 }
 0x613   :  { %v2561_v56 = vmul.f32 %v6237_v57, %v8478_v5  ;;  %v2560_v2 = vmul.f32 %v6237_v57, %v8484_v31  ;;  %6242 = vrcp.f32 %v2504_v34  ;;  %v10538_v34 = vld [vmem:[#allocation72_spill] sm:$0xff] }
 0x614   :  { %v1357_v32 = vpop.f32.mrf.mxu0  ;;  %v2520_v61 = vpop.xlane.xlu0 %2519 }
 0x615   :  { %3349 = vmatpush1.bf16.msra.mxu0 %v8850_v33  ;;  %v2500_v39 = vpop.xlane.xlu1 %2499  ;;  %v2589_v6 = vpack.c.bf16 %v2561_v56, %v2559_v49  ;;  %v2588_v27 = vpack.c.bf16 %v2560_v2, %v2558_v20  ;;  %v10540_v2 = vld [vmem:[#allocation75_spill] sm:$0xff] }
 0x616   :  { %3350 = vmatprep.subr.bf16.mxu0 %v10376_v26  ;;  %6244 = vrcp.f32 %v2500_v39  ;;  %v6239_v5 = vpop.eup %6238 }
 0x617   :  { %5308 = vmatprep.mubr.msk.bf16.mxu0 %vm762_vm4, %v2589_v6  ;;  %6246 = vrcp.f32 %v2512_v45  ;;  %v2565_v28 = vmul.f32 %v6239_v5, %v8496_v10  ;;  %v2564_v48 = vmul.f32 %v6239_v5, %v10538_v34 }
 0x618   :  { %2707 = vmatmul.mubr.bf16.gmra.mxu0 %v2588_v27 }
 0x619   :  { %v2508_v4 = vpop.xlane.xlu1 %2507  ;;  %v2528_v32 = vpop.xlane.xlu0 %2527 }
 0x61a   :  { %6248 = vrcp.f32 %v2508_v4  ;;  %v10541_v4 = vld [vmem:[#allocation21_spill] sm:$0xff] }
 0x61d   :  { %v2516_v14 = vpop.xlane.xlu1 %2515 }
 0x61e   :  { %6250 = vrcp.f32 %v2516_v14 }
 0x61f   :  { %v6241_v31 = vpop.eup %6240  ;;  %6252 = vrcp.f32 %v2520_v61  ;;  %v10542_v61 = vld [vmem:[#allocation81_spill] sm:$0xff] }
 0x620   :  { %v2563_v33 = vmul.f32 %v6241_v31, %v8500_v35  ;;  %v2562_v55 = vmul.f32 %v6241_v31, %v10537_v47  ;;  %v6243_v57 = vpop.eup %6242  ;;  %v10543_v31 = vld [vmem:[#allocation74_spill] sm:$0xff] }
 0x621   :  { %v2569_v39 = vmul.f32 %v6243_v57, %v10540_v2  ;;  %v2524_v10 = vpop.xlane.xlu1 %2523 }
 0x622   :  { %v2591_v11 = vpack.c.bf16 %v2565_v28, %v2563_v33  ;;  %v2590_v49 = vpack.c.bf16 %v2564_v48, %v2562_v55  ;;  %6254 = vrcp.f32 %v2524_v10  ;;  %v2568_v28 = vmul.f32 %v6243_v57, %v10543_v31  ;;  %v10544_v33 = vld [vmem:[#allocation77_spill] sm:$0xff]  ;;  %v10548_v57 = vld [vmem:[#allocation83_spill] sm:$0xff] }
 0x623   :  { %v6245_v56 = vpop.eup %6244  ;;  %6256 = vrcp.f32 %v2528_v32 }
 0x624   :  { %5309 = vmatprep.mubr.msk.bf16.mxu0 %vm762_vm4, %v2591_v11  ;;  %v2567_v20 = vmul.f32 %v6245_v56, %v10539_v29  ;;  %v6247_v6 = vpop.eup %6246  ;;  %v2532_v35 = vpop.xlane.xlu0 %2531  ;;  %v2566_v5 = vmul.f32 %v6245_v56, %v10541_v4  ;;  %v10545_v29 = vld [vmem:[#allocation22_spill] sm:$0xff] }
 0x625   :  { %2715 = vmatmul.mubr.bf16.gmra.mxu0 %v2590_v49  ;;  %v2573_v47 = vmul.f32 %v6247_v6, %v10544_v33  ;;  %6258 = vrcp.f32 %v2532_v35 }
 0x626   :  { %v2593_v27 = vpack.c.bf16 %v2569_v39, %v2567_v20  ;;  %v2592_v55 = vpack.c.bf16 %v2568_v28, %v2566_v5  ;;  %v10546_v20 = vld [vmem:[#allocation87_spill] sm:$0xff]  ;;  %v10547_v39 = vld [vmem:[#allocation12_spill] sm:$0xff] }
 0x627   :  { %v6249_v45 = vpop.eup %6248  ;;  %v2572_v10 = vmul.f32 %v6247_v6, %v10547_v39  ;;  %v10550_v6 = vld [vmem:[#allocation13_spill] sm:$0xff] }
 0x628   :  { %5310 = vmatprep.mubr.msk.bf16.mxu0 %vm762_vm4, %v2593_v27  ;;  %v2571_v14 = vmul.f32 %v6249_v45, %v10542_v61  ;;  %v3146_v34 = vpop.xlane.xlu0 %3145  ;;  %v2570_v56 = vmul.f32 %v6249_v45, %v10545_v29  ;;  %v10549_v45 = vld [vmem:[#allocation85_spill] sm:$0xff] }
 0x62a   :  { %v2595_v48 = vpack.c.bf16 %v2573_v47, %v2571_v14  ;;  %v2594_v4 = vpack.c.bf16 %v2572_v10, %v2570_v56 }
 0x62b   :  { %v6251_v11 = vpop.eup %6250 }
 0x62c   :  { %v6253_v49 = vpop.eup %6252  ;;  %v2575_v2 = vmul.f32 %v6251_v11, %v10546_v20  ;;  %v3154_v28 = vpop.xlane.xlu1 %3153  ;;  %v2574_v33 = vmul.f32 %v6251_v11, %v8570_v36 }
 0x62d   :  { %2723 = vmatmul.mubr.bf16.gmra.mxu0 %v2592_v55  ;;  %v3150_v27 = vpop.xlane.xlu0 %3149  ;;  %v2577_v32 = vmul.f32 %v6253_v49, %v10548_v57  ;;  %v2576_v47 = vmul.f32 %v6253_v49, %v10549_v45 }
 0x62e   :  { %5311 = vmatprep.mubr.msk.bf16.mxu0 %vm762_vm4, %v2595_v48  ;;  %6260 = vrcp.f32 %v3150_v27 }
 0x62f   :  { %v2597_v61 = vpack.c.bf16 %v2577_v32, %v2575_v2  ;;  %v6255_v5 = vpop.eup %6254  ;;  %6262 = vrcp.f32 %v3146_v34  ;;  %v2596_v29 = vpack.c.bf16 %v2576_v47, %v2574_v33 }
 0x630   :  { %v6257_v31 = vpop.eup %6256  ;;  %v2579_v35 = vmul.f32 %v6255_v5, %v8582_v24  ;;  %v3162_v39 = vpop.xlane.xlu1 %3161  ;;  %v2578_v24 = vmul.f32 %v6255_v5, %v8589_v12 }
 0x631   :  { %v2581_v55 = vmul.f32 %v6257_v31, %v10550_v6  ;;  %v2580_v57 = vmul.f32 %v6257_v31, %v8560_v22 }
 0x632   :  { %v6259_v2 = vpop.eup %6258 }
 0x633   :  { %v2599_v20 = vpack.c.bf16 %v2581_v55, %v2579_v35  ;;  %v2583_v34 = vmul.f32 %v6259_v2, %v8605_v46  ;;  %v2598_v32 = vpack.c.bf16 %v2580_v57, %v2578_v24  ;;  %v2582_v46 = vmul.f32 %v6259_v2, %v8600_v0  ;;  %v10552_v2 = vld [vmem:[#allocation23_spill] sm:$0xff] }
 0x634   :  { %v10551_v55 = vmov 0.0  }
 0x635   :  { %2731 = vmatmul.mubr.bf16.gmra.mxu0 %v2594_v4  ;;  %v3158_v14 = vpop.xlane.xlu0 %3157  ;;  %v2601_v4 = vpack.c.bf16 %v2583_v34, %v2583_v34  ;;  %v2600_v6 = vpack.c.bf16 %v2582_v46, %v2582_v46 }
 0x636   :  { %5312 = vmatprep.mubr.msk.bf16.mxu0 %vm762_vm4, %v2597_v61  ;;  %6264 = vrcp.f32 %v3158_v14 }
 0x637   :  { %6266 = vrcp.f32 %v3154_v28 }
 0x639   :  { %v3166_v56 = vpop.xlane.xlu0 %3165 }
 0x63a   :  { %6268 = vrcp.f32 %v3166_v56 }
 0x63b   :  { %v8923_v48 = vpop.f32.mrf.mxu0  ;;  %v6261_v61 = vpop.eup %6260  ;;  %6270 = vrcp.f32 %v3162_v39 }
 0x63c   :  { %v6263_v12 = vpop.eup %6262  ;;  %v3231_v22 = vmul.f32 %v6261_v61, %v8626_v41  ;;  %v3230_v41 = vmul.f32 %v6261_v61, %v8618_v38  ;;  %v10554_v38 = vld [vmem:[#allocation58_spill] sm:$0xff] }
 0x63d   :  { %2739 = vmatmul.mubr.bf16.gmra.mxu0 %v2596_v29  ;;  %v1362_v10 = vpop.f32.mrf.mxu0  ;;  %v3229_v28 = vmul.f32 %v6263_v12, %v8603_v58  ;;  %v3228_v39 = vmul.f32 %v6263_v12, %v10552_v2 }
 0x63e   :  { %5313 = vmatprep.mubr.msk.bf16.mxu0 %vm762_vm4, %v2599_v20  ;;  %v10553_v10 = vld [vmem:[#allocation59_spill] sm:$0xff] }
 0x63f   :  { %v8926_v36 = vpop.f32.mrf.mxu0  ;;  %v3263_v29 = vpack.c.bf16 %v3231_v22, %v3229_v28  ;;  %v3262_v24 = vpack.c.bf16 %v3230_v41, %v3228_v39  ;;  %v10558_v39 = vld [vmem:[#allocation14_spill] sm:$0xff] }
 0x640   :  { %v3174_v11 = vpop.xlane.xlu0 %3173 }
 0x641   :  { %v3170_v49 = vpop.xlane.xlu1 %3169  ;;  %v1365_v27 = vpop.f32.mrf.mxu0  ;;  %6272 = vrcp.f32 %v3174_v11 }
 0x642   :  { %6274 = vrcp.f32 %v3170_v49  ;;  %v10555_v49 = vld [vmem:[#allocation61_spill] sm:$0xff] }
 0x643   :  { %v6265_v20 = vpop.eup %6264 }
 0x644   :  { %v3297_v45 = vpop.permute.xlu0 %3296  ;;  %v6267_v0 = vpop.eup %6266  ;;  %v3235_v56 = vmul.f32 %v6265_v20, %v8656_v7  ;;  %v3234_v11 = vmul.f32 %v6265_v20, %v10554_v38 }
 0x645   :  { %v3281_v33 = vpop.permute.xlu1 %3280  ;;  %v8931_v35 = vpop.f32.mrf.mxu0  ;;  %2747 = vmatmul.mubr.bf16.gmra.mxu0 %v2598_v32  ;;  %v3334_v14 = vsel %vm1298_vm5, %v3297_v45, 0  ;;  %v3233_v58 = vmul.f32 %v6267_v0, %v10553_v10  ;;  %v10556_v45 = vld [vmem:[#allocation7_spill] sm:$0xff] }
 0x646   :  { %3351 = vmatpush1.bf16.msra.mxu0 %v3281_v33  ;;  %5314 = vmatprep.mubr.msk.bf16.mxu0 %vm762_vm4, %v2601_v4  ;;  %v3232_v12 = vmul.f32 %v6267_v0, %v10556_v45 }
 0x647   :  { %v1370_v5 = vpop.f32.mrf.mxu0  ;;  %3366 = vmatprep.subr.bf16.mxu0 %v10376_v26  ;;  %v3265_v27 = vpack.c.bf16 %v3235_v56, %v3233_v58  ;;  %v6269_v57 = vpop.eup %6268 }
 0x648   :  { %v6271_v4 = vpop.eup %6270  ;;  %v3239_v7 = vmul.f32 %v6269_v57, %v10555_v49  ;;  %v10557_v5 = vld [vmem:[#allocation54_spill] sm:$0xff]  ;;  %v3238_v20 = vmul.f32 %v6269_v57, %v8650_v37  ;;  %v10559_v37 = vld [vmem:[#allocation60_spill] sm:$0xff] }
 0x649   :  { %v8938_v31 = vpop.f32.mrf.mxu0  ;;  %v3237_v46 = vmul.f32 %v6271_v4, %v10557_v5  ;;  %v3236_v10 = vmul.f32 %v6271_v4, %v10558_v39 }
 0x64a   :  { %3367 = vmatpush2.bf16.msra.mxu0 %v3334_v14  ;;  %v3264_v14 = vpack.c.bf16 %v3234_v11, %v3232_v12 }
 0x64b   :  { %v1373_v47 = vpop.f32.mrf.mxu0  ;;  %5622 = vmatprep.subr.bf16.mxu0 %v10551_v55 }
 0x64c   :  { %v3267_v47 = vpack.c.bf16 %v3239_v7, %v3237_v46 }
 0x64d   :  { %2755 = vmatmul.mubr.bf16.gmra.mxu0 %v2600_v6 }
 0x64e   :  { %5324 = vmatprep.mubr.msk.bf16.mxu0 %vm762_vm4, %v3263_v29  ;;  %v6273_v28 = vpop.eup %6272 }
 0x64f   :  { %v6275_v6 = vpop.eup %6274  ;;  %v3243_v0 = vmul.f32 %v6273_v28, %v8681_v60  ;;  %v3242_v57 = vmul.f32 %v6273_v28, %v10559_v37 }
 0x650   :  { %v3241_v56 = vmul.f32 %v6275_v6, %v8685_v18  ;;  %v3240_v11 = vmul.f32 %v6275_v6, %v8676_v17 }
 0x652   :  { %v3268_v60 = vpack.c.bf16 %v3242_v57, %v3240_v11 }
 0x654   :  { %v8947_v34 = vpop.f32.mrf.mxu0 }
 0x655   :  { %3369 = vmatmul.mubr.bf16.vlgmr.msra.gmra.mxu0 %v3262_v24  ;;  %v3266_v24 = vpack.c.bf16 %v3238_v20, %v3236_v10 }
 0x656   :  { %v1378_v32 = vpop.f32.mrf.mxu0  ;;  %5325 = vmatprep.mubr.msk.bf16.mxu0 %vm762_vm4, %v3265_v27  ;;  %v3269_v27 = vpack.c.bf16 %v3243_v0, %v3241_v56 }
 0x658   :  { %v8950_v33 = vpop.f32.mrf.mxu0 }
 0x65a   :  { %v1381_v61 = vpop.f32.mrf.mxu0 }
 0x65c   :  { %v8956_v22 = vpop.f32.mrf.mxu0 }
 0x65d   :  { %3377 = vmatmul.mubr.bf16.gmra.mxu0 %v3264_v14 }
 0x65e   :  { %v1386_v29 = vpop.f32.mrf.mxu0  ;;  %5326 = vmatprep.mubr.msk.bf16.mxu0 %vm762_vm4, %v3267_v47 }
 0x660   :  { %v8959_v41 = vpop.f32.mrf.mxu0 }
 0x662   :  { %v1389_v2 = vpop.f32.mrf.mxu0 }
 0x664   :  { %v8965_v58 = vpop.f32.mrf.mxu0 }
 0x665   :  { %3385 = vmatmul.mubr.bf16.gmra.mxu0 %v3266_v24 }
 0x666   :  { %v1394_v32 = vpop.f32.mrf.mxu0  ;;  %5327 = vmatprep.mubr.msk.bf16.mxu0 %vm762_vm4, %v3269_v27 }
 0x668   :  { %v8968_v38 = vpop.f32.mrf.mxu0 }
 0x66a   :  { %v1397_v18 = vpop.f32.mrf.mxu0 }
 0x66c   :  { %v8972_v49 = vpop.f32.mrf.mxu0 }
 0x66d   :  { %3393 = vmatmul.mubr.bf16.gmra.mxu0 %v3268_v60 }
 0x66e   :  { %v1402_v7 = vpop.f32.mrf.mxu0 }
 0x670   :  { %v1403_v4 = vpop.f32.mrf.mxu0 }
 0x672   :  { %v1404_v61 = vpop.f32.mrf.mxu0 }
 0x674   :  { %v2014_v45 = vpop.f32.mrf.mxu0 }
 0x675   :  { %v3182_v5 = vpop.xlane.xlu0 %3181 }
 0x676   :  { %v2016_v12 = vpop.f32.mrf.mxu0  ;;  %v3178_v46 = vpop.xlane.xlu1 %3177  ;;  %6276 = vrcp.f32 %v3182_v5 }
 0x677   :  { %6278 = vrcp.f32 %v3178_v46 }
 0x678   :  { %v2017_v14 = vpop.f32.mrf.mxu0 }
 0x679   :  { %v5742_v47 = vpack.i.bf16 %v2017_v14, %v2014_v45  ;;  %v3194_v6 = vpop.xlane.xlu0 %3193 }
 0x67a   :  { %v2019_v29 = vpop.f32.mrf.mxu0  ;;  %v3186_v17 = vpop.xlane.xlu1 %3185 }
 0x67b   :  { %5743 = vrot.lane.b32.xlu1 %v5742_v47, %s6451_s0  ;;  %6280 = vrcp.f32 %v3186_v17 }
 0x67c   :  { %v8975_v28 = vpop.f32.mrf.mxu0 }
 0x67d   :  { %v3202_v27 = vpop.xlane.xlu0 %3201 }
 0x67e   :  { %v2024_v20 = vpop.f32.mrf.mxu0  ;;  %v3190_v56 = vpop.xlane.xlu1 %3189 }
 0x67f   :  { %6282 = vrcp.f32 %v3190_v56 }
 0x680   :  { %v8977_v0 = vpop.f32.mrf.mxu0  ;;  %6284 = vrcp.f32 %v3194_v6 }
 0x681   :  { %v5757_v2 = vpack.i.bf16 %v8977_v0, %v8975_v28  ;;  %v3210_v46 = vpop.xlane.xlu0 %3209 }
 0x682   :  { %v2027_v39 = vpop.f32.mrf.mxu0  ;;  %v3198_v10 = vpop.xlane.xlu1 %3197 }
 0x683   :  { %v6277_v24 = vpop.eup %6276  ;;  %6286 = vrcp.f32 %v3198_v10 }
 0x684   :  { %v8981_v32 = vpop.f32.mrf.mxu0  ;;  %v6279_v11 = vpop.eup %6278  ;;  %v3247_v37 = vmul.f32 %v6277_v24, %v8790_v25  ;;  %v3246_v57 = vmul.f32 %v6277_v24, %v8796_v59  ;;  %6288 = vrcp.f32 %v3202_v27 }
 0x685   :  { %v3245_v60 = vmul.f32 %v6279_v11, %v8783_v21  ;;  %v3244_v7 = vmul.f32 %v6279_v11, %v8778_v50 }
 0x686   :  { %v2032_v18 = vpop.f32.mrf.mxu0  ;;  %v3206_v4 = vpop.xlane.xlu1 %3205 }
 0x687   :  { %6290 = vrcp.f32 %v3206_v4  ;;  %v3271_v45 = vpack.c.bf16 %v3247_v37, %v3245_v60  ;;  %v3270_v12 = vpack.c.bf16 %v3246_v57, %v3244_v7 }
 0x688   :  { %v8987_v61 = vpop.f32.mrf.mxu0  ;;  %v6281_v25 = vpop.eup %6280  ;;  %6292 = vrcp.f32 %v3210_v46 }
 0x689   :  { %v5772_v5 = vpack.i.bf16 %v8987_v61, %v8981_v32  ;;  %5328 = vmatprep.mubr.msk.bf16.mxu0 %vm762_vm4, %v3271_v45  ;;  %v3249_v47 = vmul.f32 %v6281_v25, %v8812_v8  ;;  %v3248_v17 = vmul.f32 %v6281_v25, %v8803_v1  ;;  %v5869_v32 = vld [vmem:[%s10560_s25] sm:$0xff]  }
 0x68a   :  { %v2035_v14 = vpop.f32.mrf.mxu0  ;;  %3401 = vmatmul.mubr.bf16.gmra.mxu0 %v3270_v12 }
 0x68c   :  { %v8992_v59 = vpop.f32.mrf.mxu0  ;;  %v6283_v21 = vpop.eup %6282 }
 0x68d   :  { %v3251_v29 = vmul.f32 %v6283_v21, %v8800_v63  ;;  %v3250_v6 = vmul.f32 %v6283_v21, %v8826_v52  ;;  %v6285_v20 = vpop.eup %6284 }
 0x68e   :  { %v2040_v50 = vpop.f32.mrf.mxu0  ;;  %v3253_v8 = vmul.f32 %v6285_v20, %v8808_v13  ;;  %v3252_v4 = vmul.f32 %v6285_v20, %v8814_v51 }
 0x68f   :  { %v3273_v39 = vpack.c.bf16 %v3251_v29, %v3249_v47  ;;  %v3272_v10 = vpack.c.bf16 %v3250_v6, %v3248_v17 }
 0x690   :  { %v8998_v56 = vpop.f32.mrf.mxu0  ;;  %v6287_v24 = vpop.eup %6286 }
 0x691   :  { %v5787_v27 = vpack.i.bf16 %v8998_v56, %v8992_v59  ;;  %5329 = vmatprep.mubr.msk.bf16.mxu0 %vm762_vm4, %v3273_v39  ;;  %v3255_v63 = vmul.f32 %v6287_v24, %v8840_v19  ;;  %v6289_v1 = vpop.eup %6288  ;;  %v3254_v18 = vmul.f32 %v6287_v24, %v8848_v30 }
 0x692   :  { %v2043_v11 = vpop.f32.mrf.mxu0  ;;  %3409 = vmatmul.mubr.bf16.gmra.mxu0 %v3272_v10  ;;  %v3257_v13 = vmul.f32 %v6289_v1, %v8820_v16  ;;  %v3256_v50 = vmul.f32 %v6289_v1, %v8830_v42 }
 0x693   :  { %v3275_v52 = vpack.c.bf16 %v3255_v63, %v3253_v8  ;;  %v3274_v12 = vpack.c.bf16 %v3254_v18, %v3252_v4 }
 0x694   :  { %v9005_v37 = vpop.f32.mrf.mxu0  ;;  %v6291_v57 = vpop.eup %6290 }
 0x695   :  { %5330 = vmatprep.mubr.msk.bf16.mxu0 %vm762_vm4, %v3275_v52  ;;  %v3259_v7 = vmul.f32 %v6291_v57, %v8855_v23  ;;  %v6293_v46 = vpop.eup %6292  ;;  %v3258_v23 = vmul.f32 %v6291_v57, %v8863_v40 }
 0x696   :  { %v2048_v60 = vpop.f32.mrf.mxu0  ;;  %v3261_v51 = vmul.f32 %v6293_v46, %v8835_v62  ;;  %v3260_v40 = vmul.f32 %v6293_v46, %v8843_v53 }
 0x697   :  { %v3277_v25 = vpack.c.bf16 %v3259_v7, %v3257_v13  ;;  %v3276_v29 = vpack.c.bf16 %v3258_v23, %v3256_v50 }
 0x698   :  { %v9011_v45 = vpop.f32.mrf.mxu0  ;;  %v3279_v6 = vpack.c.bf16 %v3261_v51, %v3261_v51  ;;  %v3278_v62 = vpack.c.bf16 %v3260_v40, %v3260_v40 }
 0x699   :  { %v5802_v19 = vpack.i.bf16 %v9011_v45, %v9005_v37 }
 0x69a   :  { %v2051_v14 = vpop.f32.mrf.mxu0  ;;  %3417 = vmatmul.mubr.bf16.gmra.mxu0 %v3274_v12 }
 0x69b   :  { %5331 = vmatprep.mubr.msk.bf16.mxu0 %vm762_vm4, %v3277_v25 }
 0x69c   :  { %v9016_v30 = vpop.f32.mrf.mxu0 }
 0x69e   :  { %v2056_v21 = vpop.f32.mrf.mxu0 }
 0x6a0   :  { %v9022_v16 = vpop.f32.mrf.mxu0 }
 0x6a1   :  { %v5817_v47 = vpack.i.bf16 %v9022_v16, %v9016_v30 }
 0x6a2   :  { %v2059_v17 = vpop.f32.mrf.mxu0  ;;  %3425 = vmatmul.mubr.bf16.gmra.mxu0 %v3276_v29 }
 0x6a3   :  { %5332 = vmatprep.mubr.msk.bf16.mxu0 %vm762_vm4, %v3279_v6 }
 0x6a4   :  { %v9026_v20 = vpop.f32.mrf.mxu0 }
 0x6a6   :  { %v2064_v39 = vpop.f32.mrf.mxu0 }
 0x6a7   :  { %v5868_v39 = vld [vmem:[%s10560_s25 + $0x8] sm:$0xff]  }
 0x6a8   :  { %v9030_v10 = vpop.f32.mrf.mxu0  ;;  %5583 = vmatpush3.bf16.msra.mxu1 %v5868_v39 }
 0x6a9   :  { %v5832_v42 = vpack.i.bf16 %v9030_v10, %v9026_v20  ;;  %5584 = vmatprep.subr.bf16.mxu1 %v10551_v55 }
 0x6aa   :  { %v2067_v24 = vpop.f32.mrf.mxu0  ;;  %3433 = vmatmul.mubr.bf16.gmra.mxu0 %v3278_v62 }
 0x6ab   :  { %5626 = vmatprep.mubr.msk.bf16.mxu0 %vm6437_vm0, %v10551_v55 }
 0x6ac   :  { %v9034_v11 = vpop.f32.mrf.mxu0  ;;  %5585 = vmatpush3.bf16.msra.mxu1 %v5869_v32 }
 0x6ad   :  { %5662 = vmatprep.subr.bf16.mxu1 %v10551_v55 }
 0x6ae   :  { %v2072_v8 = vpop.f32.mrf.mxu0 }
 0x6b0   :  { %v9038_v63 = vpop.f32.mrf.mxu0 }
 0x6b1   :  { %v5847_v53 = vpack.i.bf16 %v9038_v63, %v9034_v11 }
 0x6b2   :  { %v2075_v1 = vpop.f32.mrf.mxu0 }
 0x6b4   :  { %v9042_v52 = vpop.f32.mrf.mxu0 }
 0x6b6   :  { %v2080_v57 = vpop.f32.mrf.mxu0 }
 0x6b8   :  { %v2081_v18 = vpop.f32.mrf.mxu0 }
 0x6ba   :  { %v2082_v60 = vpop.f32.mrf.mxu0 }
 0x6bc   :  { %v2692_v7 = vpop.f32.mrf.mxu0 }
 0x6be   :  { %v2694_v4 = vpop.f32.mrf.mxu0 }
 0x6c0   :  { %v2695_v13 = vpop.f32.mrf.mxu0 }
 0x6c1   :  { %v5747_v12 = vpack.i.bf16 %v2695_v13, %v2692_v7 }
 0x6c2   :  { %v2697_v46 = vpop.f32.mrf.mxu0 }
 0x6c3   :  { %5748 = vrot.lane.b32.xlu0 %v5747_v12, %s6452_s4 }
 0x6d0   :  { %v2700_v14 = vpop.f32.mrf.mxu0 }
 0x6d2   :  { %v2702_v25 = vpop.f32.mrf.mxu0 }
 0x6d4   :  { %v2703_v23 = vpop.f32.mrf.mxu0 }
 0x6d5   :  { %v5762_v21 = vpack.i.bf16 %v2703_v23, %v2700_v14 }
 0x6d6   :  { %v2705_v51 = vpop.f32.mrf.mxu0 }
 0x6d7   :  { %5763 = vrot.lane.b32.xlu0 %v5762_v21, %s6452_s4 }
 0x6d8   :  { %v2708_v50 = vpop.f32.mrf.mxu0 }
 0x6da   :  { %v2710_v29 = vpop.f32.mrf.mxu0 }
 0x6db   :  { %5773 = vrot.lane.b32.xlu0 %v5772_v5, %s6451_s0 }
 0x6dc   :  { %v2711_v17 = vpop.f32.mrf.mxu0 }
 0x6dd   :  { %v5777_v6 = vpack.i.bf16 %v2711_v17, %v2708_v50 }
 0x6de   :  { %v2713_v40 = vpop.f32.mrf.mxu0 }
 0x6e5   :  { %v2716_v62 = vpop.f32.mrf.mxu0 }
 0x6e7   :  { %v2718_v24 = vpop.f32.mrf.mxu0 }
 0x6e9   :  { %v2719_v8 = vpop.f32.mrf.mxu0 }
 0x6ea   :  { %v5792_v1 = vpack.i.bf16 %v2719_v8, %v2716_v62 }
 0x6eb   :  { %v2721_v57 = vpop.f32.mrf.mxu0 }
 0x6ed   :  { %v2724_v18 = vpop.f32.mrf.mxu0 }
 0x6ef   :  { %v2726_v60 = vpop.f32.mrf.mxu0 }
 0x6f1   :  { %v2727_v61 = vpop.f32.mrf.mxu0 }
 0x6f2   :  { %v5807_v5 = vpack.i.bf16 %v2727_v61, %v2724_v18 }
 0x6f3   :  { %v2729_v7 = vpop.f32.mrf.mxu0 }
 0x6f5   :  { %v2732_v4 = vpop.f32.mrf.mxu0 }
 0x6f7   :  { %v2734_v13 = vpop.f32.mrf.mxu0 }
 0x6f9   :  { %v2735_v12 = vpop.f32.mrf.mxu0 }
 0x6fa   :  { %v5822_v46 = vpack.i.bf16 %v2735_v12, %v2732_v4 }
 0x6fb   :  { %v2737_v14 = vpop.f32.mrf.mxu0 }
 0x6fd   :  { %v2740_v25 = vpop.f32.mrf.mxu0 }
 0x6ff   :  { %v2742_v23 = vpop.f32.mrf.mxu0 }
 0x701   :  { %v2743_v21 = vpop.f32.mrf.mxu0 }
 0x702   :  { %v5837_v51 = vpack.i.bf16 %v2743_v21, %v2740_v25 }
 0x703   :  { %v2745_v50 = vpop.f32.mrf.mxu0 }
 0x705   :  { %v9058_v29 = vpop.f32.mrf.mxu0 }
 0x707   :  { %v2750_v17 = vpop.f32.mrf.mxu0 }
 0x709   :  { %v9060_v40 = vpop.f32.mrf.mxu0 }
 0x70a   :  { %v5852_v39 = vpack.i.bf16 %v9060_v40, %v9058_v29 }
 0x70b   :  { %v2753_v62 = vpop.f32.mrf.mxu0 }
 0x70d   :  { %v9064_v24 = vpop.f32.mrf.mxu0 }
 0x70f   :  { %v2758_v8 = vpop.f32.mrf.mxu0 }
 0x711   :  { %v2759_v57 = vpop.f32.mrf.mxu0 }
 0x713   :  { %v2760_v18 = vpop.f32.mrf.mxu0 }
 0x715   :  { %v3370_v60 = vpop.f32.mrf.mxu0 }
 0x717   :  { %v3372_v32 = vpop.f32.mrf.mxu0 }
 0x719   :  { %v3373_v61 = vpop.f32.mrf.mxu0 }
 0x71a   :  { %v5752_v7 = vpack.i.bf16 %v3373_v61, %v3370_v60 }
 0x71b   :  { %v3375_v4 = vpop.f32.mrf.mxu0 }
 0x71c   :  { %5753 = vrot.lane.b32.xlu1 %v5752_v7, %s6453_s26 }
 0x71d   :  { %v3378_v13 = vpop.f32.mrf.mxu0 }
 0x71f   :  { %v3380_v12 = vpop.f32.mrf.mxu0 }
 0x720   :  { %5758 = vrot.lane.b32.xlu1 %v5757_v2, %s6451_s0 }
 0x721   :  { %v3381_v14 = vpop.f32.mrf.mxu0 }
 0x722   :  { %v5767_v25 = vpack.i.bf16 %v3381_v14, %v3378_v13 }
 0x723   :  { %v3383_v23 = vpop.f32.mrf.mxu0 }
 0x724   :  { %5768 = vrot.lane.b32.xlu1 %v5767_v25, %s6453_s26 }
 0x725   :  { %v3386_v21 = vpop.f32.mrf.mxu0 }
 0x727   :  { %v3388_v50 = vpop.f32.mrf.mxu0 }
 0x728   :  { %5778 = vrot.lane.b32.xlu1 %v5777_v6, %s6452_s4 }
 0x729   :  { %v3389_v29 = vpop.f32.mrf.mxu0 }
 0x72a   :  { %v5782_v17 = vpack.i.bf16 %v3389_v29, %v3386_v21 }
 0x72b   :  { %v3391_v40 = vpop.f32.mrf.mxu0 }
 0x72c   :  { %5788 = vrot.lane.b32.xlu1 %v5787_v27, %s6451_s0  ;;  %5783 = vrot.lane.b32.xlu0 %v5782_v17, %s6453_s26 }
 0x72d   :  { %v3394_v28 = vpop.f32.mrf.mxu0 }
 0x72f   :  { %v3396_v0 = vpop.f32.mrf.mxu0 }
 0x730   :  { %5793 = vrot.lane.b32.xlu0 %v5792_v1, %s6452_s4 }
 0x731   :  { %v3397_v2 = vpop.f32.mrf.mxu0 }
 0x732   :  { %v5797_v62 = vpack.i.bf16 %v3397_v2, %v3394_v28 }
 0x733   :  { %v3399_v8 = vpop.f32.mrf.mxu0 }
 0x734   :  { %5803 = vrot.lane.b32.xlu0 %v5802_v19, %s6451_s0  ;;  %5798 = vrot.lane.b32.xlu1 %v5797_v62, %s6453_s26 }
 0x735   :  { %v5749_v7 = vpop.permute.xlu0 %5748 }
 0x736   :  { %v5751_v13 = vunpack.i.h.bf16 %v5749_v7  ;;  %v5750_v12 = vunpack.i.l.bf16 %v5749_v7 }
 0x738   :  { %5808 = vrot.lane.b32.xlu1 %v5807_v5, %s6452_s4 }
 0x73c   :  { %5818 = vrot.lane.b32.xlu1 %v5817_v47, %s6451_s0 }
 0x749   :  { %v5764_v40 = vpop.permute.xlu0 %5763 }
 0x74a   :  { %v3402_v59 = vpop.f32.mrf.mxu0  ;;  %v5766_v8 = vunpack.i.h.bf16 %v5764_v40 }
 0x74c   :  { %v3404_v56 = vpop.f32.mrf.mxu0 }
 0x74e   :  { %v3405_v27 = vpop.f32.mrf.mxu0 }
 0x74f   :  { %v5812_v6 = vpack.i.bf16 %v3405_v27, %v3402_v59  ;;  %v5765_v59 = vunpack.i.l.bf16 %v5764_v40 }
 0x750   :  { %v3407_v1 = vpop.f32.mrf.mxu0 }
 0x751   :  { %5813 = vrot.lane.b32.xlu0 %v5812_v6, %s6453_s26  ;;  %v5774_v1 = vpop.permute.xlu0 %5773 }
 0x752   :  { %v3410_v57 = vpop.f32.mrf.mxu0 }
 0x754   :  { %v3412_v18 = vpop.f32.mrf.mxu0 }
 0x755   :  { %5823 = vrot.lane.b32.xlu0 %v5822_v46, %s6452_s4 }
 0x756   :  { %v3413_v37 = vpop.f32.mrf.mxu0 }
 0x757   :  { %v5827_v45 = vpack.i.bf16 %v3413_v37, %v3410_v57 }
 0x758   :  { %v3415_v19 = vpop.f32.mrf.mxu0 }
 0x759   :  { %5833 = vrot.lane.b32.xlu0 %v5832_v42, %s6451_s0  ;;  %5828 = vrot.lane.b32.xlu1 %v5827_v45, %s6453_s26 }
 0x75a   :  { %v3418_v30 = vpop.f32.mrf.mxu0 }
 0x75c   :  { %v3420_v16 = vpop.f32.mrf.mxu0 }
 0x75d   :  { %5838 = vrot.lane.b32.xlu1 %v5837_v51, %s6452_s4 }
 0x75e   :  { %v3421_v47 = vpop.f32.mrf.mxu0 }
 0x75f   :  { %v5842_v5 = vpack.i.bf16 %v3421_v47, %v3418_v30  ;;  %v5775_v30 = vunpack.i.l.bf16 %v5774_v1 }
 0x760   :  { %v3423_v60 = vpop.f32.mrf.mxu0 }
 0x761   :  { %5848 = vrot.lane.b32.xlu1 %v5847_v53, %s6451_s0  ;;  %5843 = vrot.lane.b32.xlu0 %v5842_v5, %s6453_s26  ;;  %v5744_v53 = vpop.permute.xlu1 %5743 }
 0x762   :  { %v3426_v46 = vpop.f32.mrf.mxu0  ;;  %v5745_v4 = vunpack.i.l.bf16 %v5744_v53 }
 0x764   :  { %v3428_v32 = vpop.f32.mrf.mxu0  ;;  %v3644_v25 = vsel %vm762_vm4, %v8858_v44, %v5745_v4 }
 0x765   :  { %5853 = vrot.lane.b32.xlu0 %v5852_v39, %s6452_s4  ;;  %v5746_v39 = vunpack.i.h.bf16 %v5744_v53  ;;  %v3662_v50 = vsel %vm3661_vm7, %v3644_v25, %v5750_v12 }
 0x766   :  { %v3429_v20 = vpop.f32.mrf.mxu0 }
 0x767   :  { %v5857_v10 = vpack.i.bf16 %v3429_v20, %v3426_v46  ;;  %v3645_v14 = vsel %vm762_vm4, %v8867_v54, %v5746_v39  ;;  %v3648_v46 = vsel %vm762_vm4, %v8888_v3, %v5775_v30 }
 0x768   :  { %v3431_v42 = vpop.f32.mrf.mxu0  ;;  %v3663_v21 = vsel %vm3661_vm7, %v3645_v14, %v5751_v13 }
 0x769   :  { %3489 = vrot.lane.b32.xlu0 %v9042_v52, %s6451_s0  ;;  %5858 = vrot.lane.b32.xlu1 %v5857_v10, %s6453_s26 }
 0x76a   :  { %v3434_v51 = vpop.f32.mrf.mxu0 }
 0x76c   :  { %v3436_v61 = vpop.f32.mrf.mxu0 }
 0x76d   :  { %3557 = vrot.lane.b32.xlu1 %v9064_v24, %s6452_s4  ;;  %3625 = vrot.lane.b32.xlu0 %v3434_v51, %s6453_s26 }
 0x76e   :  { %v3437_v11 = vpop.f32.mrf.mxu0 }
 0x770   :  { %v3438_v63 = vpop.f32.mrf.mxu0 }
 0x78e   :  { %v5754_v52 = vpop.permute.xlu1 %5753 }
 0x78f   :  { %v5756_v24 = vunpack.i.h.bf16 %v5754_v52  ;;  %v5755_v23 = vunpack.i.l.bf16 %v5754_v52 }
 0x791   :  { %v3681_v29 = vsel %vm3679_vm8, %v3663_v21, %v5756_v24  ;;  %v3680_v17 = vsel %vm3679_vm8, %v3662_v50, %v5755_v23 }
 0x792   :  { %v3701_v28 = vpack.c.bf16 %v3681_v29, %v3680_v17  ;;  %v5759_v0 = vpop.permute.xlu1 %5758 }
 0x793   :  { %v5761_v2 = vunpack.i.h.bf16 %v5759_v0  ;;  %v5760_v62 = vunpack.i.l.bf16 %v5759_v0 }
 0x794   :  { %5587 = vmatmul.mubr.msk.bf16.vlgmr.msra.gmra.mxu1 %vm122_vm1, %v3701_v28 }
 0x795   :  { %v3647_v44 = vsel %vm762_vm4, %v8877_v15, %v5761_v2  ;;  %v3646_v54 = vsel %vm762_vm4, %v8873_v9, %v5760_v62  ;;  %5590 = vmatprep.mubr.msk.bf16.mxu1 %vm6437_vm0, %v10551_v55  ;;  %v5776_v9 = vunpack.i.h.bf16 %v5774_v1 }
 0x796   :  { %v5769_v56 = vpop.permute.xlu1 %5768  ;;  %v3664_v57 = vsel %vm3661_vm7, %v3646_v54, %v5765_v59  ;;  %v3665_v18 = vsel %vm3661_vm7, %v3647_v44, %v5766_v8 }
 0x797   :  { %v5771_v27 = vunpack.i.h.bf16 %v5769_v56  ;;  %v5770_v6 = vunpack.i.l.bf16 %v5769_v56  ;;  %v3649_v60 = vsel %vm762_vm4, %v8892_v43, %v5776_v9 }
 0x799   :  { %v3683_v37 = vsel %vm3679_vm8, %v3665_v18, %v5771_v27  ;;  %v3682_v15 = vsel %vm3679_vm8, %v3664_v57, %v5770_v6 }
 0x79a   :  { %v3702_v45 = vpack.c.bf16 %v3683_v37, %v3682_v15  ;;  %v5779_v19 = vpop.permute.xlu1 %5778 }
 0x79b   :  { %v5781_v16 = vunpack.i.h.bf16 %v5779_v19  ;;  %v5780_v47 = vunpack.i.l.bf16 %v5779_v19 }
 0x79c   :  { %5591 = vmatmul.mubr.msk.bf16.gmra.mxu1 %vm122_vm1, %v3702_v45 }
 0x79d   :  { %5594 = vmatprep.mubr.msk.bf16.mxu1 %vm6437_vm0, %v10551_v55  ;;  %v3667_v10 = vsel %vm3661_vm7, %v3649_v60, %v5781_v16  ;;  %v3666_v42 = vsel %vm3661_vm7, %v3648_v46, %v5780_v47 }
 0x79e   :  { %v5784_v5 = vpop.permute.xlu0 %5783  ;;  %v5789_v51 = vpop.permute.xlu1 %5788 }
 0x79f   :  { %v5786_v32 = vunpack.i.h.bf16 %v5784_v5  ;;  %v5785_v20 = vunpack.i.l.bf16 %v5784_v5  ;;  %v5791_v7 = vunpack.i.h.bf16 %v5789_v51  ;;  %v5790_v39 = vunpack.i.l.bf16 %v5789_v51 }
 0x7a1   :  { %v3685_v61 = vsel %vm3679_vm8, %v3667_v10, %v5786_v32  ;;  %v3684_v11 = vsel %vm3679_vm8, %v3666_v42, %v5785_v20  ;;  %v3651_v13 = vsel %vm762_vm4, %v8926_v36, %v5791_v7  ;;  %v3650_v12 = vsel %vm762_vm4, %v8923_v48, %v5790_v39 }
 0x7a2   :  { %v3703_v63 = vpack.c.bf16 %v3685_v61, %v3684_v11  ;;  %v5794_v53 = vpop.permute.xlu0 %5793 }
 0x7a3   :  { %v5796_v4 = vunpack.i.h.bf16 %v5794_v53  ;;  %v5795_v43 = vunpack.i.l.bf16 %v5794_v53 }
 0x7a4   :  { %5595 = vmatmul.mubr.msk.bf16.gmra.mxu1 %vm122_vm1, %v3703_v63 }
 0x7a5   :  { %5598 = vmatprep.mubr.msk.bf16.mxu1 %vm6437_vm0, %v10551_v55  ;;  %v3669_v25 = vsel %vm3661_vm7, %v3651_v13, %v5796_v4  ;;  %v3668_v24 = vsel %vm3661_vm7, %v3650_v12, %v5795_v43 }
 0x7a6   :  { %v5799_v3 = vpop.permute.xlu1 %5798  ;;  %v5804_v36 = vpop.permute.xlu0 %5803 }
 0x7a7   :  { %v5801_v52 = vunpack.i.h.bf16 %v5799_v3  ;;  %v5800_v14 = vunpack.i.l.bf16 %v5799_v3  ;;  %v5806_v17 = vunpack.i.h.bf16 %v5804_v36  ;;  %v5805_v48 = vunpack.i.l.bf16 %v5804_v36 }
 0x7a9   :  { %v3687_v23 = vsel %vm3679_vm8, %v3669_v25, %v5801_v52  ;;  %v3686_v21 = vsel %vm3679_vm8, %v3668_v24, %v5800_v14  ;;  %v3653_v2 = vsel %vm762_vm4, %v8938_v31, %v5806_v17  ;;  %v3652_v62 = vsel %vm762_vm4, %v8931_v35, %v5805_v48 }
 0x7aa   :  { %v3704_v50 = vpack.c.bf16 %v3687_v23, %v3686_v21  ;;  %v5809_v29 = vpop.permute.xlu1 %5808 }
 0x7ab   :  { %v5811_v40 = vunpack.i.h.bf16 %v5809_v29  ;;  %v5810_v28 = vunpack.i.l.bf16 %v5809_v29 }
 0x7ac   :  { %5599 = vmatmul.mubr.msk.bf16.gmra.mxu1 %vm122_vm1, %v3704_v50 }
 0x7ad   :  { %5602 = vmatprep.mubr.msk.bf16.mxu1 %vm6437_vm0, %v10551_v55  ;;  %v3671_v8 = vsel %vm3661_vm7, %v3653_v2, %v5811_v40  ;;  %v3670_v59 = vsel %vm3661_vm7, %v3652_v62, %v5810_v28 }
 0x7ae   :  { %v5819_v56 = vpop.permute.xlu1 %5818 }
 0x7af   :  { %v5821_v18 = vunpack.i.h.bf16 %v5819_v56  ;;  %v5820_v37 = vunpack.i.l.bf16 %v5819_v56  ;;  %v6398_v56 = vld [vmem:[%s10188_s2] sm:$0xff] }
 0x7b1   :  { %v3655_v45 = vsel %vm762_vm4, %v8950_v33, %v5821_v18  ;;  %v3654_v19 = vsel %vm762_vm4, %v8947_v34, %v5820_v37  ;;  %v6399_v37 = vld [vmem:[%s10188_s2 + $0x8] sm:$0xff] }
 0x7c3   :  { %v5814_v0 = vpop.permute.xlu0 %5813 }
 0x7c4   :  { %v5816_v44 = vunpack.i.h.bf16 %v5814_v0  ;;  %v5815_v54 = vunpack.i.l.bf16 %v5814_v0 }
 0x7c6   :  { %v3689_v27 = vsel %vm3679_vm8, %v3671_v8, %v5816_v44  ;;  %v3688_v6 = vsel %vm3679_vm8, %v3670_v59, %v5815_v54 }
 0x7c7   :  { %v3705_v1 = vpack.c.bf16 %v3689_v27, %v3688_v6  ;;  %v5824_v57 = vpop.permute.xlu0 %5823 }
 0x7c8   :  { %v5826_v15 = vunpack.i.h.bf16 %v5824_v57  ;;  %v5825_v31 = vunpack.i.l.bf16 %v5824_v57 }
 0x7c9   :  { %5603 = vmatmul.mubr.msk.bf16.gmra.mxu1 %vm122_vm1, %v3705_v1 }
 0x7ca   :  { %5606 = vmatprep.mubr.msk.bf16.mxu1 %vm6437_vm0, %v10551_v55  ;;  %v3673_v16 = vsel %vm3661_vm7, %v3655_v45, %v5826_v15  ;;  %v3672_v47 = vsel %vm3661_vm7, %v3654_v19, %v5825_v31 }
 0x7cb   :  { %v5829_v35 = vpop.permute.xlu1 %5828  ;;  %v5834_v5 = vpop.permute.xlu0 %5833 }
 0x7cc   :  { %v5831_v9 = vunpack.i.h.bf16 %v5829_v35  ;;  %v5830_v30 = vunpack.i.l.bf16 %v5829_v35  ;;  %v5836_v10 = vunpack.i.h.bf16 %v5834_v5  ;;  %v5835_v42 = vunpack.i.l.bf16 %v5834_v5 }
 0x7ce   :  { %v3691_v60 = vsel %vm3679_vm8, %v3673_v16, %v5831_v9  ;;  %v3690_v46 = vsel %vm3679_vm8, %v3672_v47, %v5830_v30  ;;  %v3657_v61 = vsel %vm762_vm4, %v8959_v41, %v5836_v10  ;;  %v3656_v11 = vsel %vm762_vm4, %v8956_v22, %v5835_v42  ;;  %v6400_v9 = vld [vmem:[%s10188_s2 + $0x10] sm:$0xff] }
 0x7cf   :  { %v3706_v32 = vpack.c.bf16 %v3691_v60, %v3690_v46  ;;  %v5839_v20 = vpop.permute.xlu1 %5838  ;;  %v6401_v46 = vld [vmem:[%s10188_s2 + $0x18] sm:$0xff] }
 0x7d0   :  { %v5841_v51 = vunpack.i.h.bf16 %v5839_v20  ;;  %v5840_v33 = vunpack.i.l.bf16 %v5839_v20 }
 0x7d1   :  { %5607 = vmatmul.mubr.msk.bf16.gmra.mxu1 %vm122_vm1, %v3706_v32 }
 0x7d2   :  { %5610 = vmatprep.mubr.msk.bf16.mxu1 %vm6437_vm0, %v10551_v55  ;;  %v3675_v7 = vsel %vm3661_vm7, %v3657_v61, %v5841_v51  ;;  %v3674_v39 = vsel %vm3661_vm7, %v3656_v11, %v5840_v33  ;;  %v6402_v33 = vld [vmem:[%s10188_s2 + $0x20] sm:$0xff] }
 0x7d3   :  { %v5844_v34 = vpop.permute.xlu0 %5843  ;;  %v5849_v4 = vpop.permute.xlu1 %5848 }
 0x7d4   :  { %v5846_v63 = vunpack.i.h.bf16 %v5844_v34  ;;  %v5845_v53 = vunpack.i.l.bf16 %v5844_v34  ;;  %v5851_v52 = vunpack.i.h.bf16 %v5849_v4  ;;  %v5850_v14 = vunpack.i.l.bf16 %v5849_v4 }
 0x7d6   :  { %v3693_v43 = vsel %vm3679_vm8, %v3675_v7, %v5846_v63  ;;  %v3692_v3 = vsel %vm3679_vm8, %v3674_v39, %v5845_v53  ;;  %v3659_v23 = vsel %vm762_vm4, %v8968_v38, %v5851_v52  ;;  %v3658_v21 = vsel %vm762_vm4, %v8965_v58, %v5850_v14  ;;  %v6403_v7 = vld [vmem:[%s10188_s2 + $0x28] sm:$0xff] }
 0x7d7   :  { %v3707_v13 = vpack.c.bf16 %v3693_v43, %v3692_v3  ;;  %v5854_v12 = vpop.permute.xlu0 %5853 }
 0x7d8   :  { %v5856_v25 = vunpack.i.h.bf16 %v5854_v12  ;;  %v5855_v41 = vunpack.i.l.bf16 %v5854_v12  ;;  %v6404_v12 = vld [vmem:[%s10188_s2 + $0x30] sm:$0xff] }
 0x7d9   :  { %5611 = vmatmul.mubr.msk.bf16.gmra.mxu1 %vm122_vm1, %v3707_v13 }
 0x7da   :  { %5614 = vmatprep.mubr.msk.bf16.mxu1 %vm6437_vm0, %v10551_v55  ;;  %v3677_v29 = vsel %vm3661_vm7, %v3659_v23, %v5856_v25  ;;  %v3676_v17 = vsel %vm3661_vm7, %v3658_v21, %v5855_v41 }
 0x7db   :  { %v3490_v22 = vpop.permute.xlu0 %3489  ;;  %v5859_v24 = vpop.permute.xlu1 %5858 }
 0x7dc   :  { %v5861_v50 = vunpack.i.h.bf16 %v5859_v24  ;;  %v5860_v36 = vunpack.i.l.bf16 %v5859_v24  ;;  %v3660_v2 = vsel %vm762_vm4, %v8972_v49, %v3490_v22  ;;  %v9207_v49 = vld [vmem:[%s9993_s8] ss:$0 sm:$0xff]  ;;  %v6405_v24 = vld [vmem:[%s10188_s2 + $0x38] sm:$0xff] }
 0x7de   :  { %v3695_v48 = vsel %vm3679_vm8, %v3677_v29, %v5861_v50  ;;  %v3694_v40 = vsel %vm3679_vm8, %v3676_v17, %v5860_v36  ;;  %v6406_v17 = vld [vmem:[%s10188_s2 + $0x40] sm:$0xff] }
 0x7df   :  { %v3708_v28 = vpack.c.bf16 %v3695_v48, %v3694_v40  ;;  %v3558_v0 = vpop.permute.xlu1 %3557  ;;  %v3626_v62 = vpop.permute.xlu0 %3625 }
 0x7e0   :  { %v3678_v38 = vsel %vm3661_vm7, %v3660_v2, %v3558_v0 }
 0x7e1   :  { %5615 = vmatmul.mubr.msk.bf16.gmra.mxu1 %vm122_vm1, %v3708_v28  ;;  %v3696_v58 = vsel %vm3679_vm8, %v3678_v38, %v3626_v62  ;;  %v6407_v38 = vld [vmem:[%s10188_s2 + $0x48] sm:$0xff] }
 0x7e2   :  { %5618 = vmatprep.mubr.msk.bf16.mxu1 %vm6437_vm0, %v10551_v55  ;;  %v3709_v44 = vpack.c.bf16 %v3696_v58, %v3696_v58 }
 0x7e9   :  { %5619 = vmatmul.mubr.msk.bf16.gmra.mxu1 %vm122_vm1, %v3709_v44 }
 0x7ea   :  { %5670 = vmatprep.mubr.msk.bf16.mxu1 %vm6437_vm0, %v10551_v55 }
 0x854   :  { %v3790_v54 = vpop.f32.mrf.mxu1 }
 0x855   :  { %v3791_v8 = vadd.f32 %v9207_v49, %v3790_v54 }
 0x856   :  { %v5588_v59 = vpop.f32.mrf.mxu1 }
 0x857   :  { %v9213_v27 = vadd.f32 %v6398_v56, %v3791_v8  ;;  %v6408_v59 = vld [vmem:[%s10188_s2 + $0x50] sm:$0xff] }
 0x858   :  { %v3793_v6 = vpop.f32.mrf.mxu1 }
 0x859   :  { %v3794_v1 = vadd.f32 %v9207_v49, %v3793_v6  ;;  %v3879_v57 = vsel %vm122_vm1, %v9213_v27, 0.0 }
 0x85a   :  { %v5589_v18 = vpop.f32.mrf.mxu1  ;;  %3880 = vadd.xlane.f32.xlu1 %v3879_v57 }
 0x85b   :  { %v9221_v15 = vadd.f32 %v6399_v37, %v3794_v1  ;;  %v6409_v37 = vld [vmem:[%s10188_s2 + $0x58] sm:$0xff] }
 0x85c   :  { %v3798_v31 = vpop.f32.mrf.mxu1 }
 0x85d   :  { %v3799_v35 = vadd.f32 %v9207_v49, %v3798_v31  ;;  %v3882_v45 = vsel %vm122_vm1, %v9221_v15, 0.0 }
 0x85e   :  { %v5592_v19 = vpop.f32.mrf.mxu1  ;;  %3883 = vadd.xlane.f32.xlu0 %v3882_v45 }
 0x85f   :  { %v9229_v30 = vadd.f32 %v6400_v9, %v3799_v35 }
 0x860   :  { %v3801_v16 = vpop.f32.mrf.mxu1 }
 0x861   :  { %v3802_v47 = vadd.f32 %v9207_v49, %v3801_v16  ;;  %v3885_v5 = vsel %vm122_vm1, %v9229_v30, 0.0  ;;  %v6410_v16 = vld [vmem:[%s10188_s2 + $0x60] sm:$0xff] }
 0x862   :  { %v5593_v60 = vpop.f32.mrf.mxu1  ;;  %3886 = vadd.xlane.f32.xlu0 %v3885_v5 }
 0x863   :  { %v9237_v32 = vadd.f32 %v6401_v46, %v3802_v47 }
 0x864   :  { %v3806_v20 = vpop.f32.mrf.mxu1 }
 0x865   :  { %v3807_v10 = vadd.f32 %v9207_v49, %v3806_v20  ;;  %v3888_v42 = vsel %vm122_vm1, %v9237_v32, 0.0 }
 0x866   :  { %v5596_v51 = vpop.f32.mrf.mxu1  ;;  %3889 = vadd.xlane.f32.xlu1 %v3888_v42 }
 0x867   :  { %v9245_v34 = vadd.f32 %v6402_v33, %v3807_v10  ;;  %v6411_v10 = vld [vmem:[%s10188_s2 + $0x68] sm:$0xff] }
 0x868   :  { %v3809_v61 = vpop.f32.mrf.mxu1 }
 0x869   :  { %v3810_v11 = vadd.f32 %v9207_v49, %v3809_v61  ;;  %v3891_v63 = vsel %vm122_vm1, %v9245_v34, 0.0 }
 0x86a   :  { %v5597_v53 = vpop.f32.mrf.mxu1  ;;  %3892 = vadd.xlane.f32.xlu0 %v3891_v63  ;;  %v6412_v63 = vld [vmem:[%s10188_s2 + $0x70] sm:$0xff] }
 0x86b   :  { %v9253_v39 = vadd.f32 %v6403_v7, %v3810_v11 }
 0x86c   :  { %v3814_v4 = vpop.f32.mrf.mxu1 }
 0x86d   :  { %v3815_v43 = vadd.f32 %v9207_v49, %v3814_v4  ;;  %v3894_v3 = vsel %vm122_vm1, %v9253_v39, 0.0 }
 0x86e   :  { %v5600_v13 = vpop.f32.mrf.mxu1  ;;  %3895 = vadd.xlane.f32.xlu1 %v3894_v3 }
 0x86f   :  { %v9261_v52 = vadd.f32 %v6404_v12, %v3815_v43  ;;  %v6413_v13 = vld [vmem:[%s10188_s2 + $0x78] sm:$0xff] }
 0x870   :  { %v3817_v14 = vpop.f32.mrf.mxu1 }
 0x871   :  { %v3818_v25 = vadd.f32 %v9207_v49, %v3817_v14  ;;  %v3897_v41 = vsel %vm122_vm1, %v9261_v52, 0.0 }
 0x872   :  { %v5601_v22 = vpop.f32.mrf.mxu1  ;;  %3898 = vadd.xlane.f32.xlu0 %v3897_v41 }
 0x873   :  { %v9269_v23 = vadd.f32 %v6405_v24, %v3818_v25  ;;  %v10561_v24 = vld [vmem:[#allocation9_spill] sm:$0xff] }
 0x875   :  { %v3900_v21 = vsel %vm122_vm1, %v9269_v23, 0.0 }
 0x876   :  { %3901 = vadd.xlane.f32.xlu1 %v3900_v21 }
 0x889   :  { %v3822_v50 = vpop.f32.mrf.mxu1 }
 0x88a   :  { %v3823_v36 = vadd.f32 %v9207_v49, %v3822_v50 }
 0x88b   :  { %v5604_v29 = vpop.f32.mrf.mxu1 }
 0x88c   :  { %v9277_v48 = vadd.f32 %v6406_v17, %v3823_v36  ;;  %v5870_v17 = vld [vmem:[%s9996_s11 + $0x8] sm:$0xff]  }
 0x88d   :  { %v3825_v40 = vpop.f32.mrf.mxu1  ;;  %5623 = vmatpush3.bf16.msra.mxu0 %v5870_v17 }
 0x88e   :  { %v3826_v28 = vadd.f32 %v9207_v49, %v3825_v40  ;;  %v3903_v0 = vsel %vm122_vm1, %v9277_v48, 0.0  ;;  %5624 = vmatprep.subr.bf16.mxu0 %v10551_v55 }
 0x88f   :  { %v5605_v2 = vpop.f32.mrf.mxu1  ;;  %3904 = vadd.xlane.f32.xlu0 %v3903_v0 }
 0x890   :  { %v9285_v62 = vadd.f32 %v6407_v38, %v3826_v28 }
 0x891   :  { %v3830_v58 = vpop.f32.mrf.mxu1 }
 0x892   :  { %v3831_v44 = vadd.f32 %v9207_v49, %v3830_v58  ;;  %v3906_v54 = vsel %vm122_vm1, %v9285_v62, 0.0 }
 0x893   :  { %v5608_v8 = vpop.f32.mrf.mxu1  ;;  %3907 = vadd.xlane.f32.xlu1 %v3906_v54 }
 0x894   :  { %v9293_v56 = vadd.f32 %v6408_v59, %v3831_v44 }
 0x895   :  { %v3833_v6 = vpop.f32.mrf.mxu1 }
 0x896   :  { %v3834_v1 = vadd.f32 %v9207_v49, %v3833_v6  ;;  %v3909_v57 = vsel %vm122_vm1, %v9293_v56, 0.0 }
 0x897   :  { %v5609_v18 = vpop.f32.mrf.mxu1  ;;  %3910 = vadd.xlane.f32.xlu0 %v3909_v57 }
 0x898   :  { %v9301_v31 = vadd.f32 %v6409_v37, %v3834_v1 }
 0x899   :  { %v3838_v35 = vpop.f32.mrf.mxu1 }
 0x89a   :  { %v3839_v45 = vadd.f32 %v9207_v49, %v3838_v35  ;;  %v3912_v19 = vsel %vm122_vm1, %v9301_v31, 0.0 }
 0x89b   :  { %v5612_v9 = vpop.f32.mrf.mxu1  ;;  %3913 = vadd.xlane.f32.xlu1 %v3912_v19 }
 0x89c   :  { %v9309_v47 = vadd.f32 %v6410_v16, %v3839_v45 }
 0x89d   :  { %v3841_v5 = vpop.f32.mrf.mxu1 }
 0x89e   :  { %v3842_v60 = vadd.f32 %v9207_v49, %v3841_v5  ;;  %v3915_v46 = vsel %vm122_vm1, %v9309_v47, 0.0 }
 0x89f   :  { %v5613_v20 = vpop.f32.mrf.mxu1  ;;  %3916 = vadd.xlane.f32.xlu0 %v3915_v46 }
 0x8a0   :  { %v9317_v42 = vadd.f32 %v6411_v10, %v3842_v60 }
 0x8a1   :  { %v3846_v51 = vpop.f32.mrf.mxu1 }
 0x8a2   :  { %v3847_v33 = vadd.f32 %v9207_v49, %v3846_v51  ;;  %v3918_v61 = vsel %vm122_vm1, %v9317_v42, 0.0 }
 0x8a3   :  { %3919 = vadd.xlane.f32.xlu1 %v3918_v61  ;;  %v5616_v11 = vpop.f32.mrf.mxu1 }
 0x8a4   :  { %v9325_v53 = vadd.f32 %v6412_v63, %v3847_v33 }
 0x8a5   :  { %v3849_v7 = vpop.f32.mrf.mxu1 }
 0x8a6   :  { %v3850_v4 = vadd.f32 %v9207_v49, %v3849_v7  ;;  %v3921_v43 = vsel %vm122_vm1, %v9325_v53, 0.0 }
 0x8a7   :  { %v5617_v3 = vpop.f32.mrf.mxu1  ;;  %3922 = vadd.xlane.f32.xlu0 %v3921_v43  ;;  %v5871_v43 = vld [vmem:[%s9996_s11] sm:$0xff]  }
 0x8a8   :  { %v9333_v12 = vadd.f32 %v6413_v13, %v3850_v4  ;;  %5625 = vmatpush3.bf16.msra.mxu0 %v5871_v43 }
 0x8a9   :  { %v3854_v14 = vpop.f32.mrf.mxu1 }
 0x8aa   :  { %v3855_v25 = vadd.f32 %v9207_v49, %v3854_v14  ;;  %v3924_v41 = vsel %vm122_vm1, %v9333_v12, 0.0 }
 0x8ab   :  { %3925 = vadd.xlane.f32.xlu1 %v3924_v41  ;;  %v5620_v22 = vpop.f32.mrf.mxu1 }
 0x8ac   :  { %v9339_v21 = vadd.f32 %v3855_v25, %v10561_v24 }
 0x8ad   :  { %v3857_v50 = vpop.f32.mrf.mxu1 }
 0x8ae   :  { %v3927_v36 = vsel %vm122_vm1, %v9339_v21, 0.0 }
 0x8af   :  { %3928 = vadd.xlane.f32.xlu0 %v3927_v36  ;;  %v5621_v29 = vpop.f32.mrf.mxu1 }
 0x8e3   :  { %v3881_v49 = vpop.xlane.xlu1 %3880 }
 0x8e4   :  { %v3931_v40 = vmul.f32 0.03125, %v3881_v49 }
 0x8e6   :  { %v9348_v28 = vsub.f32 %v9213_v27, %v3931_v40 }
 0x8e7   :  { %v3884_v0 = vpop.xlane.xlu0 %3883 }
 0x8e8   :  { %v3932_v2 = vmul.f32 0.03125, %v3884_v0  ;;  %v3965_v38 = vmul.f32 %v9348_v28, %v9348_v28 }
 0x8ea   :  { %v9353_v58 = vsub.f32 %v9221_v15, %v3932_v2  ;;  %v3982_v44 = vsel %vm122_vm1, %v3965_v38, 0.0 }
 0x8eb   :  { %3983 = vadd.xlane.f32.xlu1 %v3982_v44  ;;  %v3887_v54 = vpop.xlane.xlu0 %3886 }
 0x8ec   :  { %v3933_v8 = vmul.f32 0.03125, %v3887_v54  ;;  %v3966_v59 = vmul.f32 %v9353_v58, %v9353_v58 }
 0x8ee   :  { %v9359_v6 = vsub.f32 %v9229_v30, %v3933_v8  ;;  %v3985_v27 = vsel %vm122_vm1, %v3966_v59, 0.0 }
 0x8ef   :  { %v3890_v1 = vpop.xlane.xlu1 %3889  ;;  %3986 = vadd.xlane.f32.xlu0 %v3985_v27 }
 0x8f0   :  { %v3934_v57 = vmul.f32 0.03125, %v3890_v1  ;;  %v3967_v15 = vmul.f32 %v9359_v6, %v9359_v6 }
 0x8f2   :  { %v9365_v18 = vsub.f32 %v9237_v32, %v3934_v57  ;;  %v3988_v37 = vsel %vm122_vm1, %v3967_v15, 0.0 }
 0x8f3   :  { %3989 = vadd.xlane.f32.xlu1 %v3988_v37  ;;  %v3893_v35 = vpop.xlane.xlu0 %3892 }
 0x8f4   :  { %v3935_v45 = vmul.f32 0.03125, %v3893_v35  ;;  %v3968_v30 = vmul.f32 %v9365_v18, %v9365_v18 }
 0x8f6   :  { %v9371_v19 = vsub.f32 %v9245_v34, %v3935_v45  ;;  %v3991_v9 = vsel %vm122_vm1, %v3968_v30, 0.0 }
 0x8f7   :  { %v3896_v16 = vpop.xlane.xlu1 %3895  ;;  %3992 = vadd.xlane.f32.xlu0 %v3991_v9 }
 0x8f8   :  { %v3936_v5 = vmul.f32 0.03125, %v3896_v16  ;;  %v3969_v32 = vmul.f32 %v9371_v19, %v9371_v19 }
 0x8fa   :  { %v9377_v60 = vsub.f32 %v9253_v39, %v3936_v5  ;;  %v3994_v46 = vsel %vm122_vm1, %v3969_v32, 0.0 }
 0x8fb   :  { %3995 = vadd.xlane.f32.xlu1 %v3994_v46  ;;  %v3899_v20 = vpop.xlane.xlu0 %3898 }
 0x8fc   :  { %v3937_v10 = vmul.f32 0.03125, %v3899_v20  ;;  %v3970_v34 = vmul.f32 %v9377_v60, %v9377_v60 }
 0x8fe   :  { %v9383_v51 = vsub.f32 %v9261_v52, %v3937_v10  ;;  %v3997_v33 = vsel %vm122_vm1, %v3970_v34, 0.0 }
 0x8ff   :  { %v3902_v61 = vpop.xlane.xlu1 %3901  ;;  %3998 = vadd.xlane.f32.xlu0 %v3997_v33 }
 0x900   :  { %v3938_v11 = vmul.f32 0.03125, %v3902_v61  ;;  %v3971_v39 = vmul.f32 %v9383_v51, %v9383_v51 }
 0x902   :  { %v9389_v63 = vsub.f32 %v9269_v23, %v3938_v11  ;;  %v4000_v7 = vsel %vm122_vm1, %v3971_v39, 0.0 }
 0x903   :  { %4001 = vadd.xlane.f32.xlu1 %v4000_v7 }
 0x904   :  { %v3972_v4 = vmul.f32 %v9389_v63, %v9389_v63 }
 0x906   :  { %v4003_v52 = vsel %vm122_vm1, %v3972_v4, 0.0 }
 0x907   :  { %4004 = vadd.xlane.f32.xlu0 %v4003_v52 }
 0x918   :  { %v3905_v3 = vpop.xlane.xlu0 %3904 }
 0x919   :  { %v3939_v13 = vmul.f32 0.03125, %v3905_v3 }
 0x91b   :  { %v9399_v14 = vsub.f32 %v9277_v48, %v3939_v13 }
 0x91c   :  { %v3908_v23 = vpop.xlane.xlu1 %3907 }
 0x91d   :  { %v3940_v25 = vmul.f32 0.03125, %v3908_v23  ;;  %v3973_v41 = vmul.f32 %v9399_v14, %v9399_v14 }
 0x91f   :  { %v9404_v22 = vsub.f32 %v9285_v62, %v3940_v25  ;;  %v4006_v50 = vsel %vm122_vm1, %v3973_v41, 0.0 }
 0x920   :  { %4007 = vadd.xlane.f32.xlu1 %v4006_v50  ;;  %v3911_v36 = vpop.xlane.xlu0 %3910 }
 0x921   :  { %v3941_v29 = vmul.f32 0.03125, %v3911_v36  ;;  %v3974_v17 = vmul.f32 %v9404_v22, %v9404_v22 }
 0x923   :  { %v9410_v49 = vsub.f32 %v9293_v56, %v3941_v29  ;;  %v4009_v48 = vsel %vm122_vm1, %v3974_v17, 0.0 }
 0x924   :  { %v3914_v40 = vpop.xlane.xlu1 %3913  ;;  %4010 = vadd.xlane.f32.xlu0 %v4009_v48  ;;  %v9456_v48 = vld [vmem:[%s9994_s9] ss:$0 sm:$0xff] }
 0x925   :  { %v3942_v0 = vmul.f32 0.03125, %v3914_v40  ;;  %v3975_v62 = vmul.f32 %v9410_v49, %v9410_v49 }
 0x927   :  { %v9416_v2 = vsub.f32 %v9301_v31, %v3942_v0  ;;  %v4012_v38 = vsel %vm122_vm1, %v3975_v62, 0.0 }
 0x928   :  { %4013 = vadd.xlane.f32.xlu1 %v4012_v38  ;;  %v3917_v44 = vpop.xlane.xlu0 %3916 }
 0x929   :  { %v3943_v54 = vmul.f32 0.03125, %v3917_v44  ;;  %v3976_v56 = vmul.f32 %v9416_v2, %v9416_v2 }
 0x92b   :  { %v9422_v8 = vsub.f32 %v9309_v47, %v3943_v54  ;;  %v4015_v59 = vsel %vm122_vm1, %v3976_v56, 0.0  ;;  %v9463_v56 = vld [vmem:[%s9995_s10] ss:$0 sm:$0xff] }
 0x92c   :  { %v3920_v27 = vpop.xlane.xlu1 %3919  ;;  %4016 = vadd.xlane.f32.xlu0 %v4015_v59 }
 0x92d   :  { %v3944_v1 = vmul.f32 0.03125, %v3920_v27  ;;  %v3977_v31 = vmul.f32 %v9422_v8, %v9422_v8 }
 0x92f   :  { %v9428_v57 = vsub.f32 %v9317_v42, %v3944_v1  ;;  %v4018_v15 = vsel %vm122_vm1, %v3977_v31, 0.0 }
 0x930   :  { %4019 = vadd.xlane.f32.xlu1 %v4018_v15  ;;  %v3923_v37 = vpop.xlane.xlu0 %3922 }
 0x931   :  { %v3945_v35 = vmul.f32 0.03125, %v3923_v37  ;;  %v3978_v47 = vmul.f32 %v9428_v57, %v9428_v57 }
 0x933   :  { %v9434_v45 = vsub.f32 %v9325_v53, %v3945_v35  ;;  %v4021_v30 = vsel %vm122_vm1, %v3978_v47, 0.0 }
 0x934   :  { %v3926_v9 = vpop.xlane.xlu1 %3925  ;;  %4022 = vadd.xlane.f32.xlu0 %v4021_v30 }
 0x935   :  { %v3946_v16 = vmul.f32 0.03125, %v3926_v9  ;;  %v3979_v42 = vmul.f32 %v9434_v45, %v9434_v45 }
 0x937   :  { %v9440_v5 = vsub.f32 %v9333_v12, %v3946_v16  ;;  %v4024_v32 = vsel %vm122_vm1, %v3979_v42, 0.0 }
 0x938   :  { %4025 = vadd.xlane.f32.xlu1 %v4024_v32  ;;  %v3929_v46 = vpop.xlane.xlu0 %3928 }
 0x939   :  { %v3947_v20 = vmul.f32 0.03125, %v3929_v46  ;;  %v3980_v53 = vmul.f32 %v9440_v5, %v9440_v5 }
 0x93b   :  { %v9446_v10 = vsub.f32 %v9339_v21, %v3947_v20  ;;  %v4027_v34 = vsel %vm122_vm1, %v3980_v53, 0.0 }
 0x93c   :  { %4028 = vadd.xlane.f32.xlu0 %v4027_v34 }
 0x93d   :  { %v3981_v33 = vmul.f32 %v9446_v10, %v9446_v10 }
 0x93f   :  { %v4030_v12 = vsel %vm122_vm1, %v3981_v33, 0.0 }
 0x940   :  { %4031 = vadd.xlane.f32.xlu1 %v4030_v12 }
 0x974   :  { %v3984_v61 = vpop.xlane.xlu1 %3983 }
 0x975   :  { %v4033_v11 = vmul.f32 0.03125, %v3984_v61 }
 0x977   :  { %v4050_v39 = vadd.f32 1e-05, %v4033_v11 }
 0x978   :  { %v3987_v7 = vpop.xlane.xlu0 %3986 }
 0x979   :  { %6294 = vrsqrt.f32 %v4050_v39  ;;  %v4034_v4 = vmul.f32 0.03125, %v3987_v7 }
 0x97b   :  { %v4051_v52 = vadd.f32 1e-05, %v4034_v4 }
 0x97c   :  { %v3990_v43 = vpop.xlane.xlu1 %3989 }
 0x97d   :  { %6296 = vrsqrt.f32 %v4051_v52  ;;  %v4035_v21 = vmul.f32 0.03125, %v3990_v43 }
 0x97f   :  { %v4052_v3 = vadd.f32 1e-05, %v4035_v21 }
 0x980   :  { %v3993_v13 = vpop.xlane.xlu0 %3992 }
 0x981   :  { %6298 = vrsqrt.f32 %v4052_v3  ;;  %v4036_v23 = vmul.f32 0.03125, %v3993_v13 }
 0x983   :  { %v4053_v25 = vadd.f32 1e-05, %v4036_v23 }
 0x984   :  { %v3996_v41 = vpop.xlane.xlu1 %3995 }
 0x985   :  { %6300 = vrsqrt.f32 %v4053_v25  ;;  %v4037_v50 = vmul.f32 0.03125, %v3996_v41 }
 0x986   :  { %v6295_v36 = vpop.eup %6294 }
 0x987   :  { %v4084_v29 = vmul.f32 %v6295_v36, %v9348_v28  ;;  %v4054_v17 = vadd.f32 1e-05, %v4037_v50 }
 0x988   :  { %v3999_v40 = vpop.xlane.xlu0 %3998 }
 0x989   :  { %6302 = vrsqrt.f32 %v4054_v17  ;;  %v4038_v0 = vmul.f32 0.03125, %v3999_v40  ;;  %v4107_v38 = vmul.f32 %v9456_v48, %v4084_v29 }
 0x98a   :  { %v6297_v62 = vpop.eup %6296 }
 0x98b   :  { %v4085_v44 = vmul.f32 %v6297_v62, %v9353_v58  ;;  %v4055_v54 = vadd.f32 1e-05, %v4038_v0  ;;  %v4130_v31 = vadd.f32 %v9463_v56, %v4107_v38 }
 0x98c   :  { %v4002_v28 = vpop.xlane.xlu1 %4001 }
 0x98d   :  { %v4108_v59 = vmul.f32 %v9456_v48, %v4085_v44  ;;  %6304 = vrsqrt.f32 %v4055_v54  ;;  %v4039_v27 = vmul.f32 0.03125, %v4002_v28 }
 0x98e   :  { %v6299_v1 = vpop.eup %6298 }
 0x98f   :  { %v4131_v15 = vadd.f32 %v9463_v56, %v4108_v59  ;;  %v4086_v37 = vmul.f32 %v6299_v1, %v9359_v6  ;;  %v4056_v35 = vadd.f32 1e-05, %v4039_v27 }
 0x990   :  { %v4005_v58 = vpop.xlane.xlu0 %4004 }
 0x991   :  { %v4151_v47 = vpack.c.bf16 %v4131_v15, %v4130_v31  ;;  %6306 = vrsqrt.f32 %v4056_v35  ;;  %v4040_v30 = vmul.f32 0.03125, %v4005_v58  ;;  %v4109_v32 = vmul.f32 %v9456_v48, %v4086_v37 }
 0x992   :  { %v6301_v9 = vpop.eup %6300 }
 0x993   :  { %v4087_v16 = vmul.f32 %v6301_v9, %v9365_v18  ;;  %v4057_v42 = vadd.f32 1e-05, %v4040_v30  ;;  %5627 = vmatmul.mubr.msk.bf16.vlgmr.msra.gmra.mxu0 %vm122_vm1, %v4151_v47  ;;  %v4132_v53 = vadd.f32 %v9463_v56, %v4109_v32 }
 0x994   :  { %5630 = vmatprep.mubr.msk.bf16.mxu0 %vm6437_vm0, %v10551_v55 }
 0x995   :  { %6308 = vrsqrt.f32 %v4057_v42  ;;  %v4110_v46 = vmul.f32 %v9456_v48, %v4087_v16 }
 0x996   :  { %v6303_v6 = vpop.eup %6302 }
 0x997   :  { %v4088_v20 = vmul.f32 %v6303_v6, %v9371_v19  ;;  %v4133_v34 = vadd.f32 %v9463_v56, %v4110_v46 }
 0x999   :  { %v4152_v33 = vpack.c.bf16 %v4133_v34, %v4132_v53  ;;  %v4111_v61 = vmul.f32 %v9456_v48, %v4088_v20 }
 0x99a   :  { %v6305_v18 = vpop.eup %6304 }
 0x99b   :  { %v4089_v12 = vmul.f32 %v6305_v18, %v9377_v60  ;;  %5631 = vmatmul.mubr.msk.bf16.gmra.mxu0 %vm122_vm1, %v4152_v33  ;;  %v4134_v7 = vadd.f32 %v9463_v56, %v4111_v61 }
 0x99c   :  { %5634 = vmatprep.mubr.msk.bf16.mxu0 %vm6437_vm0, %v10551_v55 }
 0x99d   :  { %v4112_v11 = vmul.f32 %v9456_v48, %v4089_v12 }
 0x99e   :  { %v6307_v39 = vpop.eup %6306 }
 0x99f   :  { %v4090_v19 = vmul.f32 %v6307_v39, %v9383_v51  ;;  %v4135_v4 = vadd.f32 %v9463_v56, %v4112_v11 }
 0x9a1   :  { %v4153_v52 = vpack.c.bf16 %v4135_v4, %v4134_v7  ;;  %v4113_v21 = vmul.f32 %v9456_v48, %v4090_v19 }
 0x9a2   :  { %v6309_v43 = vpop.eup %6308 }
 0x9a3   :  { %v4091_v60 = vmul.f32 %v6309_v43, %v9389_v63  ;;  %5635 = vmatmul.mubr.msk.bf16.gmra.mxu0 %vm122_vm1, %v4153_v52  ;;  %v4136_v13 = vadd.f32 %v9463_v56, %v4113_v21 }
 0x9a4   :  { %5638 = vmatprep.mubr.msk.bf16.mxu0 %vm6437_vm0, %v10551_v55 }
 0x9a5   :  { %v4114_v3 = vmul.f32 %v9456_v48, %v4091_v60 }
 0x9a7   :  { %v4137_v51 = vadd.f32 %v9463_v56, %v4114_v3 }
 0x9a9   :  { %v4008_v23 = vpop.xlane.xlu1 %4007  ;;  %v4154_v25 = vpack.c.bf16 %v4137_v51, %v4136_v13 }
 0x9aa   :  { %v4041_v41 = vmul.f32 0.03125, %v4008_v23 }
 0x9ab   :  { %5639 = vmatmul.mubr.msk.bf16.gmra.mxu0 %vm122_vm1, %v4154_v25 }
 0x9ac   :  { %v4058_v50 = vadd.f32 1e-05, %v4041_v41  ;;  %5642 = vmatprep.mubr.msk.bf16.mxu0 %vm6437_vm0, %v10551_v55 }
 0x9ad   :  { %v4011_v63 = vpop.xlane.xlu0 %4010 }
 0x9ae   :  { %6310 = vrsqrt.f32 %v4058_v50  ;;  %v4042_v36 = vmul.f32 0.03125, %v4011_v63 }
 0x9b0   :  { %v4059_v29 = vadd.f32 1e-05, %v4042_v36 }
 0x9b1   :  { %v4014_v17 = vpop.xlane.xlu1 %4013 }
 0x9b2   :  { %6312 = vrsqrt.f32 %v4059_v29  ;;  %v4043_v40 = vmul.f32 0.03125, %v4014_v17 }
 0x9b4   :  { %v4060_v0 = vadd.f32 1e-05, %v4043_v40 }
 0x9b5   :  { %v4017_v62 = vpop.xlane.xlu0 %4016 }
 0x9b6   :  { %6314 = vrsqrt.f32 %v4060_v0  ;;  %v4044_v38 = vmul.f32 0.03125, %v4017_v62 }
 0x9b8   :  { %v4061_v44 = vadd.f32 1e-05, %v4044_v38  ;;  %v9562_v38 = vld [vmem:[%s9997_s12] ss:$0 sm:$0xff] }
 0x9b9   :  { %v4020_v54 = vpop.xlane.xlu1 %4019 }
 0x9ba   :  { %6316 = vrsqrt.f32 %v4061_v44  ;;  %v4045_v28 = vmul.f32 0.03125, %v4020_v54 }
 0x9bb   :  { %v6311_v59 = vpop.eup %6310 }
 0x9bc   :  { %v4092_v27 = vmul.f32 %v6311_v59, %v9399_v14  ;;  %v4062_v1 = vadd.f32 1e-05, %v4045_v28 }
 0x9bd   :  { %v4023_v31 = vpop.xlane.xlu0 %4022 }
 0x9be   :  { %6318 = vrsqrt.f32 %v4062_v1  ;;  %v4046_v15 = vmul.f32 0.03125, %v4023_v31  ;;  %v4115_v47 = vmul.f32 %v9456_v48, %v4092_v27 }
 0x9bf   :  { %v6313_v37 = vpop.eup %6312 }
 0x9c0   :  { %v4093_v35 = vmul.f32 %v6313_v37, %v9404_v22  ;;  %v4063_v58 = vadd.f32 1e-05, %v4046_v15  ;;  %v4138_v14 = vadd.f32 %v9463_v56, %v4115_v47 }
 0x9c1   :  { %v4026_v30 = vpop.xlane.xlu1 %4025 }
 0x9c2   :  { %6320 = vrsqrt.f32 %v4063_v58  ;;  %v4047_v9 = vmul.f32 0.03125, %v4026_v30  ;;  %v4116_v16 = vmul.f32 %v9456_v48, %v4093_v35 }
 0x9c3   :  { %v6315_v42 = vpop.eup %6314 }
 0x9c4   :  { %v4094_v32 = vmul.f32 %v6315_v42, %v9410_v49  ;;  %v4064_v46 = vadd.f32 1e-05, %v4047_v9  ;;  %v4139_v6 = vadd.f32 %v9463_v56, %v4116_v16 }
 0x9c5   :  { %v4029_v20 = vpop.xlane.xlu0 %4028 }
 0x9c6   :  { %6322 = vrsqrt.f32 %v4064_v46  ;;  %v4048_v53 = vmul.f32 0.03125, %v4029_v20  ;;  %v4155_v22 = vpack.c.bf16 %v4139_v6, %v4138_v14  ;;  %v4117_v12 = vmul.f32 %v9456_v48, %v4094_v32 }
 0x9c7   :  { %v6317_v34 = vpop.eup %6316 }
 0x9c8   :  { %v4095_v33 = vmul.f32 %v6317_v34, %v9416_v2  ;;  %v4065_v18 = vadd.f32 1e-05, %v4048_v53  ;;  %5643 = vmatmul.mubr.msk.bf16.gmra.mxu0 %vm122_vm1, %v4155_v22  ;;  %v4140_v4 = vadd.f32 %v9463_v56, %v4117_v12 }
 0x9c9   :  { %v4032_v61 = vpop.xlane.xlu1 %4031  ;;  %5646 = vmatprep.mubr.msk.bf16.mxu0 %vm6437_vm0, %v10551_v55 }
 0x9ca   :  { %6324 = vrsqrt.f32 %v4065_v18  ;;  %v4049_v49 = vmul.f32 0.03125, %v4032_v61  ;;  %v4118_v11 = vmul.f32 %v9456_v48, %v4095_v33 }
 0x9cb   :  { %v6319_v39 = vpop.eup %6318 }
 0x9cc   :  { %v4096_v19 = vmul.f32 %v6319_v39, %v9422_v8  ;;  %v4066_v7 = vadd.f32 1e-05, %v4049_v49  ;;  %v4141_v2 = vadd.f32 %v9463_v56, %v4118_v11 }
 0x9ce   :  { %6326 = vrsqrt.f32 %v4066_v7  ;;  %v4156_v52 = vpack.c.bf16 %v4141_v2, %v4140_v4  ;;  %v4119_v21 = vmul.f32 %v9456_v48, %v4096_v19 }
 0x9cf   :  { %v6321_v43 = vpop.eup %6320 }
 0x9d0   :  { %v4097_v60 = vmul.f32 %v6321_v43, %v9428_v57  ;;  %5647 = vmatmul.mubr.msk.bf16.gmra.mxu0 %vm122_vm1, %v4156_v52  ;;  %v4142_v51 = vadd.f32 %v9463_v56, %v4119_v21 }
 0x9d1   :  { %5650 = vmatprep.mubr.msk.bf16.mxu0 %vm6437_vm0, %v10551_v55 }
 0x9d2   :  { %v4120_v3 = vmul.f32 %v9456_v48, %v4097_v60 }
 0x9d3   :  { %v6323_v8 = vpop.eup %6322 }
 0x9d4   :  { %v4098_v13 = vmul.f32 %v6323_v8, %v9434_v45  ;;  %v4143_v23 = vadd.f32 %v9463_v56, %v4120_v3 }
 0x9d6   :  { %v4157_v25 = vpack.c.bf16 %v4143_v23, %v4142_v51  ;;  %v4121_v50 = vmul.f32 %v9456_v48, %v4098_v13 }
 0x9d7   :  { %v6325_v41 = vpop.eup %6324 }
 0x9d8   :  { %v4099_v57 = vmul.f32 %v6325_v41, %v9440_v5  ;;  %5651 = vmatmul.mubr.msk.bf16.gmra.mxu0 %vm122_vm1, %v4157_v25  ;;  %v4144_v29 = vadd.f32 %v9463_v56, %v4121_v50 }
 0x9d9   :  { %5654 = vmatprep.mubr.msk.bf16.mxu0 %vm6437_vm0, %v10551_v55 }
 0x9da   :  { %v4122_v63 = vmul.f32 %v9456_v48, %v4099_v57 }
 0x9db   :  { %v6327_v36 = vpop.eup %6326 }
 0x9dc   :  { %v4100_v45 = vmul.f32 %v6327_v36, %v9446_v10  ;;  %v4145_v17 = vadd.f32 %v9463_v56, %v4122_v63  ;;  %v5872_v10 = vld [vmem:[%s9998_s13 + $0x18] sm:$0xff]  }
 0x9dd   :  { %5663 = vmatpush3.bf16.msra.mxu1 %v5872_v10 }
 0x9de   :  { %v4158_v40 = vpack.c.bf16 %v4145_v17, %v4144_v29  ;;  %v4123_v0 = vmul.f32 %v9456_v48, %v4100_v45  ;;  %5664 = vmatprep.subr.bf16.mxu1 %v10551_v55  ;;  %v5873_v48 = vld [vmem:[%s9998_s13 + $0x10] sm:$0xff]  }
 0x9e0   :  { %5655 = vmatmul.mubr.msk.bf16.gmra.mxu0 %vm122_vm1, %v4158_v40  ;;  %v9537_v5 = vadd.f32 %v9463_v56, %v4123_v0  ;;  %v5874_v56 = vld [vmem:[%s9998_s13 + $0x8] sm:$0xff]  }
 0x9e1   :  { %5658 = vmatprep.mubr.msk.bf16.mxu0 %vm6437_vm0, %v10551_v55  ;;  %5665 = vmatpush3.bf16.msra.mxu1 %v5873_v48 }
 0x9e2   :  { %v4159_v62 = vpack.c.bf16 %v9537_v5, %v9537_v5  ;;  %5666 = vmatprep.subr.bf16.mxu1 %v10551_v55 }
 0x9e5   :  { %5667 = vmatpush3.bf16.msra.mxu1 %v5874_v56 }
 0x9e6   :  { %5668 = vmatprep.subr.bf16.mxu1 %v10551_v55 }
 0x9e8   :  { %5659 = vmatmul.mubr.msk.bf16.gmra.mxu0 %vm122_vm1, %v4159_v62 }
 0x9e9   :  { %5057 = vmatprep.mubr.bf16.mxu0 %v10376_v26  ;;  %v5875_v26 = vld [vmem:[%s9998_s13] sm:$0xff]  }
 0x9ea   :  { %5669 = vmatpush3.bf16.msra.mxu1 %v5875_v26 }
 0x9eb   :  { %5706 = vmatprep.subr.bf16.mxu1 %v10551_v55 }
 0xa53   :  { %v4240_v44 = vpop.f32.mrf.mxu0 }
 0xa54   :  { %v9565_v54 = vadd.f32 %v9562_v38, %v4240_v44 }
 0xa55   :  { %v5628_v28 = vpop.f32.mrf.mxu0 }
 0xa56   :  { %v9568_v59 = vmul.f32 0.70710677, %v9565_v54 }
 0xa57   :  { %v4243_v27 = vpop.f32.mrf.mxu0 }
 0xa58   :  { %v4344_v1 = vand.u32 2147483647, %v9568_v59  ;;  %v9572_v31 = vadd.f32 %v9562_v38, %v4243_v27  ;;  %vm4684_vm9 = vcmp.ge.f32.partialorder %v9568_v59, 0.0 }
 0xa59   :  { %v5629_v15 = vpop.f32.mrf.mxu0 }
 0xa5a   :  { %v4361_v37 = vmul.f32 0.3275911, %v4344_v1  ;;  %v9575_v35 = vmul.f32 0.70710677, %v9572_v31  ;;  %v4582_v34 = vsub.f32 0.0, %v4344_v1 }
 0xa5b   :  { %v4248_v58 = vpop.f32.mrf.mxu0 }
 0xa5c   :  { %v4378_v47 = vadd.f32 1.0, %v4361_v37  ;;  %v4345_v30 = vand.u32 2147483647, %v9575_v35  ;;  %v9579_v9 = vadd.f32 %v9562_v38, %v4248_v58  ;;  %v4599_v4 = vmul.f32 %v4582_v34, %v4344_v1 }
 0xa5d   :  { %v5632_v16 = vpop.f32.mrf.mxu0  ;;  %vm4685_vm10 = vcmp.ge.f32.partialorder %v9575_v35, 0.0 }
 0xa5e   :  { %6328 = vrcp.f32 %v4378_v47  ;;  %v4362_v42 = vmul.f32 0.3275911, %v4345_v30  ;;  %v9582_v32 = vmul.f32 0.70710677, %v9579_v9  ;;  %v4583_v39 = vsub.f32 0.0, %v4345_v30 }
 0xa5f   :  { %v4251_v46 = vpop.f32.mrf.mxu0  ;;  %v4616_v51 = vmul.f32 1.442695, %v4599_v4 }
 0xa60   :  { %v4379_v14 = vadd.f32 1.0, %v4362_v42  ;;  %v9585_v6 = vadd.f32 %v9562_v38, %v4251_v46  ;;  %v4346_v20 = vand.u32 2147483647, %v9582_v32  ;;  %v4600_v3 = vmul.f32 %v4583_v39, %v4345_v30 }
 0xa61   :  { %v5633_v53 = vpop.f32.mrf.mxu0  ;;  %vm4686_vm11 = vcmp.ge.f32.partialorder %v9582_v32, 0.0 }
 0xa62   :  { %6330 = vrcp.f32 %v4379_v14  ;;  %v9589_v22 = vmul.f32 0.70710677, %v9585_v6  ;;  %v4363_v33 = vmul.f32 0.3275911, %v4346_v20  ;;  %v4584_v57 = vsub.f32 0.0, %v4346_v20 }
 0xa63   :  { %v4256_v18 = vpop.f32.mrf.mxu0  ;;  %v4618_v40 = vmul.f32 1.442695, %v4600_v3 }
 0xa64   :  { %v4347_v12 = vand.u32 2147483647, %v9589_v22  ;;  %v9593_v61 = vadd.f32 %v9562_v38, %v4256_v18  ;;  %v4380_v49 = vadd.f32 1.0, %v4363_v33  ;;  %v4601_v44 = vmul.f32 %v4584_v57, %v4346_v20 }
 0xa65   :  { %v5636_v11 = vpop.f32.mrf.mxu0  ;;  %vm4687_vm13 = vcmp.ge.f32.partialorder %v9589_v22, 0.0 }
 0xa66   :  { %v4364_v19 = vmul.f32 0.3275911, %v4347_v12  ;;  %v9596_v7 = vmul.f32 0.70710677, %v9593_v61  ;;  %6332 = vrcp.f32 %v4380_v49  ;;  %v4585_v63 = vsub.f32 0.0, %v4347_v12 }
 0xa67   :  { %v4259_v2 = vpop.f32.mrf.mxu0  ;;  %v4620_v20 = vmul.f32 1.442695, %v4601_v44  ;;  %v9656_v44 = vmul.f32 0.5, %v9579_v9 }
 0xa68   :  { %v4381_v52 = vadd.f32 1.0, %v4364_v19  ;;  %v4348_v43 = vand.u32 2147483647, %v9596_v7  ;;  %v9600_v60 = vadd.f32 %v9562_v38, %v4259_v2  ;;  %v4602_v27 = vmul.f32 %v4585_v63, %v4347_v12 }
 0xa69   :  { %v5637_v21 = vpop.f32.mrf.mxu0  ;;  %v9638_v19 = vmul.f32 0.5, %v9565_v54  ;;  %vm4688_vm14 = vcmp.ge.f32.partialorder %v9596_v7, 0.0 }
 0xa6a   :  { %6334 = vrcp.f32 %v4381_v52  ;;  %v4365_v8 = vmul.f32 0.3275911, %v4348_v43  ;;  %v9605_v23 = vmul.f32 0.70710677, %v9600_v60  ;;  %v4586_v30 = vsub.f32 0.0, %v4348_v43 }
 0xa6b   :  { %v9602_v13 = vpop.eup %6328  ;;  %v4264_v25 = vpop.f32.mrf.mxu0  ;;  %v4622_v33 = vmul.f32 1.442695, %v4602_v27 }
 0xa6c   :  { %v4429_v41 = vmul.f32 1.0614054, %v9602_v13  ;;  %v4382_v50 = vadd.f32 1.0, %v4365_v8  ;;  %v9609_v36 = vand.u32 2147483647, %v9605_v23  ;;  %v9612_v45 = vadd.f32 %v9562_v38, %v4264_v25 }
 0xa6d   :  { %v5640_v29 = vpop.f32.mrf.mxu0  ;;  %v4603_v2 = vmul.f32 %v4586_v30, %v4348_v43  ;;  %vm4689_vm15 = vcmp.ge.f32.partialorder %v9605_v23, 0.0 }
 0xa6e   :  { %v4446_v17 = vadd.f32 -1.4531521, %v4429_v41  ;;  %6336 = vrcp.f32 %v4382_v50  ;;  %v4366_v62 = vmul.f32 0.3275911, %v9609_v36  ;;  %v9618_v10 = vmul.f32 0.70710677, %v9612_v45 }
 0xa6f   :  { %v9614_v0 = vpop.eup %6330  ;;  %6338 = vpow2.f32 %v4616_v51  ;;  %v4267_v48 = vpop.f32.mrf.mxu0  ;;  %v9644_v51 = vmul.f32 0.5, %v9572_v31  ;;  %v4587_v41 = vsub.f32 0.0, %v9609_v36  ;;  %v4624_v29 = vmul.f32 1.442695, %v4603_v2 }
 0xa70   :  { %v4463_v56 = vmul.f32 %v9602_v13, %v4446_v17  ;;  %v4430_v26 = vmul.f32 1.0614054, %v9614_v0  ;;  %v9623_v28 = vadd.f32 %v9562_v38, %v4267_v48  ;;  %v4383_v1 = vadd.f32 1.0, %v4366_v62 }
 0xa71   :  { %v4350_v15 = vand.u32 2147483647, %v9618_v10  ;;  %v5641_v37 = vpop.f32.mrf.mxu0  ;;  %6340 = vpow2.f32 %v4618_v40  ;;  %vm4690_vm2 = vcmp.ge.f32.partialorder %v9618_v10, 0.0 }
 0xa72   :  { %v4480_v58 = vadd.f32 1.4214138, %v4463_v56  ;;  %v4447_v47 = vadd.f32 -1.4531521, %v4430_v26  ;;  %6342 = vrcp.f32 %v4383_v1  ;;  %v9631_v53 = vmul.f32 0.70710677, %v9623_v28 }
 0xa73   :  { %v4367_v16 = vmul.f32 0.3275911, %v4350_v15  ;;  %v9626_v42 = vpop.eup %6332  ;;  %v4588_v17 = vsub.f32 0.0, %v4350_v15  ;;  %v4604_v1 = vmul.f32 %v4587_v41, %v9609_v36 }
 0xa74   :  { %v4497_v46 = vmul.f32 %v9602_v13, %v4480_v58  ;;  %v4464_v14 = vmul.f32 %v9614_v0, %v4447_v47  ;;  %v4431_v34 = vmul.f32 1.0614054, %v9626_v42  ;;  %v4351_v11 = vand.u32 2147483647, %v9631_v53 }
 0xa75   :  { %v4384_v18 = vadd.f32 1.0, %v4367_v16  ;;  %vm4691_vm3 = vcmp.ge.f32.partialorder %v9631_v53, 0.0 }
 0xa76   :  { %v4514_v12 = vadd.f32 -0.28449672, %v4497_v46  ;;  %v4481_v49 = vadd.f32 1.4214138, %v4464_v14  ;;  %v4448_v4 = vadd.f32 -1.4531521, %v4431_v34  ;;  %v4605_v46 = vmul.f32 %v4588_v17, %v4350_v15 }
 0xa77   :  { %v9635_v39 = vpop.eup %6334  ;;  %6344 = vrcp.f32 %v4384_v18  ;;  %v4368_v8 = vmul.f32 0.3275911, %v4351_v11  ;;  %v4589_v14 = vsub.f32 0.0, %v4351_v11 }
 0xa78   :  { %v4531_v52 = vmul.f32 %v9602_v13, %v4514_v12  ;;  %v4498_v21 = vmul.f32 %v9614_v0, %v4481_v49  ;;  %v4432_v3 = vmul.f32 1.0614054, %v9635_v39  ;;  %v4465_v25 = vmul.f32 %v9626_v42, %v4448_v4 }
 0xa79   :  { %6346 = vpow2.f32 %v4620_v20  ;;  %v4385_v40 = vadd.f32 1.0, %v4368_v8  ;;  %v9668_v12 = vmul.f32 0.5, %v9585_v6  ;;  %v4626_v4 = vmul.f32 1.442695, %v4604_v1 }
 0xa7a   :  { %v4548_v54 = vadd.f32 0.2548296, %v4531_v52  ;;  %v4515_v57 = vadd.f32 -0.28449672, %v4498_v21  ;;  %v4449_v50 = vadd.f32 -1.4531521, %v4432_v3  ;;  %6348 = vpow2.f32 %v4622_v33 }
 0xa7b   :  { %v9648_v43 = vpop.eup %6336  ;;  %v4482_v63 = vadd.f32 1.4214138, %v4465_v25  ;;  %6350 = vrcp.f32 %v4385_v40  ;;  %v4628_v25 = vmul.f32 1.442695, %v4605_v46 }
 0xa7c   :  { %v6339_v62 = vpop.eup %6338  ;;  %v4565_v31 = vmul.f32 %v9602_v13, %v4548_v54  ;;  %v4532_v48 = vmul.f32 %v9614_v0, %v4515_v57  ;;  %v4466_v56 = vmul.f32 %v9635_v39, %v4449_v50  ;;  %v4433_v26 = vmul.f32 1.0614054, %v9648_v43 }
 0xa7d   :  { %v4499_v27 = vmul.f32 %v9626_v42, %v4482_v63  ;;  %6352 = vpow2.f32 %v4624_v29 }
 0xa7e   :  { %v4650_v37 = vmul.f32 %v6339_v62, %v4565_v31  ;;  %v4549_v58 = vadd.f32 0.2548296, %v4532_v48  ;;  %v4483_v47 = vadd.f32 1.4214138, %v4466_v56  ;;  %v4450_v30 = vadd.f32 -1.4531521, %v4433_v26  ;;  %v6341_v16 = vpop.eup %6340 }
 0xa7f   :  { %v4516_v13 = vadd.f32 -0.28449672, %v4499_v27  ;;  %v9661_v20 = vpop.eup %6342  ;;  %6354 = vpow2.f32 %v4626_v4 }
 0xa80   :  { %v4667_v9 = vsub.f32 1.0, %v4650_v37  ;;  %v4566_v34 = vmul.f32 %v9614_v0, %v4549_v58  ;;  %v4500_v33 = vmul.f32 %v9635_v39, %v4483_v47  ;;  %v4467_v36 = vmul.f32 %v9648_v43, %v4450_v30 }
 0xa81   :  { %v4533_v18 = vmul.f32 %v9626_v42, %v4516_v13  ;;  %v4434_v49 = vmul.f32 1.0614054, %v9661_v20  ;;  %v4606_v0 = vmul.f32 %v4589_v14, %v4351_v11  ;;  %6356 = vpow2.f32 %v4628_v25 }
 0xa82   :  { %v4701_v2 = vsub.f32 0.0, %v4667_v9  ;;  %v4651_v15 = vmul.f32 %v6341_v16, %v4566_v34  ;;  %v4517_v52 = vadd.f32 -0.28449672, %v4500_v33  ;;  %v4484_v21 = vadd.f32 1.4214138, %v4467_v36 }
 0xa83   :  { %v4550_v3 = vadd.f32 0.2548296, %v4533_v18  ;;  %v4451_v8 = vadd.f32 -1.4531521, %v4434_v49  ;;  %v4630_v58 = vmul.f32 1.442695, %v4606_v0 }
 0xa84   :  { %v9671_v41 = vpop.eup %6344  ;;  %v4718_v54 = vsel %vm4684_vm9, %v4667_v9, %v4701_v2  ;;  %v4668_v57 = vsub.f32 1.0, %v4651_v15  ;;  %v4534_v6 = vmul.f32 %v9635_v39, %v4517_v52  ;;  %v4501_v50 = vmul.f32 %v9648_v43, %v4484_v21 }
 0xa85   :  { %v4567_v63 = vmul.f32 %v9626_v42, %v4550_v3  ;;  %v4468_v29 = vmul.f32 %v9661_v20, %v4451_v8  ;;  %v4435_v11 = vmul.f32 1.0614054, %v9671_v41  ;;  %v4735_v40 = vadd.f32 1.0, %v4718_v54 }
 0xa86   :  { %v6347_v17 = vpop.eup %6346  ;;  %v4702_v62 = vsub.f32 0.0, %v4668_v57  ;;  %v4551_v59 = vadd.f32 0.2548296, %v4534_v6  ;;  %v4518_v31 = vadd.f32 -0.28449672, %v4501_v50  ;;  %6358 = vpow2.f32 %v4630_v58 }
 0xa87   :  { %v6349_v48 = vpop.eup %6348  ;;  %v4652_v56 = vmul.f32 %v6347_v17, %v4567_v63  ;;  %v4485_v26 = vadd.f32 1.4214138, %v4468_v29  ;;  %v4452_v27 = vadd.f32 -1.4531521, %v4435_v11  ;;  %v4752_v9 = vmul.f32 %v4735_v40, %v9638_v19 }
 0xa88   :  { %v4719_v1 = vsel %vm4685_vm10, %v4668_v57, %v4702_v62  ;;  %v4568_v42 = vmul.f32 %v9635_v39, %v4551_v59  ;;  %v4535_v37 = vmul.f32 %v9648_v43, %v4518_v31  ;;  %v4272_v47 = vpop.f32.mrf.mxu0  ;;  %v9687_v14 = vpop.eup %6350 }
 0xa89   :  { %v4736_v30 = vadd.f32 1.0, %v4719_v1  ;;  %v4669_v16 = vsub.f32 1.0, %v4652_v56  ;;  %v4502_v13 = vmul.f32 %v9661_v20, %v4485_v26  ;;  %v4469_v46 = vmul.f32 %v9671_v41, %v4452_v27 }
 0xa8a   :  { %v4653_v34 = vmul.f32 %v6349_v48, %v4568_v42  ;;  %v4552_v33 = vadd.f32 0.2548296, %v4535_v37  ;;  %v9691_v35 = vadd.f32 %v9562_v38, %v4272_v47  ;;  %v5644_v39 = vpop.f32.mrf.mxu0  ;;  %v6353_v2 = vpop.eup %6352  ;;  %v4436_v21 = vmul.f32 1.0614054, %v9687_v14 }
 0xa8b   :  { %v4753_v36 = vmul.f32 %v4736_v30, %v9644_v51  ;;  %v4703_v18 = vsub.f32 0.0, %v4669_v16  ;;  %v4519_v49 = vadd.f32 -0.28449672, %v4502_v13  ;;  %v4486_v4 = vadd.f32 1.4214138, %v4469_v46 }
 0xa8c   :  { %v4670_v15 = vsub.f32 1.0, %v4653_v34  ;;  %v4569_v52 = vmul.f32 %v9648_v43, %v4552_v33  ;;  %v4275_v19 = vpop.f32.mrf.mxu0  ;;  %v4453_v6 = vadd.f32 -1.4531521, %v4436_v21  ;;  %v9702_v43 = vmul.f32 0.70710677, %v9691_v35  ;;  %v6355_v22 = vpop.eup %6354 }
 0xa8d   :  { %v4777_v3 = vpack.c.bf16 %v4753_v36, %v4752_v9  ;;  %v4720_v8 = vsel %vm4686_vm11, %v4669_v16, %v4703_v18  ;;  %v4536_v25 = vmul.f32 %v9661_v20, %v4519_v49  ;;  %v4503_v51 = vmul.f32 %v9671_v41, %v4486_v4 }
 0xa8e   :  { %v4737_v0 = vadd.f32 1.0, %v4720_v8  ;;  %v4704_v54 = vsub.f32 0.0, %v4670_v15  ;;  %v4654_v57 = vmul.f32 %v6353_v2, %v4569_v52  ;;  %v5645_v50 = vpop.f32.mrf.mxu0  ;;  %v4470_v17 = vmul.f32 %v9687_v14, %v4453_v6 }
 0xa8f   :  { %v4553_v63 = vadd.f32 0.2548296, %v4536_v25  ;;  %v4520_v29 = vadd.f32 -0.28449672, %v4503_v51  ;;  %5671 = vmatmul.mubr.msk.bf16.vlgmr.msra.gmra.mxu1 %vm4817_vm12, %v4777_v3  ;;  %v9709_v40 = vadd.f32 %v9562_v38, %v4275_v19  ;;  %v9716_v56 = vand.u32 2147483647, %v9702_v43 }
 0xa90   :  { %v4721_v32 = vsel %vm4687_vm13, %v4670_v15, %v4704_v54  ;;  %v4671_v11 = vsub.f32 1.0, %v4654_v57  ;;  %v4280_v62 = vpop.f32.mrf.mxu0  ;;  %5674 = vmatprep.mubr.msk.bf16.mxu1 %vm6437_vm0, %v10551_v55  ;;  %v4754_v26 = vmul.f32 %v4737_v0, %v9656_v44  ;;  %v4487_v1 = vadd.f32 1.4214138, %v4470_v17 }
 0xa91   :  { %v4738_v59 = vadd.f32 1.0, %v4721_v32  ;;  %v4570_v31 = vmul.f32 %v9661_v20, %v4553_v63  ;;  %v4537_v48 = vmul.f32 %v9671_v41, %v4520_v29  ;;  %v4369_v30 = vmul.f32 0.3275911, %v9716_v56  ;;  %v6357_v20 = vpop.eup %6356 }
 0xa92   :  { %v4705_v27 = vsub.f32 0.0, %v4671_v11  ;;  %v5648_v42 = vpop.f32.mrf.mxu0  ;;  %v4504_v13 = vmul.f32 %v9687_v14, %v4487_v1  ;;  %v9724_v46 = vmul.f32 0.70710677, %v9709_v40  ;;  %v9738_v3 = vadd.f32 %v9562_v38, %v4280_v62 }
 0xa93   :  { %v4755_v37 = vmul.f32 %v4738_v59, %v9668_v12  ;;  %v4655_v58 = vmul.f32 %v6355_v22, %v4570_v31  ;;  %v4554_v47 = vadd.f32 0.2548296, %v4537_v48  ;;  %v4386_v39 = vadd.f32 1.0, %v4369_v30  ;;  %v6359_v50 = vpop.eup %6358 }
 0xa94   :  { %v4722_v16 = vsel %vm4688_vm14, %v4671_v11, %v4705_v27  ;;  %v4283_v9 = vpop.f32.mrf.mxu0  ;;  %v4521_v33 = vadd.f32 -0.28449672, %v4504_v13  ;;  %v9728_v12 = vand.u32 2147483647, %v9724_v46  ;;  %v4315_v8 = vmul.f32 0.5, %v9600_v60 }
 0xa95   :  { %v4778_v44 = vpack.c.bf16 %v4755_v37, %v4754_v26  ;;  %v4672_v34 = vsub.f32 1.0, %v4655_v58  ;;  %v4571_v7 = vmul.f32 %v9671_v41, %v4554_v47  ;;  %v4739_v18 = vadd.f32 1.0, %v4722_v16 }
 0xa96   :  { %v5649_v36 = vpop.f32.mrf.mxu0  ;;  %v4538_v2 = vmul.f32 %v9687_v14, %v4521_v33  ;;  %6360 = vrcp.f32 %v4386_v39  ;;  %v4370_v15 = vmul.f32 0.3275911, %v9728_v12  ;;  %v4314_v41 = vmul.f32 0.5, %v9593_v61 }
 0xa97   :  { %v4706_v49 = vsub.f32 0.0, %v4672_v34  ;;  %v4656_v4 = vmul.f32 %v6357_v20, %v4571_v7  ;;  %5675 = vmatmul.mubr.msk.bf16.gmra.mxu1 %vm4817_vm12, %v4778_v44  ;;  %v9742_v6 = vmul.f32 0.70710677, %v9738_v3  ;;  %v9746_v29 = vadd.f32 %v9562_v38, %v4283_v9 }
 0xa98   :  { %v4288_v52 = vpop.f32.mrf.mxu0  ;;  %5678 = vmatprep.mubr.msk.bf16.mxu1 %vm6437_vm0, %v10551_v55  ;;  %v4555_v23 = vadd.f32 0.2548296, %v4538_v2  ;;  %v4387_v51 = vadd.f32 1.0, %v4370_v15  ;;  %v4756_v54 = vmul.f32 %v4739_v18, %v4314_v41  ;;  %v4590_v60 = vsub.f32 0.0, %v9716_v56 }
 0xa99   :  { %v4723_v21 = vsel %vm4689_vm15, %v4672_v34, %v4706_v49  ;;  %v4673_v19 = vsub.f32 1.0, %v4656_v4  ;;  %v4354_v11 = vand.u32 2147483647, %v9742_v6  ;;  %v9752_v48 = vmul.f32 0.70710677, %v9746_v29 }
 0xa9a   :  { %v4740_v25 = vadd.f32 1.0, %v4723_v21  ;;  %v5652_v0 = vpop.f32.mrf.mxu0  ;;  %v4572_v61 = vmul.f32 %v9687_v14, %v4555_v23  ;;  %6362 = vrcp.f32 %v4387_v51  ;;  %v9755_v26 = vadd.f32 %v9562_v38, %v4288_v52 }
 0xa9b   :  { %v4707_v57 = vsub.f32 0.0, %v4673_v19  ;;  %v4371_v31 = vmul.f32 0.3275911, %v4354_v11  ;;  %v4607_v42 = vmul.f32 %v4590_v60, %v9716_v56  ;;  %v4591_v37 = vsub.f32 0.0, %v9728_v12 }
 0xa9c   :  { %v4757_v63 = vmul.f32 %v4740_v25, %v4315_v8  ;;  %v4291_v32 = vpop.f32.mrf.mxu0  ;;  %v4657_v62 = vmul.f32 %v6359_v50, %v4572_v61  ;;  %v4355_v58 = vand.u32 2147483647, %v9752_v48  ;;  %v4316_v47 = vmul.f32 0.5, %v9612_v45 }
 0xa9d   :  { %v4724_v22 = vsel %vm4690_vm2, %v4673_v19, %v4707_v57  ;;  %v9758_v27 = vadd.f32 %v9562_v38, %v4291_v32  ;;  %v4388_v10 = vadd.f32 1.0, %v4371_v31  ;;  %v9768_v20 = vmul.f32 0.70710677, %v9755_v26 }
 0xa9e   :  { %v4779_v17 = vpack.c.bf16 %v4757_v63, %v4756_v54  ;;  %v5653_v59 = vpop.f32.mrf.mxu0  ;;  %v4674_v14 = vsub.f32 1.0, %v4657_v62  ;;  %v4741_v13 = vadd.f32 1.0, %v4724_v22  ;;  %v4372_v56 = vmul.f32 0.3275911, %v4355_v58 }
 0xa9f   :  { %6364 = vrcp.f32 %v4388_v10  ;;  %v4317_v9 = vmul.f32 0.5, %v9623_v28  ;;  %v4356_v34 = vand.u32 2147483647, %v9768_v20  ;;  %v9774_v7 = vmul.f32 0.70710677, %v9758_v27 }
 0xaa0   :  { %v4296_v1 = vpop.f32.mrf.mxu0  ;;  %5679 = vmatmul.mubr.msk.bf16.gmra.mxu1 %vm4817_vm12, %v4779_v17  ;;  %v4708_v30 = vsub.f32 0.0, %v4674_v14  ;;  %v4632_v36 = vmul.f32 1.442695, %v4607_v42  ;;  %v4608_v18 = vmul.f32 %v4591_v37, %v9728_v12  ;;  %v4389_v49 = vadd.f32 1.0, %v4372_v56 }
 0xaa1   :  { %5682 = vmatprep.mubr.msk.bf16.mxu1 %vm6437_vm0, %v10551_v55  ;;  %v4592_v4 = vsub.f32 0.0, %v4354_v11  ;;  %v4373_v2 = vmul.f32 0.3275911, %v4356_v34  ;;  %v4758_v28 = vmul.f32 %v4741_v13, %v4316_v47  ;;  %v4357_v41 = vand.u32 2147483647, %v9774_v7 }
 0xaa2   :  { %v5656_v16 = vpop.f32.mrf.mxu0  ;;  %v4725_v44 = vsel %vm4691_vm3, %v4674_v14, %v4708_v30  ;;  %6366 = vrcp.f32 %v4389_v49  ;;  %v9782_v8 = vadd.f32 %v9562_v38, %v4296_v1  ;;  %v4634_v51 = vmul.f32 1.442695, %v4608_v18 }
 0xaa3   :  { %v9776_v45 = vpop.eup %6360  ;;  %v4742_v39 = vadd.f32 1.0, %v4725_v44  ;;  %v4390_v19 = vadd.f32 1.0, %v4373_v2  ;;  %6368 = vpow2.f32 %v4632_v36  ;;  %v4374_v0 = vmul.f32 0.3275911, %v4357_v41 }
 0xaa4   :  { %v4299_v33 = vpop.f32.mrf.mxu0  ;;  %v4437_v53 = vmul.f32 1.0614054, %v9776_v45  ;;  %v4609_v50 = vmul.f32 %v4592_v4, %v4354_v11  ;;  %v4593_v61 = vsub.f32 0.0, %v4355_v58  ;;  %v4594_v32 = vsub.f32 0.0, %v4356_v34 }
 0xaa5   :  { %v4759_v52 = vmul.f32 %v4742_v39, %v4317_v9  ;;  %6370 = vrcp.f32 %v4390_v19  ;;  %v4391_v60 = vadd.f32 1.0, %v4374_v0  ;;  %v9789_v17 = vmul.f32 0.70710677, %v9782_v8 }
 0xaa6   :  { %v5657_v15 = vpop.f32.mrf.mxu0  ;;  %v4454_v21 = vadd.f32 -1.4531521, %v4437_v53  ;;  %v9793_v31 = vadd.f32 %v9562_v38, %v4299_v33  ;;  %v9798_v11 = vmul.f32 0.5, %v9691_v35  ;;  %v4636_v47 = vmul.f32 1.442695, %v4609_v50 }
 0xaa7   :  { %v9784_v23 = vpop.eup %6362  ;;  %v4780_v12 = vpack.c.bf16 %v4759_v52, %v4758_v28  ;;  %6372 = vrcp.f32 %v4391_v60  ;;  %v9801_v14 = vand.u32 2147483647, %v9789_v17  ;;  %v4610_v30 = vmul.f32 %v4593_v61, %v4355_v58 }
 0xaa8   :  { %v4304_v25 = vpop.f32.mrf.mxu0  ;;  %v4471_v54 = vmul.f32 %v9776_v45, %v4454_v21  ;;  %v4438_v57 = vmul.f32 1.0614054, %v9784_v23  ;;  %6374 = vpow2.f32 %v4634_v51  ;;  %v9806_v37 = vmul.f32 0.70710677, %v9793_v31 }
 0xaa9   :  { %5683 = vmatmul.mubr.msk.bf16.gmra.mxu1 %vm4817_vm12, %v4780_v12  ;;  %v4611_v16 = vmul.f32 %v4594_v32, %v4356_v34  ;;  %v4375_v13 = vmul.f32 0.3275911, %v9801_v14  ;;  %v4595_v39 = vsub.f32 0.0, %v4357_v41  ;;  %v9814_v18 = vadd.f32 %v9562_v38, %v4304_v25 }
 0xaaa   :  { %v5660_v63 = vpop.f32.mrf.mxu0  ;;  %v4488_v62 = vadd.f32 1.4214138, %v4471_v54  ;;  %v4455_v59 = vadd.f32 -1.4531521, %v4438_v57  ;;  %5686 = vmatprep.mubr.msk.bf16.mxu1 %vm6437_vm0, %v10551_v55  ;;  %v4359_v44 = vand.u32 2147483647, %v9806_v37 }
 0xaab   :  { %v4392_v36 = vadd.f32 1.0, %v4375_v13  ;;  %v9818_v58 = vmul.f32 0.5, %v9709_v40  ;;  %v4638_v2 = vmul.f32 1.442695, %v4610_v30  ;;  %v4640_v15 = vmul.f32 1.442695, %v4611_v16 }
 0xaac   :  { %v4307_v22 = vpop.f32.mrf.mxu0  ;;  %v4505_v1 = vmul.f32 %v9776_v45, %v4488_v62  ;;  %v4472_v42 = vmul.f32 %v9784_v23, %v4455_v59  ;;  %v9809_v35 = vpop.eup %6364  ;;  %v4376_v53 = vmul.f32 0.3275911, %v4359_v44  ;;  %vm4692_vm4 = vcmp.ge.f32.partialorder %v9702_v43, 0.0 }
 0xaad   :  { %v4439_v33 = vmul.f32 1.0614054, %v9809_v35  ;;  %6376 = vrcp.f32 %v4392_v36  ;;  %v4612_v25 = vmul.f32 %v4595_v39, %v4357_v41  ;;  %v9827_v12 = vmul.f32 0.70710677, %v9814_v18 }
 0xaae   :  { %v5661_v10 = vpop.f32.mrf.mxu0  ;;  %v4522_v56 = vadd.f32 -0.28449672, %v4505_v1  ;;  %v4489_v9 = vadd.f32 1.4214138, %v4472_v42  ;;  %6378 = vpow2.f32 %v4636_v47  ;;  %v4393_v19 = vadd.f32 1.0, %v4376_v53 }
 0xaaf   :  { %v4456_v4 = vadd.f32 -1.4531521, %v4439_v33  ;;  %v9821_v28 = vpop.eup %6366  ;;  %v4596_v57 = vsub.f32 0.0, %v9801_v14  ;;  %v9835_v32 = vand.u32 2147483647, %v9827_v12  ;;  %vm4693_vm5 = vcmp.ge.f32.partialorder %v9724_v46, 0.0 }
 0xab0   :  { %v4539_v49 = vmul.f32 %v9776_v45, %v4522_v56  ;;  %v4506_v34 = vmul.f32 %v9784_v23, %v4489_v9  ;;  %v4440_v40 = vmul.f32 1.0614054, %v9821_v28  ;;  %v6369_v51 = vpop.eup %6368  ;;  %6380 = vrcp.f32 %v4393_v19 }
 0xab1   :  { %v4473_v38 = vmul.f32 %v9809_v35, %v4456_v4  ;;  %6382 = vpow2.f32 %v4638_v2  ;;  %v4597_v22 = vsub.f32 0.0, %v4359_v44  ;;  %v4377_v1 = vmul.f32 0.3275911, %v9835_v32 }
 0xab2   :  { %v4556_v52 = vadd.f32 0.2548296, %v4539_v49  ;;  %v4523_v21 = vadd.f32 -0.28449672, %v4506_v34  ;;  %v9832_v50 = vpop.eup %6370  ;;  %v4457_v61 = vadd.f32 -1.4531521, %v4440_v40  ;;  %6384 = vpow2.f32 %v4640_v15 }
 0xab3   :  { %v4490_v63 = vadd.f32 1.4214138, %v4473_v38  ;;  %v4441_v62 = vmul.f32 1.0614054, %v9832_v50  ;;  %v4642_v16 = vmul.f32 1.442695, %v4612_v25  ;;  %v4613_v39 = vmul.f32 %v4596_v57, %v9801_v14 }
 0xab4   :  { %v4573_v0 = vmul.f32 %v9776_v45, %v4556_v52  ;;  %v4540_v54 = vmul.f32 %v9784_v23, %v4523_v21  ;;  %v4474_v59 = vmul.f32 %v9821_v28, %v4457_v61  ;;  %v9842_v42 = vpop.eup %6372  ;;  %v4394_v53 = vadd.f32 1.0, %v4377_v1 }
 0xab5   :  { %v4507_v45 = vmul.f32 %v9809_v35, %v4490_v63  ;;  %v4458_v30 = vadd.f32 -1.4531521, %v4441_v62  ;;  %v6375_v13 = vpop.eup %6374  ;;  %v4442_v33 = vmul.f32 1.0614054, %v9842_v42  ;;  %vm4694_vm6 = vcmp.ge.f32.partialorder %v9742_v6, 0.0 }
 0xab6   :  { %v4658_v41 = vmul.f32 %v6369_v51, %v4573_v0  ;;  %v4557_v60 = vadd.f32 0.2548296, %v4540_v54  ;;  %v4491_v9 = vadd.f32 1.4214138, %v4474_v59  ;;  %6386 = vrcp.f32 %v4394_v53 }
 0xab7   :  { %v4524_v56 = vadd.f32 -0.28449672, %v4507_v45  ;;  %v4475_v34 = vmul.f32 %v9832_v50, %v4458_v30  ;;  %v4459_v15 = vadd.f32 -1.4531521, %v4442_v33  ;;  %6388 = vpow2.f32 %v4642_v16 }
 0xab8   :  { %v4675_v10 = vsub.f32 1.0, %v4658_v41  ;;  %v4574_v47 = vmul.f32 %v9784_v23, %v4557_v60  ;;  %v4508_v2 = vmul.f32 %v9821_v28, %v4491_v9  ;;  %v4614_v23 = vmul.f32 %v4597_v22, %v4359_v44 }
 0xab9   :  { %v4541_v4 = vmul.f32 %v9809_v35, %v4524_v56  ;;  %v4492_v19 = vadd.f32 1.4214138, %v4475_v34  ;;  %v4476_v14 = vmul.f32 %v9842_v42, %v4459_v15  ;;  %v4644_v44 = vmul.f32 1.442695, %v4613_v39 }
 0xaba   :  { %v4709_v36 = vsub.f32 0.0, %v4675_v10  ;;  %v4659_v49 = vmul.f32 %v6375_v13, %v4574_v47  ;;  %v4525_v40 = vadd.f32 -0.28449672, %v4508_v2  ;;  %v9853_v25 = vpop.eup %6376  ;;  %v4646_v41 = vmul.f32 1.442695, %v4614_v23 }
 0xabb   :  { %v4558_v38 = vadd.f32 0.2548296, %v4541_v4  ;;  %v4509_v54 = vmul.f32 %v9832_v50, %v4492_v19  ;;  %v6379_v57 = vpop.eup %6378  ;;  %v4493_v61 = vadd.f32 1.4214138, %v4476_v14  ;;  %v4443_v45 = vmul.f32 1.0614054, %v9853_v25 }
 0xabc   :  { %v4726_v52 = vsel %vm4692_vm4, %v4675_v10, %v4709_v36  ;;  %v4676_v21 = vsub.f32 1.0, %v4659_v49  ;;  %v4542_v63 = vmul.f32 %v9821_v28, %v4525_v40  ;;  %v4598_v59 = vsub.f32 0.0, %v9835_v32 }
 0xabd   :  { %v4743_v51 = vadd.f32 1.0, %v4726_v52  ;;  %v4575_v43 = vmul.f32 %v9809_v35, %v4558_v38  ;;  %v4526_v62 = vadd.f32 -0.28449672, %v4509_v54  ;;  %v9863_v22 = vpop.eup %6380  ;;  %v4510_v30 = vmul.f32 %v9842_v42, %v4493_v61 }
 0xabe   :  { %v4710_v0 = vsub.f32 0.0, %v4676_v21  ;;  %v4559_v47 = vadd.f32 0.2548296, %v4542_v63  ;;  %v6383_v35 = vpop.eup %6382  ;;  %v4460_v56 = vadd.f32 -1.4531521, %v4443_v45  ;;  %6390 = vpow2.f32 %v4644_v44 }
 0xabf   :  { %v4660_v10 = vmul.f32 %v6379_v57, %v4575_v43  ;;  %v4760_v16 = vmul.f32 %v4743_v51, %v9798_v11  ;;  %v4543_v13 = vmul.f32 %v9832_v50, %v4526_v62  ;;  %v4444_v46 = vmul.f32 1.0614054, %v9863_v22  ;;  %v6385_v9 = vpop.eup %6384 }
 0xac0   :  { %v4727_v60 = vsel %vm4693_vm5, %v4676_v21, %v4710_v0  ;;  %v4576_v36 = vmul.f32 %v9821_v28, %v4559_v47  ;;  %v4527_v49 = vadd.f32 -0.28449672, %v4510_v30  ;;  %v4477_v53 = vmul.f32 %v9853_v25, %v4460_v56 }
 0xac1   :  { %v4744_v1 = vadd.f32 1.0, %v4727_v60  ;;  %v4677_v39 = vsub.f32 1.0, %v4660_v10  ;;  %v4560_v34 = vadd.f32 0.2548296, %v4543_v13  ;;  %v4461_v4 = vadd.f32 -1.4531521, %v4444_v46 }
 0xac2   :  { %v4661_v11 = vmul.f32 %v6383_v35, %v4576_v36  ;;  %v4544_v23 = vmul.f32 %v9842_v42, %v4527_v49  ;;  %v4494_v21 = vadd.f32 1.4214138, %v4477_v53  ;;  %6392 = vpow2.f32 %v4646_v41 }
 0xac3   :  { %v4761_v33 = vmul.f32 %v4744_v1, %v9818_v58  ;;  %v4711_v15 = vsub.f32 0.0, %v4677_v39  ;;  %v4577_v52 = vmul.f32 %v9832_v50, %v4560_v34  ;;  %v4478_v19 = vmul.f32 %v9863_v22, %v4461_v4  ;;  %v9883_v50 = vpop.eup %6386 }
 0xac4   :  { %v4678_v28 = vsub.f32 1.0, %v4661_v11  ;;  %v4561_v38 = vadd.f32 0.2548296, %v4544_v23  ;;  %v4615_v40 = vmul.f32 %v4598_v59, %v9835_v32  ;;  %v4320_v14 = vmul.f32 0.5, %v9738_v3  ;;  %v6389_v32 = vpop.eup %6388 }
 0xac5   :  { %v4781_v2 = vpack.c.bf16 %v4761_v33, %v4760_v16  ;;  %v4728_v58 = vsel %vm4694_vm6, %v4677_v39, %v4711_v15  ;;  %v4662_v51 = vmul.f32 %v6385_v9, %v4577_v52  ;;  %v4511_v0 = vmul.f32 %v9853_v25, %v4494_v21 }
 0xac6   :  { %v4495_v54 = vadd.f32 1.4214138, %v4478_v19  ;;  %v4745_v44 = vadd.f32 1.0, %v4728_v58  ;;  %v4321_v6 = vmul.f32 0.5, %v9746_v29  ;;  %v4712_v57 = vsub.f32 0.0, %v4678_v28 }
 0xac7   :  { %5687 = vmatmul.mubr.msk.bf16.gmra.mxu1 %vm4817_vm12, %v4781_v2  ;;  %v4578_v43 = vmul.f32 %v9842_v42, %v4561_v38  ;;  %vm4695_vm7 = vcmp.ge.f32.partialorder %v9752_v48, 0.0  ;;  %v4679_v63 = vsub.f32 1.0, %v4662_v51  ;;  %v4528_v3 = vadd.f32 -0.28449672, %v4511_v0 }
 0xac8   :  { %5690 = vmatprep.mubr.msk.bf16.mxu1 %vm6437_vm0, %v10551_v55  ;;  %v4512_v61 = vmul.f32 %v9863_v22, %v4495_v54  ;;  %v4729_v41 = vsel %vm4695_vm7, %v4678_v28, %v4712_v57  ;;  %v4445_v62 = vmul.f32 1.0614054, %v9883_v50  ;;  %v4648_v45 = vmul.f32 1.442695, %v4615_v40 }
 0xac9   :  { %v4663_v60 = vmul.f32 %v6389_v32, %v4578_v43  ;;  %v4746_v59 = vadd.f32 1.0, %v4729_v41  ;;  %v4713_v1 = vsub.f32 0.0, %v4679_v63  ;;  %v4545_v10 = vmul.f32 %v9853_v25, %v4528_v3 }
 0xaca   :  { %v4529_v29 = vadd.f32 -0.28449672, %v4512_v61  ;;  %v4762_v47 = vmul.f32 %v4745_v44, %v4320_v14  ;;  %vm4696_vm8 = vcmp.ge.f32.partialorder %v9768_v20, 0.0  ;;  %v4462_v30 = vadd.f32 -1.4531521, %v4445_v62 }
 0xacb   :  { %v4680_v42 = vsub.f32 1.0, %v4663_v60  ;;  %v4763_v48 = vmul.f32 %v4746_v59, %v4321_v6  ;;  %v4730_v35 = vsel %vm4696_vm8, %v4679_v63, %v4713_v1  ;;  %v4562_v16 = vadd.f32 0.2548296, %v4545_v10  ;;  %v6391_v49 = vpop.eup %6390 }
 0xacc   :  { %v4546_v13 = vmul.f32 %v9863_v22, %v4529_v29  ;;  %vm4697_vm9 = vcmp.ge.f32.partialorder %v9774_v7, 0.0  ;;  %v4479_v46 = vmul.f32 %v9883_v50, %v4462_v30  ;;  %6394 = vpow2.f32 %v4648_v45 }
 0xacd   :  { %v4714_v56 = vsub.f32 0.0, %v4680_v42  ;;  %v4782_v9 = vpack.c.bf16 %v4763_v48, %v4762_v47  ;;  %v4747_v33 = vadd.f32 1.0, %v4730_v35  ;;  %v4579_v39 = vmul.f32 %v9853_v25, %v4562_v16 }
 0xace   :  { %v4563_v36 = vadd.f32 0.2548296, %v4546_v13  ;;  %v4322_v20 = vmul.f32 0.5, %v9755_v26  ;;  %v4496_v53 = vadd.f32 1.4214138, %v4479_v46  ;;  %v4323_v4 = vmul.f32 0.5, %v9758_v27 }
 0xacf   :  { %v4731_v34 = vsel %vm4697_vm9, %v4680_v42, %v4714_v56  ;;  %v4664_v15 = vmul.f32 %v6391_v49, %v4579_v39  ;;  %5691 = vmatmul.mubr.msk.bf16.gmra.mxu1 %vm4817_vm12, %v4782_v9  ;;  %v6393_v11 = vpop.eup %6392  ;;  %vm4698_vm10 = vcmp.ge.f32.partialorder %v9789_v17, 0.0  ;;  %vm4699_vm11 = vcmp.ge.f32.partialorder %v9806_v37, 0.0 }
 0xad0   :  { %v4748_v2 = vadd.f32 1.0, %v4731_v34  ;;  %v4580_v7 = vmul.f32 %v9863_v22, %v4563_v36  ;;  %v4513_v23 = vmul.f32 %v9883_v50, %v4496_v53  ;;  %5694 = vmatprep.mubr.msk.bf16.mxu1 %vm6437_vm0, %v10551_v55  ;;  %v4764_v25 = vmul.f32 %v4747_v33, %v4322_v20 }
 0xad1   :  { %v4681_v21 = vsub.f32 1.0, %v4664_v15  ;;  %v4324_v54 = vmul.f32 0.5, %v9782_v8  ;;  %v4325_v44 = vmul.f32 0.5, %v9793_v31  ;;  %vm4700_vm13 = vcmp.ge.f32.partialorder %v9827_v12, 0.0 }
 0xad2   :  { %v4765_v52 = vmul.f32 %v4748_v2, %v4323_v4  ;;  %v4665_v26 = vmul.f32 %v6393_v11, %v4580_v7  ;;  %v4530_v19 = vadd.f32 -0.28449672, %v4513_v23  ;;  %v4326_v31 = vmul.f32 0.5, %v9814_v18 }
 0xad3   :  { %v4715_v28 = vsub.f32 0.0, %v4681_v21 }
 0xad4   :  { %v4783_v58 = vpack.c.bf16 %v4765_v52, %v4764_v25  ;;  %v4682_v27 = vsub.f32 1.0, %v4665_v26  ;;  %v4547_v22 = vmul.f32 %v9883_v50, %v4530_v19  ;;  %v5359_v52 = vld [vmem:[%s9999_s14] ss:$0 sm:$0xff] }
 0xad5   :  { %v4732_v38 = vsel %vm4698_vm10, %v4681_v21, %v4715_v28 }
 0xad6   :  { %v4716_v40 = vsub.f32 0.0, %v4682_v27  ;;  %v4749_v14 = vadd.f32 1.0, %v4732_v38  ;;  %v4564_v51 = vadd.f32 0.2548296, %v4547_v22  ;;  %v5876_v38 = vld [vmem:[%s10002_s17 + $0x18] ss:$12 sps:$4 sm:$0xff]  }
 0xad7   :  { %5695 = vmatmul.mubr.msk.bf16.gmra.mxu1 %vm4817_vm12, %v4783_v58 }
 0xad8   :  { %v4733_v0 = vsel %vm4699_vm11, %v4682_v27, %v4716_v40  ;;  %v4581_v57 = vmul.f32 %v9883_v50, %v4564_v51  ;;  %5698 = vmatprep.mubr.msk.bf16.mxu1 %vm6437_vm0, %v10551_v55  ;;  %v4766_v43 = vmul.f32 %v4749_v14, %v4324_v54  ;;  %v5878_v40 = vld [vmem:[%s10002_s17 + $0x1c] ss:$12 sps:$4 sm:$0xff]   ;;  %v5879_v14 = vld [vmem:[%s10002_s17 + $0x20] ss:$12 sps:$4 sm:$0xff]  }
 0xad9   :  { %v4750_v6 = vadd.f32 1.0, %v4733_v0  ;;  %v6395_v17 = vpop.eup %6394  ;;  %5037 = vmatprep.subr.bf16.mxu0 %v5878_v40  ;;  %5707 = vmatpush3.bf16.msra.mxu1 %v5879_v14  ;;  %v5883_v51 = vld [vmem:[%s10002_s17 + $0x8] ss:$12 sps:$4 sm:$0xff]   ;;  %v5880_v0 = vld [vmem:[%s10002_s17] ss:$12 sps:$4 sm:$0xff]  }
 0xada   :  { %v4666_v63 = vmul.f32 %v6395_v17, %v4581_v57  ;;  %5038 = vmatpush1.bf16.msra.mxu0 %v5876_v38  ;;  %5708 = vmatprep.subr.bf16.mxu1 %v10551_v55 }
 0xadb   :  { %v4767_v32 = vmul.f32 %v4750_v6, %v4325_v44 }
 0xadc   :  { %v4683_v37 = vsub.f32 1.0, %v4666_v63 }
 0xadd   :  { %v4784_v3 = vpack.c.bf16 %v4767_v32, %v4766_v43  ;;  %5709 = vmatpush3.bf16.msra.mxu1 %v5883_v51 }
 0xade   :  { %v4717_v61 = vsub.f32 0.0, %v4683_v37 }
 0xadf   :  { %5699 = vmatmul.mubr.msk.bf16.gmra.mxu1 %vm4817_vm12, %v4784_v3 }
 0xae0   :  { %v4734_v8 = vsel %vm4700_vm13, %v4683_v37, %v4717_v61  ;;  %5702 = vmatprep.mubr.msk.bf16.mxu1 %vm6437_vm0, %v10551_v55  ;;  %v5373_v37 = vld [vmem:[%s10000_s15] ss:$0 sm:$0xff] }
 0xae1   :  { %v4751_v50 = vadd.f32 1.0, %v4734_v8  ;;  %v5374_v8 = vld [vmem:[%s10001_s16] ss:$0 sm:$0xff]  ;;  %s6454_s16 = smov [#allocation2]  }
 0xae2   :  { %s5209_s27 = sshll.u32 %s6454_s16, 4  ;;  %s5210_s27 = int_to_ptr.vmem [resolvable:$true] %s5209_s27 }
 0xae3   :  { %v4768_v41 = vmul.f32 %v4751_v50, %v4326_v31  ;;  %s6414_s7 = scalar_lea.vmem %s5210_s27, 64  ;;  %p6419_p1 = scmp.lt.s32.totalorder %s5210_s27, %s5210_s27 }
 0xae4   :  { %p6415_p0 = scmp.ne.s32.totalorder %s5210_s27, %s6414_s7  ;;  %p6420_p2 = scmp.lt.s32.totalorder %s6414_s7, %s6414_s7 }
 0xae5   :  { %v4785_v60 = vpack.c.bf16 %v4768_v41, %v4768_v41 }
 0xae6   :  { %p6421_p3 = por %p6420_p2, %p6419_p1 }
 0xae7   :  { %5703 = vmatmul.mubr.msk.bf16.gmra.mxu1 %vm4817_vm12, %v4785_v60  ;;  %v5884_v60 = vld [vmem:[%s10004_s19 + $0x8] sm:$0xff]  }
 0xae8   :  { %5710 = vmatprep.mubr.msk.bf16.mxu1 %vm6437_vm0, %v10551_v55  ;;  %p6422_p4 = pnand %p6421_p3, %p6415_p0 }
 0xb4f   :  { %v4879_v62 = vpop.f32.mrf.mxu1 }
 0xb51   :  { %v5672_v45 = vpop.f32.mrf.mxu1 }
 0xb52   :  { %v5885_v45 = vld [vmem:[%s10004_s19] sm:$0xff]  }
 0xb53   :  { %v4881_v59 = vpop.f32.mrf.mxu1 }
 0xb55   :  { %v5673_v12 = vpop.f32.mrf.mxu1 }
 0xb57   :  { %v4885_v1 = vpop.f32.mrf.mxu1 }
 0xb59   :  { %v5676_v10 = vpop.f32.mrf.mxu1 }
 0xb5b   :  { %v4887_v29 = vpop.f32.mrf.mxu1 }
 0xb5d   :  { %v5677_v47 = vpop.f32.mrf.mxu1 }
 0xb60   :  { %v4891_v42 = vpop.f32.mrf.mxu1 }
 0xb62   :  { %v5680_v30 = vpop.f32.mrf.mxu1 }
 0xb64   :  { %v4893_v48 = vpop.f32.mrf.mxu1 }
 0xb66   :  { %v5681_v18 = vpop.f32.mrf.mxu1 }
 0xb69   :  { %v4897_v35 = vpop.f32.mrf.mxu1 }
 0xb6b   :  { %v5684_v16 = vpop.f32.mrf.mxu1 }
 0xb6d   :  { %v4899_v13 = vpop.f32.mrf.mxu1 }
 0xb6f   :  { %v5685_v56 = vpop.f32.mrf.mxu1 }
 0xb87   :  { %v4903_v46 = vpop.f32.mrf.mxu1 }
 0xb89   :  { %v5688_v9 = vpop.f32.mrf.mxu1 }
 0xb8b   :  { %v4905_v33 = vpop.f32.mrf.mxu1 }
 0xb8d   :  { %v5689_v39 = vpop.f32.mrf.mxu1 }
 0xb8f   :  { %v4909_v36 = vpop.f32.mrf.mxu1 }
 0xb91   :  { %v5692_v49 = vpop.f32.mrf.mxu1 }
 0xb93   :  { %v4911_v20 = vpop.f32.mrf.mxu1 }
 0xb95   :  { %v5693_v34 = vpop.f32.mrf.mxu1 }
 0xb97   :  { %v4915_v53 = vpop.f32.mrf.mxu1 }
 0xb99   :  { %v5696_v4 = vpop.f32.mrf.mxu1 }
 0xb9b   :  { %v4917_v2 = vpop.f32.mrf.mxu1 }
 0xb9d   :  { %v5697_v15 = vpop.f32.mrf.mxu1 }
 0xb9f   :  { %v4921_v7 = vpop.f32.mrf.mxu1 }
 0xba1   :  { %v5700_v11 = vpop.f32.mrf.mxu1 }
 0xba3   :  { %v4923_v23 = vpop.f32.mrf.mxu1 }
 0xba5   :  { %v5701_v25 = vpop.f32.mrf.mxu1 }
 0xba7   :  { %v4927_v21 = vpop.f32.mrf.mxu1 }
 0xba8   :  { %v4928_v26 = vadd.f32 %v5359_v52, %v4927_v21 }
 0xba9   :  { %v5704_v19 = vpop.f32.mrf.mxu1 }
 0xbaa   :  { %v4933_v58 = vadd.f32 %v4928_v26, %v9537_v5  ;;  %v5882_v5 = vld [vmem:[%s10002_s17 + $0x4] ss:$12 sps:$4 sm:$0xff]  }
 0xbab   :  { %v4930_v28 = vpop.f32.mrf.mxu1  ;;  %5039 = vmatprep.subr.bf16.mxu0 %v5882_v5 }
 0xbac   :  { %v4936_v27 = vsel %vm122_vm1, %v4933_v58, 0.0  ;;  %5040 = vmatpush1.bf16.msra.mxu0 %v5880_v0 }
 0xbad   :  { %4937 = vadd.xlane.f32.xlu0 %v4936_v27  ;;  %v5705_v22 = vpop.f32.mrf.mxu1  ;;  %5714 = vmatprep.subr.bf16.mxu0 %v10551_v55 }
 0xc36   :  { %v4938_v54 = vpop.xlane.xlu0 %4937 }
 0xc37   :  { %v4939_v44 = vmul.f32 0.03125, %v4938_v54 }
 0xc39   :  { %v4940_v6 = vsub.f32 %v4933_v58, %v4939_v44 }
 0xc3b   :  { %v4941_v57 = vmul.f32 %v4940_v6, %v4940_v6 }
 0xc3d   :  { %v4942_v17 = vsel %vm122_vm1, %v4941_v57, 0.0 }
 0xc3e   :  { %4943 = vadd.xlane.f32.xlu1 %v4942_v17 }
 0xcc7   :  { %v4944_v43 = vpop.xlane.xlu1 %4943 }
 0xcc8   :  { %v4945_v32 = vmul.f32 0.03125, %v4944_v43 }
 0xcca   :  { %v4946_v63 = vadd.f32 1e-05, %v4945_v32 }
 0xccc   :  { %6396 = vrsqrt.f32 %v4946_v63 }
 0xcd9   :  { %v6397_v3 = vpop.eup %6396 }
 0xcda   :  { %v4948_v61 = vmul.f32 %v6397_v3, %v4940_v6 }
 0xcdc   :  { %v4955_v31 = vmul.f32 %v5373_v37, %v4948_v61 }
 0xcde   :  { %v4962_v50 = vadd.f32 %v5374_v8, %v4955_v31 }
 0xce0   :  { %v4963_v41 = vadd.f32 %v4962_v50, %v10561_v24  ;;  %v5139_v24 = vpack.c.bf16 %v4962_v50, %v4962_v50 }
 0xce2   :  { %v4972_v62 = vpack.c.bf16 %v4963_v41, %v4963_v41 }
 0xce4   :  { %5381 = vmatmul.mubr.msk.bf16.vlgmr.msra.gmra.mxu0 %vm122_vm1, %v4972_v62  ;;  %5711 = vmatmul.mubr.msk.bf16.vlgmr.msra.gmra.mxu1 %vm122_vm1, %v4972_v62 }
 0xce5   :  { %5715 = vmatpush3.bf16.msra.mxu0 %v5884_v60  ;;  %5718 = vmatprep.mubr.msk.bf16.mxu0 %vm6437_vm0, %v10551_v55 }
 0xce6   :  { %5716 = vmatprep.subr.bf16.mxu0 %v10551_v55 }
 0xce9   :  { %5717 = vmatpush3.bf16.msra.mxu0 %v5885_v45 }
 0xcec   :  { %5719 = vmatmul.mubr.msk.bf16.vlgmr.msra.gmra.mxu0 %vm122_vm1, %v5139_v24 }
 0xced   :  { %6425 = shalt.err (!%p6422_p4)
}
 0xcee   :  { %5212 = dma.vmem_to_hbm [thread:$0]  %s5210_s27, 64, %s10006_s21, [#allocation3]   ;;  %v10562_v59 = vld [vmem:[#allocation8_spill] sm:$0xff]  ;;  %v6455_v10 = vmov 1983009808   ;;  %vm5129_vm0 = vcmask 1041408  }
 0xcef   :  { %v4985_v55 = vsub.s32 2, %v10562_v59  ;;  %v4973_v12 = vld [vmem:[%s10003_s18] sm:$0x7]  ;;  %v4977_v1 = vsub.s32 0, %v10562_v59  ;;  %v5114_v29 = vunpack.c.l.s4 %v6455_v10  ;;  %v4981_v47 = vsub.s32 1, %v10562_v59 }
 0xcf0   :  { %vm5130_vm12 = vcmask 1043458   ;;  %vm5132_vm15 = vcmask 259076   ;;  %v5384_v2 = vld [vmem:[%s10005_s20] ss:$0 sm:$0xff] }
 0xcf1   :  { %v4986_v42 = vrot.slane %v4973_v12, %v4985_v55  ;;  %v4978_v30 = vrot.slane %v4973_v12, %v4977_v1  ;;  %v5115_v48 = vunpack.c.0.s8 %v5114_v29  ;;  %v4982_v18 = vrot.slane %v4973_v12, %v4981_v47  ;;  %vm5131_vm14 = vmor %vm5130_vm12, %vm5129_vm0 }
 0xcf2   :  { %vm5133_vm2 = vmor %vm5132_vm15, %vm5131_vm14 }
 0xcf3   :  { %v5118_v39 = vsub.s32 %v5115_v48, %v10562_v59 }
 0xda4   :  { %v5059_v35 = vpop.f32.mrf.mxu0  ;;  %v5100_v16 = vpop.f32.mrf.mxu1 }
 0xda5   :  { %v5101_v13 = vadd.f32 %v5100_v16, %v4986_v42  ;;  %v5060_v9 = vadd.f32 %v5059_v35, %v4978_v30 }
 0xda6   :  { %v5061_v56 = vpop.f32.mrf.mxu0  ;;  %v5712_v46 = vpop.f32.mrf.mxu1 }
 0xda7   :  { %v5108_v33 = vpack.c.bf16 %v5101_v13, %v5101_v13  ;;  %v5062_v36 = vadd.f32 %v5061_v56, %v4982_v18 }
 0xda8   :  { %v5063_v49 = vpop.f32.mrf.mxu0  ;;  %v5103_v20 = vpop.f32.mrf.mxu1 }
 0xda9   :  { %v5383_v34 = vpack.c.bf16 %v5062_v36, %v5060_v9  ;;  %v5126_v15 = vrot.slane %v5108_v33, %v5118_v39 }
 0xdaa   :  { %v5064_v53 = vpop.f32.mrf.mxu0  ;;  %v5713_v4 = vpop.f32.mrf.mxu1 }
 0xdab   :  { %v5119_v7 = vrot.slane %v5383_v34, %v5118_v39 }
 0xdac   :  { %v5196_v11 = vpop.f32.mrf.mxu0 }
 0xdad   :  { %v5127_v23 = vcombine.low %v5119_v7, %v5126_v15  ;;  %v5197_v25 = vadd.f32 %v5384_v2, %v5196_v11 }
 0xdae   :  { %v5720_v52 = vpop.f32.mrf.mxu0 }
 0xdaf   :  { %5134 = vst.msk [vmem:[%s10007_s22] sm:$0x3f] %vm5133_vm2, %v5127_v23 }
 0xdb0   :  { %5202 = vst.msk [vmem:[%s10008_s23] sm:$0xff] %vm122_vm1, %v5197_v25  ;;  %v5199_v21 = vpop.f32.mrf.mxu0 }
 0xdb2   :  { %v5721_v26 = vpop.f32.mrf.mxu0 }
 0xdb3   :  { %6434 = dma.done.wait [#allocation3], 64  }
 0xdb4   :  { %6435 = vsyncadd [#allocation3], 4294967232 }
 0xdb5   :  { %5224 = vsyncpa [#allocation3], 1 }

</bundles_post_ra>
